<compile_context>
chip_gen: v7x
topology: tpu7x:2x2x1
jax: 0.10.0
libtpu: 0.0.40
codegen_flags: <defaults>
</compile_context>

<pallas_src>
import jax
import jax.numpy as jnp
from jax.experimental import pallas as pl
from jax.experimental.pallas import tpu as pltpu

_DILATIONS = (1, 2, 4, 8)
_PAD = max(_DILATIONS)  # one shared halo wide enough for every dilation


def _make_dblock_kernel(H, W, C):
    HW = H * W
    Hp, Wp = H + 2 * _PAD, W + 2 * _PAD
    n_layers = len(_DILATIONS)

    def conv3x3_relu(xp_ref, w_ref, b_ref, layer, d):
        """Dilated 3x3 'same' conv + bias + ReLU read from the shared halo buffer."""
        acc = jnp.zeros((HW, C), jnp.float32)
        for kh in range(3):
            for kw in range(3):
                r0 = _PAD + (kh - 1) * d
                c0 = _PAD + (kw - 1) * d
                patch = xp_ref[r0:r0 + H, c0:c0 + W, :]          # (H, W, C)
                acc = acc + jnp.dot(
                    patch.reshape(HW, C),                        # free: W % 8 == 0
                    w_ref[layer, kh, kw],                        # (C, C)
                    preferred_element_type=jnp.float32,
                )
        acc = acc + b_ref[layer:layer + 1, :]                    # (1, C) broadcast
        return jnp.maximum(acc, 0.0).reshape(H, W, C)

    def kernel(x_ref, w_ref, b_ref, o_ref, xp_ref):
        # x_ref  : (1, H, W, C)          one image
        # w_ref  : (4, 3, 3, C, C)       HWIO weights, one per dilation
        # b_ref  : (4, C)                biases
        # o_ref  : (1, H, W, C)          x + d1 + d2 + d3 + d4
        # xp_ref : (H+2P, W+2P, C) f32   shared zero-halo VMEM scratch (P = 8)

        # Zero only the halo BORDER; the interior is fully overwritten below.
        # All W-axis (sublane) offsets/sizes are multiples of 8 -> aligned stores.
        xp_ref[0:_PAD, :, :] = jnp.zeros((_PAD, Wp, C), jnp.float32)
        xp_ref[_PAD + H:Hp, :, :] = jnp.zeros((Hp - _PAD - H, Wp, C), jnp.float32)
        xp_ref[_PAD:_PAD + H, 0:_PAD, :] = jnp.zeros((H, _PAD, C), jnp.float32)
        xp_ref[_PAD:_PAD + H, _PAD + W:Wp, :] = jnp.zeros((H, Wp - _PAD - W, C), jnp.float32)

        x = x_ref[0].astype(jnp.float32)                         # (H, W, C)
        xp_ref[_PAD:_PAD + H, _PAD:_PAD + W, :] = x

        total = x                                                # residual sum in registers
        for layer, d in enumerate(_DILATIONS):
            di = conv3x3_relu(xp_ref, w_ref, b_ref, layer, d)    # (H, W, C) f32
            total = total + di
            if layer + 1 < n_layers:                             # feed next conv
                xp_ref[_PAD:_PAD + H, _PAD:_PAD + W, :] = di

        o_ref[...] = total.reshape(1, H, W, C).astype(o_ref.dtype)

    return kernel


@jax.jit
def dblock_forward(x, params):
    """Fused Dblock forward.  x: (B, H, W, C) NHWC."""
    B, H, W, C = x.shape
    w_all = jnp.stack([params[f"dilate{i}"][0] for i in (1, 2, 3, 4)])  # (4,3,3,C,C)
    b_all = jnp.stack([params[f"dilate{i}"][1] for i in (1, 2, 3, 4)])  # (4,C)
    Hp, Wp = H + 2 * _PAD, W + 2 * _PAD

    flops = 2 * B * len(_DILATIONS) * 9 * H * W * C * C
    bytes_accessed = (2 * B * H * W * C) * x.dtype.itemsize \
        + int(w_all.size) * w_all.dtype.itemsize \
        + int(b_all.size) * b_all.dtype.itemsize

    return pl.pallas_call(
        _make_dblock_kernel(H, W, C),
        out_shape=jax.ShapeDtypeStruct((B, H, W, C), x.dtype),
        grid=(B,),
        in_specs=[
            pl.BlockSpec((1, H, W, C), lambda b: (b, 0, 0, 0)),
            pl.BlockSpec((4, 3, 3, C, C), lambda b: (0, 0, 0, 0, 0)),  # resident
            pl.BlockSpec((4, C), lambda b: (0, 0)),                    # resident
        ],
        out_specs=pl.BlockSpec((1, H, W, C), lambda b: (b, 0, 0, 0)),
        scratch_shapes=[
            pltpu.VMEM((Hp, Wp, C), jnp.float32),   # shared halo buffer
        ],
        compiler_params=pltpu.CompilerParams(
            dimension_semantics=("parallel",)),
        cost_estimate=pl.CostEstimate(
            flops=flops, transcendentals=0, bytes_accessed=bytes_accessed),
    )(x, w_all, b_all)


def init_dblock_params(key, channel, dtype=jnp.float32):
    """Deterministic synthetic init (PyTorch-like uniform fan-in scale), bias = 0."""
    params = {}
    fan_in = channel * 3 * 3
    bound = 1.0 / (fan_in ** 0.5)
    keys = jax.random.split(key, 4)
    for i, k in enumerate(keys, start=1):
        w = jax.random.uniform(k, (3, 3, channel, channel), dtype,
                               minval=-bound, maxval=bound)
        b = jnp.zeros((channel,), dtype)  # Dblock.__init__ zeroes conv biases
        params[f"dilate{i}"] = (w, b)
    return params


def dblock_reference(x, params):
    """Pure-JAX reference (lax.conv) for correctness checking."""
    def conv(h, w, b, d):
        y = jax.lax.conv_general_dilated(
            h, w, window_strides=(1, 1), padding=((d, d), (d, d)),
            rhs_dilation=(d, d),
            dimension_numbers=("NHWC", "HWIO", "NHWC"))
        return jax.nn.relu(y + b[None, None, None, :])
    w1, b1 = params["dilate1"]
    w2, b2 = params["dilate2"]
    w3, b3 = params["dilate3"]
    w4, b4 = params["dilate4"]
    d1 = conv(x, w1, b1, 1)
    d2 = conv(d1, w2, b2, 2)
    d3 = conv(d2, w3, b3, 4)
    d4 = conv(d3, w4, b4, 8)
    return x + d1 + d2 + d3 + d4


if __name__ == "__main__":
    B, H, W, C = 2, 16, 16, 4  # NHWC; PyTorch-NCHW equivalent is (2, 4, 16, 16)
    key = jax.random.PRNGKey(0)
    kx, kp = jax.random.split(key)
    x = jax.random.normal(kx, (B, H, W, C), jnp.float32)
    params = init_dblock_params(kp, C)

    out = jax.block_until_ready(dblock_forward(x, params))

    ref = dblock_reference(x, params)
    assert out.shape == (B, H, W, C)
    assert jnp.allclose(out, ref, atol=1e-4, rtol=1e-4), "mismatch vs reference"

    print("KERNEL_OK")
</pallas_src>

<mosaic_0001>
module attributes {stable_mosaic.version = 11 : i64} {
  func.func @kernel(%arg0: i32, %arg1: memref<1x16x16x4xf32, #tpu.memory_space<vmem>>, %arg2: memref<4x3x3x4x4xf32, #tpu.memory_space<vmem>>, %arg3: memref<4x4xf32, #tpu.memory_space<vmem>>, %arg4: memref<1x16x16x4xf32, #tpu.memory_space<vmem>>, %arg5: memref<32x32x4xf32, #tpu.memory_space<vmem>>) attributes {dimension_semantics = [#tpu.dimension_semantics<parallel>], iteration_bounds = array<i64: 2>, scalar_prefetch = 0 : i64, scratch_operands = 1 : i64, tpu.core_type = #tpu.core_type<tc>, window_params = [{transform_indices = @transform_0, window_bounds = array<i64: 1, 16, 16, 4>}, {pipeline_mode = #tpu.pipeline_mode<synchronous>, transform_indices = @transform_1, window_bounds = array<i64: 4, 3, 3, 4, 4>}, {pipeline_mode = #tpu.pipeline_mode<synchronous>, transform_indices = @transform_2, window_bounds = array<i64: 4, 4>}, {transform_indices = @transform_3, window_bounds = array<i64: 1, 16, 16, 4>}]} {
    %cst = arith.constant 0.000000e+00 : f32
    %0 = vector.broadcast %cst : f32 to vector<8x32x4xf32>
    %c0 = arith.constant 0 : index
    %c0_0 = arith.constant 0 : index
    %c0_1 = arith.constant 0 : index
    %1 = vector.load %arg5[%c0, %c0_0, %c0_1] : memref<32x32x4xf32, #tpu.memory_space<vmem>>, vector<8x32x4xf32>
    tpu.vector_store %arg5[%c0, %c0_0, %c0_1], %0 {strides = array<i32>} : memref<32x32x4xf32, #tpu.memory_space<vmem>>, vector<8x32x4xf32>,
    %cst_2 = arith.constant 0.000000e+00 : f32
    %2 = vector.broadcast %cst_2 : f32 to vector<8x32x4xf32>
    %c24 = arith.constant 24 : index
    %c0_3 = arith.constant 0 : index
    %c0_4 = arith.constant 0 : index
    %3 = vector.load %arg5[%c24, %c0_3, %c0_4] : memref<32x32x4xf32, #tpu.memory_space<vmem>>, vector<8x32x4xf32>
    tpu.vector_store %arg5[%c24, %c0_3, %c0_4], %2 {strides = array<i32>} : memref<32x32x4xf32, #tpu.memory_space<vmem>>, vector<8x32x4xf32>,
    %cst_5 = arith.constant 0.000000e+00 : f32
    %4 = vector.broadcast %cst_5 : f32 to vector<16x8x4xf32>
    %c8 = arith.constant 8 : index
    %c0_6 = arith.constant 0 : index
    %c0_7 = arith.constant 0 : index
    %5 = vector.load %arg5[%c8, %c0_6, %c0_7] : memref<32x32x4xf32, #tpu.memory_space<vmem>>, vector<16x8x4xf32>
    tpu.vector_store %arg5[%c8, %c0_6, %c0_7], %4 {strides = array<i32>} : memref<32x32x4xf32, #tpu.memory_space<vmem>>, vector<16x8x4xf32>,
    %cst_8 = arith.constant 0.000000e+00 : f32
    %6 = vector.broadcast %cst_8 : f32 to vector<16x8x4xf32>
    %c8_9 = arith.constant 8 : index
    %c24_10 = arith.constant 24 : index
    %c0_11 = arith.constant 0 : index
    %7 = vector.load %arg5[%c8_9, %c24_10, %c0_11] : memref<32x32x4xf32, #tpu.memory_space<vmem>>, vector<16x8x4xf32>
    tpu.vector_store %arg5[%c8_9, %c24_10, %c0_11], %6 {strides = array<i32>} : memref<32x32x4xf32, #tpu.memory_space<vmem>>, vector<16x8x4xf32>,
    %c0_12 = arith.constant 0 : index
    %c0_13 = arith.constant 0 : index
    %c0_14 = arith.constant 0 : index
    %c0_15 = arith.constant 0 : index
    %8 = vector.load %arg1[%c0_12, %c0_13, %c0_14, %c0_15] : memref<1x16x16x4xf32, #tpu.memory_space<vmem>>, vector<1x16x16x4xf32>
    %9 = vector.shape_cast %8 : vector<1x16x16x4xf32> to vector<16x16x4xf32>
    %c8_16 = arith.constant 8 : index
    %c8_17 = arith.constant 8 : index
    %c0_18 = arith.constant 0 : index
    %10 = vector.load %arg5[%c8_16, %c8_17, %c0_18] : memref<32x32x4xf32, #tpu.memory_space<vmem>>, vector<16x16x4xf32>
    tpu.vector_store %arg5[%c8_16, %c8_17, %c0_18], %9 {strides = array<i32>} : memref<32x32x4xf32, #tpu.memory_space<vmem>>, vector<16x16x4xf32>,
    %cst_19 = arith.constant 0.000000e+00 : f32
    %11 = vector.broadcast %cst_19 : f32 to vector<256x4xf32>
    %c7 = arith.constant 7 : index
    %c7_20 = arith.constant 7 : index
    %c0_21 = arith.constant 0 : index
    %12 = vector.load %arg5[%c7, %c7_20, %c0_21] : memref<32x32x4xf32, #tpu.memory_space<vmem>>, vector<16x16x4xf32>
    %13 = vector.shape_cast %12 : vector<16x16x4xf32> to vector<256x4xf32>
    %c0_22 = arith.constant 0 : index
    %c0_23 = arith.constant 0 : index
    %c0_24 = arith.constant 0 : index
    %c0_25 = arith.constant 0 : index
    %c0_26 = arith.constant 0 : index
    %14 = vector.load %arg2[%c0_22, %c0_23, %c0_24, %c0_25, %c0_26] : memref<4x3x3x4x4xf32, #tpu.memory_space<vmem>>, vector<1x1x1x4x4xf32>
    %15 = vector.shape_cast %14 : vector<1x1x1x4x4xf32> to vector<4x4xf32>
    %cst_27 = arith.constant dense<0.000000e+00> : vector<256x4xf32>
    %16 = tpu.matmul %13, %15, %cst_27 {dimension_numbers = #tpu.dot_dimension_numbers<[1], [0], [0], [1], [0, 0, 1, 1], [], []>} : vector<256x4xf32>, vector<4x4xf32>, vector<256x4xf32> -> vector<256x4xf32>
    %17 = arith.addf %11, %16 : vector<256x4xf32>
    %c7_28 = arith.constant 7 : index
    %c8_29 = arith.constant 8 : index
    %c0_30 = arith.constant 0 : index
    %18 = vector.load %arg5[%c7_28, %c8_29, %c0_30] : memref<32x32x4xf32, #tpu.memory_space<vmem>>, vector<16x16x4xf32>
    %19 = vector.shape_cast %18 : vector<16x16x4xf32> to vector<256x4xf32>
    %c0_31 = arith.constant 0 : index
    %c0_32 = arith.constant 0 : index
    %c1 = arith.constant 1 : index
    %c0_33 = arith.constant 0 : index
    %c0_34 = arith.constant 0 : index
    %20 = vector.load %arg2[%c0_31, %c0_32, %c1, %c0_33, %c0_34] : memref<4x3x3x4x4xf32, #tpu.memory_space<vmem>>, vector<1x1x1x4x4xf32>
    %21 = vector.shape_cast %20 : vector<1x1x1x4x4xf32> to vector<4x4xf32>
    %cst_35 = arith.constant dense<0.000000e+00> : vector<256x4xf32>
    %22 = tpu.matmul %19, %21, %cst_35 {dimension_numbers = #tpu.dot_dimension_numbers<[1], [0], [0], [1], [0, 0, 1, 1], [], []>} : vector<256x4xf32>, vector<4x4xf32>, vector<256x4xf32> -> vector<256x4xf32>
    %23 = arith.addf %17, %22 : vector<256x4xf32>
    %c7_36 = arith.constant 7 : index
    %c9 = arith.constant 9 : index
    %c0_37 = arith.constant 0 : index
    %24 = vector.load %arg5[%c7_36, %c9, %c0_37] : memref<32x32x4xf32, #tpu.memory_space<vmem>>, vector<16x16x4xf32>
    %25 = vector.shape_cast %24 : vector<16x16x4xf32> to vector<256x4xf32>
    %c0_38 = arith.constant 0 : index
    %c0_39 = arith.constant 0 : index
    %c2 = arith.constant 2 : index
    %c0_40 = arith.constant 0 : index
    %c0_41 = arith.constant 0 : index
    %26 = vector.load %arg2[%c0_38, %c0_39, %c2, %c0_40, %c0_41] : memref<4x3x3x4x4xf32, #tpu.memory_space<vmem>>, vector<1x1x1x4x4xf32>
    %27 = vector.shape_cast %26 : vector<1x1x1x4x4xf32> to vector<4x4xf32>
    %cst_42 = arith.constant dense<0.000000e+00> : vector<256x4xf32>
    %28 = tpu.matmul %25, %27, %cst_42 {dimension_numbers = #tpu.dot_dimension_numbers<[1], [0], [0], [1], [0, 0, 1, 1], [], []>} : vector<256x4xf32>, vector<4x4xf32>, vector<256x4xf32> -> vector<256x4xf32>
    %29 = arith.addf %23, %28 : vector<256x4xf32>
    %c8_43 = arith.constant 8 : index
    %c7_44 = arith.constant 7 : index
    %c0_45 = arith.constant 0 : index
    %30 = vector.load %arg5[%c8_43, %c7_44, %c0_45] : memref<32x32x4xf32, #tpu.memory_space<vmem>>, vector<16x16x4xf32>
    %31 = vector.shape_cast %30 : vector<16x16x4xf32> to vector<256x4xf32>
    %c0_46 = arith.constant 0 : index
    %c1_47 = arith.constant 1 : index
    %c0_48 = arith.constant 0 : index
    %c0_49 = arith.constant 0 : index
    %c0_50 = arith.constant 0 : index
    %32 = vector.load %arg2[%c0_46, %c1_47, %c0_48, %c0_49, %c0_50] : memref<4x3x3x4x4xf32, #tpu.memory_space<vmem>>, vector<1x1x1x4x4xf32>
    %33 = vector.shape_cast %32 : vector<1x1x1x4x4xf32> to vector<4x4xf32>
    %cst_51 = arith.constant dense<0.000000e+00> : vector<256x4xf32>
    %34 = tpu.matmul %31, %33, %cst_51 {dimension_numbers = #tpu.dot_dimension_numbers<[1], [0], [0], [1], [0, 0, 1, 1], [], []>} : vector<256x4xf32>, vector<4x4xf32>, vector<256x4xf32> -> vector<256x4xf32>
    %35 = arith.addf %29, %34 : vector<256x4xf32>
    %c8_52 = arith.constant 8 : index
    %c8_53 = arith.constant 8 : index
    %c0_54 = arith.constant 0 : index
    %36 = vector.load %arg5[%c8_52, %c8_53, %c0_54] : memref<32x32x4xf32, #tpu.memory_space<vmem>>, vector<16x16x4xf32>
    %37 = vector.shape_cast %36 : vector<16x16x4xf32> to vector<256x4xf32>
    %c0_55 = arith.constant 0 : index
    %c1_56 = arith.constant 1 : index
    %c1_57 = arith.constant 1 : index
    %c0_58 = arith.constant 0 : index
    %c0_59 = arith.constant 0 : index
    %38 = vector.load %arg2[%c0_55, %c1_56, %c1_57, %c0_58, %c0_59] : memref<4x3x3x4x4xf32, #tpu.memory_space<vmem>>, vector<1x1x1x4x4xf32>
    %39 = vector.shape_cast %38 : vector<1x1x1x4x4xf32> to vector<4x4xf32>
    %cst_60 = arith.constant dense<0.000000e+00> : vector<256x4xf32>
    %40 = tpu.matmul %37, %39, %cst_60 {dimension_numbers = #tpu.dot_dimension_numbers<[1], [0], [0], [1], [0, 0, 1, 1], [], []>} : vector<256x4xf32>, vector<4x4xf32>, vector<256x4xf32> -> vector<256x4xf32>
    %41 = arith.addf %35, %40 : vector<256x4xf32>
    %c8_61 = arith.constant 8 : index
    %c9_62 = arith.constant 9 : index
    %c0_63 = arith.constant 0 : index
    %42 = vector.load %arg5[%c8_61, %c9_62, %c0_63] : memref<32x32x4xf32, #tpu.memory_space<vmem>>, vector<16x16x4xf32>
    %43 = vector.shape_cast %42 : vector<16x16x4xf32> to vector<256x4xf32>
    %c0_64 = arith.constant 0 : index
    %c1_65 = arith.constant 1 : index
    %c2_66 = arith.constant 2 : index
    %c0_67 = arith.constant 0 : index
    %c0_68 = arith.constant 0 : index
    %44 = vector.load %arg2[%c0_64, %c1_65, %c2_66, %c0_67, %c0_68] : memref<4x3x3x4x4xf32, #tpu.memory_space<vmem>>, vector<1x1x1x4x4xf32>
    %45 = vector.shape_cast %44 : vector<1x1x1x4x4xf32> to vector<4x4xf32>
    %cst_69 = arith.constant dense<0.000000e+00> : vector<256x4xf32>
    %46 = tpu.matmul %43, %45, %cst_69 {dimension_numbers = #tpu.dot_dimension_numbers<[1], [0], [0], [1], [0, 0, 1, 1], [], []>} : vector<256x4xf32>, vector<4x4xf32>, vector<256x4xf32> -> vector<256x4xf32>
    %47 = arith.addf %41, %46 : vector<256x4xf32>
    %c9_70 = arith.constant 9 : index
    %c7_71 = arith.constant 7 : index
    %c0_72 = arith.constant 0 : index
    %48 = vector.load %arg5[%c9_70, %c7_71, %c0_72] : memref<32x32x4xf32, #tpu.memory_space<vmem>>, vector<16x16x4xf32>
    %49 = vector.shape_cast %48 : vector<16x16x4xf32> to vector<256x4xf32>
    %c0_73 = arith.constant 0 : index
    %c2_74 = arith.constant 2 : index
    %c0_75 = arith.constant 0 : index
    %c0_76 = arith.constant 0 : index
    %c0_77 = arith.constant 0 : index
    %50 = vector.load %arg2[%c0_73, %c2_74, %c0_75, %c0_76, %c0_77] : memref<4x3x3x4x4xf32, #tpu.memory_space<vmem>>, vector<1x1x1x4x4xf32>
    %51 = vector.shape_cast %50 : vector<1x1x1x4x4xf32> to vector<4x4xf32>
    %cst_78 = arith.constant dense<0.000000e+00> : vector<256x4xf32>
    %52 = tpu.matmul %49, %51, %cst_78 {dimension_numbers = #tpu.dot_dimension_numbers<[1], [0], [0], [1], [0, 0, 1, 1], [], []>} : vector<256x4xf32>, vector<4x4xf32>, vector<256x4xf32> -> vector<256x4xf32>
    %53 = arith.addf %47, %52 : vector<256x4xf32>
    %c9_79 = arith.constant 9 : index
    %c8_80 = arith.constant 8 : index
    %c0_81 = arith.constant 0 : index
    %54 = vector.load %arg5[%c9_79, %c8_80, %c0_81] : memref<32x32x4xf32, #tpu.memory_space<vmem>>, vector<16x16x4xf32>
    %55 = vector.shape_cast %54 : vector<16x16x4xf32> to vector<256x4xf32>
    %c0_82 = arith.constant 0 : index
    %c2_83 = arith.constant 2 : index
    %c1_84 = arith.constant 1 : index
    %c0_85 = arith.constant 0 : index
    %c0_86 = arith.constant 0 : index
    %56 = vector.load %arg2[%c0_82, %c2_83, %c1_84, %c0_85, %c0_86] : memref<4x3x3x4x4xf32, #tpu.memory_space<vmem>>, vector<1x1x1x4x4xf32>
    %57 = vector.shape_cast %56 : vector<1x1x1x4x4xf32> to vector<4x4xf32>
    %cst_87 = arith.constant dense<0.000000e+00> : vector<256x4xf32>
    %58 = tpu.matmul %55, %57, %cst_87 {dimension_numbers = #tpu.dot_dimension_numbers<[1], [0], [0], [1], [0, 0, 1, 1], [], []>} : vector<256x4xf32>, vector<4x4xf32>, vector<256x4xf32> -> vector<256x4xf32>
    %59 = arith.addf %53, %58 : vector<256x4xf32>
    %c9_88 = arith.constant 9 : index
    %c9_89 = arith.constant 9 : index
    %c0_90 = arith.constant 0 : index
    %60 = vector.load %arg5[%c9_88, %c9_89, %c0_90] : memref<32x32x4xf32, #tpu.memory_space<vmem>>, vector<16x16x4xf32>
    %61 = vector.shape_cast %60 : vector<16x16x4xf32> to vector<256x4xf32>
    %c0_91 = arith.constant 0 : index
    %c2_92 = arith.constant 2 : index
    %c2_93 = arith.constant 2 : index
    %c0_94 = arith.constant 0 : index
    %c0_95 = arith.constant 0 : index
    %62 = vector.load %arg2[%c0_91, %c2_92, %c2_93, %c0_94, %c0_95] : memref<4x3x3x4x4xf32, #tpu.memory_space<vmem>>, vector<1x1x1x4x4xf32>
    %63 = vector.shape_cast %62 : vector<1x1x1x4x4xf32> to vector<4x4xf32>
    %cst_96 = arith.constant dense<0.000000e+00> : vector<256x4xf32>
    %64 = tpu.matmul %61, %63, %cst_96 {dimension_numbers = #tpu.dot_dimension_numbers<[1], [0], [0], [1], [0, 0, 1, 1], [], []>} : vector<256x4xf32>, vector<4x4xf32>, vector<256x4xf32> -> vector<256x4xf32>
    %65 = arith.addf %59, %64 : vector<256x4xf32>
    %c0_97 = arith.constant 0 : index
    %c0_98 = arith.constant 0 : index
    %66 = vector.load %arg3[%c0_97, %c0_98] : memref<4x4xf32, #tpu.memory_space<vmem>>, vector<1x4xf32>
    %67 = vector.broadcast %66 : vector<1x4xf32> to vector<256x4xf32>
    %68 = arith.addf %65, %67 : vector<256x4xf32>
    %cst_99 = arith.constant 0.000000e+00 : f32
    %69 = vector.broadcast %cst_99 : f32 to vector<256x4xf32>
    %70 = arith.maximumf %68, %69 : vector<256x4xf32>
    %71 = vector.shape_cast %70 : vector<256x4xf32> to vector<16x16x4xf32>
    %72 = arith.addf %9, %71 : vector<16x16x4xf32>
    %c8_100 = arith.constant 8 : index
    %c8_101 = arith.constant 8 : index
    %c0_102 = arith.constant 0 : index
    %73 = vector.load %arg5[%c8_100, %c8_101, %c0_102] : memref<32x32x4xf32, #tpu.memory_space<vmem>>, vector<16x16x4xf32>
    tpu.vector_store %arg5[%c8_100, %c8_101, %c0_102], %71 {strides = array<i32>} : memref<32x32x4xf32, #tpu.memory_space<vmem>>, vector<16x16x4xf32>,
    %cst_103 = arith.constant 0.000000e+00 : f32
    %74 = vector.broadcast %cst_103 : f32 to vector<256x4xf32>
    %c6 = arith.constant 6 : index
    %c6_104 = arith.constant 6 : index
    %c0_105 = arith.constant 0 : index
    %75 = vector.load %arg5[%c6, %c6_104, %c0_105] : memref<32x32x4xf32, #tpu.memory_space<vmem>>, vector<16x16x4xf32>
    %76 = vector.shape_cast %75 : vector<16x16x4xf32> to vector<256x4xf32>
    %c1_106 = arith.constant 1 : index
    %c0_107 = arith.constant 0 : index
    %c0_108 = arith.constant 0 : index
    %c0_109 = arith.constant 0 : index
    %c0_110 = arith.constant 0 : index
    %77 = vector.load %arg2[%c1_106, %c0_107, %c0_108, %c0_109, %c0_110] : memref<4x3x3x4x4xf32, #tpu.memory_space<vmem>>, vector<1x1x1x4x4xf32>
    %78 = vector.shape_cast %77 : vector<1x1x1x4x4xf32> to vector<4x4xf32>
    %cst_111 = arith.constant dense<0.000000e+00> : vector<256x4xf32>
    %79 = tpu.matmul %76, %78, %cst_111 {dimension_numbers = #tpu.dot_dimension_numbers<[1], [0], [0], [1], [0, 0, 1, 1], [], []>} : vector<256x4xf32>, vector<4x4xf32>, vector<256x4xf32> -> vector<256x4xf32>
    %80 = arith.addf %74, %79 : vector<256x4xf32>
    %c6_112 = arith.constant 6 : index
    %c8_113 = arith.constant 8 : index
    %c0_114 = arith.constant 0 : index
    %81 = vector.load %arg5[%c6_112, %c8_113, %c0_114] : memref<32x32x4xf32, #tpu.memory_space<vmem>>, vector<16x16x4xf32>
    %82 = vector.shape_cast %81 : vector<16x16x4xf32> to vector<256x4xf32>
    %c1_115 = arith.constant 1 : index
    %c0_116 = arith.constant 0 : index
    %c1_117 = arith.constant 1 : index
    %c0_118 = arith.constant 0 : index
    %c0_119 = arith.constant 0 : index
    %83 = vector.load %arg2[%c1_115, %c0_116, %c1_117, %c0_118, %c0_119] : memref<4x3x3x4x4xf32, #tpu.memory_space<vmem>>, vector<1x1x1x4x4xf32>
    %84 = vector.shape_cast %83 : vector<1x1x1x4x4xf32> to vector<4x4xf32>
    %cst_120 = arith.constant dense<0.000000e+00> : vector<256x4xf32>
    %85 = tpu.matmul %82, %84, %cst_120 {dimension_numbers = #tpu.dot_dimension_numbers<[1], [0], [0], [1], [0, 0, 1, 1], [], []>} : vector<256x4xf32>, vector<4x4xf32>, vector<256x4xf32> -> vector<256x4xf32>
    %86 = arith.addf %80, %85 : vector<256x4xf32>
    %c6_121 = arith.constant 6 : index
    %c10 = arith.constant 10 : index
    %c0_122 = arith.constant 0 : index
    %87 = vector.load %arg5[%c6_121, %c10, %c0_122] : memref<32x32x4xf32, #tpu.memory_space<vmem>>, vector<16x16x4xf32>
    %88 = vector.shape_cast %87 : vector<16x16x4xf32> to vector<256x4xf32>
    %c1_123 = arith.constant 1 : index
    %c0_124 = arith.constant 0 : index
    %c2_125 = arith.constant 2 : index
    %c0_126 = arith.constant 0 : index
    %c0_127 = arith.constant 0 : index
    %89 = vector.load %arg2[%c1_123, %c0_124, %c2_125, %c0_126, %c0_127] : memref<4x3x3x4x4xf32, #tpu.memory_space<vmem>>, vector<1x1x1x4x4xf32>
    %90 = vector.shape_cast %89 : vector<1x1x1x4x4xf32> to vector<4x4xf32>
    %cst_128 = arith.constant dense<0.000000e+00> : vector<256x4xf32>
    %91 = tpu.matmul %88, %90, %cst_128 {dimension_numbers = #tpu.dot_dimension_numbers<[1], [0], [0], [1], [0, 0, 1, 1], [], []>} : vector<256x4xf32>, vector<4x4xf32>, vector<256x4xf32> -> vector<256x4xf32>
    %92 = arith.addf %86, %91 : vector<256x4xf32>
    %c8_129 = arith.constant 8 : index
    %c6_130 = arith.constant 6 : index
    %c0_131 = arith.constant 0 : index
    %93 = vector.load %arg5[%c8_129, %c6_130, %c0_131] : memref<32x32x4xf32, #tpu.memory_space<vmem>>, vector<16x16x4xf32>
    %94 = vector.shape_cast %93 : vector<16x16x4xf32> to vector<256x4xf32>
    %c1_132 = arith.constant 1 : index
    %c1_133 = arith.constant 1 : index
    %c0_134 = arith.constant 0 : index
    %c0_135 = arith.constant 0 : index
    %c0_136 = arith.constant 0 : index
    %95 = vector.load %arg2[%c1_132, %c1_133, %c0_134, %c0_135, %c0_136] : memref<4x3x3x4x4xf32, #tpu.memory_space<vmem>>, vector<1x1x1x4x4xf32>
    %96 = vector.shape_cast %95 : vector<1x1x1x4x4xf32> to vector<4x4xf32>
    %cst_137 = arith.constant dense<0.000000e+00> : vector<256x4xf32>
    %97 = tpu.matmul %94, %96, %cst_137 {dimension_numbers = #tpu.dot_dimension_numbers<[1], [0], [0], [1], [0, 0, 1, 1], [], []>} : vector<256x4xf32>, vector<4x4xf32>, vector<256x4xf32> -> vector<256x4xf32>
    %98 = arith.addf %92, %97 : vector<256x4xf32>
    %c8_138 = arith.constant 8 : index
    %c8_139 = arith.constant 8 : index
    %c0_140 = arith.constant 0 : index
    %99 = vector.load %arg5[%c8_138, %c8_139, %c0_140] : memref<32x32x4xf32, #tpu.memory_space<vmem>>, vector<16x16x4xf32>
    %100 = vector.shape_cast %99 : vector<16x16x4xf32> to vector<256x4xf32>
    %c1_141 = arith.constant 1 : index
    %c1_142 = arith.constant 1 : index
    %c1_143 = arith.constant 1 : index
    %c0_144 = arith.constant 0 : index
    %c0_145 = arith.constant 0 : index
    %101 = vector.load %arg2[%c1_141, %c1_142, %c1_143, %c0_144, %c0_145] : memref<4x3x3x4x4xf32, #tpu.memory_space<vmem>>, vector<1x1x1x4x4xf32>
    %102 = vector.shape_cast %101 : vector<1x1x1x4x4xf32> to vector<4x4xf32>
    %cst_146 = arith.constant dense<0.000000e+00> : vector<256x4xf32>
    %103 = tpu.matmul %100, %102, %cst_146 {dimension_numbers = #tpu.dot_dimension_numbers<[1], [0], [0], [1], [0, 0, 1, 1], [], []>} : vector<256x4xf32>, vector<4x4xf32>, vector<256x4xf32> -> vector<256x4xf32>
    %104 = arith.addf %98, %103 : vector<256x4xf32>
    %c8_147 = arith.constant 8 : index
    %c10_148 = arith.constant 10 : index
    %c0_149 = arith.constant 0 : index
    %105 = vector.load %arg5[%c8_147, %c10_148, %c0_149] : memref<32x32x4xf32, #tpu.memory_space<vmem>>, vector<16x16x4xf32>
    %106 = vector.shape_cast %105 : vector<16x16x4xf32> to vector<256x4xf32>
    %c1_150 = arith.constant 1 : index
    %c1_151 = arith.constant 1 : index
    %c2_152 = arith.constant 2 : index
    %c0_153 = arith.constant 0 : index
    %c0_154 = arith.constant 0 : index
    %107 = vector.load %arg2[%c1_150, %c1_151, %c2_152, %c0_153, %c0_154] : memref<4x3x3x4x4xf32, #tpu.memory_space<vmem>>, vector<1x1x1x4x4xf32>
    %108 = vector.shape_cast %107 : vector<1x1x1x4x4xf32> to vector<4x4xf32>
    %cst_155 = arith.constant dense<0.000000e+00> : vector<256x4xf32>
    %109 = tpu.matmul %106, %108, %cst_155 {dimension_numbers = #tpu.dot_dimension_numbers<[1], [0], [0], [1], [0, 0, 1, 1], [], []>} : vector<256x4xf32>, vector<4x4xf32>, vector<256x4xf32> -> vector<256x4xf32>
    %110 = arith.addf %104, %109 : vector<256x4xf32>
    %c10_156 = arith.constant 10 : index
    %c6_157 = arith.constant 6 : index
    %c0_158 = arith.constant 0 : index
    %111 = vector.load %arg5[%c10_156, %c6_157, %c0_158] : memref<32x32x4xf32, #tpu.memory_space<vmem>>, vector<16x16x4xf32>
    %112 = vector.shape_cast %111 : vector<16x16x4xf32> to vector<256x4xf32>
    %c1_159 = arith.constant 1 : index
    %c2_160 = arith.constant 2 : index
    %c0_161 = arith.constant 0 : index
    %c0_162 = arith.constant 0 : index
    %c0_163 = arith.constant 0 : index
    %113 = vector.load %arg2[%c1_159, %c2_160, %c0_161, %c0_162, %c0_163] : memref<4x3x3x4x4xf32, #tpu.memory_space<vmem>>, vector<1x1x1x4x4xf32>
    %114 = vector.shape_cast %113 : vector<1x1x1x4x4xf32> to vector<4x4xf32>
    %cst_164 = arith.constant dense<0.000000e+00> : vector<256x4xf32>
    %115 = tpu.matmul %112, %114, %cst_164 {dimension_numbers = #tpu.dot_dimension_numbers<[1], [0], [0], [1], [0, 0, 1, 1], [], []>} : vector<256x4xf32>, vector<4x4xf32>, vector<256x4xf32> -> vector<256x4xf32>
    %116 = arith.addf %110, %115 : vector<256x4xf32>
    %c10_165 = arith.constant 10 : index
    %c8_166 = arith.constant 8 : index
    %c0_167 = arith.constant 0 : index
    %117 = vector.load %arg5[%c10_165, %c8_166, %c0_167] : memref<32x32x4xf32, #tpu.memory_space<vmem>>, vector<16x16x4xf32>
    %118 = vector.shape_cast %117 : vector<16x16x4xf32> to vector<256x4xf32>
    %c1_168 = arith.constant 1 : index
    %c2_169 = arith.constant 2 : index
    %c1_170 = arith.constant 1 : index
    %c0_171 = arith.constant 0 : index
    %c0_172 = arith.constant 0 : index
    %119 = vector.load %arg2[%c1_168, %c2_169, %c1_170, %c0_171, %c0_172] : memref<4x3x3x4x4xf32, #tpu.memory_space<vmem>>, vector<1x1x1x4x4xf32>
    %120 = vector.shape_cast %119 : vector<1x1x1x4x4xf32> to vector<4x4xf32>
    %cst_173 = arith.constant dense<0.000000e+00> : vector<256x4xf32>
    %121 = tpu.matmul %118, %120, %cst_173 {dimension_numbers = #tpu.dot_dimension_numbers<[1], [0], [0], [1], [0, 0, 1, 1], [], []>} : vector<256x4xf32>, vector<4x4xf32>, vector<256x4xf32> -> vector<256x4xf32>
    %122 = arith.addf %116, %121 : vector<256x4xf32>
    %c10_174 = arith.constant 10 : index
    %c10_175 = arith.constant 10 : index
    %c0_176 = arith.constant 0 : index
    %123 = vector.load %arg5[%c10_174, %c10_175, %c0_176] : memref<32x32x4xf32, #tpu.memory_space<vmem>>, vector<16x16x4xf32>
    %124 = vector.shape_cast %123 : vector<16x16x4xf32> to vector<256x4xf32>
    %c1_177 = arith.constant 1 : index
    %c2_178 = arith.constant 2 : index
    %c2_179 = arith.constant 2 : index
    %c0_180 = arith.constant 0 : index
    %c0_181 = arith.constant 0 : index
    %125 = vector.load %arg2[%c1_177, %c2_178, %c2_179, %c0_180, %c0_181] : memref<4x3x3x4x4xf32, #tpu.memory_space<vmem>>, vector<1x1x1x4x4xf32>
    %126 = vector.shape_cast %125 : vector<1x1x1x4x4xf32> to vector<4x4xf32>
    %cst_182 = arith.constant dense<0.000000e+00> : vector<256x4xf32>
    %127 = tpu.matmul %124, %126, %cst_182 {dimension_numbers = #tpu.dot_dimension_numbers<[1], [0], [0], [1], [0, 0, 1, 1], [], []>} : vector<256x4xf32>, vector<4x4xf32>, vector<256x4xf32> -> vector<256x4xf32>
    %128 = arith.addf %122, %127 : vector<256x4xf32>
    %c1_183 = arith.constant 1 : index
    %c0_184 = arith.constant 0 : index
    %129 = vector.load %arg3[%c1_183, %c0_184] : memref<4x4xf32, #tpu.memory_space<vmem>>, vector<1x4xf32>
    %130 = vector.broadcast %129 : vector<1x4xf32> to vector<256x4xf32>
    %131 = arith.addf %128, %130 : vector<256x4xf32>
    %cst_185 = arith.constant 0.000000e+00 : f32
    %132 = vector.broadcast %cst_185 : f32 to vector<256x4xf32>
    %133 = arith.maximumf %131, %132 : vector<256x4xf32>
    %134 = vector.shape_cast %133 : vector<256x4xf32> to vector<16x16x4xf32>
    %135 = arith.addf %72, %134 : vector<16x16x4xf32>
    %c8_186 = arith.constant 8 : index
    %c8_187 = arith.constant 8 : index
    %c0_188 = arith.constant 0 : index
    %136 = vector.load %arg5[%c8_186, %c8_187, %c0_188] : memref<32x32x4xf32, #tpu.memory_space<vmem>>, vector<16x16x4xf32>
    tpu.vector_store %arg5[%c8_186, %c8_187, %c0_188], %134 {strides = array<i32>} : memref<32x32x4xf32, #tpu.memory_space<vmem>>, vector<16x16x4xf32>,
    %cst_189 = arith.constant 0.000000e+00 : f32
    %137 = vector.broadcast %cst_189 : f32 to vector<256x4xf32>
    %c4 = arith.constant 4 : index
    %c4_190 = arith.constant 4 : index
    %c0_191 = arith.constant 0 : index
    %138 = vector.load %arg5[%c4, %c4_190, %c0_191] : memref<32x32x4xf32, #tpu.memory_space<vmem>>, vector<16x16x4xf32>
    %139 = vector.shape_cast %138 : vector<16x16x4xf32> to vector<256x4xf32>
    %c2_192 = arith.constant 2 : index
    %c0_193 = arith.constant 0 : index
    %c0_194 = arith.constant 0 : index
    %c0_195 = arith.constant 0 : index
    %c0_196 = arith.constant 0 : index
    %140 = vector.load %arg2[%c2_192, %c0_193, %c0_194, %c0_195, %c0_196] : memref<4x3x3x4x4xf32, #tpu.memory_space<vmem>>, vector<1x1x1x4x4xf32>
    %141 = vector.shape_cast %140 : vector<1x1x1x4x4xf32> to vector<4x4xf32>
    %cst_197 = arith.constant dense<0.000000e+00> : vector<256x4xf32>
    %142 = tpu.matmul %139, %141, %cst_197 {dimension_numbers = #tpu.dot_dimension_numbers<[1], [0], [0], [1], [0, 0, 1, 1], [], []>} : vector<256x4xf32>, vector<4x4xf32>, vector<256x4xf32> -> vector<256x4xf32>
    %143 = arith.addf %137, %142 : vector<256x4xf32>
    %c4_198 = arith.constant 4 : index
    %c8_199 = arith.constant 8 : index
    %c0_200 = arith.constant 0 : index
    %144 = vector.load %arg5[%c4_198, %c8_199, %c0_200] : memref<32x32x4xf32, #tpu.memory_space<vmem>>, vector<16x16x4xf32>
    %145 = vector.shape_cast %144 : vector<16x16x4xf32> to vector<256x4xf32>
    %c2_201 = arith.constant 2 : index
    %c0_202 = arith.constant 0 : index
    %c1_203 = arith.constant 1 : index
    %c0_204 = arith.constant 0 : index
    %c0_205 = arith.constant 0 : index
    %146 = vector.load %arg2[%c2_201, %c0_202, %c1_203, %c0_204, %c0_205] : memref<4x3x3x4x4xf32, #tpu.memory_space<vmem>>, vector<1x1x1x4x4xf32>
    %147 = vector.shape_cast %146 : vector<1x1x1x4x4xf32> to vector<4x4xf32>
    %cst_206 = arith.constant dense<0.000000e+00> : vector<256x4xf32>
    %148 = tpu.matmul %145, %147, %cst_206 {dimension_numbers = #tpu.dot_dimension_numbers<[1], [0], [0], [1], [0, 0, 1, 1], [], []>} : vector<256x4xf32>, vector<4x4xf32>, vector<256x4xf32> -> vector<256x4xf32>
    %149 = arith.addf %143, %148 : vector<256x4xf32>
    %c4_207 = arith.constant 4 : index
    %c12 = arith.constant 12 : index
    %c0_208 = arith.constant 0 : index
    %150 = vector.load %arg5[%c4_207, %c12, %c0_208] : memref<32x32x4xf32, #tpu.memory_space<vmem>>, vector<16x16x4xf32>
    %151 = vector.shape_cast %150 : vector<16x16x4xf32> to vector<256x4xf32>
    %c2_209 = arith.constant 2 : index
    %c0_210 = arith.constant 0 : index
    %c2_211 = arith.constant 2 : index
    %c0_212 = arith.constant 0 : index
    %c0_213 = arith.constant 0 : index
    %152 = vector.load %arg2[%c2_209, %c0_210, %c2_211, %c0_212, %c0_213] : memref<4x3x3x4x4xf32, #tpu.memory_space<vmem>>, vector<1x1x1x4x4xf32>
    %153 = vector.shape_cast %152 : vector<1x1x1x4x4xf32> to vector<4x4xf32>
    %cst_214 = arith.constant dense<0.000000e+00> : vector<256x4xf32>
    %154 = tpu.matmul %151, %153, %cst_214 {dimension_numbers = #tpu.dot_dimension_numbers<[1], [0], [0], [1], [0, 0, 1, 1], [], []>} : vector<256x4xf32>, vector<4x4xf32>, vector<256x4xf32> -> vector<256x4xf32>
    %155 = arith.addf %149, %154 : vector<256x4xf32>
    %c8_215 = arith.constant 8 : index
    %c4_216 = arith.constant 4 : index
    %c0_217 = arith.constant 0 : index
    %156 = vector.load %arg5[%c8_215, %c4_216, %c0_217] : memref<32x32x4xf32, #tpu.memory_space<vmem>>, vector<16x16x4xf32>
    %157 = vector.shape_cast %156 : vector<16x16x4xf32> to vector<256x4xf32>
    %c2_218 = arith.constant 2 : index
    %c1_219 = arith.constant 1 : index
    %c0_220 = arith.constant 0 : index
    %c0_221 = arith.constant 0 : index
    %c0_222 = arith.constant 0 : index
    %158 = vector.load %arg2[%c2_218, %c1_219, %c0_220, %c0_221, %c0_222] : memref<4x3x3x4x4xf32, #tpu.memory_space<vmem>>, vector<1x1x1x4x4xf32>
    %159 = vector.shape_cast %158 : vector<1x1x1x4x4xf32> to vector<4x4xf32>
    %cst_223 = arith.constant dense<0.000000e+00> : vector<256x4xf32>
    %160 = tpu.matmul %157, %159, %cst_223 {dimension_numbers = #tpu.dot_dimension_numbers<[1], [0], [0], [1], [0, 0, 1, 1], [], []>} : vector<256x4xf32>, vector<4x4xf32>, vector<256x4xf32> -> vector<256x4xf32>
    %161 = arith.addf %155, %160 : vector<256x4xf32>
    %c8_224 = arith.constant 8 : index
    %c8_225 = arith.constant 8 : index
    %c0_226 = arith.constant 0 : index
    %162 = vector.load %arg5[%c8_224, %c8_225, %c0_226] : memref<32x32x4xf32, #tpu.memory_space<vmem>>, vector<16x16x4xf32>
    %163 = vector.shape_cast %162 : vector<16x16x4xf32> to vector<256x4xf32>
    %c2_227 = arith.constant 2 : index
    %c1_228 = arith.constant 1 : index
    %c1_229 = arith.constant 1 : index
    %c0_230 = arith.constant 0 : index
    %c0_231 = arith.constant 0 : index
    %164 = vector.load %arg2[%c2_227, %c1_228, %c1_229, %c0_230, %c0_231] : memref<4x3x3x4x4xf32, #tpu.memory_space<vmem>>, vector<1x1x1x4x4xf32>
    %165 = vector.shape_cast %164 : vector<1x1x1x4x4xf32> to vector<4x4xf32>
    %cst_232 = arith.constant dense<0.000000e+00> : vector<256x4xf32>
    %166 = tpu.matmul %163, %165, %cst_232 {dimension_numbers = #tpu.dot_dimension_numbers<[1], [0], [0], [1], [0, 0, 1, 1], [], []>} : vector<256x4xf32>, vector<4x4xf32>, vector<256x4xf32> -> vector<256x4xf32>
    %167 = arith.addf %161, %166 : vector<256x4xf32>
    %c8_233 = arith.constant 8 : index
    %c12_234 = arith.constant 12 : index
    %c0_235 = arith.constant 0 : index
    %168 = vector.load %arg5[%c8_233, %c12_234, %c0_235] : memref<32x32x4xf32, #tpu.memory_space<vmem>>, vector<16x16x4xf32>
    %169 = vector.shape_cast %168 : vector<16x16x4xf32> to vector<256x4xf32>
    %c2_236 = arith.constant 2 : index
    %c1_237 = arith.constant 1 : index
    %c2_238 = arith.constant 2 : index
    %c0_239 = arith.constant 0 : index
    %c0_240 = arith.constant 0 : index
    %170 = vector.load %arg2[%c2_236, %c1_237, %c2_238, %c0_239, %c0_240] : memref<4x3x3x4x4xf32, #tpu.memory_space<vmem>>, vector<1x1x1x4x4xf32>
    %171 = vector.shape_cast %170 : vector<1x1x1x4x4xf32> to vector<4x4xf32>
    %cst_241 = arith.constant dense<0.000000e+00> : vector<256x4xf32>
    %172 = tpu.matmul %169, %171, %cst_241 {dimension_numbers = #tpu.dot_dimension_numbers<[1], [0], [0], [1], [0, 0, 1, 1], [], []>} : vector<256x4xf32>, vector<4x4xf32>, vector<256x4xf32> -> vector<256x4xf32>
    %173 = arith.addf %167, %172 : vector<256x4xf32>
    %c12_242 = arith.constant 12 : index
    %c4_243 = arith.constant 4 : index
    %c0_244 = arith.constant 0 : index
    %174 = vector.load %arg5[%c12_242, %c4_243, %c0_244] : memref<32x32x4xf32, #tpu.memory_space<vmem>>, vector<16x16x4xf32>
    %175 = vector.shape_cast %174 : vector<16x16x4xf32> to vector<256x4xf32>
    %c2_245 = arith.constant 2 : index
    %c2_246 = arith.constant 2 : index
    %c0_247 = arith.constant 0 : index
    %c0_248 = arith.constant 0 : index
    %c0_249 = arith.constant 0 : index
    %176 = vector.load %arg2[%c2_245, %c2_246, %c0_247, %c0_248, %c0_249] : memref<4x3x3x4x4xf32, #tpu.memory_space<vmem>>, vector<1x1x1x4x4xf32>
    %177 = vector.shape_cast %176 : vector<1x1x1x4x4xf32> to vector<4x4xf32>
    %cst_250 = arith.constant dense<0.000000e+00> : vector<256x4xf32>
    %178 = tpu.matmul %175, %177, %cst_250 {dimension_numbers = #tpu.dot_dimension_numbers<[1], [0], [0], [1], [0, 0, 1, 1], [], []>} : vector<256x4xf32>, vector<4x4xf32>, vector<256x4xf32> -> vector<256x4xf32>
    %179 = arith.addf %173, %178 : vector<256x4xf32>
    %c12_251 = arith.constant 12 : index
    %c8_252 = arith.constant 8 : index
    %c0_253 = arith.constant 0 : index
    %180 = vector.load %arg5[%c12_251, %c8_252, %c0_253] : memref<32x32x4xf32, #tpu.memory_space<vmem>>, vector<16x16x4xf32>
    %181 = vector.shape_cast %180 : vector<16x16x4xf32> to vector<256x4xf32>
    %c2_254 = arith.constant 2 : index
    %c2_255 = arith.constant 2 : index
    %c1_256 = arith.constant 1 : index
    %c0_257 = arith.constant 0 : index
    %c0_258 = arith.constant 0 : index
    %182 = vector.load %arg2[%c2_254, %c2_255, %c1_256, %c0_257, %c0_258] : memref<4x3x3x4x4xf32, #tpu.memory_space<vmem>>, vector<1x1x1x4x4xf32>
    %183 = vector.shape_cast %182 : vector<1x1x1x4x4xf32> to vector<4x4xf32>
    %cst_259 = arith.constant dense<0.000000e+00> : vector<256x4xf32>
    %184 = tpu.matmul %181, %183, %cst_259 {dimension_numbers = #tpu.dot_dimension_numbers<[1], [0], [0], [1], [0, 0, 1, 1], [], []>} : vector<256x4xf32>, vector<4x4xf32>, vector<256x4xf32> -> vector<256x4xf32>
    %185 = arith.addf %179, %184 : vector<256x4xf32>
    %c12_260 = arith.constant 12 : index
    %c12_261 = arith.constant 12 : index
    %c0_262 = arith.constant 0 : index
    %186 = vector.load %arg5[%c12_260, %c12_261, %c0_262] : memref<32x32x4xf32, #tpu.memory_space<vmem>>, vector<16x16x4xf32>
    %187 = vector.shape_cast %186 : vector<16x16x4xf32> to vector<256x4xf32>
    %c2_263 = arith.constant 2 : index
    %c2_264 = arith.constant 2 : index
    %c2_265 = arith.constant 2 : index
    %c0_266 = arith.constant 0 : index
    %c0_267 = arith.constant 0 : index
    %188 = vector.load %arg2[%c2_263, %c2_264, %c2_265, %c0_266, %c0_267] : memref<4x3x3x4x4xf32, #tpu.memory_space<vmem>>, vector<1x1x1x4x4xf32>
    %189 = vector.shape_cast %188 : vector<1x1x1x4x4xf32> to vector<4x4xf32>
    %cst_268 = arith.constant dense<0.000000e+00> : vector<256x4xf32>
    %190 = tpu.matmul %187, %189, %cst_268 {dimension_numbers = #tpu.dot_dimension_numbers<[1], [0], [0], [1], [0, 0, 1, 1], [], []>} : vector<256x4xf32>, vector<4x4xf32>, vector<256x4xf32> -> vector<256x4xf32>
    %191 = arith.addf %185, %190 : vector<256x4xf32>
    %c2_269 = arith.constant 2 : index
    %c0_270 = arith.constant 0 : index
    %192 = vector.load %arg3[%c2_269, %c0_270] : memref<4x4xf32, #tpu.memory_space<vmem>>, vector<1x4xf32>
    %193 = vector.broadcast %192 : vector<1x4xf32> to vector<256x4xf32>
    %194 = arith.addf %191, %193 : vector<256x4xf32>
    %cst_271 = arith.constant 0.000000e+00 : f32
    %195 = vector.broadcast %cst_271 : f32 to vector<256x4xf32>
    %196 = arith.maximumf %194, %195 : vector<256x4xf32>
    %197 = vector.shape_cast %196 : vector<256x4xf32> to vector<16x16x4xf32>
    %198 = arith.addf %135, %197 : vector<16x16x4xf32>
    %c8_272 = arith.constant 8 : index
    %c8_273 = arith.constant 8 : index
    %c0_274 = arith.constant 0 : index
    %199 = vector.load %arg5[%c8_272, %c8_273, %c0_274] : memref<32x32x4xf32, #tpu.memory_space<vmem>>, vector<16x16x4xf32>
    tpu.vector_store %arg5[%c8_272, %c8_273, %c0_274], %197 {strides = array<i32>} : memref<32x32x4xf32, #tpu.memory_space<vmem>>, vector<16x16x4xf32>,
    %cst_275 = arith.constant 0.000000e+00 : f32
    %200 = vector.broadcast %cst_275 : f32 to vector<256x4xf32>
    %c0_276 = arith.constant 0 : index
    %c0_277 = arith.constant 0 : index
    %c0_278 = arith.constant 0 : index
    %201 = vector.load %arg5[%c0_276, %c0_277, %c0_278] : memref<32x32x4xf32, #tpu.memory_space<vmem>>, vector<16x16x4xf32>
    %202 = vector.shape_cast %201 : vector<16x16x4xf32> to vector<256x4xf32>
    %c3 = arith.constant 3 : index
    %c0_279 = arith.constant 0 : index
    %c0_280 = arith.constant 0 : index
    %c0_281 = arith.constant 0 : index
    %c0_282 = arith.constant 0 : index
    %203 = vector.load %arg2[%c3, %c0_279, %c0_280, %c0_281, %c0_282] : memref<4x3x3x4x4xf32, #tpu.memory_space<vmem>>, vector<1x1x1x4x4xf32>
    %204 = vector.shape_cast %203 : vector<1x1x1x4x4xf32> to vector<4x4xf32>
    %cst_283 = arith.constant dense<0.000000e+00> : vector<256x4xf32>
    %205 = tpu.matmul %202, %204, %cst_283 {dimension_numbers = #tpu.dot_dimension_numbers<[1], [0], [0], [1], [0, 0, 1, 1], [], []>} : vector<256x4xf32>, vector<4x4xf32>, vector<256x4xf32> -> vector<256x4xf32>
    %206 = arith.addf %200, %205 : vector<256x4xf32>
    %c0_284 = arith.constant 0 : index
    %c8_285 = arith.constant 8 : index
    %c0_286 = arith.constant 0 : index
    %207 = vector.load %arg5[%c0_284, %c8_285, %c0_286] : memref<32x32x4xf32, #tpu.memory_space<vmem>>, vector<16x16x4xf32>
    %208 = vector.shape_cast %207 : vector<16x16x4xf32> to vector<256x4xf32>
    %c3_287 = arith.constant 3 : index
    %c0_288 = arith.constant 0 : index
    %c1_289 = arith.constant 1 : index
    %c0_290 = arith.constant 0 : index
    %c0_291 = arith.constant 0 : index
    %209 = vector.load %arg2[%c3_287, %c0_288, %c1_289, %c0_290, %c0_291] : memref<4x3x3x4x4xf32, #tpu.memory_space<vmem>>, vector<1x1x1x4x4xf32>
    %210 = vector.shape_cast %209 : vector<1x1x1x4x4xf32> to vector<4x4xf32>
    %cst_292 = arith.constant dense<0.000000e+00> : vector<256x4xf32>
    %211 = tpu.matmul %208, %210, %cst_292 {dimension_numbers = #tpu.dot_dimension_numbers<[1], [0], [0], [1], [0, 0, 1, 1], [], []>} : vector<256x4xf32>, vector<4x4xf32>, vector<256x4xf32> -> vector<256x4xf32>
    %212 = arith.addf %206, %211 : vector<256x4xf32>
    %c0_293 = arith.constant 0 : index
    %c16 = arith.constant 16 : index
    %c0_294 = arith.constant 0 : index
    %213 = vector.load %arg5[%c0_293, %c16, %c0_294] : memref<32x32x4xf32, #tpu.memory_space<vmem>>, vector<16x16x4xf32>
    %214 = vector.shape_cast %213 : vector<16x16x4xf32> to vector<256x4xf32>
    %c3_295 = arith.constant 3 : index
    %c0_296 = arith.constant 0 : index
    %c2_297 = arith.constant 2 : index
    %c0_298 = arith.constant 0 : index
    %c0_299 = arith.constant 0 : index
    %215 = vector.load %arg2[%c3_295, %c0_296, %c2_297, %c0_298, %c0_299] : memref<4x3x3x4x4xf32, #tpu.memory_space<vmem>>, vector<1x1x1x4x4xf32>
    %216 = vector.shape_cast %215 : vector<1x1x1x4x4xf32> to vector<4x4xf32>
    %cst_300 = arith.constant dense<0.000000e+00> : vector<256x4xf32>
    %217 = tpu.matmul %214, %216, %cst_300 {dimension_numbers = #tpu.dot_dimension_numbers<[1], [0], [0], [1], [0, 0, 1, 1], [], []>} : vector<256x4xf32>, vector<4x4xf32>, vector<256x4xf32> -> vector<256x4xf32>
    %218 = arith.addf %212, %217 : vector<256x4xf32>
    %c8_301 = arith.constant 8 : index
    %c0_302 = arith.constant 0 : index
    %c0_303 = arith.constant 0 : index
    %219 = vector.load %arg5[%c8_301, %c0_302, %c0_303] : memref<32x32x4xf32, #tpu.memory_space<vmem>>, vector<16x16x4xf32>
    %220 = vector.shape_cast %219 : vector<16x16x4xf32> to vector<256x4xf32>
    %c3_304 = arith.constant 3 : index
    %c1_305 = arith.constant 1 : index
    %c0_306 = arith.constant 0 : index
    %c0_307 = arith.constant 0 : index
    %c0_308 = arith.constant 0 : index
    %221 = vector.load %arg2[%c3_304, %c1_305, %c0_306, %c0_307, %c0_308] : memref<4x3x3x4x4xf32, #tpu.memory_space<vmem>>, vector<1x1x1x4x4xf32>
    %222 = vector.shape_cast %221 : vector<1x1x1x4x4xf32> to vector<4x4xf32>
    %cst_309 = arith.constant dense<0.000000e+00> : vector<256x4xf32>
    %223 = tpu.matmul %220, %222, %cst_309 {dimension_numbers = #tpu.dot_dimension_numbers<[1], [0], [0], [1], [0, 0, 1, 1], [], []>} : vector<256x4xf32>, vector<4x4xf32>, vector<256x4xf32> -> vector<256x4xf32>
    %224 = arith.addf %218, %223 : vector<256x4xf32>
    %c8_310 = arith.constant 8 : index
    %c8_311 = arith.constant 8 : index
    %c0_312 = arith.constant 0 : index
    %225 = vector.load %arg5[%c8_310, %c8_311, %c0_312] : memref<32x32x4xf32, #tpu.memory_space<vmem>>, vector<16x16x4xf32>
    %226 = vector.shape_cast %225 : vector<16x16x4xf32> to vector<256x4xf32>
    %c3_313 = arith.constant 3 : index
    %c1_314 = arith.constant 1 : index
    %c1_315 = arith.constant 1 : index
    %c0_316 = arith.constant 0 : index
    %c0_317 = arith.constant 0 : index
    %227 = vector.load %arg2[%c3_313, %c1_314, %c1_315, %c0_316, %c0_317] : memref<4x3x3x4x4xf32, #tpu.memory_space<vmem>>, vector<1x1x1x4x4xf32>
    %228 = vector.shape_cast %227 : vector<1x1x1x4x4xf32> to vector<4x4xf32>
    %cst_318 = arith.constant dense<0.000000e+00> : vector<256x4xf32>
    %229 = tpu.matmul %226, %228, %cst_318 {dimension_numbers = #tpu.dot_dimension_numbers<[1], [0], [0], [1], [0, 0, 1, 1], [], []>} : vector<256x4xf32>, vector<4x4xf32>, vector<256x4xf32> -> vector<256x4xf32>
    %230 = arith.addf %224, %229 : vector<256x4xf32>
    %c8_319 = arith.constant 8 : index
    %c16_320 = arith.constant 16 : index
    %c0_321 = arith.constant 0 : index
    %231 = vector.load %arg5[%c8_319, %c16_320, %c0_321] : memref<32x32x4xf32, #tpu.memory_space<vmem>>, vector<16x16x4xf32>
    %232 = vector.shape_cast %231 : vector<16x16x4xf32> to vector<256x4xf32>
    %c3_322 = arith.constant 3 : index
    %c1_323 = arith.constant 1 : index
    %c2_324 = arith.constant 2 : index
    %c0_325 = arith.constant 0 : index
    %c0_326 = arith.constant 0 : index
    %233 = vector.load %arg2[%c3_322, %c1_323, %c2_324, %c0_325, %c0_326] : memref<4x3x3x4x4xf32, #tpu.memory_space<vmem>>, vector<1x1x1x4x4xf32>
    %234 = vector.shape_cast %233 : vector<1x1x1x4x4xf32> to vector<4x4xf32>
    %cst_327 = arith.constant dense<0.000000e+00> : vector<256x4xf32>
    %235 = tpu.matmul %232, %234, %cst_327 {dimension_numbers = #tpu.dot_dimension_numbers<[1], [0], [0], [1], [0, 0, 1, 1], [], []>} : vector<256x4xf32>, vector<4x4xf32>, vector<256x4xf32> -> vector<256x4xf32>
    %236 = arith.addf %230, %235 : vector<256x4xf32>
    %c16_328 = arith.constant 16 : index
    %c0_329 = arith.constant 0 : index
    %c0_330 = arith.constant 0 : index
    %237 = vector.load %arg5[%c16_328, %c0_329, %c0_330] : memref<32x32x4xf32, #tpu.memory_space<vmem>>, vector<16x16x4xf32>
    %238 = vector.shape_cast %237 : vector<16x16x4xf32> to vector<256x4xf32>
    %c3_331 = arith.constant 3 : index
    %c2_332 = arith.constant 2 : index
    %c0_333 = arith.constant 0 : index
    %c0_334 = arith.constant 0 : index
    %c0_335 = arith.constant 0 : index
    %239 = vector.load %arg2[%c3_331, %c2_332, %c0_333, %c0_334, %c0_335] : memref<4x3x3x4x4xf32, #tpu.memory_space<vmem>>, vector<1x1x1x4x4xf32>
    %240 = vector.shape_cast %239 : vector<1x1x1x4x4xf32> to vector<4x4xf32>
    %cst_336 = arith.constant dense<0.000000e+00> : vector<256x4xf32>
    %241 = tpu.matmul %238, %240, %cst_336 {dimension_numbers = #tpu.dot_dimension_numbers<[1], [0], [0], [1], [0, 0, 1, 1], [], []>} : vector<256x4xf32>, vector<4x4xf32>, vector<256x4xf32> -> vector<256x4xf32>
    %242 = arith.addf %236, %241 : vector<256x4xf32>
    %c16_337 = arith.constant 16 : index
    %c8_338 = arith.constant 8 : index
    %c0_339 = arith.constant 0 : index
    %243 = vector.load %arg5[%c16_337, %c8_338, %c0_339] : memref<32x32x4xf32, #tpu.memory_space<vmem>>, vector<16x16x4xf32>
    %244 = vector.shape_cast %243 : vector<16x16x4xf32> to vector<256x4xf32>
    %c3_340 = arith.constant 3 : index
    %c2_341 = arith.constant 2 : index
    %c1_342 = arith.constant 1 : index
    %c0_343 = arith.constant 0 : index
    %c0_344 = arith.constant 0 : index
    %245 = vector.load %arg2[%c3_340, %c2_341, %c1_342, %c0_343, %c0_344] : memref<4x3x3x4x4xf32, #tpu.memory_space<vmem>>, vector<1x1x1x4x4xf32>
    %246 = vector.shape_cast %245 : vector<1x1x1x4x4xf32> to vector<4x4xf32>
    %cst_345 = arith.constant dense<0.000000e+00> : vector<256x4xf32>
    %247 = tpu.matmul %244, %246, %cst_345 {dimension_numbers = #tpu.dot_dimension_numbers<[1], [0], [0], [1], [0, 0, 1, 1], [], []>} : vector<256x4xf32>, vector<4x4xf32>, vector<256x4xf32> -> vector<256x4xf32>
    %248 = arith.addf %242, %247 : vector<256x4xf32>
    %c16_346 = arith.constant 16 : index
    %c16_347 = arith.constant 16 : index
    %c0_348 = arith.constant 0 : index
    %249 = vector.load %arg5[%c16_346, %c16_347, %c0_348] : memref<32x32x4xf32, #tpu.memory_space<vmem>>, vector<16x16x4xf32>
    %250 = vector.shape_cast %249 : vector<16x16x4xf32> to vector<256x4xf32>
    %c3_349 = arith.constant 3 : index
    %c2_350 = arith.constant 2 : index
    %c2_351 = arith.constant 2 : index
    %c0_352 = arith.constant 0 : index
    %c0_353 = arith.constant 0 : index
    %251 = vector.load %arg2[%c3_349, %c2_350, %c2_351, %c0_352, %c0_353] : memref<4x3x3x4x4xf32, #tpu.memory_space<vmem>>, vector<1x1x1x4x4xf32>
    %252 = vector.shape_cast %251 : vector<1x1x1x4x4xf32> to vector<4x4xf32>
    %cst_354 = arith.constant dense<0.000000e+00> : vector<256x4xf32>
    %253 = tpu.matmul %250, %252, %cst_354 {dimension_numbers = #tpu.dot_dimension_numbers<[1], [0], [0], [1], [0, 0, 1, 1], [], []>} : vector<256x4xf32>, vector<4x4xf32>, vector<256x4xf32> -> vector<256x4xf32>
    %254 = arith.addf %248, %253 : vector<256x4xf32>
    %c3_355 = arith.constant 3 : index
    %c0_356 = arith.constant 0 : index
    %255 = vector.load %arg3[%c3_355, %c0_356] : memref<4x4xf32, #tpu.memory_space<vmem>>, vector<1x4xf32>
    %256 = vector.broadcast %255 : vector<1x4xf32> to vector<256x4xf32>
    %257 = arith.addf %254, %256 : vector<256x4xf32>
    %cst_357 = arith.constant 0.000000e+00 : f32
    %258 = vector.broadcast %cst_357 : f32 to vector<256x4xf32>
    %259 = arith.maximumf %257, %258 : vector<256x4xf32>
    %260 = vector.shape_cast %259 : vector<256x4xf32> to vector<16x16x4xf32>
    %261 = arith.addf %198, %260 : vector<16x16x4xf32>
    %262 = vector.shape_cast %261 : vector<16x16x4xf32> to vector<1x16x16x4xf32>
    %c0_358 = arith.constant 0 : index
    %c0_359 = arith.constant 0 : index
    %c0_360 = arith.constant 0 : index
    %c0_361 = arith.constant 0 : index
    %263 = vector.load %arg4[%c0_358, %c0_359, %c0_360, %c0_361] : memref<1x16x16x4xf32, #tpu.memory_space<vmem>>, vector<1x16x16x4xf32>
    tpu.vector_store %arg4[%c0_358, %c0_359, %c0_360, %c0_361], %262 {strides = array<i32>} : memref<1x16x16x4xf32, #tpu.memory_space<vmem>>, vector<1x16x16x4xf32>,
    return
  }
  func.func @transform_0(%arg0: i32) -> (i32, i32, i32, i32) {
    %c0_i32 = arith.constant 0 : i32
    %c0_i32_0 = arith.constant 0 : i32
    %c0_i32_1 = arith.constant 0 : i32
    %c0_i32_2 = arith.constant 0 : i32
    return %arg0, %c0_i32, %c0_i32_0, %c0_i32_1 : i32, i32, i32, i32
  }
  func.func @transform_1(%arg0: i32) -> (i32, i32, i32, i32, i32) {
    %c0_i32 = arith.constant 0 : i32
    %c0_i32_0 = arith.constant 0 : i32
    %c0_i32_1 = arith.constant 0 : i32
    %c0_i32_2 = arith.constant 0 : i32
    %c0_i32_3 = arith.constant 0 : i32
    %c0_i32_4 = arith.constant 0 : i32
    return %c0_i32, %c0_i32_0, %c0_i32_1, %c0_i32_2, %c0_i32_3 : i32, i32, i32, i32, i32
  }
  func.func @transform_2(%arg0: i32) -> (i32, i32) {
    %c0_i32 = arith.constant 0 : i32
    %c0_i32_0 = arith.constant 0 : i32
    %c0_i32_1 = arith.constant 0 : i32
    return %c0_i32, %c0_i32_0 : i32, i32
  }
  func.func @transform_3(%arg0: i32) -> (i32, i32, i32, i32) {
    %c0_i32 = arith.constant 0 : i32
    %c0_i32_0 = arith.constant 0 : i32
    %c0_i32_1 = arith.constant 0 : i32
    %c0_i32_2 = arith.constant 0 : i32
    return %arg0, %c0_i32, %c0_i32_0, %c0_i32_1 : i32, i32, i32, i32
  }
}

</mosaic_0001>

<bundles_post_ra>
// kernel: dblock_forward.1
= control target key start
LH: loop header
LB: loop body
LE: loop exit
PB: predicated region body
PF: predicated region fallthrough
CT: control target
= control target key end

     0   :  { %s19938_s12 = smov 0   ;;  %s24180_s0 = inlined_call_operand.vmem [shape: f32[2,16,16,4], index: 0, kind: input, shape index: {}]   ;;  %s24181_s1 = inlined_call_operand.vmem [shape: f32[4,3,3,4,4], index: 1, kind: input, shape index: {}]   ;;  %s24182_s2 = inlined_call_operand.vmem [shape: f32[4,4], index: 2, kind: input, shape index: {}]   ;;  %s24183_s3 = inlined_call_operand.vmem [shape: f32[2,16,16,4], index: 3, kind: output, shape index: {}]  }
   0x1 LB: > { %s14648_s13 = sadd.s32 4294967295, %s19915_s12   ;;  %p14652_p0 = scmp.ge.s32.totalorder %s19915_s12, 1  ;;  %s19915_s12 = sphi %s19938_s12, %s13_s12  }
   0x2   : > { %p137_p1 = scmp.lt.s32.totalorder %s19915_s12, 3 }
   0x4   : > { %p138_p2 = pnand %p14652_p0, %p137_p1 }
   0x6   : > { %141 = sbr.rel (%p138_p2) target bundleno = 3018 (0xbca), region = 32 }
   0xd   : > { %v19949_v0 = vld [vmem:[%s24181_s1 + $0x4] sm:$0xf]  ;;  %vm498_vm0 = vcmask 1043456   ;;  %vm171_vm1 = vcmask 31744   ;;  %p19953_p3 = scmp.lt.s32.totalorder %s14648_s13, 1  ;;  %v19917_v1 = vmov 0.0  }
   0xe   : > { %17076 = vmatprep.subr.msk.mxu0 %vm498_vm0, %v19949_v0  ;;  %201 = vst.msk [vmem:[#allocation2 + $0xe8] sm:$0xff] %vm171_vm1, %v19917_v1  ;;  %172 = vst.msk [vmem:[#allocation2] sm:$0xff] %vm171_vm1, %v19917_v1  ;;  %v367_v2 = vld [vmem:[%s24181_s1] sm:$0xf]  ;;  %v20198_v9 = vld [vmem:[%s24181_s1 + $0x8] sm:$0xf] }
   0xf   : > { %173 = vst.msk [vmem:[#allocation2 + $0x8] sm:$0xff] %vm171_vm1, %v19917_v1  ;;  %174 = vst.msk [vmem:[#allocation2 + $0x10] sm:$0xff] %vm171_vm1, %v19917_v1  ;;  %17077 = vmatpush3.msk.msra.mxu0 %vm498_vm0, %v19949_v0  ;;  %s24776_s13 = smov (!%p19953_p3, %s14648_s13), 1 }
  0x10   : > { %175 = vst.msk [vmem:[#allocation2 + $0x18] sm:$0xff] %vm171_vm1, %v19917_v1  ;;  %176 = vst.msk [vmem:[#allocation2 + $0x20] sm:$0xff] %vm171_vm1, %v19917_v1  ;;  %17126 = vmatprep.subr.msk.mxu0 %vm498_vm0, %v367_v2  ;;  %s15886_s19 = sshll.u32 %s24776_s13, 8 }
  0x11   : > { %177 = vst.msk [vmem:[#allocation2 + $0x28] sm:$0xff] %vm171_vm1, %v19917_v1  ;;  %178 = vst.msk [vmem:[#allocation2 + $0x30] sm:$0xff] %vm171_vm1, %v19917_v1  ;;  %s20169_s22 = scalar_lea.vmem %s24180_s0, %s15886_s19  ;;  %s24049_s29 = scalar_lea.vmem %s24183_s3, %s15886_s19 }
  0x12   : > { %179 = vst.msk [vmem:[#allocation2 + $0x38] sm:$0xff] %vm171_vm1, %v19917_v1  ;;  %180 = vst.msk [vmem:[#allocation2 + $0x40] sm:$0xff] %vm171_vm1, %v19917_v1  ;;  %v20172_v3 = vld [vmem:[%s20169_s22] sm:$0xff]  ;;  %v20175_v4 = vld [vmem:[%s20169_s22 + $0x8] sm:$0xff] }
  0x13   : > { %181 = vst.msk [vmem:[#allocation2 + $0x48] sm:$0xff] %vm171_vm1, %v19917_v1  ;;  %182 = vst.msk [vmem:[#allocation2 + $0x50] sm:$0xff] %vm171_vm1, %v19917_v1  ;;  %v20178_v5 = vld [vmem:[%s20169_s22 + $0x10] sm:$0xff]  ;;  %v20187_v6 = vld [vmem:[%s20169_s22 + $0x18] sm:$0xff] }
  0x14   : > { %183 = vst.msk [vmem:[#allocation2 + $0x58] sm:$0xff] %vm171_vm1, %v19917_v1  ;;  %184 = vst.msk [vmem:[#allocation2 + $0x60] sm:$0xff] %vm171_vm1, %v19917_v1  ;;  %v20190_v7 = vld [vmem:[%s20169_s22 + $0x20] sm:$0xff]  ;;  %v20193_v8 = vld [vmem:[%s20169_s22 + $0x28] sm:$0xff] }
  0x15   : > { %185 = vst.msk [vmem:[#allocation2 + $0x68] sm:$0xff] %vm171_vm1, %v19917_v1  ;;  %186 = vst.msk [vmem:[#allocation2 + $0x70] sm:$0xff] %vm171_vm1, %v19917_v1  ;;  %v368_v10 = vld [vmem:[#allocation2 + $0xe8] sm:$0xff]  ;;  %v20207_v12 = vld [vmem:[%s20169_s22 + $0x30] sm:$0xff] }
  0x16   : > { %187 = vst.msk [vmem:[#allocation2 + $0x78] sm:$0xff] %vm171_vm1, %v19917_v1  ;;  %188 = vst.msk [vmem:[#allocation2 + $0x80] sm:$0xff] %vm171_vm1, %v19917_v1  ;;  %17078 = vmatprep.mubr.msk.f32.mxu0 %vm171_vm1, %v368_v10  ;;  %v20213_v13 = vld [vmem:[%s20169_s22 + $0x38] sm:$0xff]  ;;  %v20216_v14 = vld [vmem:[%s20169_s22 + $0x40] sm:$0xff] }
  0x17   : > { %189 = vst.msk [vmem:[#allocation2 + $0x88] sm:$0xff] %vm171_vm1, %v19917_v1  ;;  %190 = vst.msk [vmem:[#allocation2 + $0x90] sm:$0xff] %vm171_vm1, %v19917_v1  ;;  %v20219_v15 = vld [vmem:[%s20169_s22 + $0x48] sm:$0xff]  ;;  %v20229_v16 = vld [vmem:[%s20169_s22 + $0x50] sm:$0xff] }
  0x18   : > { %191 = vst.msk [vmem:[#allocation2 + $0x98] sm:$0xff] %vm171_vm1, %v19917_v1  ;;  %192 = vst.msk [vmem:[#allocation2 + $0xa0] sm:$0xff] %vm171_vm1, %v19917_v1  ;;  %v20232_v17 = vld [vmem:[%s20169_s22 + $0x58] sm:$0xff]  ;;  %v20235_v18 = vld [vmem:[%s20169_s22 + $0x60] sm:$0xff] }
  0x19   : > { %193 = vst.msk [vmem:[#allocation2 + $0xa8] sm:$0xff] %vm171_vm1, %v19917_v1  ;;  %194 = vst.msk [vmem:[#allocation2 + $0xb0] sm:$0xff] %vm171_vm1, %v19917_v1  ;;  %v20245_v19 = vld [vmem:[%s20169_s22 + $0x68] sm:$0xff]  ;;  %v20248_v20 = vld [vmem:[%s20169_s22 + $0x70] sm:$0xff] }
  0x1a   : > { %195 = vst.msk [vmem:[#allocation2 + $0xb8] sm:$0xff] %vm171_vm1, %v19917_v1  ;;  %196 = vst.msk [vmem:[#allocation2 + $0xc0] sm:$0xff] %vm171_vm1, %v19917_v1  ;;  %v20251_v21 = vld [vmem:[%s20169_s22 + $0x78] sm:$0xff]  ;;  %v20260_v22 = vld [vmem:[%s20169_s22 + $0x80] sm:$0xff] }
  0x1b   : > { %197 = vst.msk [vmem:[#allocation2 + $0xc8] sm:$0xff] %vm171_vm1, %v19917_v1  ;;  %198 = vst.msk [vmem:[#allocation2 + $0xd0] sm:$0xff] %vm171_vm1, %v19917_v1  ;;  %v20263_v23 = vld [vmem:[%s20169_s22 + $0x88] sm:$0xff]  ;;  %v20266_v24 = vld [vmem:[%s20169_s22 + $0x90] sm:$0xff] }
  0x1c   : > { %199 = vst.msk [vmem:[#allocation2 + $0xd8] sm:$0xff] %vm171_vm1, %v19917_v1  ;;  %200 = vst.msk [vmem:[#allocation2 + $0xe0] sm:$0xff] %vm171_vm1, %v19917_v1  ;;  %v20277_v25 = vld [vmem:[%s20169_s22 + $0x98] sm:$0xff]  ;;  %v20280_v26 = vld [vmem:[%s20169_s22 + $0xa0] sm:$0xff] }
  0x1d   : > { %202 = vst.msk [vmem:[#allocation2 + $0xf0] sm:$0xff] %vm171_vm1, %v19917_v1  ;;  %203 = vst.msk [vmem:[#allocation2 + $0xf8] sm:$0xff] %vm171_vm1, %v19917_v1  ;;  %v20283_v27 = vld [vmem:[%s20169_s22 + $0xa8] sm:$0xff]  ;;  %v20302_v31 = vld [vmem:[%s20169_s22 + $0xb0] sm:$0xff] }
  0x1e   : > { %205 = vst.msk [vmem:[#allocation2 + $0x300] sm:$0xff] %vm171_vm1, %v19917_v1  ;;  %206 = vst.msk [vmem:[#allocation2 + $0x308] sm:$0xff] %vm171_vm1, %v19917_v1  ;;  %v20305_v32 = vld [vmem:[%s20169_s22 + $0xb8] sm:$0xff]  ;;  %v20326_v37 = vld [vmem:[%s20169_s22 + $0xc0] sm:$0xff] }
  0x1f   : > { %207 = vst.msk [vmem:[#allocation2 + $0x310] sm:$0xff] %vm171_vm1, %v19917_v1  ;;  %208 = vst.msk [vmem:[#allocation2 + $0x318] sm:$0xff] %vm171_vm1, %v19917_v1  ;;  %v20329_v38 = vld [vmem:[%s20169_s22 + $0xc8] sm:$0xff]  ;;  %v20332_v39 = vld [vmem:[%s20169_s22 + $0xd0] sm:$0xff] }
  0x20   : > { %209 = vst.msk [vmem:[#allocation2 + $0x320] sm:$0xff] %vm171_vm1, %v19917_v1  ;;  %210 = vst.msk [vmem:[#allocation2 + $0x328] sm:$0xff] %vm171_vm1, %v19917_v1  ;;  %v20341_v40 = vld [vmem:[%s20169_s22 + $0xd8] sm:$0xff]  ;;  %v20344_v41 = vld [vmem:[%s20169_s22 + $0xe0] sm:$0xff] }
  0x21   : > { %211 = vst.msk [vmem:[#allocation2 + $0x330] sm:$0xff] %vm171_vm1, %v19917_v1  ;;  %212 = vst.msk [vmem:[#allocation2 + $0x338] sm:$0xff] %vm171_vm1, %v19917_v1  ;;  %v20347_v42 = vld [vmem:[%s20169_s22 + $0xe8] sm:$0xff] }
  0x22   : > { %213 = vst.msk [vmem:[#allocation2 + $0x340] sm:$0xff] %vm171_vm1, %v19917_v1  ;;  %214 = vst.msk [vmem:[#allocation2 + $0x348] sm:$0xff] %vm171_vm1, %v19917_v1 }
  0x23   : > { %215 = vst.msk [vmem:[#allocation2 + $0x350] sm:$0xff] %vm171_vm1, %v19917_v1  ;;  %216 = vst.msk [vmem:[#allocation2 + $0x358] sm:$0xff] %vm171_vm1, %v19917_v1 }
  0x24   : > { %217 = vst.msk [vmem:[#allocation2 + $0x360] sm:$0xff] %vm171_vm1, %v19917_v1  ;;  %218 = vst.msk [vmem:[#allocation2 + $0x368] sm:$0xff] %vm171_vm1, %v19917_v1  ;;  %v369_v11 = vld [vmem:[#allocation2 + $0xf0] sm:$0xff] }
  0x25   : > { %219 = vst.msk [vmem:[#allocation2 + $0x370] sm:$0xff] %vm171_vm1, %v19917_v1  ;;  %220 = vst.msk [vmem:[#allocation2 + $0x378] sm:$0xff] %vm171_vm1, %v19917_v1  ;;  %17079 = vmatmul.mubr.msk.f32.vlgmr.msra.gmra.mrb[0].mxu0 %vm171_vm1, %v369_v11  ;;  %v336_v10 = vld [vmem:[#allocation2 + $0xef] sm:$0xff] }
  0x26   : > { %221 = vst.msk [vmem:[#allocation2 + $0x380] sm:$0xff] %vm171_vm1, %v19917_v1  ;;  %222 = vst.msk [vmem:[#allocation2 + $0x388] sm:$0xff] %vm171_vm1, %v19917_v1  ;;  %17127 = vmatpush3.msk.msra.mxu0 %vm498_vm0, %v367_v2  ;;  %v335_v2 = vld [vmem:[#allocation2 + $0xe7] sm:$0xff] }
  0x27   : > { %223 = vst.msk [vmem:[#allocation2 + $0x390] sm:$0xff] %vm171_vm1, %v19917_v1  ;;  %224 = vst.msk [vmem:[#allocation2 + $0x398] sm:$0xff] %vm171_vm1, %v19917_v1  ;;  %17176 = vmatprep.subr.msk.mxu0 %vm498_vm0, %v20198_v9 }
  0x28   : > { %225 = vst.msk [vmem:[#allocation2 + $0x3a0] sm:$0xff] %vm171_vm1, %v19917_v1  ;;  %226 = vst.msk [vmem:[#allocation2 + $0x3a8] sm:$0xff] %vm171_vm1, %v19917_v1 }
  0x29   : > { %227 = vst.msk [vmem:[#allocation2 + $0x3b0] sm:$0xff] %vm171_vm1, %v19917_v1  ;;  %228 = vst.msk [vmem:[#allocation2 + $0x3b8] sm:$0xff] %vm171_vm1, %v19917_v1 }
  0x2a   : > { %229 = vst.msk [vmem:[#allocation2 + $0x3c0] sm:$0xff] %vm171_vm1, %v19917_v1  ;;  %230 = vst.msk [vmem:[#allocation2 + $0x3c8] sm:$0xff] %vm171_vm1, %v19917_v1 }
  0x2b   : > { %231 = vst.msk [vmem:[#allocation2 + $0x3d0] sm:$0xff] %vm171_vm1, %v19917_v1  ;;  %232 = vst.msk [vmem:[#allocation2 + $0x3d8] sm:$0xff] %vm171_vm1, %v19917_v1 }
  0x2c   : > { %233 = vst.msk [vmem:[#allocation2 + $0x3e0] sm:$0xff] %vm171_vm1, %v19917_v1  ;;  %234 = vst.msk [vmem:[#allocation2 + $0x3e8] sm:$0xff] %vm171_vm1, %v19917_v1 }
  0x2d   : > { %235 = vst.msk [vmem:[#allocation2 + $0x3f0] sm:$0xff] %vm171_vm1, %v19917_v1  ;;  %236 = vst.msk [vmem:[#allocation2 + $0x3f8] sm:$0xff] %vm171_vm1, %v19917_v1 }
  0x2e   : > { %238 = vst.msk [vmem:[#allocation2 + $0x100] sm:$0xff] %vm171_vm1, %v19917_v1  ;;  %239 = vst.msk [vmem:[#allocation2 + $0x120] sm:$0xff] %vm171_vm1, %v19917_v1 }
  0x2f   : > { %240 = vst.msk [vmem:[#allocation2 + $0x140] sm:$0xff] %vm171_vm1, %v19917_v1  ;;  %241 = vst.msk [vmem:[#allocation2 + $0x160] sm:$0xff] %vm171_vm1, %v19917_v1 }
  0x30   : > { %242 = vst.msk [vmem:[#allocation2 + $0x180] sm:$0xff] %vm171_vm1, %v19917_v1  ;;  %243 = vst.msk [vmem:[#allocation2 + $0x1a0] sm:$0xff] %vm171_vm1, %v19917_v1 }
  0x31   : > { %244 = vst.msk [vmem:[#allocation2 + $0x1c0] sm:$0xff] %vm171_vm1, %v19917_v1  ;;  %245 = vst.msk [vmem:[#allocation2 + $0x1e0] sm:$0xff] %vm171_vm1, %v19917_v1 }
  0x32   : > { %246 = vst.msk [vmem:[#allocation2 + $0x200] sm:$0xff] %vm171_vm1, %v19917_v1  ;;  %247 = vst.msk [vmem:[#allocation2 + $0x220] sm:$0xff] %vm171_vm1, %v19917_v1 }
  0x33   : > { %248 = vst.msk [vmem:[#allocation2 + $0x240] sm:$0xff] %vm171_vm1, %v19917_v1  ;;  %249 = vst.msk [vmem:[#allocation2 + $0x260] sm:$0xff] %vm171_vm1, %v19917_v1 }
  0x34   : > { %250 = vst.msk [vmem:[#allocation2 + $0x280] sm:$0xff] %vm171_vm1, %v19917_v1  ;;  %251 = vst.msk [vmem:[#allocation2 + $0x2a0] sm:$0xff] %vm171_vm1, %v19917_v1 }
  0x35   : > { %252 = vst.msk [vmem:[#allocation2 + $0x2c0] sm:$0xff] %vm171_vm1, %v19917_v1  ;;  %253 = vst.msk [vmem:[#allocation2 + $0x2e0] sm:$0xff] %vm171_vm1, %v19917_v1 }
  0x36   : > { %254 = vst.msk [vmem:[#allocation2 + $0x118] sm:$0xff] %vm171_vm1, %v19917_v1  ;;  %255 = vst.msk [vmem:[#allocation2 + $0x138] sm:$0xff] %vm171_vm1, %v19917_v1 }
  0x37   : > { %256 = vst.msk [vmem:[#allocation2 + $0x158] sm:$0xff] %vm171_vm1, %v19917_v1  ;;  %257 = vst.msk [vmem:[#allocation2 + $0x178] sm:$0xff] %vm171_vm1, %v19917_v1 }
  0x38   : > { %258 = vst.msk [vmem:[#allocation2 + $0x198] sm:$0xff] %vm171_vm1, %v19917_v1  ;;  %259 = vst.msk [vmem:[#allocation2 + $0x1b8] sm:$0xff] %vm171_vm1, %v19917_v1 }
  0x39   : > { %260 = vst.msk [vmem:[#allocation2 + $0x1d8] sm:$0xff] %vm171_vm1, %v19917_v1  ;;  %261 = vst.msk [vmem:[#allocation2 + $0x1f8] sm:$0xff] %vm171_vm1, %v19917_v1 }
  0x3a   : > { %262 = vst.msk [vmem:[#allocation2 + $0x218] sm:$0xff] %vm171_vm1, %v19917_v1  ;;  %263 = vst.msk [vmem:[#allocation2 + $0x238] sm:$0xff] %vm171_vm1, %v19917_v1 }
  0x3b   : > { %264 = vst.msk [vmem:[#allocation2 + $0x258] sm:$0xff] %vm171_vm1, %v19917_v1  ;;  %265 = vst.msk [vmem:[#allocation2 + $0x278] sm:$0xff] %vm171_vm1, %v19917_v1 }
  0x3c   : > { %266 = vst.msk [vmem:[#allocation2 + $0x298] sm:$0xff] %vm171_vm1, %v19917_v1  ;;  %267 = vst.msk [vmem:[#allocation2 + $0x2b8] sm:$0xff] %vm171_vm1, %v19917_v1 }
  0x3d   : > { %268 = vst.msk [vmem:[#allocation2 + $0x2d8] sm:$0xff] %vm171_vm1, %v19917_v1  ;;  %269 = vst.msk [vmem:[#allocation2 + $0x2f8] sm:$0xff] %vm171_vm1, %v19917_v1 }
  0x3e   : > { %24385 = vst [vmem:[#allocation3_spill] sm:$0xff] %v20172_v3  ;;  %24386 = vst [vmem:[#allocation4_spill] sm:$0xff] %v20175_v4 }
  0x3f   : > { %24387 = vst [vmem:[#allocation5_spill] sm:$0xff] %v20178_v5  ;;  %302 = vst.msk [vmem:[#allocation2 + $0x108] sm:$0xff] %vm171_vm1, %v20172_v3  ;;  %v1051_v3 = vld [vmem:[#allocation2 + $0xe9] sm:$0xff] }
  0x40   : > { %303 = vst.msk [vmem:[#allocation2 + $0x110] sm:$0xff] %vm171_vm1, %v20175_v4  ;;  %304 = vst.msk [vmem:[#allocation2 + $0x128] sm:$0xff] %vm171_vm1, %v20178_v5 }
  0x41   : > { %24388 = vst [vmem:[#allocation6_spill] sm:$0xff] %v20187_v6  ;;  %24389 = vst [vmem:[#allocation7_spill] sm:$0xff] %v20190_v7 }
  0x42   : > { %24390 = vst [vmem:[#allocation8_spill] sm:$0xff] %v20193_v8  ;;  %305 = vst.msk [vmem:[#allocation2 + $0x130] sm:$0xff] %vm171_vm1, %v20187_v6 }
  0x43   : > { %306 = vst.msk [vmem:[#allocation2 + $0x148] sm:$0xff] %vm171_vm1, %v20190_v7  ;;  %307 = vst.msk [vmem:[#allocation2 + $0x150] sm:$0xff] %vm171_vm1, %v20193_v8  ;;  %v20567_v7 = vld [vmem:[%s20169_s22 + $0xf0] sm:$0xff]  ;;  %v20572_v8 = vld [vmem:[%s20169_s22 + $0xf8] sm:$0xff] }
  0x44   : > { %24391 = vst [vmem:[#allocation9_spill] sm:$0xff] %v20207_v12  ;;  %308 = vst.msk [vmem:[#allocation2 + $0x168] sm:$0xff] %vm171_vm1, %v20207_v12 }
  0x45   : > { %24392 = vst [vmem:[#allocation10_spill] sm:$0xff] %v20213_v13  ;;  %24393 = vst [vmem:[#allocation11_spill] sm:$0xff] %v20216_v14 }
  0x46   : > { %24394 = vst [vmem:[#allocation12_spill] sm:$0xff] %v20219_v15  ;;  %309 = vst.msk [vmem:[#allocation2 + $0x170] sm:$0xff] %vm171_vm1, %v20213_v13  ;;  %v20285_v28 = vld [vmem:[#allocation2 + $0x108] sm:$0xff] }
  0x47   : > { %310 = vst.msk [vmem:[#allocation2 + $0x188] sm:$0xff] %vm171_vm1, %v20216_v14  ;;  %311 = vst.msk [vmem:[#allocation2 + $0x190] sm:$0xff] %vm171_vm1, %v20219_v15  ;;  %v20287_v29 = vld [vmem:[#allocation2 + $0x110] sm:$0xff]  ;;  %v20289_v30 = vld [vmem:[#allocation2 + $0x128] sm:$0xff]  ;;  %17081 = vmatprep.mubr.msk.f32.mxu0 %vm171_vm1, %v20285_v28 }
  0x48   : > { %24395 = vst [vmem:[#allocation13_spill] sm:$0xff] %v20229_v16  ;;  %24396 = vst [vmem:[#allocation14_spill] sm:$0xff] %v20232_v17  ;;  %17082 = vmatmul.mubr.msk.f32.gmra.mrb[2].mxu0 %vm171_vm1, %v20287_v29  ;;  %v20452_v11 = vld [vmem:[#allocation2 + $0x107] sm:$0xff] }
  0x49   : > { %24397 = vst [vmem:[#allocation15_spill] sm:$0xff] %v20235_v18  ;;  %312 = vst.msk [vmem:[#allocation2 + $0x1a8] sm:$0xff] %vm171_vm1, %v20229_v16  ;;  %17084 = vmatprep.mubr.msk.f32.mxu0 %vm171_vm1, %v20289_v30  ;;  %v20309_v33 = vld [vmem:[#allocation2 + $0x130] sm:$0xff] }
  0x4a   : > { %313 = vst.msk [vmem:[#allocation2 + $0x1b0] sm:$0xff] %vm171_vm1, %v20232_v17  ;;  %314 = vst.msk [vmem:[#allocation2 + $0x1c8] sm:$0xff] %vm171_vm1, %v20235_v18  ;;  %v20315_v34 = vld [vmem:[#allocation2 + $0x148] sm:$0xff]  ;;  %v20321_v35 = vld [vmem:[#allocation2 + $0x150] sm:$0xff] }
  0x4b   : > { %24398 = vst [vmem:[#allocation16_spill] sm:$0xff] %v20245_v19  ;;  %24399 = vst [vmem:[#allocation17_spill] sm:$0xff] %v20248_v20  ;;  %v20323_v36 = vld [vmem:[#allocation2 + $0x168] sm:$0xff] }
  0x4c   : > { %24400 = vst [vmem:[#allocation18_spill] sm:$0xff] %v20251_v21  ;;  %315 = vst.msk [vmem:[#allocation2 + $0x1d0] sm:$0xff] %vm171_vm1, %v20245_v19  ;;  %17085 = vmatmul.mubr.msk.f32.gmra.mrb[4].mxu0 %vm171_vm1, %v20309_v33  ;;  %v20593_v4 = vld [vmem:[#allocation2 + $0x109] sm:$0xff] }
  0x4d   : > { %316 = vst.msk [vmem:[#allocation2 + $0x1e8] sm:$0xff] %vm171_vm1, %v20248_v20  ;;  %317 = vst.msk [vmem:[#allocation2 + $0x1f0] sm:$0xff] %vm171_vm1, %v20251_v21  ;;  %17087 = vmatprep.mubr.msk.f32.mxu0 %vm171_vm1, %v20315_v34  ;;  %v20359_v43 = vld [vmem:[#allocation2 + $0x170] sm:$0xff] }
  0x4e   : > { %24401 = vst [vmem:[#allocation19_spill] sm:$0xff] %v20260_v22  ;;  %24402 = vst [vmem:[#allocation20_spill] sm:$0xff] %v20263_v23  ;;  %v20361_v44 = vld [vmem:[#allocation2 + $0x188] sm:$0xff]  ;;  %v20367_v45 = vld [vmem:[#allocation2 + $0x190] sm:$0xff] }
  0x4f   : > { %24403 = vst [vmem:[#allocation21_spill] sm:$0xff] %v20266_v24  ;;  %318 = vst.msk [vmem:[#allocation2 + $0x208] sm:$0xff] %vm171_vm1, %v20260_v22 }
  0x50   : > { %319 = vst.msk [vmem:[#allocation2 + $0x210] sm:$0xff] %vm171_vm1, %v20263_v23  ;;  %320 = vst.msk [vmem:[#allocation2 + $0x228] sm:$0xff] %vm171_vm1, %v20266_v24  ;;  %17088 = vmatmul.mubr.msk.f32.gmra.mrb[6].mxu0 %vm171_vm1, %v20321_v35  ;;  %v20369_v46 = vld [vmem:[#allocation2 + $0x1a8] sm:$0xff] }
  0x51   : > { %24404 = vst [vmem:[#allocation22_spill] sm:$0xff] %v20277_v25  ;;  %24405 = vst [vmem:[#allocation23_spill] sm:$0xff] %v20280_v26  ;;  %17090 = vmatprep.mubr.msk.f32.mxu0 %vm171_vm1, %v20323_v36  ;;  %v20375_v47 = vld [vmem:[#allocation2 + $0x1b0] sm:$0xff]  ;;  %v20377_v48 = vld [vmem:[#allocation2 + $0x1c8] sm:$0xff] }
  0x52   : > { %24406 = vst [vmem:[#allocation24_spill] sm:$0xff] %v20283_v27  ;;  %321 = vst.msk [vmem:[#allocation2 + $0x230] sm:$0xff] %vm171_vm1, %v20277_v25 }
  0x53   : > { %322 = vst.msk [vmem:[#allocation2 + $0x248] sm:$0xff] %vm171_vm1, %v20280_v26  ;;  %323 = vst.msk [vmem:[#allocation2 + $0x250] sm:$0xff] %vm171_vm1, %v20283_v27  ;;  %v20383_v49 = vld [vmem:[#allocation2 + $0x1d0] sm:$0xff]  ;;  %v20508_v27 = vld [vmem:[#allocation2 + $0x1c7] sm:$0xff] }
  0x54   : > { %24407 = vst [vmem:[#allocation25_spill] sm:$0xff] %v20302_v31  ;;  %24408 = vst [vmem:[#allocation26_spill] sm:$0xff] %v20305_v32  ;;  %17091 = vmatmul.mubr.msk.f32.gmra.mrb[8].mxu0 %vm171_vm1, %v20359_v43  ;;  %v20385_v50 = vld [vmem:[#allocation2 + $0x1e8] sm:$0xff]  ;;  %v20391_v51 = vld [vmem:[#allocation2 + $0x1f0] sm:$0xff] }
  0x55   : > { %324 = vst.msk [vmem:[#allocation2 + $0x268] sm:$0xff] %vm171_vm1, %v20302_v31  ;;  %325 = vst.msk [vmem:[#allocation2 + $0x270] sm:$0xff] %vm171_vm1, %v20305_v32  ;;  %17093 = vmatprep.mubr.msk.f32.mxu0 %vm171_vm1, %v20361_v44  ;;  %v20498_v31 = vld [vmem:[#allocation2 + $0x18f] sm:$0xff]  ;;  %v20500_v32 = vld [vmem:[#allocation2 + $0x1a7] sm:$0xff] }
  0x56   : > { %24409 = vst [vmem:[#allocation27_spill] sm:$0xff] %v20326_v37  ;;  %24410 = vst [vmem:[#allocation28_spill] sm:$0xff] %v20329_v38  ;;  %v20393_v52 = vld [vmem:[#allocation2 + $0x208] sm:$0xff] }
  0x57   : > { %24411 = vst [vmem:[#allocation29_spill] sm:$0xff] %v20332_v39  ;;  %326 = vst.msk [vmem:[#allocation2 + $0x288] sm:$0xff] %vm171_vm1, %v20326_v37  ;;  %v20399_v53 = vld [vmem:[#allocation2 + $0x210] sm:$0xff]  ;;  %v20401_v54 = vld [vmem:[#allocation2 + $0x228] sm:$0xff] }
  0x58   : > { %327 = vst.msk [vmem:[#allocation2 + $0x290] sm:$0xff] %vm171_vm1, %v20329_v38  ;;  %328 = vst.msk [vmem:[#allocation2 + $0x2a8] sm:$0xff] %vm171_vm1, %v20332_v39  ;;  %17094 = vmatmul.mubr.msk.f32.gmra.mrb[10].mxu0 %vm171_vm1, %v20367_v45  ;;  %v20466_v39 = vld [vmem:[#allocation2 + $0x127] sm:$0xff]  ;;  %v20490_v37 = vld [vmem:[#allocation2 + $0x16f] sm:$0xff] }
  0x59   : > { %24412 = vst [vmem:[#allocation30_spill] sm:$0xff] %v20341_v40  ;;  %24413 = vst [vmem:[#allocation31_spill] sm:$0xff] %v20344_v41  ;;  %17096 = vmatprep.mubr.msk.f32.mxu0 %vm171_vm1, %v20369_v46  ;;  %v20407_v55 = vld [vmem:[#allocation2 + $0x230] sm:$0xff]  ;;  %v20492_v38 = vld [vmem:[#allocation2 + $0x187] sm:$0xff] }
  0x5a   : > { %24414 = vst [vmem:[#allocation32_spill] sm:$0xff] %v20347_v42  ;;  %329 = vst.msk [vmem:[#allocation2 + $0x2b0] sm:$0xff] %vm171_vm1, %v20341_v40  ;;  %v20409_v56 = vld [vmem:[#allocation2 + $0x248] sm:$0xff]  ;;  %v20415_v57 = vld [vmem:[#allocation2 + $0x250] sm:$0xff] }
  0x5b   : > { %330 = vst.msk [vmem:[#allocation2 + $0x2c8] sm:$0xff] %vm171_vm1, %v20344_v41  ;;  %331 = vst.msk [vmem:[#allocation2 + $0x2d0] sm:$0xff] %vm171_vm1, %v20347_v42  ;;  %v20457_v41 = vld [vmem:[%s24181_s1 + $0xc] sm:$0xf] }
  0x5c   : > { %17097 = vmatmul.mubr.msk.f32.gmra.mrb[12].mxu0 %vm171_vm1, %v20375_v47  ;;  %v20417_v58 = vld [vmem:[#allocation2 + $0x268] sm:$0xff]  ;;  %v20423_v59 = vld [vmem:[#allocation2 + $0x270] sm:$0xff]  ;;  %24419 = vst [vmem:[#allocation37_spill] sm:$0xff] %v20567_v7  ;;  %332 = vst.msk [vmem:[#allocation2 + $0x2e8] sm:$0xff] %vm171_vm1, %v20567_v7 }
  0x5d   : > { %17099 = vmatprep.mubr.msk.f32.mxu0 %vm171_vm1, %v20377_v48  ;;  %v20464_v42 = vld [vmem:[#allocation2 + $0x10f] sm:$0xff]  ;;  %v20484_v40 = vld [vmem:[#allocation2 + $0x167] sm:$0xff]  ;;  %24420 = vst [vmem:[#allocation38_spill] sm:$0xff] %v20572_v8  ;;  %333 = vst.msk [vmem:[#allocation2 + $0x2f0] sm:$0xff] %vm171_vm1, %v20572_v8 }
  0x5e   : > { %v20425_v60 = vld [vmem:[#allocation2 + $0x288] sm:$0xff]  ;;  %v1052_v8 = vld [vmem:[#allocation2 + $0xf1] sm:$0xff]  ;;  %24421 = vst [vmem:[#allocation39_spill] sm:$0xff] %v20593_v4 }
  0x5f   : > { %v20431_v61 = vld [vmem:[#allocation2 + $0x290] sm:$0xff]  ;;  %v20433_v62 = vld [vmem:[#allocation2 + $0x2a8] sm:$0xff] }
  0x60   : > { %17100 = vmatmul.mubr.msk.f32.gmra.mrb[14].mxu0 %vm171_vm1, %v20383_v49  ;;  %24415 = vst [vmem:[#allocation33_spill] sm:$0xff] %v20433_v62  ;;  %v20506_v26 = vld [vmem:[#allocation2 + $0x1af] sm:$0xff]  ;;  %v20516_v25 = vld [vmem:[#allocation2 + $0x1e7] sm:$0xff] }
  0x61   : > { %17102 = vmatprep.mubr.msk.f32.mxu0 %vm171_vm1, %v20385_v50  ;;  %v20439_v63 = vld [vmem:[#allocation2 + $0x2b0] sm:$0xff]  ;;  %v20524_v23 = vld [vmem:[#allocation2 + $0x207] sm:$0xff] }
  0x62   : > { %24416 = vst [vmem:[#allocation34_spill] sm:$0xff] %v20439_v63  ;;  %v20441_v0 = vld [vmem:[#allocation2 + $0x2c8] sm:$0xff]  ;;  %v20447_v1 = vld [vmem:[#allocation2 + $0x2d0] sm:$0xff] }
  0x63   : > { %24417 = vst [vmem:[#allocation35_spill] sm:$0xff] %v20441_v0  ;;  %24418 = vst [vmem:[#allocation36_spill] sm:$0xff] %v20447_v1  ;;  %v20514_v24 = vld [vmem:[#allocation2 + $0x1cf] sm:$0xff]  ;;  %v20532_v21 = vld [vmem:[#allocation2 + $0x227] sm:$0xff] }
  0x64   : > { %17103 = vmatmul.mubr.msk.f32.gmra.mrb[16].mxu0 %vm171_vm1, %v20391_v51  ;;  %v20522_v22 = vld [vmem:[#allocation2 + $0x1ef] sm:$0xff]  ;;  %v20540_v19 = vld [vmem:[#allocation2 + $0x247] sm:$0xff] }
  0x65   : > { %17105 = vmatprep.mubr.msk.f32.mxu0 %vm171_vm1, %v20393_v52  ;;  %v20530_v20 = vld [vmem:[#allocation2 + $0x20f] sm:$0xff]  ;;  %v20548_v17 = vld [vmem:[#allocation2 + $0x267] sm:$0xff] }
  0x66   : > { %v20538_v18 = vld [vmem:[#allocation2 + $0x22f] sm:$0xff]  ;;  %v20556_v15 = vld [vmem:[#allocation2 + $0x287] sm:$0xff] }
  0x67   : > { %v20546_v16 = vld [vmem:[#allocation2 + $0x24f] sm:$0xff]  ;;  %v20564_v13 = vld [vmem:[#allocation2 + $0x2a7] sm:$0xff] }
  0x68   : > { %17106 = vmatmul.mubr.msk.f32.gmra.mrb[18].mxu0 %vm171_vm1, %v20399_v53  ;;  %v20554_v14 = vld [vmem:[#allocation2 + $0x26f] sm:$0xff]  ;;  %v20582_v6 = vld [vmem:[#allocation2 + $0x2c7] sm:$0xff] }
  0x69   : > { %17108 = vmatprep.mubr.msk.f32.mxu0 %vm171_vm1, %v20401_v54  ;;  %v20562_v12 = vld [vmem:[#allocation2 + $0x28f] sm:$0xff] }
  0x6a   : > { %v20580_v5 = vld [vmem:[#allocation2 + $0x2af] sm:$0xff] }
  0x6b   : > { %v20588_v7 = vld [vmem:[#allocation2 + $0x2cf] sm:$0xff] }
  0x6c   : > { %17109 = vmatmul.mubr.msk.f32.gmra.mrb[20].mxu0 %vm171_vm1, %v20407_v55 }
  0x6d   : > { %17111 = vmatprep.mubr.msk.f32.mxu0 %vm171_vm1, %v20409_v56 }
  0x70   : > { %17112 = vmatmul.mubr.msk.f32.gmra.mrb[22].mxu0 %vm171_vm1, %v20415_v57 }
  0x71   : > { %17114 = vmatprep.mubr.msk.f32.mxu0 %vm171_vm1, %v20417_v58 }
  0x74   : > { %17115 = vmatmul.mubr.msk.f32.gmra.mrb[24].mxu0 %vm171_vm1, %v20423_v59 }
  0x75   : > { %17117 = vmatprep.mubr.msk.f32.mxu0 %vm171_vm1, %v20425_v60 }
  0x78   : > { %17118 = vmatmul.mubr.msk.f32.gmra.mrb[26].mxu0 %vm171_vm1, %v20431_v61 }
  0x79   : > { %17120 = vmatprep.mubr.msk.f32.mxu0 %vm171_vm1, %v20433_v62 }
  0x7c   : > { %17121 = vmatmul.mubr.msk.f32.gmra.mrb[28].mxu0 %vm171_vm1, %v20439_v63  ;;  %v20607_v63 = vld [vmem:[#allocation2 + $0x129] sm:$0xff] }
  0x7d   : > { %17123 = vmatprep.mubr.msk.f32.mxu0 %vm171_vm1, %v20441_v0  ;;  %v20605_v0 = vld [vmem:[#allocation2 + $0x111] sm:$0xff]  ;;  %24423 = vst [vmem:[#allocation41_spill] sm:$0xff] %v20607_v63 }
  0x7e   : > { %24422 = vst [vmem:[#allocation40_spill] sm:$0xff] %v20605_v0 }
  0x80   : > { %17124 = vmatmul.mubr.msk.f32.gmra.mrb[30].mxu0 %vm171_vm1, %v20447_v1  ;;  %v20598_v1 = vld [vmem:[%s24181_s1 + $0x10] sm:$0xf] }
  0x81   : > { %17128 = vmatprep.mubr.msk.f32.mxu0 %vm171_vm1, %v335_v2  ;;  %v20474_v2 = vld [vmem:[#allocation2 + $0x12f] sm:$0xff] }
  0x84   : > { %17129 = vmatmul.mubr.msk.f32.vlgmr.msra.gmra.mrb[0].mxu0 %vm171_vm1, %v336_v10  ;;  %v20476_v10 = vld [vmem:[#allocation2 + $0x147] sm:$0xff] }
  0x85   : > { %17177 = vmatpush3.msk.msra.mxu0 %vm498_vm0, %v20198_v9  ;;  %17131 = vmatprep.mubr.msk.f32.mxu0 %vm171_vm1, %v20452_v11  ;;  %v20482_v9 = vld [vmem:[#allocation2 + $0x14f] sm:$0xff] }
  0x86   : > { %17226 = vmatprep.subr.msk.mxu0 %vm498_vm0, %v20457_v41 }
  0x88   : > { %17132 = vmatmul.mubr.msk.f32.gmra.mrb[2].mxu0 %vm171_vm1, %v20464_v42 }
  0x89   : > { %17134 = vmatprep.mubr.msk.f32.mxu0 %vm171_vm1, %v20466_v39 }
  0x8c   : > { %17135 = vmatmul.mubr.msk.f32.gmra.mrb[4].mxu0 %vm171_vm1, %v20474_v2 }
  0x8d   : > { %17137 = vmatprep.mubr.msk.f32.mxu0 %vm171_vm1, %v20476_v10 }
  0x90   : > { %17138 = vmatmul.mubr.msk.f32.gmra.mrb[6].mxu0 %vm171_vm1, %v20482_v9 }
  0x91   : > { %17140 = vmatprep.mubr.msk.f32.mxu0 %vm171_vm1, %v20484_v40 }
  0x94   : > { %17141 = vmatmul.mubr.msk.f32.gmra.mrb[8].mxu0 %vm171_vm1, %v20490_v37 }
  0x95   : > { %17143 = vmatprep.mubr.msk.f32.mxu0 %vm171_vm1, %v20492_v38 }
  0x98   : > { %17144 = vmatmul.mubr.msk.f32.gmra.mrb[10].mxu0 %vm171_vm1, %v20498_v31 }
  0x99   : > { %17146 = vmatprep.mubr.msk.f32.mxu0 %vm171_vm1, %v20500_v32 }
  0x9c   : > { %17147 = vmatmul.mubr.msk.f32.gmra.mrb[12].mxu0 %vm171_vm1, %v20506_v26 }
  0x9d   : > { %17149 = vmatprep.mubr.msk.f32.mxu0 %vm171_vm1, %v20508_v27 }
  0xa0   : > { %17150 = vmatmul.mubr.msk.f32.gmra.mrb[14].mxu0 %vm171_vm1, %v20514_v24 }
  0xa1   : > { %17152 = vmatprep.mubr.msk.f32.mxu0 %vm171_vm1, %v20516_v25 }
  0xa4   : > { %17153 = vmatmul.mubr.msk.f32.gmra.mrb[16].mxu0 %vm171_vm1, %v20522_v22 }
  0xa5   : > { %17155 = vmatprep.mubr.msk.f32.mxu0 %vm171_vm1, %v20524_v23 }
  0xa8   : > { %17156 = vmatmul.mubr.msk.f32.gmra.mrb[18].mxu0 %vm171_vm1, %v20530_v20 }
  0xa9   : > { %17158 = vmatprep.mubr.msk.f32.mxu0 %vm171_vm1, %v20532_v21 }
  0xac   : > { %17159 = vmatmul.mubr.msk.f32.gmra.mrb[20].mxu0 %vm171_vm1, %v20538_v18 }
  0xad   : > { %17161 = vmatprep.mubr.msk.f32.mxu0 %vm171_vm1, %v20540_v19 }
  0xb0   : > { %17162 = vmatmul.mubr.msk.f32.gmra.mrb[22].mxu0 %vm171_vm1, %v20546_v16 }
  0xb1   : > { %17164 = vmatprep.mubr.msk.f32.mxu0 %vm171_vm1, %v20548_v17 }
  0xb4   : > { %17165 = vmatmul.mubr.msk.f32.gmra.mrb[24].mxu0 %vm171_vm1, %v20554_v14 }
  0xb5   : > { %17167 = vmatprep.mubr.msk.f32.mxu0 %vm171_vm1, %v20556_v15 }
  0xb8   : > { %17168 = vmatmul.mubr.msk.f32.gmra.mrb[26].mxu0 %vm171_vm1, %v20562_v12 }
  0xb9   : > { %17170 = vmatprep.mubr.msk.f32.mxu0 %vm171_vm1, %v20564_v13 }
  0xbc   : > { %17171 = vmatmul.mubr.msk.f32.gmra.mrb[28].mxu0 %vm171_vm1, %v20580_v5 }
  0xbd   : > { %17173 = vmatprep.mubr.msk.f32.mxu0 %vm171_vm1, %v20582_v6 }
  0xc0   : > { %17174 = vmatmul.mubr.msk.f32.gmra.mrb[30].mxu0 %vm171_vm1, %v20588_v7 }
  0xc1   : > { %17178 = vmatprep.mubr.msk.f32.mxu0 %vm171_vm1, %v1051_v3  ;;  %v20615_v3 = vld [vmem:[#allocation2 + $0x131] sm:$0xff] }
  0xc2   : > { %24424 = vst [vmem:[#allocation42_spill] sm:$0xff] %v20615_v3 }
  0xc4   : > { %17179 = vmatmul.mubr.msk.f32.vlgmr.msra.gmra.mrb[0].mxu0 %vm171_vm1, %v1052_v8  ;;  %v20617_v8 = vld [vmem:[#allocation2 + $0x149] sm:$0xff] }
  0xc5   : > { %17227 = vmatpush3.msk.msra.mxu0 %vm498_vm0, %v20457_v41  ;;  %17181 = vmatprep.mubr.msk.f32.mxu0 %vm171_vm1, %v20593_v4  ;;  %24425 = vst [vmem:[#allocation43_spill] sm:$0xff] %v20617_v8  ;;  %v20623_v41 = vld [vmem:[#allocation2 + $0x151] sm:$0xff]  ;;  %v20625_v4 = vld [vmem:[#allocation2 + $0x169] sm:$0xff] }
  0xc6   : > { %17276 = vmatprep.subr.msk.mxu0 %vm498_vm0, %v20598_v1  ;;  %24426 = vst [vmem:[#allocation44_spill] sm:$0xff] %v20623_v41  ;;  %24427 = vst [vmem:[#allocation45_spill] sm:$0xff] %v20625_v4 }
  0xc8   : > { %17182 = vmatmul.mubr.msk.f32.gmra.mrb[2].mxu0 %vm171_vm1, %v20605_v0  ;;  %v20633_v0 = vld [vmem:[#allocation2 + $0x189] sm:$0xff] }
  0xc9   : > { %17184 = vmatprep.mubr.msk.f32.mxu0 %vm171_vm1, %v20607_v63  ;;  %v20631_v63 = vld [vmem:[#allocation2 + $0x171] sm:$0xff]  ;;  %24429 = vst [vmem:[#allocation47_spill] sm:$0xff] %v20633_v0 }
  0xca   : > { %24428 = vst [vmem:[#allocation46_spill] sm:$0xff] %v20631_v63 }
  0xcc   : > { %17185 = vmatmul.mubr.msk.f32.gmra.mrb[4].mxu0 %vm171_vm1, %v20615_v3  ;;  %v20641_v3 = vld [vmem:[#allocation2 + $0x1a9] sm:$0xff] }
  0xcd   : > { %17187 = vmatprep.mubr.msk.f32.mxu0 %vm171_vm1, %v20617_v8  ;;  %v20639_v8 = vld [vmem:[#allocation2 + $0x191] sm:$0xff]  ;;  %24431 = vst [vmem:[#allocation49_spill] sm:$0xff] %v20641_v3 }
  0xce   : > { %24430 = vst [vmem:[#allocation48_spill] sm:$0xff] %v20639_v8 }
  0xd0   : > { %17188 = vmatmul.mubr.msk.f32.gmra.mrb[6].mxu0 %vm171_vm1, %v20623_v41  ;;  %v20649_v41 = vld [vmem:[#allocation2 + $0x1c9] sm:$0xff] }
  0xd1   : > { %17190 = vmatprep.mubr.msk.f32.mxu0 %vm171_vm1, %v20625_v4  ;;  %v20647_v4 = vld [vmem:[#allocation2 + $0x1b1] sm:$0xff]  ;;  %24433 = vst [vmem:[#allocation51_spill] sm:$0xff] %v20649_v41 }
  0xd2   : > { %24432 = vst [vmem:[#allocation50_spill] sm:$0xff] %v20647_v4 }
  0xd4   : > { %17191 = vmatmul.mubr.msk.f32.gmra.mrb[8].mxu0 %vm171_vm1, %v20631_v63  ;;  %v20657_v63 = vld [vmem:[#allocation2 + $0x1e9] sm:$0xff] }
  0xd5   : > { %17193 = vmatprep.mubr.msk.f32.mxu0 %vm171_vm1, %v20633_v0  ;;  %v20655_v0 = vld [vmem:[#allocation2 + $0x1d1] sm:$0xff]  ;;  %24435 = vst [vmem:[#allocation53_spill] sm:$0xff] %v20657_v63 }
  0xd6   : > { %24434 = vst [vmem:[#allocation52_spill] sm:$0xff] %v20655_v0 }
  0xd8   : > { %17194 = vmatmul.mubr.msk.f32.gmra.mrb[10].mxu0 %vm171_vm1, %v20639_v8  ;;  %v20665_v8 = vld [vmem:[#allocation2 + $0x209] sm:$0xff] }
  0xd9   : > { %17196 = vmatprep.mubr.msk.f32.mxu0 %vm171_vm1, %v20641_v3  ;;  %v20663_v3 = vld [vmem:[#allocation2 + $0x1f1] sm:$0xff]  ;;  %24437 = vst [vmem:[#allocation55_spill] sm:$0xff] %v20665_v8 }
  0xda   : > { %24436 = vst [vmem:[#allocation54_spill] sm:$0xff] %v20663_v3 }
  0xdc   : > { %17197 = vmatmul.mubr.msk.f32.gmra.mrb[12].mxu0 %vm171_vm1, %v20647_v4  ;;  %v20673_v4 = vld [vmem:[#allocation2 + $0x229] sm:$0xff] }
  0xdd   : > { %17199 = vmatprep.mubr.msk.f32.mxu0 %vm171_vm1, %v20649_v41  ;;  %v20671_v41 = vld [vmem:[#allocation2 + $0x211] sm:$0xff]  ;;  %24439 = vst [vmem:[#allocation57_spill] sm:$0xff] %v20673_v4 }
  0xde   : > { %24438 = vst [vmem:[#allocation56_spill] sm:$0xff] %v20671_v41 }
  0xe0   : > { %17200 = vmatmul.mubr.msk.f32.gmra.mrb[14].mxu0 %vm171_vm1, %v20655_v0  ;;  %v20681_v0 = vld [vmem:[#allocation2 + $0x249] sm:$0xff] }
  0xe1   : > { %17202 = vmatprep.mubr.msk.f32.mxu0 %vm171_vm1, %v20657_v63  ;;  %v20679_v63 = vld [vmem:[#allocation2 + $0x231] sm:$0xff]  ;;  %24441 = vst [vmem:[#allocation59_spill] sm:$0xff] %v20681_v0 }
  0xe2   : > { %24440 = vst [vmem:[#allocation58_spill] sm:$0xff] %v20679_v63 }
  0xe4   : > { %17203 = vmatmul.mubr.msk.f32.gmra.mrb[16].mxu0 %vm171_vm1, %v20663_v3  ;;  %v20689_v3 = vld [vmem:[#allocation2 + $0x269] sm:$0xff] }
  0xe5   : > { %17205 = vmatprep.mubr.msk.f32.mxu0 %vm171_vm1, %v20665_v8  ;;  %v20687_v8 = vld [vmem:[#allocation2 + $0x251] sm:$0xff]  ;;  %24443 = vst [vmem:[#allocation61_spill] sm:$0xff] %v20689_v3 }
  0xe6   : > { %24442 = vst [vmem:[#allocation60_spill] sm:$0xff] %v20687_v8 }
  0xe8   : > { %17206 = vmatmul.mubr.msk.f32.gmra.mrb[18].mxu0 %vm171_vm1, %v20671_v41  ;;  %v20697_v41 = vld [vmem:[#allocation2 + $0x289] sm:$0xff] }
  0xe9   : > { %17208 = vmatprep.mubr.msk.f32.mxu0 %vm171_vm1, %v20673_v4  ;;  %v20695_v4 = vld [vmem:[#allocation2 + $0x271] sm:$0xff]  ;;  %24444 = vst [vmem:[#allocation62_spill] sm:$0xff] %v20697_v41 }
  0xec   : > { %17209 = vmatmul.mubr.msk.f32.gmra.mrb[20].mxu0 %vm171_vm1, %v20679_v63  ;;  %v20705_v63 = vld [vmem:[#allocation2 + $0x2a9] sm:$0xff] }
  0xed   : > { %17211 = vmatprep.mubr.msk.f32.mxu0 %vm171_vm1, %v20681_v0  ;;  %v20703_v0 = vld [vmem:[#allocation2 + $0x291] sm:$0xff]  ;;  %24445 = vst [vmem:[#allocation63_spill] sm:$0xff] %v20705_v63 }
  0xf0   : > { %17212 = vmatmul.mubr.msk.f32.gmra.mrb[22].mxu0 %vm171_vm1, %v20687_v8  ;;  %v20713_v8 = vld [vmem:[#allocation2 + $0x2c9] sm:$0xff] }
  0xf1   : > { %17214 = vmatprep.mubr.msk.f32.mxu0 %vm171_vm1, %v20689_v3  ;;  %v20711_v3 = vld [vmem:[#allocation2 + $0x2b1] sm:$0xff]  ;;  %24446 = vst [vmem:[#allocation64_spill] sm:$0xff] %v20713_v8 }
  0xf4   : > { %17215 = vmatmul.mubr.msk.f32.gmra.mrb[24].mxu0 %vm171_vm1, %v20695_v4 }
  0xf5   : > { %17217 = vmatprep.mubr.msk.f32.mxu0 %vm171_vm1, %v20697_v41  ;;  %v20719_v41 = vld [vmem:[#allocation2 + $0x2d1] sm:$0xff] }
  0xf8   : > { %17218 = vmatmul.mubr.msk.f32.gmra.mrb[26].mxu0 %vm171_vm1, %v20703_v0 }
  0xf9   : > { %17220 = vmatprep.mubr.msk.f32.mxu0 %vm171_vm1, %v20705_v63  ;;  %v14826_v63 = vld [vmem:[%s24181_s1 + $0x14] sm:$0xf] }
  0xfc   : > { %17221 = vmatmul.mubr.msk.f32.gmra.mrb[28].mxu0 %vm171_vm1, %v20711_v3 }
  0xfd   : > { %17223 = vmatprep.mubr.msk.f32.mxu0 %vm171_vm1, %v20713_v8 }
 0x100   : > { %17224 = vmatmul.mubr.msk.f32.gmra.mrb[30].mxu0 %vm171_vm1, %v20719_v41 }
 0x101   : > { %17228 = vmatprep.mubr.msk.f32.mxu0 %vm171_vm1, %v20452_v11  ;;  %v14860_v11 = vld [vmem:[%s24181_s1 + $0x18] sm:$0xf] }
 0x104   : > { %17229 = vmatmul.mubr.msk.f32.vlgmr.msra.gmra.mrb[0].mxu0 %vm171_vm1, %v20464_v42  ;;  %v20787_v42 = vld [vmem:[#allocation2 + $0x2e7] sm:$0xff] }
 0x105   : > { %17277 = vmatpush3.msk.msra.mxu0 %vm498_vm0, %v20598_v1  ;;  %17231 = vmatprep.mubr.msk.f32.mxu0 %vm171_vm1, %v20466_v39  ;;  %v20793_v1 = vld [vmem:[#allocation2 + $0x2ef] sm:$0xff] }
 0x106   : > { %17326 = vmatprep.subr.msk.mxu0 %vm498_vm0, %v14826_v63 }
 0x108   : > { %17232 = vmatmul.mubr.msk.f32.gmra.mrb[2].mxu0 %vm171_vm1, %v20474_v2 }
 0x109   : > { %17234 = vmatprep.mubr.msk.f32.mxu0 %vm171_vm1, %v20476_v10 }
 0x10c   : > { %17235 = vmatmul.mubr.msk.f32.gmra.mrb[4].mxu0 %vm171_vm1, %v20482_v9 }
 0x10d   : > { %17237 = vmatprep.mubr.msk.f32.mxu0 %vm171_vm1, %v20484_v40 }
 0x110   : > { %17238 = vmatmul.mubr.msk.f32.gmra.mrb[6].mxu0 %vm171_vm1, %v20490_v37 }
 0x111   : > { %17240 = vmatprep.mubr.msk.f32.mxu0 %vm171_vm1, %v20492_v38 }
 0x114   : > { %17241 = vmatmul.mubr.msk.f32.gmra.mrb[8].mxu0 %vm171_vm1, %v20498_v31 }
 0x115   : > { %17243 = vmatprep.mubr.msk.f32.mxu0 %vm171_vm1, %v20500_v32 }
 0x118   : > { %17244 = vmatmul.mubr.msk.f32.gmra.mrb[10].mxu0 %vm171_vm1, %v20506_v26 }
 0x119   : > { %17246 = vmatprep.mubr.msk.f32.mxu0 %vm171_vm1, %v20508_v27 }
 0x11c   : > { %17247 = vmatmul.mubr.msk.f32.gmra.mrb[12].mxu0 %vm171_vm1, %v20514_v24 }
 0x11d   : > { %17249 = vmatprep.mubr.msk.f32.mxu0 %vm171_vm1, %v20516_v25 }
 0x120   : > { %17250 = vmatmul.mubr.msk.f32.gmra.mrb[14].mxu0 %vm171_vm1, %v20522_v22 }
 0x121   : > { %17252 = vmatprep.mubr.msk.f32.mxu0 %vm171_vm1, %v20524_v23 }
 0x124   : > { %17253 = vmatmul.mubr.msk.f32.gmra.mrb[16].mxu0 %vm171_vm1, %v20530_v20 }
 0x125   : > { %17255 = vmatprep.mubr.msk.f32.mxu0 %vm171_vm1, %v20532_v21 }
 0x128   : > { %17256 = vmatmul.mubr.msk.f32.gmra.mrb[18].mxu0 %vm171_vm1, %v20538_v18 }
 0x129   : > { %17258 = vmatprep.mubr.msk.f32.mxu0 %vm171_vm1, %v20540_v19 }
 0x12c   : > { %17259 = vmatmul.mubr.msk.f32.gmra.mrb[20].mxu0 %vm171_vm1, %v20546_v16 }
 0x12d   : > { %17261 = vmatprep.mubr.msk.f32.mxu0 %vm171_vm1, %v20548_v17 }
 0x130   : > { %17262 = vmatmul.mubr.msk.f32.gmra.mrb[22].mxu0 %vm171_vm1, %v20554_v14 }
 0x131   : > { %17264 = vmatprep.mubr.msk.f32.mxu0 %vm171_vm1, %v20556_v15 }
 0x134   : > { %17265 = vmatmul.mubr.msk.f32.gmra.mrb[24].mxu0 %vm171_vm1, %v20562_v12 }
 0x135   : > { %17267 = vmatprep.mubr.msk.f32.mxu0 %vm171_vm1, %v20564_v13 }
 0x138   : > { %17268 = vmatmul.mubr.msk.f32.gmra.mrb[26].mxu0 %vm171_vm1, %v20580_v5 }
 0x139   : > { %17270 = vmatprep.mubr.msk.f32.mxu0 %vm171_vm1, %v20582_v6 }
 0x13c   : > { %17271 = vmatmul.mubr.msk.f32.gmra.mrb[28].mxu0 %vm171_vm1, %v20588_v7 }
 0x13d   : > { %17273 = vmatprep.mubr.msk.f32.mxu0 %vm171_vm1, %v20787_v42 }
 0x140   : > { %17274 = vmatmul.mubr.msk.f32.gmra.mrb[30].mxu0 %vm171_vm1, %v20793_v1 }
 0x141   : > { %17278 = vmatprep.mubr.msk.f32.mxu0 %vm171_vm1, %v20285_v28  ;;  %v24447_v28 = vld [vmem:[#allocation34_spill] sm:$0xff] }
 0x144   : > { %17279 = vmatmul.mubr.msk.f32.vlgmr.msra.gmra.mrb[0].mxu0 %vm171_vm1, %v20287_v29  ;;  %v24448_v29 = vld [vmem:[#allocation35_spill] sm:$0xff] }
 0x145   : > { %17327 = vmatpush3.msk.msra.mxu0 %vm498_vm0, %v14826_v63  ;;  %17281 = vmatprep.mubr.msk.f32.mxu0 %vm171_vm1, %v20289_v30  ;;  %v20860_v30 = vld [vmem:[#allocation2 + $0x2e8] sm:$0xff]  ;;  %v14894_v63 = vld [vmem:[%s24181_s1 + $0x1c] sm:$0xf] }
 0x146   : > { %17376 = vmatprep.subr.msk.mxu0 %vm498_vm0, %v14860_v11  ;;  %24449 = vst [vmem:[#allocation65_spill] sm:$0xff] %v20860_v30 }
 0x148   : > { %17282 = vmatmul.mubr.msk.f32.gmra.mrb[2].mxu0 %vm171_vm1, %v20309_v33  ;;  %v24450_v33 = vld [vmem:[#allocation36_spill] sm:$0xff] }
 0x149   : > { %17284 = vmatprep.mubr.msk.f32.mxu0 %vm171_vm1, %v20315_v34  ;;  %v20866_v34 = vld [vmem:[#allocation2 + $0x2f0] sm:$0xff] }
 0x14a   : > { %24451 = vst [vmem:[#allocation66_spill] sm:$0xff] %v20866_v34 }
 0x14c   : > { %17285 = vmatmul.mubr.msk.f32.gmra.mrb[4].mxu0 %vm171_vm1, %v20321_v35  ;;  %v24452_v35 = vld [vmem:[#allocation39_spill] sm:$0xff] }
 0x14d   : > { %17287 = vmatprep.mubr.msk.f32.mxu0 %vm171_vm1, %v20323_v36 }
 0x150   : > { %17288 = vmatmul.mubr.msk.f32.gmra.mrb[6].mxu0 %vm171_vm1, %v20359_v43 }
 0x151   : > { %17290 = vmatprep.mubr.msk.f32.mxu0 %vm171_vm1, %v20361_v44 }
 0x154   : > { %17291 = vmatmul.mubr.msk.f32.gmra.mrb[8].mxu0 %vm171_vm1, %v20367_v45 }
 0x155   : > { %17293 = vmatprep.mubr.msk.f32.mxu0 %vm171_vm1, %v20369_v46 }
 0x158   : > { %17294 = vmatmul.mubr.msk.f32.gmra.mrb[10].mxu0 %vm171_vm1, %v20375_v47 }
 0x159   : > { %17296 = vmatprep.mubr.msk.f32.mxu0 %vm171_vm1, %v20377_v48 }
 0x15c   : > { %17297 = vmatmul.mubr.msk.f32.gmra.mrb[12].mxu0 %vm171_vm1, %v20383_v49 }
 0x15d   : > { %17299 = vmatprep.mubr.msk.f32.mxu0 %vm171_vm1, %v20385_v50 }
 0x160   : > { %17300 = vmatmul.mubr.msk.f32.gmra.mrb[14].mxu0 %vm171_vm1, %v20391_v51 }
 0x161   : > { %17302 = vmatprep.mubr.msk.f32.mxu0 %vm171_vm1, %v20393_v52 }
 0x164   : > { %17303 = vmatmul.mubr.msk.f32.gmra.mrb[16].mxu0 %vm171_vm1, %v20399_v53 }
 0x165   : > { %17305 = vmatprep.mubr.msk.f32.mxu0 %vm171_vm1, %v20401_v54 }
 0x168   : > { %17306 = vmatmul.mubr.msk.f32.gmra.mrb[18].mxu0 %vm171_vm1, %v20407_v55 }
 0x169   : > { %17308 = vmatprep.mubr.msk.f32.mxu0 %vm171_vm1, %v20409_v56 }
 0x16c   : > { %17309 = vmatmul.mubr.msk.f32.gmra.mrb[20].mxu0 %vm171_vm1, %v20415_v57 }
 0x16d   : > { %17311 = vmatprep.mubr.msk.f32.mxu0 %vm171_vm1, %v20417_v58 }
 0x170   : > { %17312 = vmatmul.mubr.msk.f32.gmra.mrb[22].mxu0 %vm171_vm1, %v20423_v59 }
 0x171   : > { %17314 = vmatprep.mubr.msk.f32.mxu0 %vm171_vm1, %v20425_v60 }
 0x174   : > { %17315 = vmatmul.mubr.msk.f32.gmra.mrb[24].mxu0 %vm171_vm1, %v20431_v61 }
 0x175   : > { %17317 = vmatprep.mubr.msk.f32.mxu0 %vm171_vm1, %v20433_v62  ;;  %v24462_v62 = vld [vmem:[#allocation49_spill] sm:$0xff] }
 0x178   : > { %17318 = vmatmul.mubr.msk.f32.gmra.mrb[26].mxu0 %vm171_vm1, %v24447_v28  ;;  %v24458_v28 = vld [vmem:[#allocation45_spill] sm:$0xff] }
 0x179   : > { %17320 = vmatprep.mubr.msk.f32.mxu0 %vm171_vm1, %v24448_v29  ;;  %v24453_v29 = vld [vmem:[#allocation40_spill] sm:$0xff] }
 0x17c   : > { %17321 = vmatmul.mubr.msk.f32.gmra.mrb[28].mxu0 %vm171_vm1, %v24450_v33  ;;  %v24454_v33 = vld [vmem:[#allocation41_spill] sm:$0xff] }
 0x17d   : > { %17323 = vmatprep.mubr.msk.f32.mxu0 %vm171_vm1, %v20860_v30  ;;  %v24455_v30 = vld [vmem:[#allocation42_spill] sm:$0xff] }
 0x180   : > { %17324 = vmatmul.mubr.msk.f32.gmra.mrb[30].mxu0 %vm171_vm1, %v20866_v34  ;;  %v24456_v34 = vld [vmem:[#allocation43_spill] sm:$0xff] }
 0x181   : > { %17328 = vmatprep.mubr.msk.f32.mxu0 %vm171_vm1, %v24452_v35  ;;  %v24457_v35 = vld [vmem:[#allocation44_spill] sm:$0xff] }
 0x184   : > { %17329 = vmatmul.mubr.msk.f32.vlgmr.msra.gmra.mrb[0].mxu0 %vm171_vm1, %v24453_v29  ;;  %v24459_v29 = vld [vmem:[#allocation46_spill] sm:$0xff] }
 0x185   : > { %17377 = vmatpush3.msk.msra.mxu0 %vm498_vm0, %v14860_v11  ;;  %17331 = vmatprep.mubr.msk.f32.mxu0 %vm171_vm1, %v24454_v33  ;;  %v24460_v11 = vld [vmem:[#allocation47_spill] sm:$0xff]  ;;  %v24461_v33 = vld [vmem:[#allocation48_spill] sm:$0xff] }
 0x186   : > { %17426 = vmatprep.subr.msk.mxu0 %vm498_vm0, %v14894_v63 }
 0x188   : > { %17332 = vmatmul.mubr.msk.f32.gmra.mrb[2].mxu0 %vm171_vm1, %v24455_v30  ;;  %v24463_v30 = vld [vmem:[#allocation50_spill] sm:$0xff] }
 0x189   : > { %17334 = vmatprep.mubr.msk.f32.mxu0 %vm171_vm1, %v24456_v34  ;;  %v24464_v34 = vld [vmem:[#allocation51_spill] sm:$0xff] }
 0x18c   : > { %17335 = vmatmul.mubr.msk.f32.gmra.mrb[4].mxu0 %vm171_vm1, %v24457_v35  ;;  %v24465_v35 = vld [vmem:[#allocation52_spill] sm:$0xff] }
 0x18d   : > { %17337 = vmatprep.mubr.msk.f32.mxu0 %vm171_vm1, %v24458_v28  ;;  %v24466_v28 = vld [vmem:[#allocation53_spill] sm:$0xff] }
 0x190   : > { %17338 = vmatmul.mubr.msk.f32.gmra.mrb[6].mxu0 %vm171_vm1, %v24459_v29  ;;  %v24467_v29 = vld [vmem:[#allocation54_spill] sm:$0xff] }
 0x191   : > { %17340 = vmatprep.mubr.msk.f32.mxu0 %vm171_vm1, %v24460_v11  ;;  %v24468_v11 = vld [vmem:[#allocation55_spill] sm:$0xff] }
 0x194   : > { %17341 = vmatmul.mubr.msk.f32.gmra.mrb[8].mxu0 %vm171_vm1, %v24461_v33  ;;  %v24469_v33 = vld [vmem:[#allocation56_spill] sm:$0xff] }
 0x195   : > { %17343 = vmatprep.mubr.msk.f32.mxu0 %vm171_vm1, %v24462_v62  ;;  %v24470_v62 = vld [vmem:[#allocation57_spill] sm:$0xff] }
 0x198   : > { %17344 = vmatmul.mubr.msk.f32.gmra.mrb[10].mxu0 %vm171_vm1, %v24463_v30  ;;  %v24471_v30 = vld [vmem:[#allocation58_spill] sm:$0xff] }
 0x199   : > { %17346 = vmatprep.mubr.msk.f32.mxu0 %vm171_vm1, %v24464_v34  ;;  %v24472_v34 = vld [vmem:[#allocation59_spill] sm:$0xff] }
 0x19c   : > { %17347 = vmatmul.mubr.msk.f32.gmra.mrb[12].mxu0 %vm171_vm1, %v24465_v35  ;;  %v24473_v35 = vld [vmem:[#allocation60_spill] sm:$0xff] }
 0x19d   : > { %17349 = vmatprep.mubr.msk.f32.mxu0 %vm171_vm1, %v24466_v28  ;;  %v24474_v28 = vld [vmem:[#allocation61_spill] sm:$0xff] }
 0x1a0   : > { %17350 = vmatmul.mubr.msk.f32.gmra.mrb[14].mxu0 %vm171_vm1, %v24467_v29 }
 0x1a1   : > { %17352 = vmatprep.mubr.msk.f32.mxu0 %vm171_vm1, %v24468_v11  ;;  %v24475_v11 = vld [vmem:[#allocation62_spill] sm:$0xff] }
 0x1a4   : > { %17353 = vmatmul.mubr.msk.f32.gmra.mrb[16].mxu0 %vm171_vm1, %v24469_v33 }
 0x1a5   : > { %17355 = vmatprep.mubr.msk.f32.mxu0 %vm171_vm1, %v24470_v62  ;;  %v24476_v62 = vld [vmem:[#allocation63_spill] sm:$0xff] }
 0x1a8   : > { %17356 = vmatmul.mubr.msk.f32.gmra.mrb[18].mxu0 %vm171_vm1, %v24471_v30 }
 0x1a9   : > { %17358 = vmatprep.mubr.msk.f32.mxu0 %vm171_vm1, %v24472_v34 }
 0x1ac   : > { %17359 = vmatmul.mubr.msk.f32.gmra.mrb[20].mxu0 %vm171_vm1, %v24473_v35  ;;  %v20933_v35 = vld [vmem:[#allocation2 + $0x2e9] sm:$0xff] }
 0x1ad   : > { %17361 = vmatprep.mubr.msk.f32.mxu0 %vm171_vm1, %v24474_v28 }
 0x1b0   : > { %17362 = vmatmul.mubr.msk.f32.gmra.mrb[22].mxu0 %vm171_vm1, %v20695_v4 }
 0x1b1   : > { %17364 = vmatprep.mubr.msk.f32.mxu0 %vm171_vm1, %v24475_v11  ;;  %v20939_v11 = vld [vmem:[#allocation2 + $0x2f1] sm:$0xff] }
 0x1b4   : > { %17365 = vmatmul.mubr.msk.f32.gmra.mrb[24].mxu0 %vm171_vm1, %v20703_v0 }
 0x1b5   : > { %17367 = vmatprep.mubr.msk.f32.mxu0 %vm171_vm1, %v24476_v62 }
 0x1b8   : > { %17368 = vmatmul.mubr.msk.f32.gmra.mrb[26].mxu0 %vm171_vm1, %v20711_v3 }
 0x1b9   : > { %17370 = vmatprep.mubr.msk.f32.mxu0 %vm171_vm1, %v20713_v8  ;;  %v14928_v8 = vld [vmem:[%s24181_s1 + $0x20] sm:$0xf] }
 0x1bc   : > { %17371 = vmatmul.mubr.msk.f32.gmra.mrb[28].mxu0 %vm171_vm1, %v20719_v41 }
 0x1bd   : > { %17373 = vmatprep.mubr.msk.f32.mxu0 %vm171_vm1, %v20933_v35 }
 0x1c0   : > { %17374 = vmatmul.mubr.msk.f32.gmra.mrb[30].mxu0 %vm171_vm1, %v20939_v11 }
 0x1c1   : > { %17378 = vmatprep.mubr.msk.f32.mxu0 %vm171_vm1, %v20466_v39  ;;  %v24493_v39 = vld [vmem:[#allocation51_spill] sm:$0xff] }
 0x1c4   : > { %17379 = vmatmul.mubr.msk.f32.vlgmr.msra.gmra.mrb[0].mxu0 %vm171_vm1, %v20474_v2 }
 0x1c5   : > { %17427 = vmatpush3.msk.msra.mxu0 %vm498_vm0, %v14894_v63  ;;  %17381 = vmatprep.mubr.msk.f32.mxu0 %vm171_vm1, %v20476_v10 }
 0x1c6   : > { %17476 = vmatprep.subr.msk.mxu0 %vm498_vm0, %v14928_v8 }
 0x1c8   : > { %17382 = vmatmul.mubr.msk.f32.gmra.mrb[2].mxu0 %vm171_vm1, %v20482_v9 }
 0x1c9   : > { %17384 = vmatprep.mubr.msk.f32.mxu0 %vm171_vm1, %v20484_v40  ;;  %v24494_v40 = vld [vmem:[#allocation52_spill] sm:$0xff] }
 0x1cc   : > { %17385 = vmatmul.mubr.msk.f32.gmra.mrb[4].mxu0 %vm171_vm1, %v20490_v37  ;;  %v24491_v37 = vld [vmem:[#allocation49_spill] sm:$0xff] }
 0x1cd   : > { %17387 = vmatprep.mubr.msk.f32.mxu0 %vm171_vm1, %v20492_v38  ;;  %v24492_v38 = vld [vmem:[#allocation50_spill] sm:$0xff] }
 0x1d0   : > { %17388 = vmatmul.mubr.msk.f32.gmra.mrb[6].mxu0 %vm171_vm1, %v20498_v31  ;;  %v24488_v31 = vld [vmem:[#allocation46_spill] sm:$0xff] }
 0x1d1   : > { %17390 = vmatprep.mubr.msk.f32.mxu0 %vm171_vm1, %v20500_v32  ;;  %v24489_v32 = vld [vmem:[#allocation47_spill] sm:$0xff] }
 0x1d4   : > { %17391 = vmatmul.mubr.msk.f32.gmra.mrb[8].mxu0 %vm171_vm1, %v20506_v26  ;;  %v24486_v26 = vld [vmem:[#allocation44_spill] sm:$0xff] }
 0x1d5   : > { %17393 = vmatprep.mubr.msk.f32.mxu0 %vm171_vm1, %v20508_v27  ;;  %v24487_v27 = vld [vmem:[#allocation45_spill] sm:$0xff] }
 0x1d8   : > { %17394 = vmatmul.mubr.msk.f32.gmra.mrb[10].mxu0 %vm171_vm1, %v20514_v24  ;;  %v24484_v24 = vld [vmem:[#allocation42_spill] sm:$0xff] }
 0x1d9   : > { %17396 = vmatprep.mubr.msk.f32.mxu0 %vm171_vm1, %v20516_v25  ;;  %v24485_v25 = vld [vmem:[#allocation43_spill] sm:$0xff] }
 0x1dc   : > { %17397 = vmatmul.mubr.msk.f32.gmra.mrb[12].mxu0 %vm171_vm1, %v20522_v22  ;;  %v3033_v22 = vld [vmem:[#allocation2 + $0x310] sm:$0xff] }
 0x1dd   : > { %17399 = vmatprep.mubr.msk.f32.mxu0 %vm171_vm1, %v20524_v23  ;;  %v24483_v23 = vld [vmem:[#allocation41_spill] sm:$0xff] }
 0x1e0   : > { %17400 = vmatmul.mubr.msk.f32.gmra.mrb[14].mxu0 %vm171_vm1, %v20530_v20  ;;  %v3032_v20 = vld [vmem:[#allocation2 + $0x308] sm:$0xff] }
 0x1e1   : > { %17402 = vmatprep.mubr.msk.f32.mxu0 %vm171_vm1, %v20532_v21  ;;  %v24482_v21 = vld [vmem:[#allocation66_spill] sm:$0xff] }
 0x1e4   : > { %17403 = vmatmul.mubr.msk.f32.gmra.mrb[16].mxu0 %vm171_vm1, %v20538_v18  ;;  %v24480_v18 = vld [vmem:[#allocation36_spill] sm:$0xff] }
 0x1e5   : > { %17405 = vmatprep.mubr.msk.f32.mxu0 %vm171_vm1, %v20540_v19  ;;  %v24481_v19 = vld [vmem:[#allocation65_spill] sm:$0xff] }
 0x1e8   : > { %17406 = vmatmul.mubr.msk.f32.gmra.mrb[18].mxu0 %vm171_vm1, %v20546_v16  ;;  %v24478_v16 = vld [vmem:[#allocation34_spill] sm:$0xff] }
 0x1e9   : > { %17408 = vmatprep.mubr.msk.f32.mxu0 %vm171_vm1, %v20548_v17  ;;  %v24479_v17 = vld [vmem:[#allocation35_spill] sm:$0xff] }
 0x1ec   : > { %17409 = vmatmul.mubr.msk.f32.gmra.mrb[20].mxu0 %vm171_vm1, %v20554_v14  ;;  %v2642_v14 = vld [vmem:[#allocation2 + $0x307] sm:$0xff] }
 0x1ed   : > { %17411 = vmatprep.mubr.msk.f32.mxu0 %vm171_vm1, %v20556_v15  ;;  %v24477_v15 = vld [vmem:[#allocation33_spill] sm:$0xff] }
 0x1f0   : > { %17412 = vmatmul.mubr.msk.f32.gmra.mrb[22].mxu0 %vm171_vm1, %v20562_v12  ;;  %v2643_v12 = vld [vmem:[#allocation2 + $0x30f] sm:$0xff] }
 0x1f1   : > { %17414 = vmatprep.mubr.msk.f32.mxu0 %vm171_vm1, %v20564_v13  ;;  %v3002_v13 = vld [vmem:[#allocation2 + $0x128] sm:$0xff] }
 0x1f4   : > { %17415 = vmatmul.mubr.msk.f32.gmra.mrb[24].mxu0 %vm171_vm1, %v20580_v5  ;;  %v3003_v5 = vld [vmem:[#allocation2 + $0x130] sm:$0xff] }
 0x1f5   : > { %17417 = vmatprep.mubr.msk.f32.mxu0 %vm171_vm1, %v20582_v6  ;;  %v3004_v6 = vld [vmem:[#allocation2 + $0x148] sm:$0xff] }
 0x1f8   : > { %17418 = vmatmul.mubr.msk.f32.gmra.mrb[26].mxu0 %vm171_vm1, %v20588_v7  ;;  %v3005_v7 = vld [vmem:[#allocation2 + $0x150] sm:$0xff] }
 0x1f9   : > { %17420 = vmatprep.mubr.msk.f32.mxu0 %vm171_vm1, %v20787_v42 }
 0x1fc   : > { %17421 = vmatmul.mubr.msk.f32.gmra.mrb[28].mxu0 %vm171_vm1, %v20793_v1 }
 0x1fd   : > { %17423 = vmatprep.mubr.msk.f32.mxu0 %vm171_vm1, %v2642_v14 }
 0x200   : > { %17424 = vmatmul.mubr.msk.f32.gmra.mrb[30].mxu0 %vm171_vm1, %v2643_v12 }
 0x201   : > { %17428 = vmatprep.mubr.msk.f32.mxu0 %vm171_vm1, %v3002_v13 }
 0x204   : > { %17429 = vmatmul.mubr.msk.f32.vlgmr.msra.gmra.mrb[0].mxu0 %vm171_vm1, %v3003_v5 }
 0x205   : > { %17477 = vmatpush3.msk.msra.mxu0 %vm498_vm0, %v14928_v8  ;;  %17431 = vmatprep.mubr.msk.f32.mxu0 %vm171_vm1, %v3004_v6 }
 0x208   : > { %17432 = vmatmul.mubr.msk.f32.gmra.mrb[2].mxu0 %vm171_vm1, %v3005_v7 }
 0x209   : > { %17434 = vmatprep.mubr.msk.f32.mxu0 %vm171_vm1, %v20323_v36  ;;  %v24490_v36 = vld [vmem:[#allocation48_spill] sm:$0xff] }
 0x20c   : > { %17435 = vmatmul.mubr.msk.f32.gmra.mrb[4].mxu0 %vm171_vm1, %v20359_v43  ;;  %v24495_v43 = vld [vmem:[#allocation53_spill] sm:$0xff] }
 0x20d   : > { %17437 = vmatprep.mubr.msk.f32.mxu0 %vm171_vm1, %v20361_v44  ;;  %v24496_v44 = vld [vmem:[#allocation55_spill] sm:$0xff] }
 0x210   : > { %17438 = vmatmul.mubr.msk.f32.gmra.mrb[6].mxu0 %vm171_vm1, %v20367_v45  ;;  %v24497_v45 = vld [vmem:[#allocation57_spill] sm:$0xff] }
 0x211   : > { %17440 = vmatprep.mubr.msk.f32.mxu0 %vm171_vm1, %v20369_v46  ;;  %v24498_v46 = vld [vmem:[#allocation60_spill] sm:$0xff] }
 0x214   : > { %17441 = vmatmul.mubr.msk.f32.gmra.mrb[8].mxu0 %vm171_vm1, %v20375_v47  ;;  %v24499_v47 = vld [vmem:[#allocation62_spill] sm:$0xff] }
 0x215   : > { %17443 = vmatprep.mubr.msk.f32.mxu0 %vm171_vm1, %v20377_v48  ;;  %v24500_v48 = vld [vmem:[#allocation64_spill] sm:$0xff] }
 0x218   : > { %17444 = vmatmul.mubr.msk.f32.gmra.mrb[10].mxu0 %vm171_vm1, %v20383_v49  ;;  %v3423_v49 = vld [vmem:[#allocation2 + $0x311] sm:$0xff] }
 0x219   : > { %17446 = vmatprep.mubr.msk.f32.mxu0 %vm171_vm1, %v20385_v50  ;;  %v14964_v50 = vld [vmem:[%s24181_s1 + $0x28] sm:$0xf] }
 0x21a   : > { %17526 = vmatprep.subr.msk.mxu1 %vm498_vm0, %v14964_v50 }
 0x21b   : > { %17527 = vmatpush3.msk.msra.mxu1 %vm498_vm0, %v14964_v50 }
 0x21c   : > { %17447 = vmatmul.mubr.msk.f32.gmra.mrb[12].mxu0 %vm171_vm1, %v20391_v51  ;;  %v3950_v51 = vld [vmem:[#allocation2 + $0xc8] sm:$0xff] }
 0x21d   : > { %17449 = vmatprep.mubr.msk.f32.mxu0 %vm171_vm1, %v20393_v52  ;;  %17528 = vmatprep.mubr.msk.f32.mxu1 %vm171_vm1, %v3950_v51  ;;  %v3951_v52 = vld [vmem:[#allocation2 + $0xd0] sm:$0xff] }
 0x21e   : > { %17529 = vmatmul.mubr.msk.f32.vlgmr.msra.gmra.mrb[0].mxu1 %vm171_vm1, %v3951_v52 }
 0x220   : > { %17450 = vmatmul.mubr.msk.f32.gmra.mrb[14].mxu0 %vm171_vm1, %v20399_v53  ;;  %v3952_v53 = vld [vmem:[#allocation2 + $0xe8] sm:$0xff] }
 0x221   : > { %17452 = vmatprep.mubr.msk.f32.mxu0 %vm171_vm1, %v20401_v54  ;;  %v14963_v54 = vld [vmem:[%s24181_s1 + $0x24] sm:$0xf]  ;;  %17531 = vmatprep.mubr.msk.f32.mxu1 %vm171_vm1, %v3952_v53 }
 0x222   : > { %17576 = vmatprep.subr.msk.mxu1 %vm498_vm0, %v14963_v54 }
 0x223   : > { %17577 = vmatpush3.msk.msra.mxu1 %vm498_vm0, %v14963_v54 }
 0x224   : > { %17453 = vmatmul.mubr.msk.f32.gmra.mrb[16].mxu0 %vm171_vm1, %v20407_v55  ;;  %v3953_v55 = vld [vmem:[#allocation2 + $0xf0] sm:$0xff] }
 0x225   : > { %17455 = vmatprep.mubr.msk.f32.mxu0 %vm171_vm1, %v20409_v56  ;;  %17532 = vmatmul.mubr.msk.f32.gmra.mrb[2].mxu1 %vm171_vm1, %v3953_v55  ;;  %v21148_v56 = vld [vmem:[%s24181_s1 + $0x2c] sm:$0xf] }
 0x226   : > { %17626 = vmatprep.subr.msk.mxu1 %vm498_vm0, %v21148_v56 }
 0x228   : > { %17456 = vmatmul.mubr.msk.f32.gmra.mrb[18].mxu0 %vm171_vm1, %v20415_v57  ;;  %v21155_v57 = vld [vmem:[%s24182_s2] ss:$0 sm:$0xff] }
 0x229   : > { %17458 = vmatprep.mubr.msk.f32.mxu0 %vm171_vm1, %v20417_v58 }
 0x22c   : > { %17459 = vmatmul.mubr.msk.f32.gmra.mrb[20].mxu0 %vm171_vm1, %v20423_v59 }
 0x22d   : > { %17461 = vmatprep.mubr.msk.f32.mxu0 %vm171_vm1, %v20425_v60 }
 0x230   : > { %17462 = vmatmul.mubr.msk.f32.gmra.mrb[22].mxu0 %vm171_vm1, %v20431_v61 }
 0x231   : > { %17464 = vmatprep.mubr.msk.f32.mxu0 %vm171_vm1, %v24477_v15 }
 0x234   : > { %17465 = vmatmul.mubr.msk.f32.gmra.mrb[24].mxu0 %vm171_vm1, %v24478_v16 }
 0x235   : > { %17467 = vmatprep.mubr.msk.f32.mxu0 %vm171_vm1, %v24479_v17 }
 0x238   : > { %17468 = vmatmul.mubr.msk.f32.gmra.mrb[26].mxu0 %vm171_vm1, %v24480_v18 }
 0x239   : > { %17470 = vmatprep.mubr.msk.f32.mxu0 %vm171_vm1, %v24481_v19 }
 0x23c   : > { %17471 = vmatmul.mubr.msk.f32.gmra.mrb[28].mxu0 %vm171_vm1, %v24482_v21 }
 0x23d   : > { %17473 = vmatprep.mubr.msk.f32.mxu0 %vm171_vm1, %v3032_v20 }
 0x240   : > { %17474 = vmatmul.mubr.msk.f32.gmra.mrb[30].mxu0 %vm171_vm1, %v3033_v22 }
 0x241   : > { %17478 = vmatprep.mubr.msk.f32.mxu0 %vm171_vm1, %v24483_v23 }
 0x244   : > { %17479 = vmatmul.mubr.msk.f32.vlgmr.msra.gmra.mrb[0].mxu0 %vm171_vm1, %v24484_v24 }
 0x245   : > { %17481 = vmatprep.mubr.msk.f32.mxu0 %vm171_vm1, %v24485_v25 }
 0x248   : > { %17482 = vmatmul.mubr.msk.f32.gmra.mrb[2].mxu0 %vm171_vm1, %v24486_v26 }
 0x249   : > { %17484 = vmatprep.mubr.msk.f32.mxu0 %vm171_vm1, %v24487_v27 }
 0x24c   : > { %17485 = vmatmul.mubr.msk.f32.gmra.mrb[4].mxu0 %vm171_vm1, %v24488_v31 }
 0x24d   : > { %17487 = vmatprep.mubr.msk.f32.mxu0 %vm171_vm1, %v24489_v32 }
 0x250   : > { %17488 = vmatmul.mubr.msk.f32.gmra.mrb[6].mxu0 %vm171_vm1, %v24490_v36 }
 0x251   : > { %17490 = vmatprep.mubr.msk.f32.mxu0 %vm171_vm1, %v24491_v37 }
 0x254   : > { %17491 = vmatmul.mubr.msk.f32.gmra.mrb[8].mxu0 %vm171_vm1, %v24492_v38 }
 0x255   : > { %17493 = vmatprep.mubr.msk.f32.mxu0 %vm171_vm1, %v24493_v39 }
 0x258   : > { %17494 = vmatmul.mubr.msk.f32.gmra.mrb[10].mxu0 %vm171_vm1, %v24494_v40 }
 0x259   : > { %17496 = vmatprep.mubr.msk.f32.mxu0 %vm171_vm1, %v24495_v43 }
 0x25c   : > { %17497 = vmatmul.mubr.msk.f32.gmra.mrb[12].mxu0 %vm171_vm1, %v24467_v29 }
 0x25d   : > { %17499 = vmatprep.mubr.msk.f32.mxu0 %vm171_vm1, %v24496_v44 }
 0x260   : > { %17500 = vmatmul.mubr.msk.f32.gmra.mrb[14].mxu0 %vm171_vm1, %v24469_v33 }
 0x261   : > { %17502 = vmatprep.mubr.msk.f32.mxu0 %vm171_vm1, %v24497_v45 }
 0x264   : > { %17503 = vmatmul.mubr.msk.f32.gmra.mrb[16].mxu0 %vm171_vm1, %v24471_v30 }
 0x265   : > { %17505 = vmatprep.mubr.msk.f32.mxu0 %vm171_vm1, %v24472_v34 }
 0x268   : > { %17506 = vmatmul.mubr.msk.f32.gmra.mrb[18].mxu0 %vm171_vm1, %v24498_v46 }
 0x269   : > { %17508 = vmatprep.mubr.msk.f32.mxu0 %vm171_vm1, %v24474_v28 }
 0x26c   : > { %17509 = vmatmul.mubr.msk.f32.gmra.mrb[20].mxu0 %vm171_vm1, %v20695_v4  ;;  %v3422_v4 = vld [vmem:[#allocation2 + $0x309] sm:$0xff] }
 0x26d   : > { %17511 = vmatprep.mubr.msk.f32.mxu0 %vm171_vm1, %v24499_v47 }
 0x270   : > { %17512 = vmatmul.mubr.msk.f32.gmra.mrb[22].mxu0 %vm171_vm1, %v20703_v0 }
 0x271   : > { %17514 = vmatprep.mubr.msk.f32.mxu0 %vm171_vm1, %v24476_v62 }
 0x274   : > { %17515 = vmatmul.mubr.msk.f32.gmra.mrb[24].mxu0 %vm171_vm1, %v20711_v3 }
 0x275   : > { %17517 = vmatprep.mubr.msk.f32.mxu0 %vm171_vm1, %v24500_v48 }
 0x278   : > { %17518 = vmatmul.mubr.msk.f32.gmra.mrb[26].mxu0 %vm171_vm1, %v20719_v41 }
 0x279   : > { %17520 = vmatprep.mubr.msk.f32.mxu0 %vm171_vm1, %v20933_v35 }
 0x27c   : > { %17521 = vmatmul.mubr.msk.f32.gmra.mrb[28].mxu0 %vm171_vm1, %v20939_v11 }
 0x27d   : > { %17523 = vmatprep.mubr.msk.f32.mxu0 %vm171_vm1, %v3422_v4 }
 0x280   : > { %17524 = vmatmul.mubr.msk.f32.gmra.mrb[30].mxu0 %vm171_vm1, %v3423_v49 }
 0x317   : > { %v17480_v58 = vpop.f32.mrb[0].mxu0 }
 0x318   : > { %v21158_v59 = vadd.f32 %v17480_v58, %v21155_v57  ;;  %v3591_v60 = vpop.f32.mrb[1].mxu0 }
 0x319   : > { %v21161_v61 = vadd.f32 %v21155_v57, %v3591_v60 }
 0x31a   : > { %24501 = vst [vmem:[#allocation39_spill] sm:$0xff] %v21158_v59  ;;  %v24301_v62 = vmax.f32 %v21158_v59, 0.0 }
 0x31b   : > { %24502 = vst [vmem:[#allocation40_spill] sm:$0xff] %v21161_v61  ;;  %v24300_v0 = vmax.f32 %v21161_v61, 0.0  ;;  %v17483_v2 = vpop.f32.mrb[2].mxu0 }
 0x31c   : > { %3884 = vst.msk [vmem:[#allocation2 + $0x110] sm:$0xff] %vm171_vm1, %v24301_v62  ;;  %v21169_v10 = vadd.f32 %v17483_v2, %v21155_v57  ;;  %v3601_v9 = vpop.f32.mrb[3].mxu0 }
 0x31d   : > { %3883 = vst.msk [vmem:[#allocation2 + $0x108] sm:$0xff] %vm171_vm1, %v24300_v0  ;;  %v21175_v3 = vadd.f32 %v21155_v57, %v3601_v9 }
 0x31e   : > { %24503 = vst [vmem:[#allocation54_spill] sm:$0xff] %v21169_v10  ;;  %v24299_v8 = vmax.f32 %v21169_v10, 0.0  ;;  %v4635_v10 = vld [vmem:[#allocation2 + $0xf2] sm:$0xff] }
 0x31f   : > { %24504 = vst [vmem:[#allocation56_spill] sm:$0xff] %v21175_v3  ;;  %v24297_v41 = vmax.f32 %v21175_v3, 0.0  ;;  %v17486_v42 = vpop.f32.mrb[4].mxu0  ;;  %v21622_v3 = vld [vmem:[%s24181_s1 + $0x34] sm:$0xf] }
 0x320   : > { %3886 = vst.msk [vmem:[#allocation2 + $0x130] sm:$0xff] %vm171_vm1, %v24299_v8  ;;  %v21183_v1 = vadd.f32 %v17486_v42, %v21155_v57  ;;  %v3611_v28 = vpop.f32.mrb[5].mxu0 }
 0x321   : > { %3885 = vst.msk [vmem:[#allocation2 + $0x128] sm:$0xff] %vm171_vm1, %v24297_v41  ;;  %v21189_v30 = vadd.f32 %v21155_v57, %v3611_v28 }
 0x322   : > { %24505 = vst [vmem:[#allocation58_spill] sm:$0xff] %v21183_v1  ;;  %v24295_v33 = vmax.f32 %v21183_v1, 0.0  ;;  %v4634_v1 = vld [vmem:[#allocation2 + $0xea] sm:$0xff] }
 0x323   : > { %24506 = vst [vmem:[#allocation59_spill] sm:$0xff] %v21189_v30  ;;  %v24294_v34 = vmax.f32 %v21189_v30, 0.0  ;;  %v17489_v63 = vpop.f32.mrb[6].mxu0  ;;  %v21209_v12 = vld [vmem:[#allocation2 + $0x110] sm:$0xff] }
 0x324   : > { %3888 = vst.msk [vmem:[#allocation2 + $0x150] sm:$0xff] %vm171_vm1, %v24295_v33  ;;  %v21197_v35 = vadd.f32 %v17489_v63, %v21155_v57  ;;  %v3621_v29 = vpop.f32.mrb[7].mxu0  ;;  %v21199_v11 = vld [vmem:[#allocation2 + $0x108] sm:$0xff]  ;;  %v4633_v30 = vld [vmem:[#allocation2 + $0xd2] sm:$0xff] }
 0x325   : > { %3887 = vst.msk [vmem:[#allocation2 + $0x148] sm:$0xff] %vm171_vm1, %v24294_v34  ;;  %v21205_v14 = vadd.f32 %v21155_v57, %v3621_v29  ;;  %17534 = vmatprep.mubr.msk.f32.mxu1 %vm171_vm1, %v21199_v11  ;;  %v21635_v61 = vld [vmem:[#allocation2 + $0x112] sm:$0xff] }
 0x326   : > { %24507 = vst [vmem:[#allocation61_spill] sm:$0xff] %v21197_v35  ;;  %v24293_v13 = vmax.f32 %v21197_v35, 0.0  ;;  %17535 = vmatmul.mubr.msk.f32.gmra.mrb[4].mxu1 %vm171_vm1, %v21209_v12 }
 0x327   : > { %24508 = vst [vmem:[#allocation63_spill] sm:$0xff] %v21205_v14  ;;  %v24291_v5 = vmax.f32 %v21205_v14, 0.0  ;;  %v17492_v6 = vpop.f32.mrb[8].mxu0  ;;  %v21231_v18 = vld [vmem:[#allocation2 + $0x130] sm:$0xff] }
 0x328   : > { %3890 = vst.msk [vmem:[#allocation2 + $0x170] sm:$0xff] %vm171_vm1, %v24293_v13  ;;  %v21219_v7 = vadd.f32 %v17492_v6, %v21155_v57  ;;  %v3631_v15 = vpop.f32.mrb[9].mxu0  ;;  %v21221_v16 = vld [vmem:[#allocation2 + $0x128] sm:$0xff] }
 0x329   : > { %3889 = vst.msk [vmem:[#allocation2 + $0x168] sm:$0xff] %vm171_vm1, %v24291_v5  ;;  %v21227_v17 = vadd.f32 %v21155_v57, %v3631_v15  ;;  %17537 = vmatprep.mubr.msk.f32.mxu1 %vm171_vm1, %v21221_v16  ;;  %v4632_v14 = vld [vmem:[#allocation2 + $0xca] sm:$0xff] }
 0x32a   : > { %24509 = vst [vmem:[#allocation33_spill] sm:$0xff] %v21219_v7  ;;  %v24289_v19 = vmax.f32 %v21219_v7, 0.0  ;;  %17538 = vmatmul.mubr.msk.f32.gmra.mrb[6].mxu1 %vm171_vm1, %v21231_v18 }
 0x32b   : > { %24510 = vst [vmem:[#allocation34_spill] sm:$0xff] %v21227_v17  ;;  %v24288_v20 = vmax.f32 %v21227_v17, 0.0  ;;  %v17495_v21 = vpop.f32.mrb[10].mxu0  ;;  %v21253_v26 = vld [vmem:[#allocation2 + $0x150] sm:$0xff] }
 0x32c   : > { %3892 = vst.msk [vmem:[#allocation2 + $0x190] sm:$0xff] %vm171_vm1, %v24289_v19  ;;  %v21241_v22 = vadd.f32 %v17495_v21, %v21155_v57  ;;  %v3641_v23 = vpop.f32.mrb[11].mxu0  ;;  %v21243_v24 = vld [vmem:[#allocation2 + $0x148] sm:$0xff] }
 0x32d   : > { %3891 = vst.msk [vmem:[#allocation2 + $0x188] sm:$0xff] %vm171_vm1, %v24288_v20  ;;  %v21249_v25 = vadd.f32 %v21155_v57, %v3641_v23  ;;  %17540 = vmatprep.mubr.msk.f32.mxu1 %vm171_vm1, %v21243_v24 }
 0x32e   : > { %24511 = vst [vmem:[#allocation35_spill] sm:$0xff] %v21241_v22  ;;  %v24287_v27 = vmax.f32 %v21241_v22, 0.0  ;;  %17541 = vmatmul.mubr.msk.f32.gmra.mrb[8].mxu1 %vm171_vm1, %v21253_v26 }
 0x32f   : > { %24512 = vst [vmem:[#allocation36_spill] sm:$0xff] %v21249_v25  ;;  %v24285_v31 = vmax.f32 %v21249_v25, 0.0  ;;  %v17498_v32 = vpop.f32.mrb[12].mxu0  ;;  %v21275_v40 = vld [vmem:[#allocation2 + $0x170] sm:$0xff] }
 0x330   : > { %3894 = vst.msk [vmem:[#allocation2 + $0x1b0] sm:$0xff] %vm171_vm1, %v24287_v27  ;;  %v21263_v36 = vadd.f32 %v17498_v32, %v21155_v57  ;;  %v3651_v37 = vpop.f32.mrb[13].mxu0  ;;  %v21265_v38 = vld [vmem:[#allocation2 + $0x168] sm:$0xff] }
 0x331   : > { %3893 = vst.msk [vmem:[#allocation2 + $0x1a8] sm:$0xff] %vm171_vm1, %v24285_v31  ;;  %v21271_v39 = vadd.f32 %v21155_v57, %v3651_v37  ;;  %17543 = vmatprep.mubr.msk.f32.mxu1 %vm171_vm1, %v21265_v38  ;;  %v21655_v59 = vld [vmem:[#allocation2 + $0x16a] sm:$0xff] }
 0x332   : > { %24513 = vst [vmem:[#allocation65_spill] sm:$0xff] %v21263_v36  ;;  %v24283_v43 = vmax.f32 %v21263_v36, 0.0  ;;  %17544 = vmatmul.mubr.msk.f32.gmra.mrb[10].mxu1 %vm171_vm1, %v21275_v40  ;;  %24537 = vst [vmem:[#allocation71_spill] sm:$0xff] %v21655_v59 }
 0x333   : > { %24514 = vst [vmem:[#allocation66_spill] sm:$0xff] %v21271_v39  ;;  %v24282_v44 = vmax.f32 %v21271_v39, 0.0  ;;  %v17501_v45 = vpop.f32.mrb[14].mxu0  ;;  %v21297_v49 = vld [vmem:[#allocation2 + $0x190] sm:$0xff] }
 0x334   : > { %3896 = vst.msk [vmem:[#allocation2 + $0x1d0] sm:$0xff] %vm171_vm1, %v24283_v43  ;;  %v21285_v46 = vadd.f32 %v17501_v45, %v21155_v57  ;;  %v3661_v47 = vpop.f32.mrb[15].mxu0  ;;  %v21287_v48 = vld [vmem:[#allocation2 + $0x188] sm:$0xff] }
 0x335   : > { %3895 = vst.msk [vmem:[#allocation2 + $0x1c8] sm:$0xff] %vm171_vm1, %v24282_v44  ;;  %v21293_v4 = vadd.f32 %v21155_v57, %v3661_v47  ;;  %17546 = vmatprep.mubr.msk.f32.mxu1 %vm171_vm1, %v21287_v48 }
 0x336   : > { %24515 = vst [vmem:[#allocation41_spill] sm:$0xff] %v21285_v46  ;;  %v24281_v50 = vmax.f32 %v21285_v46, 0.0  ;;  %17547 = vmatmul.mubr.msk.f32.gmra.mrb[12].mxu1 %vm171_vm1, %v21297_v49 }
 0x337   : > { %24516 = vst [vmem:[#allocation42_spill] sm:$0xff] %v21293_v4  ;;  %v24279_v51 = vmax.f32 %v21293_v4, 0.0  ;;  %v17504_v52 = vpop.f32.mrb[16].mxu0  ;;  %v21319_v60 = vld [vmem:[#allocation2 + $0x1b0] sm:$0xff] }
 0x338   : > { %3898 = vst.msk [vmem:[#allocation2 + $0x1f0] sm:$0xff] %vm171_vm1, %v24281_v50  ;;  %v21307_v53 = vadd.f32 %v17504_v52, %v21155_v57  ;;  %v3671_v54 = vpop.f32.mrb[17].mxu0  ;;  %v21309_v55 = vld [vmem:[#allocation2 + $0x1a8] sm:$0xff] }
 0x339   : > { %3897 = vst.msk [vmem:[#allocation2 + $0x1e8] sm:$0xff] %vm171_vm1, %v24279_v51  ;;  %v21315_v58 = vadd.f32 %v21155_v57, %v3671_v54  ;;  %17549 = vmatprep.mubr.msk.f32.mxu1 %vm171_vm1, %v21309_v55 }
 0x33a   : > { %24517 = vst [vmem:[#allocation43_spill] sm:$0xff] %v21307_v53  ;;  %v24277_v2 = vmax.f32 %v21307_v53, 0.0  ;;  %17550 = vmatmul.mubr.msk.f32.gmra.mrb[14].mxu1 %vm171_vm1, %v21319_v60 }
 0x33b   : > { %24518 = vst [vmem:[#allocation44_spill] sm:$0xff] %v21315_v58  ;;  %v24276_v9 = vmax.f32 %v21315_v58, 0.0  ;;  %v17507_v42 = vpop.f32.mrb[18].mxu0  ;;  %v21341_v15 = vld [vmem:[#allocation2 + $0x1d0] sm:$0xff] }
 0x33c   : > { %3900 = vst.msk [vmem:[#allocation2 + $0x210] sm:$0xff] %vm171_vm1, %v24277_v2  ;;  %v21329_v28 = vadd.f32 %v17507_v42, %v21155_v57  ;;  %v3681_v63 = vpop.f32.mrb[19].mxu0  ;;  %v21331_v29 = vld [vmem:[#allocation2 + $0x1c8] sm:$0xff] }
 0x33d   : > { %3899 = vst.msk [vmem:[#allocation2 + $0x208] sm:$0xff] %vm171_vm1, %v24276_v9  ;;  %v21337_v6 = vadd.f32 %v21155_v57, %v3681_v63  ;;  %17552 = vmatprep.mubr.msk.f32.mxu1 %vm171_vm1, %v21331_v29 }
 0x33e   : > { %24519 = vst [vmem:[#allocation45_spill] sm:$0xff] %v21329_v28  ;;  %v24275_v21 = vmax.f32 %v21329_v28, 0.0  ;;  %17553 = vmatmul.mubr.msk.f32.gmra.mrb[16].mxu1 %vm171_vm1, %v21341_v15 }
 0x33f   : > { %24520 = vst [vmem:[#allocation46_spill] sm:$0xff] %v21337_v6  ;;  %v24274_v23 = vmax.f32 %v21337_v6, 0.0  ;;  %v17510_v32 = vpop.f32.mrb[20].mxu0  ;;  %v21363_v54 = vld [vmem:[#allocation2 + $0x1f0] sm:$0xff] }
 0x340   : > { %3902 = vst.msk [vmem:[#allocation2 + $0x230] sm:$0xff] %vm171_vm1, %v24275_v21  ;;  %v21351_v37 = vadd.f32 %v17510_v32, %v21155_v57  ;;  %v3691_v45 = vpop.f32.mrb[21].mxu0  ;;  %v21353_v47 = vld [vmem:[#allocation2 + $0x1e8] sm:$0xff] }
 0x341   : > { %3901 = vst.msk [vmem:[#allocation2 + $0x228] sm:$0xff] %vm171_vm1, %v24274_v23  ;;  %v21359_v52 = vadd.f32 %v21155_v57, %v3691_v45  ;;  %17555 = vmatprep.mubr.msk.f32.mxu1 %vm171_vm1, %v21353_v47  ;;  %v21566_v6 = vld [vmem:[#allocation2 + $0x1ee] sm:$0xff] }
 0x342   : > { %24521 = vst [vmem:[#allocation47_spill] sm:$0xff] %v21351_v37  ;;  %v24278_v42 = vmax.f32 %v21351_v37, 0.0  ;;  %17556 = vmatmul.mubr.msk.f32.gmra.mrb[18].mxu1 %vm171_vm1, %v21363_v54  ;;  %v21562_v37 = vld [vmem:[#allocation2 + $0x1e6] sm:$0xff] }
 0x343   : > { %24522 = vst [vmem:[#allocation48_spill] sm:$0xff] %v21359_v52  ;;  %v24280_v63 = vmax.f32 %v21359_v52, 0.0  ;;  %v17513_v32 = vpop.f32.mrb[22].mxu0  ;;  %v21385_v2 = vld [vmem:[#allocation2 + $0x210] sm:$0xff] }
 0x344   : > { %3904 = vst.msk [vmem:[#allocation2 + $0x250] sm:$0xff] %vm171_vm1, %v24278_v42  ;;  %v21373_v45 = vadd.f32 %v17513_v32, %v21155_v57  ;;  %v3701_v23 = vpop.f32.mrb[23].mxu0  ;;  %v21375_v21 = vld [vmem:[#allocation2 + $0x208] sm:$0xff] }
 0x345   : > { %3903 = vst.msk [vmem:[#allocation2 + $0x248] sm:$0xff] %vm171_vm1, %v24280_v63  ;;  %v21381_v9 = vadd.f32 %v21155_v57, %v3701_v23  ;;  %17558 = vmatprep.mubr.msk.f32.mxu1 %vm171_vm1, %v21375_v21  ;;  %v21558_v52 = vld [vmem:[#allocation2 + $0x1ce] sm:$0xff]  ;;  %v21570_v28 = vld [vmem:[#allocation2 + $0x206] sm:$0xff] }
 0x346   : > { %24523 = vst [vmem:[#allocation49_spill] sm:$0xff] %v21373_v45  ;;  %v24284_v42 = vmax.f32 %v21373_v45, 0.0  ;;  %17559 = vmatmul.mubr.msk.f32.gmra.mrb[20].mxu1 %vm171_vm1, %v21385_v2  ;;  %v21554_v45 = vld [vmem:[#allocation2 + $0x1c6] sm:$0xff]  ;;  %v21574_v58 = vld [vmem:[#allocation2 + $0x20e] sm:$0xff] }
 0x347   : > { %24524 = vst [vmem:[#allocation50_spill] sm:$0xff] %v21381_v9  ;;  %v24286_v32 = vmax.f32 %v21381_v9, 0.0  ;;  %v17516_v51 = vpop.f32.mrb[24].mxu0  ;;  %v21407_v43 = vld [vmem:[#allocation2 + $0x230] sm:$0xff] }
 0x348   : > { %3906 = vst.msk [vmem:[#allocation2 + $0x270] sm:$0xff] %vm171_vm1, %v24284_v42  ;;  %v21395_v23 = vadd.f32 %v17516_v51, %v21155_v57  ;;  %v3711_v63 = vpop.f32.mrb[25].mxu0  ;;  %v21397_v50 = vld [vmem:[#allocation2 + $0x228] sm:$0xff] }
 0x349   : > { %3905 = vst.msk [vmem:[#allocation2 + $0x268] sm:$0xff] %vm171_vm1, %v24286_v32  ;;  %v21403_v44 = vadd.f32 %v21155_v57, %v3711_v63  ;;  %17561 = vmatprep.mubr.msk.f32.mxu1 %vm171_vm1, %v21397_v50  ;;  %v21550_v9 = vld [vmem:[#allocation2 + $0x1ae] sm:$0xff]  ;;  %v21578_v53 = vld [vmem:[#allocation2 + $0x226] sm:$0xff] }
 0x34a   : > { %24525 = vst [vmem:[#allocation51_spill] sm:$0xff] %v21395_v23  ;;  %v24290_v42 = vmax.f32 %v21395_v23, 0.0  ;;  %17562 = vmatmul.mubr.msk.f32.gmra.mrb[22].mxu1 %vm171_vm1, %v21407_v43  ;;  %v21546_v23 = vld [vmem:[#allocation2 + $0x1a6] sm:$0xff]  ;;  %v21582_v4 = vld [vmem:[#allocation2 + $0x22e] sm:$0xff] }
 0x34b   : > { %24526 = vst [vmem:[#allocation52_spill] sm:$0xff] %v21403_v44  ;;  %v24292_v51 = vmax.f32 %v21403_v44, 0.0  ;;  %v17519_v31 = vpop.f32.mrb[26].mxu0  ;;  %v21429_v19 = vld [vmem:[#allocation2 + $0x250] sm:$0xff] }
 0x34c   : > { %3908 = vst.msk [vmem:[#allocation2 + $0x290] sm:$0xff] %vm171_vm1, %v24290_v42  ;;  %v21417_v63 = vadd.f32 %v17519_v31, %v21155_v57  ;;  %v3721_v32 = vpop.f32.mrb[27].mxu0  ;;  %v21419_v27 = vld [vmem:[#allocation2 + $0x248] sm:$0xff] }
 0x34d   : > { %3907 = vst.msk [vmem:[#allocation2 + $0x288] sm:$0xff] %vm171_vm1, %v24292_v51  ;;  %v21425_v20 = vadd.f32 %v21155_v57, %v3721_v32  ;;  %17564 = vmatprep.mubr.msk.f32.mxu1 %vm171_vm1, %v21419_v27  ;;  %v21542_v44 = vld [vmem:[#allocation2 + $0x18e] sm:$0xff]  ;;  %v21586_v46 = vld [vmem:[#allocation2 + $0x246] sm:$0xff] }
 0x34e   : > { %24527 = vst [vmem:[#allocation53_spill] sm:$0xff] %v21417_v63  ;;  %v24296_v42 = vmax.f32 %v21417_v63, 0.0  ;;  %17565 = vmatmul.mubr.msk.f32.gmra.mrb[24].mxu1 %vm171_vm1, %v21429_v19  ;;  %v21538_v63 = vld [vmem:[#allocation2 + $0x186] sm:$0xff]  ;;  %v21590_v39 = vld [vmem:[#allocation2 + $0x24e] sm:$0xff] }
 0x34f   : > { %24528 = vst [vmem:[#allocation55_spill] sm:$0xff] %v21425_v20  ;;  %v24298_v31 = vmax.f32 %v21425_v20, 0.0  ;;  %v17522_v5 = vpop.f32.mrb[28].mxu0  ;;  %v21451_v33 = vld [vmem:[#allocation2 + $0x270] sm:$0xff] }
 0x350   : > { %3910 = vst.msk [vmem:[#allocation2 + $0x2b0] sm:$0xff] %vm171_vm1, %v24296_v42  ;;  %v21439_v32 = vadd.f32 %v17522_v5, %v21155_v57  ;;  %v3731_v51 = vpop.f32.mrb[29].mxu0  ;;  %v21441_v13 = vld [vmem:[#allocation2 + $0x268] sm:$0xff] }
 0x351   : > { %3909 = vst.msk [vmem:[#allocation2 + $0x2a8] sm:$0xff] %vm171_vm1, %v24298_v31  ;;  %v21447_v34 = vadd.f32 %v21155_v57, %v3731_v51  ;;  %17567 = vmatprep.mubr.msk.f32.mxu1 %vm171_vm1, %v21441_v13  ;;  %v21534_v20 = vld [vmem:[#allocation2 + $0x16e] sm:$0xff]  ;;  %v21594_v36 = vld [vmem:[#allocation2 + $0x266] sm:$0xff] }
 0x352   : > { %24529 = vst [vmem:[#allocation57_spill] sm:$0xff] %v21439_v32  ;;  %v24302_v42 = vmax.f32 %v21439_v32, 0.0  ;;  %17568 = vmatmul.mubr.msk.f32.gmra.mrb[26].mxu1 %vm171_vm1, %v21451_v33  ;;  %v21530_v32 = vld [vmem:[#allocation2 + $0x166] sm:$0xff]  ;;  %v21598_v25 = vld [vmem:[#allocation2 + $0x26e] sm:$0xff] }
 0x353   : > { %24530 = vst [vmem:[#allocation60_spill] sm:$0xff] %v21447_v34  ;;  %v24303_v5 = vmax.f32 %v21447_v34, 0.0  ;;  %v17525_v41 = vpop.f32.mrb[30].mxu0  ;;  %v21473_v62 = vld [vmem:[#allocation2 + $0x290] sm:$0xff]  ;;  %v3918_v34 = vld [vmem:[#allocation2 + $0xe6] sm:$0xff] }
 0x354   : > { %3912 = vst.msk [vmem:[#allocation2 + $0x2d0] sm:$0xff] %vm171_vm1, %v24302_v42  ;;  %v21461_v51 = vadd.f32 %v17525_v41, %v21155_v57  ;;  %v3741_v31 = vpop.f32.mrb[31].mxu0  ;;  %v21463_v8 = vld [vmem:[#allocation2 + $0x288] sm:$0xff] }
 0x355   : > { %3911 = vst.msk [vmem:[#allocation2 + $0x2c8] sm:$0xff] %vm171_vm1, %v24303_v5  ;;  %v21469_v0 = vadd.f32 %v21155_v57, %v3741_v31  ;;  %17570 = vmatprep.mubr.msk.f32.mxu1 %vm171_vm1, %v21463_v8  ;;  %v3916_v57 = vld [vmem:[#allocation2 + $0xc6] sm:$0xff]  ;;  %v21606_v17 = vld [vmem:[#allocation2 + $0x28e] sm:$0xff] }
 0x356   : > { %24531 = vst [vmem:[#allocation62_spill] sm:$0xff] %v21461_v51  ;;  %v24306_v42 = vmax.f32 %v21461_v51, 0.0  ;;  %17571 = vmatmul.mubr.msk.f32.gmra.mrb[28].mxu1 %vm171_vm1, %v21473_v62  ;;  %v3917_v51 = vld [vmem:[#allocation2 + $0xce] sm:$0xff]  ;;  %v21602_v22 = vld [vmem:[#allocation2 + $0x286] sm:$0xff] }
 0x357   : > { %24532 = vst [vmem:[#allocation64_spill] sm:$0xff] %v21469_v0  ;;  %v24307_v41 = vmax.f32 %v21469_v0, 0.0  ;;  %v21489_v31 = vld [vmem:[#allocation2 + $0x2b0] sm:$0xff] }
 0x358   : > { %3914 = vst.msk [vmem:[#allocation2 + $0x2f0] sm:$0xff] %vm171_vm1, %v24306_v42  ;;  %v21482_v5 = vld [vmem:[#allocation2 + $0x2a8] sm:$0xff]  ;;  %v21497_v42 = vld [vmem:[%s24181_s1 + $0x30] sm:$0xf] }
 0x359   : > { %3913 = vst.msk [vmem:[#allocation2 + $0x2e8] sm:$0xff] %vm171_vm1, %v24307_v41  ;;  %17573 = vmatprep.mubr.msk.f32.mxu1 %vm171_vm1, %v21482_v5  ;;  %v3919_v41 = vld [vmem:[#allocation2 + $0xee] sm:$0xff]  ;;  %v21610_v7 = vld [vmem:[#allocation2 + $0x2a6] sm:$0xff] }
 0x35a   : > { %17574 = vmatmul.mubr.msk.f32.gmra.mrb[30].mxu1 %vm171_vm1, %v21489_v31  ;;  %v21510_v0 = vld [vmem:[#allocation2 + $0x10e] sm:$0xff] }
 0x35b   : > { %17578 = vmatprep.mubr.msk.f32.mxu1 %vm171_vm1, %v3916_v57  ;;  %v21506_v57 = vld [vmem:[#allocation2 + $0x106] sm:$0xff]  ;;  %v21614_v35 = vld [vmem:[#allocation2 + $0x2ae] sm:$0xff] }
 0x35e   : > { %17579 = vmatmul.mubr.msk.f32.vlgmr.msra.gmra.mrb[0].mxu1 %vm171_vm1, %v3917_v51  ;;  %v21514_v51 = vld [vmem:[#allocation2 + $0x126] sm:$0xff] }
 0x35f   : > { %17627 = vmatpush3.msk.msra.mxu1 %vm498_vm0, %v21148_v56  ;;  %17581 = vmatprep.mubr.msk.f32.mxu1 %vm171_vm1, %v3918_v34  ;;  %v21518_v56 = vld [vmem:[#allocation2 + $0x12e] sm:$0xff]  ;;  %v21522_v34 = vld [vmem:[#allocation2 + $0x146] sm:$0xff] }
 0x360   : > { %17676 = vmatprep.subr.msk.mxu1 %vm498_vm0, %v21497_v42 }
 0x362   : > { %17582 = vmatmul.mubr.msk.f32.gmra.mrb[2].mxu1 %vm171_vm1, %v3919_v41  ;;  %v21526_v41 = vld [vmem:[#allocation2 + $0x14e] sm:$0xff] }
 0x363   : > { %17584 = vmatprep.mubr.msk.f32.mxu1 %vm171_vm1, %v21506_v57 }
 0x366   : > { %17585 = vmatmul.mubr.msk.f32.gmra.mrb[4].mxu1 %vm171_vm1, %v21510_v0 }
 0x367   : > { %17587 = vmatprep.mubr.msk.f32.mxu1 %vm171_vm1, %v21514_v51 }
 0x36a   : > { %17588 = vmatmul.mubr.msk.f32.gmra.mrb[6].mxu1 %vm171_vm1, %v21518_v56 }
 0x36b   : > { %17590 = vmatprep.mubr.msk.f32.mxu1 %vm171_vm1, %v21522_v34 }
 0x36e   : > { %17591 = vmatmul.mubr.msk.f32.gmra.mrb[8].mxu1 %vm171_vm1, %v21526_v41 }
 0x36f   : > { %17593 = vmatprep.mubr.msk.f32.mxu1 %vm171_vm1, %v21530_v32 }
 0x372   : > { %17594 = vmatmul.mubr.msk.f32.gmra.mrb[10].mxu1 %vm171_vm1, %v21534_v20 }
 0x373   : > { %17596 = vmatprep.mubr.msk.f32.mxu1 %vm171_vm1, %v21538_v63 }
 0x376   : > { %17597 = vmatmul.mubr.msk.f32.gmra.mrb[12].mxu1 %vm171_vm1, %v21542_v44 }
 0x377   : > { %17599 = vmatprep.mubr.msk.f32.mxu1 %vm171_vm1, %v21546_v23 }
 0x37a   : > { %17600 = vmatmul.mubr.msk.f32.gmra.mrb[14].mxu1 %vm171_vm1, %v21550_v9 }
 0x37b   : > { %17602 = vmatprep.mubr.msk.f32.mxu1 %vm171_vm1, %v21554_v45 }
 0x37e   : > { %17603 = vmatmul.mubr.msk.f32.gmra.mrb[16].mxu1 %vm171_vm1, %v21558_v52 }
 0x37f   : > { %17605 = vmatprep.mubr.msk.f32.mxu1 %vm171_vm1, %v21562_v37 }
 0x382   : > { %17606 = vmatmul.mubr.msk.f32.gmra.mrb[18].mxu1 %vm171_vm1, %v21566_v6 }
 0x383   : > { %17608 = vmatprep.mubr.msk.f32.mxu1 %vm171_vm1, %v21570_v28 }
 0x386   : > { %17609 = vmatmul.mubr.msk.f32.gmra.mrb[20].mxu1 %vm171_vm1, %v21574_v58 }
 0x387   : > { %17611 = vmatprep.mubr.msk.f32.mxu1 %vm171_vm1, %v21578_v53 }
 0x38a   : > { %17612 = vmatmul.mubr.msk.f32.gmra.mrb[22].mxu1 %vm171_vm1, %v21582_v4 }
 0x38b   : > { %17614 = vmatprep.mubr.msk.f32.mxu1 %vm171_vm1, %v21586_v46 }
 0x38e   : > { %17615 = vmatmul.mubr.msk.f32.gmra.mrb[24].mxu1 %vm171_vm1, %v21590_v39 }
 0x38f   : > { %17617 = vmatprep.mubr.msk.f32.mxu1 %vm171_vm1, %v21594_v36 }
 0x392   : > { %17618 = vmatmul.mubr.msk.f32.gmra.mrb[26].mxu1 %vm171_vm1, %v21598_v25 }
 0x393   : > { %17620 = vmatprep.mubr.msk.f32.mxu1 %vm171_vm1, %v21602_v22 }
 0x396   : > { %17621 = vmatmul.mubr.msk.f32.gmra.mrb[28].mxu1 %vm171_vm1, %v21606_v17 }
 0x397   : > { %17623 = vmatprep.mubr.msk.f32.mxu1 %vm171_vm1, %v21610_v7 }
 0x39a   : > { %17624 = vmatmul.mubr.msk.f32.gmra.mrb[30].mxu1 %vm171_vm1, %v21614_v35 }
 0x39b   : > { %17628 = vmatprep.mubr.msk.f32.mxu1 %vm171_vm1, %v4632_v14  ;;  %v21631_v14 = vld [vmem:[#allocation2 + $0x10a] sm:$0xff] }
 0x39e   : > { %17629 = vmatmul.mubr.msk.f32.vlgmr.msra.gmra.mrb[0].mxu1 %vm171_vm1, %v4633_v30  ;;  %v21639_v30 = vld [vmem:[#allocation2 + $0x12a] sm:$0xff] }
 0x39f   : > { %17677 = vmatpush3.msk.msra.mxu1 %vm498_vm0, %v21497_v42  ;;  %17631 = vmatprep.mubr.msk.f32.mxu1 %vm171_vm1, %v4634_v1  ;;  %24533 = vst [vmem:[#allocation67_spill] sm:$0xff] %v21639_v30  ;;  %v21643_v1 = vld [vmem:[#allocation2 + $0x132] sm:$0xff] }
 0x3a0   : > { %17726 = vmatprep.subr.msk.mxu1 %vm498_vm0, %v21622_v3  ;;  %24534 = vst [vmem:[#allocation68_spill] sm:$0xff] %v21643_v1  ;;  %v21651_v42 = vld [vmem:[#allocation2 + $0x152] sm:$0xff] }
 0x3a1   : > { %24536 = vst [vmem:[#allocation70_spill] sm:$0xff] %v21651_v42 }
 0x3a2   : > { %17632 = vmatmul.mubr.msk.f32.gmra.mrb[2].mxu1 %vm171_vm1, %v4635_v10  ;;  %v21647_v10 = vld [vmem:[#allocation2 + $0x14a] sm:$0xff] }
 0x3a3   : > { %17634 = vmatprep.mubr.msk.f32.mxu1 %vm171_vm1, %v21631_v14  ;;  %24535 = vst [vmem:[#allocation69_spill] sm:$0xff] %v21647_v10 }
 0x3a6   : > { %17635 = vmatmul.mubr.msk.f32.gmra.mrb[4].mxu1 %vm171_vm1, %v21635_v61 }
 0x3a7   : > { %17637 = vmatprep.mubr.msk.f32.mxu1 %vm171_vm1, %v21639_v30  ;;  %v21659_v30 = vld [vmem:[#allocation2 + $0x172] sm:$0xff] }
 0x3a8   : > { %24538 = vst [vmem:[#allocation72_spill] sm:$0xff] %v21659_v30 }
 0x3aa   : > { %17638 = vmatmul.mubr.msk.f32.gmra.mrb[6].mxu1 %vm171_vm1, %v21643_v1  ;;  %v21663_v1 = vld [vmem:[#allocation2 + $0x18a] sm:$0xff] }
 0x3ab   : > { %17640 = vmatprep.mubr.msk.f32.mxu1 %vm171_vm1, %v21647_v10  ;;  %24539 = vst [vmem:[#allocation73_spill] sm:$0xff] %v21663_v1  ;;  %v21667_v10 = vld [vmem:[#allocation2 + $0x192] sm:$0xff] }
 0x3ac   : > { %24540 = vst [vmem:[#allocation74_spill] sm:$0xff] %v21667_v10 }
 0x3ae   : > { %17641 = vmatmul.mubr.msk.f32.gmra.mrb[8].mxu1 %vm171_vm1, %v21651_v42  ;;  %v21671_v42 = vld [vmem:[#allocation2 + $0x1aa] sm:$0xff] }
 0x3af   : > { %17643 = vmatprep.mubr.msk.f32.mxu1 %vm171_vm1, %v21655_v59  ;;  %24541 = vst [vmem:[#allocation75_spill] sm:$0xff] %v21671_v42  ;;  %v21675_v59 = vld [vmem:[#allocation2 + $0x1b2] sm:$0xff] }
 0x3b0   : > { %24542 = vst [vmem:[#allocation76_spill] sm:$0xff] %v21675_v59 }
 0x3b2   : > { %17644 = vmatmul.mubr.msk.f32.gmra.mrb[10].mxu1 %vm171_vm1, %v21659_v30  ;;  %v21679_v30 = vld [vmem:[#allocation2 + $0x1ca] sm:$0xff] }
 0x3b3   : > { %17646 = vmatprep.mubr.msk.f32.mxu1 %vm171_vm1, %v21663_v1  ;;  %24543 = vst [vmem:[#allocation77_spill] sm:$0xff] %v21679_v30  ;;  %v21683_v1 = vld [vmem:[#allocation2 + $0x1d2] sm:$0xff] }
 0x3b4   : > { %24544 = vst [vmem:[#allocation78_spill] sm:$0xff] %v21683_v1 }
 0x3b6   : > { %17647 = vmatmul.mubr.msk.f32.gmra.mrb[12].mxu1 %vm171_vm1, %v21667_v10  ;;  %v21687_v10 = vld [vmem:[#allocation2 + $0x1ea] sm:$0xff] }
 0x3b7   : > { %17649 = vmatprep.mubr.msk.f32.mxu1 %vm171_vm1, %v21671_v42  ;;  %24545 = vst [vmem:[#allocation79_spill] sm:$0xff] %v21687_v10  ;;  %v21691_v42 = vld [vmem:[#allocation2 + $0x1f2] sm:$0xff] }
 0x3b8   : > { %24546 = vst [vmem:[#allocation80_spill] sm:$0xff] %v21691_v42 }
 0x3ba   : > { %17650 = vmatmul.mubr.msk.f32.gmra.mrb[14].mxu1 %vm171_vm1, %v21675_v59  ;;  %v21695_v59 = vld [vmem:[#allocation2 + $0x20a] sm:$0xff] }
 0x3bb   : > { %17652 = vmatprep.mubr.msk.f32.mxu1 %vm171_vm1, %v21679_v30  ;;  %24547 = vst [vmem:[#allocation81_spill] sm:$0xff] %v21695_v59  ;;  %v21699_v30 = vld [vmem:[#allocation2 + $0x212] sm:$0xff] }
 0x3bc   : > { %24548 = vst [vmem:[#allocation82_spill] sm:$0xff] %v21699_v30 }
 0x3be   : > { %17653 = vmatmul.mubr.msk.f32.gmra.mrb[16].mxu1 %vm171_vm1, %v21683_v1  ;;  %v21703_v1 = vld [vmem:[#allocation2 + $0x22a] sm:$0xff] }
 0x3bf   : > { %17655 = vmatprep.mubr.msk.f32.mxu1 %vm171_vm1, %v21687_v10  ;;  %24549 = vst [vmem:[#allocation83_spill] sm:$0xff] %v21703_v1  ;;  %v21707_v10 = vld [vmem:[#allocation2 + $0x232] sm:$0xff] }
 0x3c0   : > { %24550 = vst [vmem:[#allocation84_spill] sm:$0xff] %v21707_v10 }
 0x3c2   : > { %17656 = vmatmul.mubr.msk.f32.gmra.mrb[18].mxu1 %vm171_vm1, %v21691_v42  ;;  %v21711_v42 = vld [vmem:[#allocation2 + $0x24a] sm:$0xff] }
 0x3c3   : > { %17658 = vmatprep.mubr.msk.f32.mxu1 %vm171_vm1, %v21695_v59  ;;  %24551 = vst [vmem:[#allocation85_spill] sm:$0xff] %v21711_v42  ;;  %v21715_v59 = vld [vmem:[#allocation2 + $0x252] sm:$0xff] }
 0x3c4   : > { %24552 = vst [vmem:[#allocation86_spill] sm:$0xff] %v21715_v59 }
 0x3c6   : > { %17659 = vmatmul.mubr.msk.f32.gmra.mrb[20].mxu1 %vm171_vm1, %v21699_v30  ;;  %v21719_v30 = vld [vmem:[#allocation2 + $0x26a] sm:$0xff] }
 0x3c7   : > { %17661 = vmatprep.mubr.msk.f32.mxu1 %vm171_vm1, %v21703_v1  ;;  %24553 = vst [vmem:[#allocation87_spill] sm:$0xff] %v21719_v30  ;;  %v21723_v1 = vld [vmem:[#allocation2 + $0x272] sm:$0xff] }
 0x3ca   : > { %17662 = vmatmul.mubr.msk.f32.gmra.mrb[22].mxu1 %vm171_vm1, %v21707_v10  ;;  %v21727_v10 = vld [vmem:[#allocation2 + $0x28a] sm:$0xff] }
 0x3cb   : > { %17664 = vmatprep.mubr.msk.f32.mxu1 %vm171_vm1, %v21711_v42  ;;  %24554 = vst [vmem:[#allocation88_spill] sm:$0xff] %v21727_v10  ;;  %v21731_v42 = vld [vmem:[#allocation2 + $0x292] sm:$0xff] }
 0x3cc   : > { %24555 = vst [vmem:[#allocation89_spill] sm:$0xff] %v21731_v42 }
 0x3ce   : > { %17665 = vmatmul.mubr.msk.f32.gmra.mrb[24].mxu1 %vm171_vm1, %v21715_v59  ;;  %v21735_v59 = vld [vmem:[#allocation2 + $0x2aa] sm:$0xff] }
 0x3cf   : > { %17667 = vmatprep.mubr.msk.f32.mxu1 %vm171_vm1, %v21719_v30  ;;  %v21739_v30 = vld [vmem:[#allocation2 + $0x2b2] sm:$0xff] }
 0x3d2   : > { %17668 = vmatmul.mubr.msk.f32.gmra.mrb[26].mxu1 %vm171_vm1, %v21723_v1 }
 0x3d3   : > { %17670 = vmatprep.mubr.msk.f32.mxu1 %vm171_vm1, %v21727_v10  ;;  %v15133_v10 = vld [vmem:[%s24181_s1 + $0x38] sm:$0xf] }
 0x3d6   : > { %17671 = vmatmul.mubr.msk.f32.gmra.mrb[28].mxu1 %vm171_vm1, %v21731_v42 }
 0x3d7   : > { %17673 = vmatprep.mubr.msk.f32.mxu1 %vm171_vm1, %v21735_v59 }
 0x3da   : > { %17674 = vmatmul.mubr.msk.f32.gmra.mrb[30].mxu1 %vm171_vm1, %v21739_v30 }
 0x3db   : > { %17678 = vmatprep.mubr.msk.f32.mxu1 %vm171_vm1, %v21506_v57  ;;  %v21813_v57 = vld [vmem:[#allocation2 + $0x2e6] sm:$0xff] }
 0x3de   : > { %17679 = vmatmul.mubr.msk.f32.vlgmr.msra.gmra.mrb[0].mxu1 %vm171_vm1, %v21510_v0  ;;  %v21805_v0 = vld [vmem:[#allocation2 + $0x2c6] sm:$0xff] }
 0x3df   : > { %17727 = vmatpush3.msk.msra.mxu1 %vm498_vm0, %v21622_v3  ;;  %17681 = vmatprep.mubr.msk.f32.mxu1 %vm171_vm1, %v21514_v51  ;;  %v21809_v3 = vld [vmem:[#allocation2 + $0x2ce] sm:$0xff] }
 0x3e0   : > { %17776 = vmatprep.subr.msk.mxu1 %vm498_vm0, %v15133_v10  ;;  %v21817_v51 = vld [vmem:[#allocation2 + $0x2ee] sm:$0xff] }
 0x3e2   : > { %17682 = vmatmul.mubr.msk.f32.gmra.mrb[2].mxu1 %vm171_vm1, %v21518_v56  ;;  %v15167_v56 = vld [vmem:[%s24181_s1 + $0x3c] sm:$0xf] }
 0x3e3   : > { %17684 = vmatprep.mubr.msk.f32.mxu1 %vm171_vm1, %v21522_v34 }
 0x3e6   : > { %17685 = vmatmul.mubr.msk.f32.gmra.mrb[4].mxu1 %vm171_vm1, %v21526_v41 }
 0x3e7   : > { %17687 = vmatprep.mubr.msk.f32.mxu1 %vm171_vm1, %v21530_v32 }
 0x3ea   : > { %17688 = vmatmul.mubr.msk.f32.gmra.mrb[6].mxu1 %vm171_vm1, %v21534_v20 }
 0x3eb   : > { %17690 = vmatprep.mubr.msk.f32.mxu1 %vm171_vm1, %v21538_v63 }
 0x3ee   : > { %17691 = vmatmul.mubr.msk.f32.gmra.mrb[8].mxu1 %vm171_vm1, %v21542_v44 }
 0x3ef   : > { %17693 = vmatprep.mubr.msk.f32.mxu1 %vm171_vm1, %v21546_v23 }
 0x3f2   : > { %17694 = vmatmul.mubr.msk.f32.gmra.mrb[10].mxu1 %vm171_vm1, %v21550_v9 }
 0x3f3   : > { %17696 = vmatprep.mubr.msk.f32.mxu1 %vm171_vm1, %v21554_v45 }
 0x3f6   : > { %17697 = vmatmul.mubr.msk.f32.gmra.mrb[12].mxu1 %vm171_vm1, %v21558_v52 }
 0x3f7   : > { %17699 = vmatprep.mubr.msk.f32.mxu1 %vm171_vm1, %v21562_v37 }
 0x3fa   : > { %17700 = vmatmul.mubr.msk.f32.gmra.mrb[14].mxu1 %vm171_vm1, %v21566_v6 }
 0x3fb   : > { %17702 = vmatprep.mubr.msk.f32.mxu1 %vm171_vm1, %v21570_v28 }
 0x3fe   : > { %17703 = vmatmul.mubr.msk.f32.gmra.mrb[16].mxu1 %vm171_vm1, %v21574_v58 }
 0x3ff   : > { %17705 = vmatprep.mubr.msk.f32.mxu1 %vm171_vm1, %v21578_v53 }
 0x402   : > { %17706 = vmatmul.mubr.msk.f32.gmra.mrb[18].mxu1 %vm171_vm1, %v21582_v4 }
 0x403   : > { %17708 = vmatprep.mubr.msk.f32.mxu1 %vm171_vm1, %v21586_v46 }
 0x406   : > { %17709 = vmatmul.mubr.msk.f32.gmra.mrb[20].mxu1 %vm171_vm1, %v21590_v39 }
 0x407   : > { %17711 = vmatprep.mubr.msk.f32.mxu1 %vm171_vm1, %v21594_v36 }
 0x40a   : > { %17712 = vmatmul.mubr.msk.f32.gmra.mrb[22].mxu1 %vm171_vm1, %v21598_v25 }
 0x40b   : > { %17714 = vmatprep.mubr.msk.f32.mxu1 %vm171_vm1, %v21602_v22 }
 0x40e   : > { %17715 = vmatmul.mubr.msk.f32.gmra.mrb[24].mxu1 %vm171_vm1, %v21606_v17 }
 0x40f   : > { %17717 = vmatprep.mubr.msk.f32.mxu1 %vm171_vm1, %v21610_v7 }
 0x412   : > { %17718 = vmatmul.mubr.msk.f32.gmra.mrb[26].mxu1 %vm171_vm1, %v21614_v35 }
 0x413   : > { %17720 = vmatprep.mubr.msk.f32.mxu1 %vm171_vm1, %v21805_v0 }
 0x416   : > { %17721 = vmatmul.mubr.msk.f32.gmra.mrb[28].mxu1 %vm171_vm1, %v21809_v3 }
 0x417   : > { %17723 = vmatprep.mubr.msk.f32.mxu1 %vm171_vm1, %v21813_v57 }
 0x41a   : > { %17724 = vmatmul.mubr.msk.f32.gmra.mrb[30].mxu1 %vm171_vm1, %v21817_v51 }
 0x41b   : > { %17728 = vmatprep.mubr.msk.f32.mxu1 %vm171_vm1, %v21199_v11  ;;  %v21882_v11 = vld [vmem:[#allocation2 + $0x2c8] sm:$0xff] }
 0x41e   : > { %17729 = vmatmul.mubr.msk.f32.vlgmr.msra.gmra.mrb[0].mxu1 %vm171_vm1, %v21209_v12  ;;  %v21886_v12 = vld [vmem:[#allocation2 + $0x2d0] sm:$0xff] }
 0x41f   : > { %17777 = vmatpush3.msk.msra.mxu1 %vm498_vm0, %v15133_v10  ;;  %17731 = vmatprep.mubr.msk.f32.mxu1 %vm171_vm1, %v21221_v16  ;;  %v21890_v16 = vld [vmem:[#allocation2 + $0x2e8] sm:$0xff]  ;;  %v24567_v10 = vld [vmem:[#allocation78_spill] sm:$0xff] }
 0x420   : > { %17826 = vmatprep.subr.msk.mxu1 %vm498_vm0, %v15167_v56 }
 0x422   : > { %17732 = vmatmul.mubr.msk.f32.gmra.mrb[2].mxu1 %vm171_vm1, %v21231_v18  ;;  %v21894_v18 = vld [vmem:[#allocation2 + $0x2f0] sm:$0xff] }
 0x423   : > { %17734 = vmatprep.mubr.msk.f32.mxu1 %vm171_vm1, %v21243_v24  ;;  %v15201_v24 = vld [vmem:[%s24181_s1 + $0x40] sm:$0xf] }
 0x426   : > { %17735 = vmatmul.mubr.msk.f32.gmra.mrb[4].mxu1 %vm171_vm1, %v21253_v26  ;;  %v24556_v26 = vld [vmem:[#allocation67_spill] sm:$0xff] }
 0x427   : > { %17737 = vmatprep.mubr.msk.f32.mxu1 %vm171_vm1, %v21265_v38  ;;  %v24557_v38 = vld [vmem:[#allocation68_spill] sm:$0xff] }
 0x42a   : > { %17738 = vmatmul.mubr.msk.f32.gmra.mrb[6].mxu1 %vm171_vm1, %v21275_v40  ;;  %v24558_v40 = vld [vmem:[#allocation69_spill] sm:$0xff] }
 0x42b   : > { %17740 = vmatprep.mubr.msk.f32.mxu1 %vm171_vm1, %v21287_v48  ;;  %v24559_v48 = vld [vmem:[#allocation70_spill] sm:$0xff] }
 0x42e   : > { %17741 = vmatmul.mubr.msk.f32.gmra.mrb[8].mxu1 %vm171_vm1, %v21297_v49  ;;  %v24560_v49 = vld [vmem:[#allocation71_spill] sm:$0xff] }
 0x42f   : > { %17743 = vmatprep.mubr.msk.f32.mxu1 %vm171_vm1, %v21309_v55  ;;  %v24562_v55 = vld [vmem:[#allocation73_spill] sm:$0xff] }
 0x432   : > { %17744 = vmatmul.mubr.msk.f32.gmra.mrb[10].mxu1 %vm171_vm1, %v21319_v60  ;;  %v24563_v60 = vld [vmem:[#allocation74_spill] sm:$0xff] }
 0x433   : > { %17746 = vmatprep.mubr.msk.f32.mxu1 %vm171_vm1, %v21331_v29  ;;  %v24564_v29 = vld [vmem:[#allocation75_spill] sm:$0xff] }
 0x436   : > { %17747 = vmatmul.mubr.msk.f32.gmra.mrb[12].mxu1 %vm171_vm1, %v21341_v15  ;;  %v24565_v15 = vld [vmem:[#allocation76_spill] sm:$0xff] }
 0x437   : > { %17749 = vmatprep.mubr.msk.f32.mxu1 %vm171_vm1, %v21353_v47 }
 0x43a   : > { %17750 = vmatmul.mubr.msk.f32.gmra.mrb[14].mxu1 %vm171_vm1, %v21363_v54 }
 0x43b   : > { %17752 = vmatprep.mubr.msk.f32.mxu1 %vm171_vm1, %v21375_v21 }
 0x43e   : > { %17753 = vmatmul.mubr.msk.f32.gmra.mrb[16].mxu1 %vm171_vm1, %v21385_v2 }
 0x43f   : > { %17755 = vmatprep.mubr.msk.f32.mxu1 %vm171_vm1, %v21397_v50 }
 0x442   : > { %17756 = vmatmul.mubr.msk.f32.gmra.mrb[18].mxu1 %vm171_vm1, %v21407_v43 }
 0x443   : > { %17758 = vmatprep.mubr.msk.f32.mxu1 %vm171_vm1, %v21419_v27 }
 0x446   : > { %17759 = vmatmul.mubr.msk.f32.gmra.mrb[20].mxu1 %vm171_vm1, %v21429_v19 }
 0x447   : > { %17761 = vmatprep.mubr.msk.f32.mxu1 %vm171_vm1, %v21441_v13 }
 0x44a   : > { %17762 = vmatmul.mubr.msk.f32.gmra.mrb[22].mxu1 %vm171_vm1, %v21451_v33 }
 0x44b   : > { %17764 = vmatprep.mubr.msk.f32.mxu1 %vm171_vm1, %v21463_v8 }
 0x44e   : > { %17765 = vmatmul.mubr.msk.f32.gmra.mrb[24].mxu1 %vm171_vm1, %v21473_v62 }
 0x44f   : > { %17767 = vmatprep.mubr.msk.f32.mxu1 %vm171_vm1, %v21482_v5 }
 0x452   : > { %17768 = vmatmul.mubr.msk.f32.gmra.mrb[26].mxu1 %vm171_vm1, %v21489_v31 }
 0x453   : > { %17770 = vmatprep.mubr.msk.f32.mxu1 %vm171_vm1, %v21882_v11 }
 0x456   : > { %17771 = vmatmul.mubr.msk.f32.gmra.mrb[28].mxu1 %vm171_vm1, %v21886_v12 }
 0x457   : > { %17773 = vmatprep.mubr.msk.f32.mxu1 %vm171_vm1, %v21890_v16 }
 0x45a   : > { %17774 = vmatmul.mubr.msk.f32.gmra.mrb[30].mxu1 %vm171_vm1, %v21894_v18 }
 0x45b   : > { %17778 = vmatprep.mubr.msk.f32.mxu1 %vm171_vm1, %v21631_v14  ;;  %v24566_v14 = vld [vmem:[#allocation77_spill] sm:$0xff] }
 0x45e   : > { %17779 = vmatmul.mubr.msk.f32.vlgmr.msra.gmra.mrb[0].mxu1 %vm171_vm1, %v21635_v61  ;;  %v24561_v61 = vld [vmem:[#allocation72_spill] sm:$0xff] }
 0x45f   : > { %17827 = vmatpush3.msk.msra.mxu1 %vm498_vm0, %v15167_v56  ;;  %17781 = vmatprep.mubr.msk.f32.mxu1 %vm171_vm1, %v24556_v26  ;;  %v24568_v56 = vld [vmem:[#allocation79_spill] sm:$0xff]  ;;  %v24569_v26 = vld [vmem:[#allocation80_spill] sm:$0xff] }
 0x460   : > { %17876 = vmatprep.subr.msk.mxu1 %vm498_vm0, %v15201_v24 }
 0x462   : > { %17782 = vmatmul.mubr.msk.f32.gmra.mrb[2].mxu1 %vm171_vm1, %v24557_v38  ;;  %v24570_v38 = vld [vmem:[#allocation81_spill] sm:$0xff] }
 0x463   : > { %17784 = vmatprep.mubr.msk.f32.mxu1 %vm171_vm1, %v24558_v40 }
 0x466   : > { %17785 = vmatmul.mubr.msk.f32.gmra.mrb[4].mxu1 %vm171_vm1, %v24559_v48 }
 0x467   : > { %17787 = vmatprep.mubr.msk.f32.mxu1 %vm171_vm1, %v24560_v49 }
 0x46a   : > { %17788 = vmatmul.mubr.msk.f32.gmra.mrb[6].mxu1 %vm171_vm1, %v24561_v61 }
 0x46b   : > { %17790 = vmatprep.mubr.msk.f32.mxu1 %vm171_vm1, %v24562_v55 }
 0x46e   : > { %17791 = vmatmul.mubr.msk.f32.gmra.mrb[8].mxu1 %vm171_vm1, %v24563_v60  ;;  %v24571_v60 = vld [vmem:[#allocation82_spill] sm:$0xff] }
 0x46f   : > { %17793 = vmatprep.mubr.msk.f32.mxu1 %vm171_vm1, %v24564_v29  ;;  %v24572_v29 = vld [vmem:[#allocation83_spill] sm:$0xff] }
 0x472   : > { %17794 = vmatmul.mubr.msk.f32.gmra.mrb[10].mxu1 %vm171_vm1, %v24565_v15  ;;  %v24573_v15 = vld [vmem:[#allocation84_spill] sm:$0xff] }
 0x473   : > { %17796 = vmatprep.mubr.msk.f32.mxu1 %vm171_vm1, %v24566_v14  ;;  %v24574_v14 = vld [vmem:[#allocation85_spill] sm:$0xff] }
 0x476   : > { %17797 = vmatmul.mubr.msk.f32.gmra.mrb[12].mxu1 %vm171_vm1, %v24567_v10  ;;  %v24575_v10 = vld [vmem:[#allocation86_spill] sm:$0xff] }
 0x477   : > { %17799 = vmatprep.mubr.msk.f32.mxu1 %vm171_vm1, %v24568_v56  ;;  %v24576_v56 = vld [vmem:[#allocation87_spill] sm:$0xff] }
 0x47a   : > { %17800 = vmatmul.mubr.msk.f32.gmra.mrb[14].mxu1 %vm171_vm1, %v24569_v26 }
 0x47b   : > { %17802 = vmatprep.mubr.msk.f32.mxu1 %vm171_vm1, %v24570_v38  ;;  %v24577_v38 = vld [vmem:[#allocation88_spill] sm:$0xff] }
 0x47e   : > { %17803 = vmatmul.mubr.msk.f32.gmra.mrb[16].mxu1 %vm171_vm1, %v24571_v60 }
 0x47f   : > { %17805 = vmatprep.mubr.msk.f32.mxu1 %vm171_vm1, %v24572_v29 }
 0x482   : > { %17806 = vmatmul.mubr.msk.f32.gmra.mrb[18].mxu1 %vm171_vm1, %v24573_v15 }
 0x483   : > { %17808 = vmatprep.mubr.msk.f32.mxu1 %vm171_vm1, %v24574_v14  ;;  %v21959_v14 = vld [vmem:[#allocation2 + $0x2ca] sm:$0xff] }
 0x484   : > { %24578 = vst [vmem:[#allocation67_spill] sm:$0xff] %v21959_v14 }
 0x486   : > { %17809 = vmatmul.mubr.msk.f32.gmra.mrb[20].mxu1 %vm171_vm1, %v24575_v10 }
 0x487   : > { %17811 = vmatprep.mubr.msk.f32.mxu1 %vm171_vm1, %v24576_v56  ;;  %v21963_v56 = vld [vmem:[#allocation2 + $0x2d2] sm:$0xff] }
 0x48a   : > { %17812 = vmatmul.mubr.msk.f32.gmra.mrb[22].mxu1 %vm171_vm1, %v21723_v1 }
 0x48b   : > { %17814 = vmatprep.mubr.msk.f32.mxu1 %vm171_vm1, %v24577_v38  ;;  %v21967_v38 = vld [vmem:[#allocation2 + $0x2ea] sm:$0xff] }
 0x48e   : > { %17815 = vmatmul.mubr.msk.f32.gmra.mrb[24].mxu1 %vm171_vm1, %v21731_v42  ;;  %v21971_v42 = vld [vmem:[#allocation2 + $0x2f2] sm:$0xff] }
 0x48f   : > { %17817 = vmatprep.mubr.msk.f32.mxu1 %vm171_vm1, %v21735_v59 }
 0x492   : > { %17818 = vmatmul.mubr.msk.f32.gmra.mrb[26].mxu1 %vm171_vm1, %v21739_v30 }
 0x493   : > { %17820 = vmatprep.mubr.msk.f32.mxu1 %vm171_vm1, %v21959_v14  ;;  %v15235_v14 = vld [vmem:[%s24181_s1 + $0x44] sm:$0xf] }
 0x496   : > { %17821 = vmatmul.mubr.msk.f32.gmra.mrb[28].mxu1 %vm171_vm1, %v21963_v56 }
 0x497   : > { %17823 = vmatprep.mubr.msk.f32.mxu1 %vm171_vm1, %v21967_v38 }
 0x49a   : > { %17824 = vmatmul.mubr.msk.f32.gmra.mrb[30].mxu1 %vm171_vm1, %v21971_v42 }
 0x49b   : > { %17828 = vmatprep.mubr.msk.f32.mxu1 %vm171_vm1, %v21522_v34  ;;  %v7004_v34 = vld [vmem:[#allocation2 + $0x332] sm:$0xff] }
 0x49e   : > { %17829 = vmatmul.mubr.msk.f32.vlgmr.msra.gmra.mrb[0].mxu1 %vm171_vm1, %v21526_v41  ;;  %v7533_v41 = vld [vmem:[#allocation2 + $0xa8] sm:$0xff] }
 0x49f   : > { %17877 = vmatpush3.msk.msra.mxu1 %vm498_vm0, %v15201_v24  ;;  %17831 = vmatprep.mubr.msk.f32.mxu1 %vm171_vm1, %v21530_v32  ;;  %v24590_v32 = vld [vmem:[#allocation67_spill] sm:$0xff]  ;;  %v24591_v24 = vld [vmem:[#allocation4_spill] sm:$0xff] }
 0x4a0   : > { %17926 = vmatprep.subr.msk.mxu1 %vm498_vm0, %v15235_v14 }
 0x4a2   : > { %17832 = vmatmul.mubr.msk.f32.gmra.mrb[2].mxu1 %vm171_vm1, %v21534_v20  ;;  %v6221_v20 = vld [vmem:[#allocation2 + $0x306] sm:$0xff] }
 0x4a3   : > { %17834 = vmatprep.mubr.msk.f32.mxu1 %vm171_vm1, %v21538_v63  ;;  %v24589_v63 = vld [vmem:[#allocation89_spill] sm:$0xff] }
 0x4a6   : > { %17835 = vmatmul.mubr.msk.f32.gmra.mrb[4].mxu1 %vm171_vm1, %v21542_v44  ;;  %v7532_v44 = vld [vmem:[#allocation2 + $0x90] sm:$0xff] }
 0x4a7   : > { %17837 = vmatprep.mubr.msk.f32.mxu1 %vm171_vm1, %v21546_v23  ;;  %v24588_v23 = vld [vmem:[#allocation88_spill] sm:$0xff] }
 0x4aa   : > { %17838 = vmatmul.mubr.msk.f32.gmra.mrb[6].mxu1 %vm171_vm1, %v21550_v9  ;;  %v6588_v9 = vld [vmem:[#allocation2 + $0x190] sm:$0xff] }
 0x4ab   : > { %17840 = vmatprep.mubr.msk.f32.mxu1 %vm171_vm1, %v21554_v45  ;;  %v24587_v45 = vld [vmem:[#allocation87_spill] sm:$0xff] }
 0x4ae   : > { %17841 = vmatmul.mubr.msk.f32.gmra.mrb[8].mxu1 %vm171_vm1, %v21558_v52  ;;  %v6592_v52 = vld [vmem:[#allocation2 + $0x1d0] sm:$0xff] }
 0x4af   : > { %17843 = vmatprep.mubr.msk.f32.mxu1 %vm171_vm1, %v21562_v37  ;;  %v6591_v37 = vld [vmem:[#allocation2 + $0x1c8] sm:$0xff] }
 0x4b2   : > { %17844 = vmatmul.mubr.msk.f32.gmra.mrb[10].mxu1 %vm171_vm1, %v21566_v6  ;;  %v6590_v6 = vld [vmem:[#allocation2 + $0x1b0] sm:$0xff] }
 0x4b3   : > { %17846 = vmatprep.mubr.msk.f32.mxu1 %vm171_vm1, %v21570_v28  ;;  %v6589_v28 = vld [vmem:[#allocation2 + $0x1a8] sm:$0xff] }
 0x4b6   : > { %17847 = vmatmul.mubr.msk.f32.gmra.mrb[12].mxu1 %vm171_vm1, %v21574_v58  ;;  %v6587_v58 = vld [vmem:[#allocation2 + $0x188] sm:$0xff] }
 0x4b7   : > { %17849 = vmatprep.mubr.msk.f32.mxu1 %vm171_vm1, %v21578_v53  ;;  %v6586_v53 = vld [vmem:[#allocation2 + $0x170] sm:$0xff] }
 0x4ba   : > { %17850 = vmatmul.mubr.msk.f32.gmra.mrb[14].mxu1 %vm171_vm1, %v21582_v4  ;;  %v6585_v4 = vld [vmem:[#allocation2 + $0x168] sm:$0xff] }
 0x4bb   : > { %17852 = vmatprep.mubr.msk.f32.mxu1 %vm171_vm1, %v21586_v46  ;;  %v6584_v46 = vld [vmem:[#allocation2 + $0x150] sm:$0xff] }
 0x4be   : > { %17853 = vmatmul.mubr.msk.f32.gmra.mrb[16].mxu1 %vm171_vm1, %v21590_v39  ;;  %v15270_v39 = vld [vmem:[%s24181_s1 + $0x48] sm:$0xf] }
 0x4bf   : > { %17855 = vmatprep.mubr.msk.f32.mxu1 %vm171_vm1, %v21594_v36  ;;  %v7531_v36 = vld [vmem:[#allocation2 + $0x88] sm:$0xff] }
 0x4c0   : > { %17978 = vmatprep.mubr.msk.f32.mxu0 %vm171_vm1, %v7531_v36 }
 0x4c2   : > { %17856 = vmatmul.mubr.msk.f32.gmra.mrb[18].mxu1 %vm171_vm1, %v21598_v25  ;;  %v15271_v25 = vld [vmem:[%s24181_s1 + $0x4c] sm:$0xf] }
 0x4c3   : > { %17858 = vmatprep.mubr.msk.f32.mxu1 %vm171_vm1, %v21602_v22  ;;  %v6583_v22 = vld [vmem:[#allocation2 + $0x148] sm:$0xff]  ;;  %17976 = vmatprep.subr.msk.mxu0 %vm498_vm0, %v15271_v25 }
 0x4c4   : > { %17977 = vmatpush3.msk.msra.mxu0 %vm498_vm0, %v15271_v25 }
 0x4c5   : > { %18026 = vmatprep.subr.msk.mxu0 %vm498_vm0, %v15270_v39  ;;  %17979 = vmatmul.mubr.msk.f32.vlgmr.msra.gmra.mrb[32].mxu0 %vm171_vm1, %v7532_v44  ;;  %v24603_v44 = vld [vmem:[#allocation56_spill] sm:$0xff] }
 0x4c6   : > { %17859 = vmatmul.mubr.msk.f32.gmra.mrb[20].mxu1 %vm171_vm1, %v21606_v17  ;;  %v6222_v17 = vld [vmem:[#allocation2 + $0x30e] sm:$0xff]  ;;  %18027 = vmatpush3.msk.msra.mxu0 %vm498_vm0, %v15270_v39 }
 0x4c7   : > { %17861 = vmatprep.mubr.msk.f32.mxu1 %vm171_vm1, %v21610_v7  ;;  %v6223_v7 = vld [vmem:[#allocation2 + $0x326] sm:$0xff]  ;;  %17981 = vmatprep.mubr.msk.f32.mxu0 %vm171_vm1, %v7533_v41  ;;  %v24602_v39 = vld [vmem:[#allocation5_spill] sm:$0xff] }
 0x4ca   : > { %17862 = vmatmul.mubr.msk.f32.gmra.mrb[22].mxu1 %vm171_vm1, %v21614_v35  ;;  %v6224_v35 = vld [vmem:[#allocation2 + $0x32e] sm:$0xff] }
 0x4cb   : > { %17864 = vmatprep.mubr.msk.f32.mxu1 %vm171_vm1, %v21805_v0  ;;  %v7537_v0 = vld [vmem:[#allocation2 + $0xe8] sm:$0xff] }
 0x4ce   : > { %17865 = vmatmul.mubr.msk.f32.gmra.mrb[24].mxu1 %vm171_vm1, %v21809_v3  ;;  %v7538_v3 = vld [vmem:[#allocation2 + $0xf0] sm:$0xff] }
 0x4cf   : > { %17867 = vmatprep.mubr.msk.f32.mxu1 %vm171_vm1, %v21813_v57  ;;  %v22172_v57 = vld [vmem:[%s24181_s1 + $0x50] sm:$0xf] }
 0x4d0   : > { %18076 = vmatprep.subr.msk.mxu0 %vm498_vm0, %v22172_v57 }
 0x4d2   : > { %17868 = vmatmul.mubr.msk.f32.gmra.mrb[26].mxu1 %vm171_vm1, %v21817_v51  ;;  %v22179_v51 = vld [vmem:[%s24182_s2 + $0x1] ss:$0 sm:$0xff] }
 0x4d3   : > { %17870 = vmatprep.mubr.msk.f32.mxu1 %vm171_vm1, %v6221_v20 }
 0x4d6   : > { %17871 = vmatmul.mubr.msk.f32.gmra.mrb[28].mxu1 %vm171_vm1, %v6222_v17 }
 0x4d7   : > { %17873 = vmatprep.mubr.msk.f32.mxu1 %vm171_vm1, %v6223_v7  ;;  %v24599_v7 = vld [vmem:[#allocation6_spill] sm:$0xff] }
 0x4da   : > { %17874 = vmatmul.mubr.msk.f32.gmra.mrb[30].mxu1 %vm171_vm1, %v6224_v35  ;;  %v24600_v35 = vld [vmem:[#allocation54_spill] sm:$0xff] }
 0x4db   : > { %17878 = vmatprep.mubr.msk.f32.mxu1 %vm171_vm1, %v6583_v22  ;;  %v24601_v22 = vmax.f32 %v24600_v35, 0.0 }
 0x4dd   : > { %v3854_v25 = vadd.f32 %v24601_v22, %v24599_v7 }
 0x4de   : > { %17879 = vmatmul.mubr.msk.f32.vlgmr.msra.gmra.mrb[0].mxu1 %vm171_vm1, %v6584_v46  ;;  %v24604_v46 = vmax.f32 %v24603_v44, 0.0 }
 0x4df   : > { %17927 = vmatpush3.msk.msra.mxu1 %vm498_vm0, %v15235_v14  ;;  %17881 = vmatprep.mubr.msk.f32.mxu1 %vm171_vm1, %v6585_v4 }
 0x4e0   : > { %v3853_v4 = vadd.f32 %v24604_v46, %v24602_v39 }
 0x4e2   : > { %17882 = vmatmul.mubr.msk.f32.gmra.mrb[2].mxu1 %vm171_vm1, %v6586_v53 }
 0x4e3   : > { %17884 = vmatprep.mubr.msk.f32.mxu1 %vm171_vm1, %v6587_v58 }
 0x4e6   : > { %17885 = vmatmul.mubr.msk.f32.gmra.mrb[4].mxu1 %vm171_vm1, %v6588_v9 }
 0x4e7   : > { %17887 = vmatprep.mubr.msk.f32.mxu1 %vm171_vm1, %v6589_v28 }
 0x4ea   : > { %17888 = vmatmul.mubr.msk.f32.gmra.mrb[6].mxu1 %vm171_vm1, %v6590_v6 }
 0x4eb   : > { %17890 = vmatprep.mubr.msk.f32.mxu1 %vm171_vm1, %v6591_v37 }
 0x4ee   : > { %17891 = vmatmul.mubr.msk.f32.gmra.mrb[8].mxu1 %vm171_vm1, %v6592_v52 }
 0x4ef   : > { %17893 = vmatprep.mubr.msk.f32.mxu1 %vm171_vm1, %v21353_v47  ;;  %v24585_v47 = vld [vmem:[#allocation81_spill] sm:$0xff] }
 0x4f2   : > { %17894 = vmatmul.mubr.msk.f32.gmra.mrb[10].mxu1 %vm171_vm1, %v21363_v54  ;;  %v24586_v54 = vld [vmem:[#allocation85_spill] sm:$0xff] }
 0x4f3   : > { %17896 = vmatprep.mubr.msk.f32.mxu1 %vm171_vm1, %v21375_v21  ;;  %v24584_v21 = vld [vmem:[#allocation79_spill] sm:$0xff] }
 0x4f6   : > { %17897 = vmatmul.mubr.msk.f32.gmra.mrb[12].mxu1 %vm171_vm1, %v21385_v2  ;;  %v24583_v2 = vld [vmem:[#allocation78_spill] sm:$0xff] }
 0x4f7   : > { %17899 = vmatprep.mubr.msk.f32.mxu1 %vm171_vm1, %v21397_v50  ;;  %v24582_v50 = vld [vmem:[#allocation77_spill] sm:$0xff] }
 0x4fa   : > { %17900 = vmatmul.mubr.msk.f32.gmra.mrb[14].mxu1 %vm171_vm1, %v21407_v43  ;;  %v24581_v43 = vld [vmem:[#allocation76_spill] sm:$0xff] }
 0x4fb   : > { %17902 = vmatprep.mubr.msk.f32.mxu1 %vm171_vm1, %v21419_v27  ;;  %v24580_v27 = vld [vmem:[#allocation75_spill] sm:$0xff] }
 0x4fe   : > { %17903 = vmatmul.mubr.msk.f32.gmra.mrb[16].mxu1 %vm171_vm1, %v21429_v19  ;;  %v24579_v19 = vld [vmem:[#allocation74_spill] sm:$0xff] }
 0x4ff   : > { %17905 = vmatprep.mubr.msk.f32.mxu1 %vm171_vm1, %v21441_v13  ;;  %v6614_v13 = vld [vmem:[#allocation2 + $0x330] sm:$0xff] }
 0x502   : > { %17906 = vmatmul.mubr.msk.f32.gmra.mrb[18].mxu1 %vm171_vm1, %v21451_v33  ;;  %v6611_v33 = vld [vmem:[#allocation2 + $0x308] sm:$0xff] }
 0x503   : > { %17908 = vmatprep.mubr.msk.f32.mxu1 %vm171_vm1, %v21463_v8  ;;  %v6613_v8 = vld [vmem:[#allocation2 + $0x328] sm:$0xff] }
 0x506   : > { %17909 = vmatmul.mubr.msk.f32.gmra.mrb[20].mxu1 %vm171_vm1, %v21473_v62  ;;  %v6612_v62 = vld [vmem:[#allocation2 + $0x310] sm:$0xff] }
 0x507   : > { %17911 = vmatprep.mubr.msk.f32.mxu1 %vm171_vm1, %v21482_v5  ;;  %v7001_v5 = vld [vmem:[#allocation2 + $0x30a] sm:$0xff] }
 0x50a   : > { %17912 = vmatmul.mubr.msk.f32.gmra.mrb[22].mxu1 %vm171_vm1, %v21489_v31  ;;  %v7002_v31 = vld [vmem:[#allocation2 + $0x312] sm:$0xff] }
 0x50b   : > { %17914 = vmatprep.mubr.msk.f32.mxu1 %vm171_vm1, %v21882_v11 }
 0x50e   : > { %17915 = vmatmul.mubr.msk.f32.gmra.mrb[24].mxu1 %vm171_vm1, %v21886_v12 }
 0x50f   : > { %17917 = vmatprep.mubr.msk.f32.mxu1 %vm171_vm1, %v21890_v16 }
 0x512   : > { %17918 = vmatmul.mubr.msk.f32.gmra.mrb[26].mxu1 %vm171_vm1, %v21894_v18 }
 0x513   : > { %17920 = vmatprep.mubr.msk.f32.mxu1 %vm171_vm1, %v6611_v33  ;;  %v24607_v33 = vld [vmem:[#allocation8_spill] sm:$0xff] }
 0x516   : > { %17921 = vmatmul.mubr.msk.f32.gmra.mrb[28].mxu1 %vm171_vm1, %v6612_v62  ;;  %v24608_v62 = vld [vmem:[#allocation58_spill] sm:$0xff] }
 0x517   : > { %17923 = vmatprep.mubr.msk.f32.mxu1 %vm171_vm1, %v6613_v8  ;;  %v24609_v8 = vmax.f32 %v24608_v62, 0.0  ;;  %v24634_v62 = vld [vmem:[#allocation13_spill] sm:$0xff] }
 0x51a   : > { %17924 = vmatmul.mubr.msk.f32.gmra.mrb[30].mxu1 %vm171_vm1, %v6614_v13  ;;  %v3856_v13 = vadd.f32 %v24609_v8, %v24607_v33  ;;  %v24635_v8 = vld [vmem:[#allocation36_spill] sm:$0xff] }
 0x51b   : > { %17928 = vmatprep.mubr.msk.f32.mxu1 %vm171_vm1, %v24558_v40  ;;  %v24592_v40 = vld [vmem:[#allocation39_spill] sm:$0xff] }
 0x51e   : > { %17929 = vmatmul.mubr.msk.f32.vlgmr.msra.gmra.mrb[0].mxu1 %vm171_vm1, %v24559_v48  ;;  %v24593_v48 = vmax.f32 %v24592_v40, 0.0 }
 0x51f   : > { %17931 = vmatprep.mubr.msk.f32.mxu1 %vm171_vm1, %v24560_v49 }
 0x520   : > { %v3852_v49 = vadd.f32 %v24593_v48, %v24591_v24 }
 0x522   : > { %17932 = vmatmul.mubr.msk.f32.gmra.mrb[2].mxu1 %vm171_vm1, %v24561_v61 }
 0x523   : > { %17934 = vmatprep.mubr.msk.f32.mxu1 %vm171_vm1, %v24562_v55  ;;  %v24594_v55 = vld [vmem:[#allocation3_spill] sm:$0xff] }
 0x526   : > { %17935 = vmatmul.mubr.msk.f32.gmra.mrb[4].mxu1 %vm171_vm1, %v24579_v19 }
 0x527   : > { %17937 = vmatprep.mubr.msk.f32.mxu1 %vm171_vm1, %v24580_v27  ;;  %v24610_v27 = vld [vmem:[#allocation7_spill] sm:$0xff] }
 0x52a   : > { %17938 = vmatmul.mubr.msk.f32.gmra.mrb[6].mxu1 %vm171_vm1, %v24581_v43  ;;  %v24611_v43 = vld [vmem:[#allocation59_spill] sm:$0xff] }
 0x52b   : > { %17940 = vmatprep.mubr.msk.f32.mxu1 %vm171_vm1, %v24582_v50  ;;  %v24612_v50 = vmax.f32 %v24611_v43, 0.0 }
 0x52e   : > { %17941 = vmatmul.mubr.msk.f32.gmra.mrb[8].mxu1 %vm171_vm1, %v24583_v2  ;;  %v3855_v2 = vadd.f32 %v24612_v50, %v24610_v27 }
 0x52f   : > { %17943 = vmatprep.mubr.msk.f32.mxu1 %vm171_vm1, %v24584_v21 }
 0x532   : > { %17944 = vmatmul.mubr.msk.f32.gmra.mrb[10].mxu1 %vm171_vm1, %v24569_v26 }
 0x533   : > { %17946 = vmatprep.mubr.msk.f32.mxu1 %vm171_vm1, %v24585_v47 }
 0x536   : > { %17947 = vmatmul.mubr.msk.f32.gmra.mrb[12].mxu1 %vm171_vm1, %v24571_v60  ;;  %v24595_v60 = vld [vmem:[#allocation40_spill] sm:$0xff] }
 0x537   : > { %17949 = vmatprep.mubr.msk.f32.mxu1 %vm171_vm1, %v24572_v29  ;;  %v24596_v29 = vmax.f32 %v24595_v60, 0.0  ;;  %v24623_v60 = vld [vmem:[#allocation12_spill] sm:$0xff] }
 0x53a   : > { %17950 = vmatmul.mubr.msk.f32.gmra.mrb[14].mxu1 %vm171_vm1, %v24573_v15  ;;  %v3851_v15 = vadd.f32 %v24596_v29, %v24594_v55  ;;  %v24624_v29 = vld [vmem:[#allocation33_spill] sm:$0xff] }
 0x53b   : > { %17952 = vmatprep.mubr.msk.f32.mxu1 %vm171_vm1, %v24586_v54 }
 0x53e   : > { %17953 = vmatmul.mubr.msk.f32.gmra.mrb[16].mxu1 %vm171_vm1, %v24575_v10 }
 0x53f   : > { %17955 = vmatprep.mubr.msk.f32.mxu1 %vm171_vm1, %v24587_v45 }
 0x542   : > { %17956 = vmatmul.mubr.msk.f32.gmra.mrb[18].mxu1 %vm171_vm1, %v21723_v1  ;;  %v7535_v1 = vld [vmem:[#allocation2 + $0xc8] sm:$0xff] }
 0x543   : > { %17958 = vmatprep.mubr.msk.f32.mxu1 %vm171_vm1, %v24588_v23 }
 0x546   : > { %17959 = vmatmul.mubr.msk.f32.gmra.mrb[20].mxu1 %vm171_vm1, %v24589_v63 }
 0x547   : > { %17961 = vmatprep.mubr.msk.f32.mxu1 %vm171_vm1, %v21735_v59  ;;  %v7003_v59 = vld [vmem:[#allocation2 + $0x32a] sm:$0xff] }
 0x54a   : > { %17962 = vmatmul.mubr.msk.f32.gmra.mrb[22].mxu1 %vm171_vm1, %v21739_v30  ;;  %v7534_v30 = vld [vmem:[#allocation2 + $0xb0] sm:$0xff] }
 0x54b   : > { %17964 = vmatprep.mubr.msk.f32.mxu1 %vm171_vm1, %v24590_v32  ;;  %17982 = vmatmul.mubr.msk.f32.gmra.mrb[34].mxu0 %vm171_vm1, %v7534_v30 }
 0x54c   : > { %17984 = vmatprep.mubr.msk.f32.mxu0 %vm171_vm1, %v7535_v1 }
 0x54e   : > { %17965 = vmatmul.mubr.msk.f32.gmra.mrb[24].mxu1 %vm171_vm1, %v21963_v56 }
 0x54f   : > { %17967 = vmatprep.mubr.msk.f32.mxu1 %vm171_vm1, %v21967_v38 }
 0x552   : > { %17968 = vmatmul.mubr.msk.f32.gmra.mrb[26].mxu1 %vm171_vm1, %v21971_v42  ;;  %v7536_v42 = vld [vmem:[#allocation2 + $0xd0] sm:$0xff] }
 0x553   : > { %17970 = vmatprep.mubr.msk.f32.mxu1 %vm171_vm1, %v7001_v5  ;;  %17985 = vmatmul.mubr.msk.f32.gmra.mrb[36].mxu0 %vm171_vm1, %v7536_v42  ;;  %v24618_v42 = vld [vmem:[#allocation9_spill] sm:$0xff] }
 0x554   : > { %17987 = vmatprep.mubr.msk.f32.mxu0 %vm171_vm1, %v7537_v0  ;;  %v24619_v0 = vld [vmem:[#allocation63_spill] sm:$0xff] }
 0x556   : > { %17971 = vmatmul.mubr.msk.f32.gmra.mrb[28].mxu1 %vm171_vm1, %v7002_v31 }
 0x557   : > { %17973 = vmatprep.mubr.msk.f32.mxu1 %vm171_vm1, %v7003_v59  ;;  %17988 = vmatmul.mubr.msk.f32.gmra.mrb[38].mxu0 %vm171_vm1, %v7538_v3  ;;  %v24615_v59 = vld [vmem:[#allocation10_spill] sm:$0xff]  ;;  %v24620_v3 = vmax.f32 %v24619_v0, 0.0 }
 0x558   : > { %v24643_v0 = vld [vmem:[#allocation66_spill] sm:$0xff] }
 0x55a   : > { %17974 = vmatmul.mubr.msk.f32.gmra.mrb[30].mxu1 %vm171_vm1, %v7004_v34  ;;  %v24616_v34 = vld [vmem:[#allocation61_spill] sm:$0xff] }
 0x55b   : > { %v24617_v41 = vmax.f32 %v24616_v34, 0.0  ;;  %v24640_v34 = vld [vmem:[#allocation65_spill] sm:$0xff] }
 0x55d   : > { %v3858_v30 = vadd.f32 %v24617_v41, %v24615_v59  ;;  %v24639_v59 = vld [vmem:[#allocation16_spill] sm:$0xff]  ;;  %v24641_v41 = vmax.f32 %v24640_v34, 0.0 }
 0x5f1   : > { %v17930_v11 = vpop.f32.mrb[0].mxu1 }
 0x5f2   : > { %v7369_v12 = vadd.f32 %v17930_v11, %v22179_v51  ;;  %v7172_v16 = vpop.f32.mrb[1].mxu1  ;;  %v3857_v11 = vadd.f32 %v24620_v3, %v24618_v42  ;;  %v24642_v42 = vld [vmem:[#allocation15_spill] sm:$0xff]  ;;  %v24644_v3 = vmax.f32 %v24643_v0, 0.0 }
 0x5f3   : > { %v7368_v18 = vadd.f32 %v22179_v51, %v7172_v16 }
 0x5f4   : > { %v7401_v61 = vmax.f32 %v7369_v12, 0.0 }
 0x5f5   : > { %v7400_v14 = vmax.f32 %v7368_v18, 0.0  ;;  %v17933_v10 = vpop.f32.mrb[2].mxu1 }
 0x5f6   : > { %v22189_v56 = vadd.f32 %v7401_v61, %v3852_v49  ;;  %7465 = vst.msk [vmem:[#allocation2 + $0x110] sm:$0xff] %vm171_vm1, %v7401_v61  ;;  %v7371_v26 = vadd.f32 %v17933_v10, %v22179_v51  ;;  %v7182_v38 = vpop.f32.mrb[3].mxu1 }
 0x5f7   : > { %v22193_v20 = vadd.f32 %v7400_v14, %v3851_v15  ;;  %7464 = vst.msk [vmem:[#allocation2 + $0x108] sm:$0xff] %vm171_vm1, %v7400_v14  ;;  %v7370_v17 = vadd.f32 %v22179_v51, %v7182_v38  ;;  %v24625_v15 = vmax.f32 %v24624_v29, 0.0  ;;  %v24627_v38 = vld [vmem:[#allocation34_spill] sm:$0xff] }
 0x5f8   : > { %24597 = vst [vmem:[#allocation68_spill] sm:$0xff] %v22189_v56  ;;  %v7403_v36 = vmax.f32 %v7371_v26, 0.0  ;;  %v24626_v26 = vld [vmem:[#allocation11_spill] sm:$0xff] }
 0x5f9   : > { %24598 = vst [vmem:[#allocation69_spill] sm:$0xff] %v22193_v20  ;;  %v7402_v53 = vmax.f32 %v7370_v17, 0.0  ;;  %v17936_v58 = vpop.f32.mrb[4].mxu1  ;;  %v3860_v14 = vadd.f32 %v24625_v15, %v24623_v60  ;;  %v24628_v17 = vmax.f32 %v24627_v38, 0.0 }
 0x5fa   : > { %v22203_v9 = vadd.f32 %v7403_v36, %v3854_v25  ;;  %7467 = vst.msk [vmem:[#allocation2 + $0x130] sm:$0xff] %vm171_vm1, %v7403_v36  ;;  %v7373_v28 = vadd.f32 %v17936_v58, %v22179_v51  ;;  %v7192_v6 = vpop.f32.mrb[5].mxu1  ;;  %v24631_v58 = vld [vmem:[#allocation14_spill] sm:$0xff] }
 0x5fb   : > { %v22207_v37 = vadd.f32 %v7402_v53, %v3853_v4  ;;  %7466 = vst.msk [vmem:[#allocation2 + $0x128] sm:$0xff] %vm171_vm1, %v7402_v53  ;;  %v7372_v52 = vadd.f32 %v22179_v51, %v7192_v6  ;;  %v3859_v7 = vadd.f32 %v24628_v17, %v24626_v26  ;;  %v24648_v26 = vld [vmem:[#allocation41_spill] sm:$0xff] }
 0x5fc   : > { %24605 = vst [vmem:[#allocation70_spill] sm:$0xff] %v22203_v9  ;;  %v7405_v19 = vmax.f32 %v7373_v28, 0.0  ;;  %v24632_v28 = vld [vmem:[#allocation35_spill] sm:$0xff]  ;;  %v24649_v38 = vmax.f32 %v24648_v26, 0.0  ;;  %v15440_v9 = vld [vmem:[%s24181_s1 + $0x5c] sm:$0xf] }
 0x5fd   : > { %24606 = vst [vmem:[#allocation71_spill] sm:$0xff] %v22207_v37  ;;  %v7404_v21 = vmax.f32 %v7372_v52, 0.0  ;;  %v17939_v47 = vpop.f32.mrb[6].mxu1  ;;  %v22229_v31 = vld [vmem:[#allocation2 + $0x110] sm:$0xff]  ;;  %v24633_v6 = vmax.f32 %v24632_v28, 0.0 }
 0x5fe   : > { %v22217_v54 = vadd.f32 %v7405_v19, %v3856_v13  ;;  %7469 = vst.msk [vmem:[#allocation2 + $0x150] sm:$0xff] %vm171_vm1, %v7405_v19  ;;  %v7375_v45 = vadd.f32 %v17939_v47, %v22179_v51  ;;  %v7202_v23 = vpop.f32.mrb[7].mxu1  ;;  %v22221_v63 = vld [vmem:[#allocation2 + $0x108] sm:$0xff]  ;;  %v24636_v13 = vmax.f32 %v24635_v8, 0.0 }
 0x5ff   : > { %v22223_v32 = vadd.f32 %v7404_v21, %v3855_v2  ;;  %7468 = vst.msk [vmem:[#allocation2 + $0x148] sm:$0xff] %vm171_vm1, %v7404_v21  ;;  %v7374_v5 = vadd.f32 %v22179_v51, %v7202_v23  ;;  %17990 = vmatprep.mubr.msk.f32.mxu0 %vm171_vm1, %v22221_v63  ;;  %v3862_v52 = vadd.f32 %v24633_v6, %v24631_v58 }
 0x600   : > { %24613 = vst [vmem:[#allocation72_spill] sm:$0xff] %v22217_v54  ;;  %v7407_v1 = vmax.f32 %v7375_v45, 0.0  ;;  %17991 = vmatmul.mubr.msk.f32.gmra.mrb[40].mxu0 %vm171_vm1, %v22229_v31  ;;  %v3861_v19 = vadd.f32 %v24636_v13, %v24634_v62 }
 0x601   : > { %24614 = vst [vmem:[#allocation73_spill] sm:$0xff] %v22223_v32  ;;  %v7406_v12 = vmax.f32 %v7374_v5, 0.0  ;;  %v17942_v16 = vpop.f32.mrb[8].mxu1  ;;  %v22251_v55 = vld [vmem:[#allocation2 + $0x130] sm:$0xff] }
 0x602   : > { %v22239_v18 = vadd.f32 %v7407_v1, %v3858_v30  ;;  %7471 = vst.msk [vmem:[#allocation2 + $0x170] sm:$0xff] %vm171_vm1, %v7407_v1  ;;  %v7377_v24 = vadd.f32 %v17942_v16, %v22179_v51  ;;  %v7212_v40 = vpop.f32.mrb[9].mxu1  ;;  %v22243_v48 = vld [vmem:[#allocation2 + $0x128] sm:$0xff]  ;;  %v3864_v30 = vadd.f32 %v24641_v41, %v24639_v59 }
 0x603   : > { %v22245_v49 = vadd.f32 %v7406_v12, %v3857_v11  ;;  %7470 = vst.msk [vmem:[#allocation2 + $0x168] sm:$0xff] %vm171_vm1, %v7406_v12  ;;  %v7376_v61 = vadd.f32 %v22179_v51, %v7212_v40  ;;  %17993 = vmatprep.mubr.msk.f32.mxu0 %vm171_vm1, %v22243_v48  ;;  %v3863_v11 = vadd.f32 %v24644_v3, %v24642_v42  ;;  %v24659_v59 = vld [vmem:[#allocation44_spill] sm:$0xff] }
 0x604   : > { %24621 = vst [vmem:[#allocation80_spill] sm:$0xff] %v22239_v18  ;;  %v7409_v10 = vmax.f32 %v7377_v24, 0.0  ;;  %17994 = vmatmul.mubr.msk.f32.gmra.mrb[42].mxu0 %vm171_vm1, %v22251_v55  ;;  %v24660_v34 = vmax.f32 %v24659_v59, 0.0 }
 0x605   : > { %24622 = vst [vmem:[#allocation82_spill] sm:$0xff] %v22245_v49  ;;  %v7408_v35 = vmax.f32 %v7376_v61, 0.0  ;;  %v17945_v22 = vpop.f32.mrb[10].mxu1  ;;  %v22273_v53 = vld [vmem:[#allocation2 + $0x150] sm:$0xff] }
 0x606   : > { %v22261_v25 = vadd.f32 %v7409_v10, %v3860_v14  ;;  %7473 = vst.msk [vmem:[#allocation2 + $0x190] sm:$0xff] %vm171_vm1, %v7409_v10  ;;  %v7379_v36 = vadd.f32 %v17945_v22, %v22179_v51  ;;  %v7222_v39 = vpop.f32.mrb[11].mxu1  ;;  %v22265_v44 = vld [vmem:[#allocation2 + $0x148] sm:$0xff]  ;;  %v24647_v10 = vld [vmem:[#allocation18_spill] sm:$0xff] }
 0x607   : > { %v22267_v46 = vadd.f32 %v7408_v35, %v3859_v7  ;;  %7472 = vst.msk [vmem:[#allocation2 + $0x188] sm:$0xff] %vm171_vm1, %v7408_v35  ;;  %v7378_v4 = vadd.f32 %v22179_v51, %v7222_v39  ;;  %17996 = vmatprep.mubr.msk.f32.mxu0 %vm171_vm1, %v22265_v44  ;;  %v3866_v17 = vadd.f32 %v24649_v38, %v24647_v10  ;;  %v24650_v35 = vld [vmem:[#allocation17_spill] sm:$0xff]  ;;  %v24651_v22 = vld [vmem:[#allocation42_spill] sm:$0xff] }
 0x608   : > { %24629 = vst [vmem:[#allocation83_spill] sm:$0xff] %v22261_v25  ;;  %v7411_v33 = vmax.f32 %v7379_v36, 0.0  ;;  %17997 = vmatmul.mubr.msk.f32.gmra.mrb[44].mxu0 %vm171_vm1, %v22273_v53  ;;  %v24652_v36 = vmax.f32 %v24651_v22, 0.0  ;;  %v8216_v25 = vld [vmem:[#allocation2 + $0xb4] sm:$0xff] }
 0x609   : > { %24630 = vst [vmem:[#allocation84_spill] sm:$0xff] %v22267_v46  ;;  %v7410_v27 = vmax.f32 %v7378_v4, 0.0  ;;  %v17948_v43 = vpop.f32.mrb[12].mxu1  ;;  %v22295_v5 = vld [vmem:[#allocation2 + $0x170] sm:$0xff]  ;;  %v15406_v46 = vld [vmem:[%s24181_s1 + $0x58] sm:$0xf] }
 0x60a   : > { %v22283_v50 = vadd.f32 %v7411_v33, %v3862_v52  ;;  %7475 = vst.msk [vmem:[#allocation2 + $0x1b0] sm:$0xff] %vm171_vm1, %v7411_v33  ;;  %v7381_v2 = vadd.f32 %v17948_v43, %v22179_v51  ;;  %v7232_v21 = vpop.f32.mrb[13].mxu1  ;;  %v22287_v47 = vld [vmem:[#allocation2 + $0x168] sm:$0xff]  ;;  %v3865_v39 = vadd.f32 %v24652_v36, %v24650_v35 }
 0x60b   : > { %v22289_v45 = vadd.f32 %v7410_v27, %v3861_v19  ;;  %7474 = vst.msk [vmem:[#allocation2 + $0x1a8] sm:$0xff] %vm171_vm1, %v7410_v27  ;;  %v7380_v23 = vadd.f32 %v22179_v51, %v7232_v21  ;;  %17999 = vmatprep.mubr.msk.f32.mxu0 %vm171_vm1, %v22287_v47  ;;  %v24655_v19 = vld [vmem:[#allocation20_spill] sm:$0xff]  ;;  %v24656_v27 = vld [vmem:[#allocation43_spill] sm:$0xff] }
 0x60c   : > { %24637 = vst [vmem:[#allocation86_spill] sm:$0xff] %v22283_v50  ;;  %v7413_v1 = vmax.f32 %v7381_v2, 0.0  ;;  %18000 = vmatmul.mubr.msk.f32.gmra.mrb[46].mxu0 %vm171_vm1, %v22295_v5  ;;  %v24657_v43 = vmax.f32 %v24656_v27, 0.0  ;;  %v8214_v50 = vld [vmem:[#allocation2 + $0x94] sm:$0xff] }
 0x60d   : > { %24638 = vst [vmem:[#allocation74_spill] sm:$0xff] %v22289_v45  ;;  %v7412_v12 = vmax.f32 %v7380_v23, 0.0  ;;  %v17951_v16 = vpop.f32.mrb[14].mxu1  ;;  %v22317_v14 = vld [vmem:[#allocation2 + $0x190] sm:$0xff]  ;;  %v24658_v23 = vld [vmem:[#allocation19_spill] sm:$0xff] }
 0x60e   : > { %v22305_v24 = vadd.f32 %v7413_v1, %v3864_v30  ;;  %7477 = vst.msk [vmem:[#allocation2 + $0x1d0] sm:$0xff] %vm171_vm1, %v7413_v1  ;;  %v7383_v40 = vadd.f32 %v17951_v16, %v22179_v51  ;;  %v7242_v61 = vpop.f32.mrb[15].mxu1  ;;  %v22309_v60 = vld [vmem:[#allocation2 + $0x188] sm:$0xff]  ;;  %v3868_v2 = vadd.f32 %v24657_v43, %v24655_v19  ;;  %v3867_v41 = vadd.f32 %v24660_v34, %v24658_v23  ;;  %v24674_v34 = vld [vmem:[#allocation23_spill] sm:$0xff] }
 0x60f   : > { %v22311_v29 = vadd.f32 %v7412_v12, %v3863_v11  ;;  %7476 = vst.msk [vmem:[#allocation2 + $0x1c8] sm:$0xff] %vm171_vm1, %v7412_v12  ;;  %v7382_v15 = vadd.f32 %v22179_v51, %v7242_v61  ;;  %18002 = vmatprep.mubr.msk.f32.mxu0 %vm171_vm1, %v22309_v60  ;;  %v24663_v61 = vld [vmem:[#allocation22_spill] sm:$0xff]  ;;  %v24671_v43 = vld [vmem:[#allocation24_spill] sm:$0xff] }
 0x610   : > { %24645 = vst [vmem:[#allocation75_spill] sm:$0xff] %v22305_v24  ;;  %v7415_v7 = vmax.f32 %v7383_v40, 0.0  ;;  %18003 = vmatmul.mubr.msk.f32.gmra.mrb[48].mxu0 %vm171_vm1, %v22317_v14 }
 0x611   : > { %24646 = vst [vmem:[#allocation76_spill] sm:$0xff] %v22311_v29  ;;  %v7414_v4 = vmax.f32 %v7382_v15, 0.0  ;;  %v17954_v58 = vpop.f32.mrb[16].mxu1  ;;  %v22339_v13 = vld [vmem:[#allocation2 + $0x1b0] sm:$0xff] }
 0x612   : > { %v22327_v28 = vadd.f32 %v7415_v7, %v3866_v17  ;;  %7479 = vst.msk [vmem:[#allocation2 + $0x1f0] sm:$0xff] %vm171_vm1, %v7415_v7  ;;  %v7385_v6 = vadd.f32 %v17954_v58, %v22179_v51  ;;  %v7252_v52 = vpop.f32.mrb[17].mxu1  ;;  %v22331_v33 = vld [vmem:[#allocation2 + $0x1a8] sm:$0xff]  ;;  %v24664_v15 = vld [vmem:[#allocation45_spill] sm:$0xff]  ;;  %v24667_v7 = vld [vmem:[#allocation46_spill] sm:$0xff] }
 0x613   : > { %v22333_v62 = vadd.f32 %v7414_v4, %v3865_v39  ;;  %7478 = vst.msk [vmem:[#allocation2 + $0x1e8] sm:$0xff] %vm171_vm1, %v7414_v4  ;;  %v7384_v8 = vadd.f32 %v22179_v51, %v7252_v52  ;;  %18005 = vmatprep.mubr.msk.f32.mxu0 %vm171_vm1, %v22331_v33  ;;  %v24665_v10 = vmax.f32 %v24664_v15, 0.0  ;;  %v24666_v17 = vld [vmem:[#allocation21_spill] sm:$0xff]  ;;  %v24668_v35 = vmax.f32 %v24667_v7, 0.0  ;;  %v24679_v7 = vld [vmem:[#allocation26_spill] sm:$0xff] }
 0x614   : > { %24653 = vst [vmem:[#allocation77_spill] sm:$0xff] %v22327_v28  ;;  %v7417_v21 = vmax.f32 %v7385_v6, 0.0  ;;  %18006 = vmatmul.mubr.msk.f32.gmra.mrb[50].mxu0 %vm171_vm1, %v22339_v13 }
 0x615   : > { %24654 = vst [vmem:[#allocation78_spill] sm:$0xff] %v22333_v62  ;;  %v7416_v30 = vmax.f32 %v7384_v8, 0.0  ;;  %v17957_v1 = vpop.f32.mrb[18].mxu1  ;;  %v22361_v40 = vld [vmem:[#allocation2 + $0x1d0] sm:$0xff]  ;;  %v3870_v26 = vadd.f32 %v24665_v10, %v24663_v61  ;;  %v3869_v22 = vadd.f32 %v24668_v35, %v24666_v17 }
 0x616   : > { %v22349_v42 = vadd.f32 %v7417_v21, %v3868_v2  ;;  %7481 = vst.msk [vmem:[#allocation2 + $0x210] sm:$0xff] %vm171_vm1, %v7417_v21  ;;  %v7387_v0 = vadd.f32 %v17957_v1, %v22179_v51  ;;  %v7262_v3 = vpop.f32.mrb[19].mxu1  ;;  %v22353_v11 = vld [vmem:[#allocation2 + $0x1c8] sm:$0xff]  ;;  %v24672_v2 = vld [vmem:[#allocation47_spill] sm:$0xff]  ;;  %v24680_v35 = vld [vmem:[#allocation49_spill] sm:$0xff] }
 0x617   : > { %v22355_v12 = vadd.f32 %v7416_v30, %v3867_v41  ;;  %7480 = vst.msk [vmem:[#allocation2 + $0x208] sm:$0xff] %vm171_vm1, %v7416_v30  ;;  %v7386_v16 = vadd.f32 %v22179_v51, %v7262_v3  ;;  %18008 = vmatprep.mubr.msk.f32.mxu0 %vm171_vm1, %v22353_v11  ;;  %v24673_v21 = vmax.f32 %v24672_v2, 0.0  ;;  %v24675_v41 = vld [vmem:[#allocation48_spill] sm:$0xff] }
 0x618   : > { %24661 = vst [vmem:[#allocation79_spill] sm:$0xff] %v22349_v42  ;;  %v7419_v38 = vmax.f32 %v7387_v0, 0.0  ;;  %18009 = vmatmul.mubr.msk.f32.gmra.mrb[52].mxu0 %vm171_vm1, %v22361_v40  ;;  %v24676_v30 = vmax.f32 %v24675_v41, 0.0 }
 0x619   : > { %24662 = vst [vmem:[#allocation81_spill] sm:$0xff] %v22355_v12  ;;  %v7418_v36 = vmax.f32 %v7386_v16, 0.0  ;;  %v17960_v39 = vpop.f32.mrb[20].mxu1  ;;  %v22383_v27 = vld [vmem:[#allocation2 + $0x1f0] sm:$0xff]  ;;  %v3872_v23 = vadd.f32 %v24673_v21, %v24671_v43 }
 0x61a   : > { %v22371_v4 = vadd.f32 %v7419_v38, %v3870_v26  ;;  %7483 = vst.msk [vmem:[#allocation2 + $0x230] sm:$0xff] %vm171_vm1, %v7419_v38  ;;  %v7389_v58 = vadd.f32 %v17960_v39, %v22179_v51  ;;  %v7272_v6 = vpop.f32.mrb[21].mxu1  ;;  %v22375_v52 = vld [vmem:[#allocation2 + $0x1e8] sm:$0xff]  ;;  %v3871_v1 = vadd.f32 %v24676_v30, %v24674_v34  ;;  %v22684_v49 = vld [vmem:[#allocation2 + $0x1f4] sm:$0xff] }
 0x61b   : > { %v22377_v8 = vadd.f32 %v7418_v36, %v3869_v22  ;;  %7482 = vst.msk [vmem:[#allocation2 + $0x228] sm:$0xff] %vm171_vm1, %v7418_v36  ;;  %v7388_v19 = vadd.f32 %v22179_v51, %v7272_v6  ;;  %18011 = vmatprep.mubr.msk.f32.mxu0 %vm171_vm1, %v22375_v52  ;;  %v24681_v22 = vmax.f32 %v24680_v35, 0.0  ;;  %v24683_v6 = vld [vmem:[#allocation50_spill] sm:$0xff]  ;;  %v24690_v35 = vld [vmem:[#allocation27_spill] sm:$0xff] }
 0x61c   : > { %24669 = vst [vmem:[#allocation85_spill] sm:$0xff] %v22371_v4  ;;  %v7421_v59 = vmax.f32 %v7389_v58, 0.0  ;;  %18012 = vmatmul.mubr.msk.f32.gmra.mrb[54].mxu0 %vm171_vm1, %v22383_v27  ;;  %v24682_v58 = vld [vmem:[#allocation25_spill] sm:$0xff] }
 0x61d   : > { %24670 = vst [vmem:[#allocation87_spill] sm:$0xff] %v22377_v8  ;;  %v7420_v0 = vmax.f32 %v7388_v19, 0.0  ;;  %v17963_v3 = vpop.f32.mrb[22].mxu1  ;;  %v22405_v17 = vld [vmem:[#allocation2 + $0x210] sm:$0xff]  ;;  %v3874_v36 = vadd.f32 %v24681_v22, %v24679_v7  ;;  %v24684_v19 = vmax.f32 %v24683_v6, 0.0  ;;  %v24691_v22 = vld [vmem:[#allocation52_spill] sm:$0xff] }
 0x61e   : > { %v22393_v16 = vadd.f32 %v7421_v59, %v3872_v23  ;;  %7485 = vst.msk [vmem:[#allocation2 + $0x250] sm:$0xff] %vm171_vm1, %v7421_v59  ;;  %v7391_v61 = vadd.f32 %v17963_v3, %v22179_v51  ;;  %v7282_v15 = vpop.f32.mrb[23].mxu1  ;;  %v22397_v10 = vld [vmem:[#allocation2 + $0x208] sm:$0xff]  ;;  %v22690_v18 = vld [vmem:[#allocation2 + $0x214] sm:$0xff] }
 0x61f   : > { %v22399_v26 = vadd.f32 %v7420_v0, %v3871_v1  ;;  %7484 = vst.msk [vmem:[#allocation2 + $0x248] sm:$0xff] %vm171_vm1, %v7420_v0  ;;  %v7390_v38 = vadd.f32 %v22179_v51, %v7282_v15  ;;  %18014 = vmatprep.mubr.msk.f32.mxu0 %vm171_vm1, %v22397_v10  ;;  %v3873_v43 = vadd.f32 %v24684_v19, %v24682_v58  ;;  %v24687_v3 = vld [vmem:[#allocation28_spill] sm:$0xff] }
 0x620   : > { %24677 = vst [vmem:[#allocation88_spill] sm:$0xff] %v22393_v16  ;;  %v7423_v39 = vmax.f32 %v7391_v61, 0.0  ;;  %18015 = vmatmul.mubr.msk.f32.gmra.mrb[56].mxu0 %vm171_vm1, %v22405_v17  ;;  %v24688_v61 = vld [vmem:[#allocation51_spill] sm:$0xff]  ;;  %v22587_v8 = vld [vmem:[#allocation2 + $0x1ec] sm:$0xff] }
 0x621   : > { %24678 = vst [vmem:[#allocation89_spill] sm:$0xff] %v22399_v26  ;;  %v7422_v2 = vmax.f32 %v7390_v38, 0.0  ;;  %v17966_v21 = vpop.f32.mrb[24].mxu1  ;;  %v22427_v0 = vld [vmem:[#allocation2 + $0x230] sm:$0xff]  ;;  %v24689_v15 = vmax.f32 %v24688_v61, 0.0  ;;  %v22583_v16 = vld [vmem:[#allocation2 + $0x1e4] sm:$0xff] }
 0x622   : > { %v22415_v23 = vadd.f32 %v7423_v39, %v3874_v36  ;;  %7487 = vst.msk [vmem:[#allocation2 + $0x270] sm:$0xff] %vm171_vm1, %v7423_v39  ;;  %v7393_v59 = vadd.f32 %v17966_v21, %v22179_v51  ;;  %v7292_v34 = vpop.f32.mrb[25].mxu1  ;;  %v22419_v41 = vld [vmem:[#allocation2 + $0x228] sm:$0xff]  ;;  %v24692_v36 = vmax.f32 %v24691_v22, 0.0  ;;  %v24696_v61 = vld [vmem:[#allocation53_spill] sm:$0xff]  ;;  %v24699_v22 = vld [vmem:[#allocation55_spill] sm:$0xff] }
 0x623   : > { %v22421_v30 = vadd.f32 %v7422_v2, %v3873_v43  ;;  %7486 = vst.msk [vmem:[#allocation2 + $0x268] sm:$0xff] %vm171_vm1, %v7422_v2  ;;  %v7392_v1 = vadd.f32 %v22179_v51, %v7292_v34  ;;  %18017 = vmatprep.mubr.msk.f32.mxu0 %vm171_vm1, %v22419_v41  ;;  %v3876_v38 = vadd.f32 %v24689_v15, %v24687_v3  ;;  %v24695_v3 = vld [vmem:[#allocation30_spill] sm:$0xff]  ;;  %v24697_v15 = vmax.f32 %v24696_v61, 0.0  ;;  %v22579_v26 = vld [vmem:[#allocation2 + $0x1cc] sm:$0xff]  ;;  %v22591_v4 = vld [vmem:[#allocation2 + $0x204] sm:$0xff] }
 0x624   : > { %24685 = vst [vmem:[#allocation67_spill] sm:$0xff] %v22415_v23  ;;  %v7425_v7 = vmax.f32 %v7393_v59, 0.0  ;;  %18018 = vmatmul.mubr.msk.f32.gmra.mrb[58].mxu0 %vm171_vm1, %v22427_v0  ;;  %v3875_v39 = vadd.f32 %v24692_v36, %v24690_v35  ;;  %v24698_v35 = vld [vmem:[#allocation29_spill] sm:$0xff]  ;;  %v24700_v36 = vmax.f32 %v24699_v22, 0.0  ;;  %v22599_v42 = vld [vmem:[#allocation2 + $0x224] sm:$0xff] }
 0x625   : > { %24686 = vst [vmem:[#allocation4_spill] sm:$0xff] %v22421_v30  ;;  %v7424_v58 = vmax.f32 %v7392_v1, 0.0  ;;  %v17969_v6 = vpop.f32.mrb[26].mxu1  ;;  %v22449_v1 = vld [vmem:[#allocation2 + $0x250] sm:$0xff] }
 0x626   : > { %v22437_v19 = vadd.f32 %v7425_v7, %v3876_v38  ;;  %7489 = vst.msk [vmem:[#allocation2 + $0x290] sm:$0xff] %vm171_vm1, %v7425_v7  ;;  %v7395_v43 = vadd.f32 %v17969_v6, %v22179_v51  ;;  %v7302_v2 = vpop.f32.mrb[27].mxu1  ;;  %v22441_v21 = vld [vmem:[#allocation2 + $0x248] sm:$0xff]  ;;  %v3878_v38 = vadd.f32 %v24697_v15, %v24695_v3  ;;  %v22696_v32 = vld [vmem:[#allocation2 + $0x234] sm:$0xff] }
 0x627   : > { %v22443_v34 = vadd.f32 %v7424_v58, %v3875_v39  ;;  %7488 = vst.msk [vmem:[#allocation2 + $0x288] sm:$0xff] %vm171_vm1, %v7424_v58  ;;  %v7394_v59 = vadd.f32 %v22179_v51, %v7302_v2  ;;  %18020 = vmatprep.mubr.msk.f32.mxu0 %vm171_vm1, %v22441_v21  ;;  %v3877_v39 = vadd.f32 %v24700_v36, %v24698_v35  ;;  %v7497_v3 = vld [vmem:[#allocation2 + $0x84] sm:$0xff]  ;;  %v22595_v12 = vld [vmem:[#allocation2 + $0x20c] sm:$0xff]  ;;  %v22702_v54 = vld [vmem:[#allocation2 + $0x254] sm:$0xff] }
 0x628   : > { %24693 = vst [vmem:[#allocation39_spill] sm:$0xff] %v22437_v19  ;;  %v7427_v7 = vmax.f32 %v7395_v43, 0.0  ;;  %18021 = vmatmul.mubr.msk.f32.gmra.mrb[60].mxu0 %vm171_vm1, %v22449_v1  ;;  %v24703_v15 = vld [vmem:[#allocation32_spill] sm:$0xff]  ;;  %v24706_v36 = vld [vmem:[#allocation31_spill] sm:$0xff] }
 0x629   : > { %24694 = vst [vmem:[#allocation3_spill] sm:$0xff] %v22443_v34  ;;  %v7426_v58 = vmax.f32 %v7394_v59, 0.0  ;;  %v17972_v6 = vpop.f32.mrb[28].mxu1  ;;  %v22471_v59 = vld [vmem:[#allocation2 + $0x270] sm:$0xff]  ;;  %v22607_v28 = vld [vmem:[#allocation2 + $0x244] sm:$0xff] }
 0x62a   : > { %v22459_v2 = vadd.f32 %v7427_v7, %v3878_v38  ;;  %7491 = vst.msk [vmem:[#allocation2 + $0x2b0] sm:$0xff] %vm171_vm1, %v7427_v7  ;;  %v7397_v34 = vadd.f32 %v17972_v6, %v22179_v51  ;;  %v7312_v19 = vpop.f32.mrb[29].mxu1  ;;  %v22463_v30 = vld [vmem:[#allocation2 + $0x268] sm:$0xff]  ;;  %v24704_v38 = vld [vmem:[#allocation57_spill] sm:$0xff] }
 0x62b   : > { %v22465_v43 = vadd.f32 %v7426_v58, %v3877_v39  ;;  %7490 = vst.msk [vmem:[#allocation2 + $0x2a8] sm:$0xff] %vm171_vm1, %v7426_v58  ;;  %v7396_v61 = vadd.f32 %v22179_v51, %v7312_v19  ;;  %18023 = vmatprep.mubr.msk.f32.mxu0 %vm171_vm1, %v22463_v30  ;;  %v24705_v7 = vmax.f32 %v24704_v38, 0.0  ;;  %v24707_v39 = vld [vmem:[#allocation60_spill] sm:$0xff]  ;;  %v22708_v37 = vld [vmem:[#allocation2 + $0x274] sm:$0xff] }
 0x62c   : > { %24701 = vst [vmem:[#allocation40_spill] sm:$0xff] %v22459_v2  ;;  %v7429_v22 = vmax.f32 %v7397_v34, 0.0  ;;  %18024 = vmatmul.mubr.msk.f32.gmra.mrb[62].mxu0 %vm171_vm1, %v22471_v59  ;;  %v24708_v6 = vmax.f32 %v24707_v39, 0.0  ;;  %v22482_v19 = vld [vmem:[#allocation2 + $0x8c] sm:$0xff]  ;;  %v7499_v38 = vld [vmem:[#allocation2 + $0xa4] sm:$0xff] }
 0x62d   : > { %24702 = vst [vmem:[#allocation6_spill] sm:$0xff] %v22465_v43  ;;  %v3880_v35 = vadd.f32 %v24705_v7, %v24703_v15  ;;  %v7428_v58 = vmax.f32 %v7396_v61, 0.0  ;;  %v17975_v2 = vpop.f32.mrb[30].mxu1  ;;  %18028 = vmatprep.mubr.msk.f32.mxu0 %vm171_vm1, %v7497_v3  ;;  %v22495_v3 = vld [vmem:[%s24181_s1 + $0x54] sm:$0xf]  ;;  %v24711_v61 = vld [vmem:[#allocation38_spill] sm:$0xff] }
 0x62e   : > { %v3879_v43 = vadd.f32 %v24708_v6, %v24706_v36  ;;  %7493 = vst.msk [vmem:[#allocation2 + $0x2d0] sm:$0xff] %vm171_vm1, %v7429_v22  ;;  %v7399_v15 = vadd.f32 %v17975_v2, %v22179_v51  ;;  %v7322_v34 = vpop.f32.mrb[31].mxu1  ;;  %v24714_v2 = vld [vmem:[#allocation37_spill] sm:$0xff]  ;;  %v22615_v24 = vld [vmem:[#allocation2 + $0x264] sm:$0xff] }
 0x62f   : > { %v22484_v23 = vadd.f32 %v7429_v22, %v3880_v35  ;;  %7492 = vst.msk [vmem:[#allocation2 + $0x2c8] sm:$0xff] %vm171_vm1, %v7428_v58  ;;  %v7398_v36 = vadd.f32 %v22179_v51, %v7322_v34  ;;  %v24712_v35 = vld [vmem:[#allocation62_spill] sm:$0xff]  ;;  %v22508_v51 = vld [vmem:[#allocation2 + $0xac] sm:$0xff] }
 0x630   : > { %v22488_v7 = vadd.f32 %v7428_v58, %v3879_v43  ;;  %v24713_v39 = vmax.f32 %v24712_v35, 0.0  ;;  %v7431_v22 = vmax.f32 %v7399_v15, 0.0  ;;  %18029 = vmatmul.mubr.msk.f32.vlgmr.msra.gmra.mrb[32].mxu0 %vm171_vm1, %v22482_v19  ;;  %v24715_v43 = vld [vmem:[#allocation64_spill] sm:$0xff] }
 0x631   : > { %24709 = vst [vmem:[#allocation54_spill] sm:$0xff] %v22484_v23  ;;  %v7430_v58 = vmax.f32 %v7398_v36, 0.0  ;;  %18077 = vmatpush3.msk.msra.mxu0 %vm498_vm0, %v22172_v57  ;;  %18031 = vmatprep.mubr.msk.f32.mxu0 %vm171_vm1, %v7499_v38  ;;  %v7501_v15 = vld [vmem:[#allocation2 + $0xc4] sm:$0xff]  ;;  %v22521_v57 = vld [vmem:[#allocation2 + $0xcc] sm:$0xff] }
 0x632   : > { %24710 = vst [vmem:[#allocation5_spill] sm:$0xff] %v22488_v7  ;;  %v3882_v6 = vadd.f32 %v24713_v39, %v24711_v61  ;;  %v24716_v7 = vmax.f32 %v24715_v43, 0.0  ;;  %7495 = vst.msk [vmem:[#allocation2 + $0x2f0] sm:$0xff] %vm171_vm1, %v7431_v22  ;;  %18126 = vmatprep.subr.msk.mxu0 %vm498_vm0, %v22495_v3  ;;  %v7503_v38 = vld [vmem:[#allocation2 + $0xe4] sm:$0xff]  ;;  %v22531_v36 = vld [vmem:[#allocation2 + $0x10c] sm:$0xff] }
 0x633   : > { %7494 = vst.msk [vmem:[#allocation2 + $0x2e8] sm:$0xff] %vm171_vm1, %v7430_v58  ;;  %v22535_v35 = vld [vmem:[#allocation2 + $0x124] sm:$0xff]  ;;  %v22539_v39 = vld [vmem:[#allocation2 + $0x12c] sm:$0xff] }
 0x634   : > { %v3881_v23 = vadd.f32 %v24716_v7, %v24714_v2  ;;  %v22510_v34 = vadd.f32 %v7431_v22, %v3882_v6  ;;  %18032 = vmatmul.mubr.msk.f32.gmra.mrb[34].mxu0 %vm171_vm1, %v22508_v51  ;;  %v7504_v7 = vld [vmem:[#allocation2 + $0xec] sm:$0xff]  ;;  %v22543_v6 = vld [vmem:[#allocation2 + $0x144] sm:$0xff] }
 0x635   : > { %18034 = vmatprep.mubr.msk.f32.mxu0 %vm171_vm1, %v7501_v15  ;;  %v22547_v22 = vld [vmem:[#allocation2 + $0x14c] sm:$0xff]  ;;  %v22551_v2 = vld [vmem:[#allocation2 + $0x164] sm:$0xff] }
 0x636   : > { %24717 = vst [vmem:[#allocation56_spill] sm:$0xff] %v22510_v34  ;;  %v22515_v61 = vadd.f32 %v7430_v58, %v3881_v23  ;;  %v22527_v23 = vld [vmem:[#allocation2 + $0x104] sm:$0xff]  ;;  %v22555_v43 = vld [vmem:[#allocation2 + $0x16c] sm:$0xff] }
 0x637   : > { %v22559_v58 = vld [vmem:[#allocation2 + $0x184] sm:$0xff]  ;;  %v22563_v15 = vld [vmem:[#allocation2 + $0x18c] sm:$0xff] }
 0x638   : > { %24718 = vst [vmem:[#allocation8_spill] sm:$0xff] %v22515_v61  ;;  %18035 = vmatmul.mubr.msk.f32.gmra.mrb[36].mxu0 %vm171_vm1, %v22521_v57  ;;  %v22571_v61 = vld [vmem:[#allocation2 + $0x1ac] sm:$0xff]  ;;  %v22575_v34 = vld [vmem:[#allocation2 + $0x1c4] sm:$0xff] }
 0x639   : > { %18037 = vmatprep.mubr.msk.f32.mxu0 %vm171_vm1, %v7503_v38  ;;  %v22567_v38 = vld [vmem:[#allocation2 + $0x1a4] sm:$0xff]  ;;  %v22603_v62 = vld [vmem:[#allocation2 + $0x22c] sm:$0xff] }
 0x63a   : > { %v22611_v29 = vld [vmem:[#allocation2 + $0x24c] sm:$0xff]  ;;  %v22789_v56 = vld [vmem:[#allocation2 + $0x2e4] sm:$0xff] }
 0x63b   : > { %v22619_v45 = vld [vmem:[#allocation2 + $0x26c] sm:$0xff] }
 0x63c   : > { %18038 = vmatmul.mubr.msk.f32.gmra.mrb[38].mxu0 %vm171_vm1, %v7504_v7  ;;  %v22785_v20 = vld [vmem:[#allocation2 + $0x2cc] sm:$0xff] }
 0x63d   : > { %18040 = vmatprep.mubr.msk.f32.mxu0 %vm171_vm1, %v22527_v23 }
 0x640   : > { %18041 = vmatmul.mubr.msk.f32.gmra.mrb[40].mxu0 %vm171_vm1, %v22531_v36 }
 0x641   : > { %18043 = vmatprep.mubr.msk.f32.mxu0 %vm171_vm1, %v22535_v35 }
 0x644   : > { %18044 = vmatmul.mubr.msk.f32.gmra.mrb[42].mxu0 %vm171_vm1, %v22539_v39 }
 0x645   : > { %18046 = vmatprep.mubr.msk.f32.mxu0 %vm171_vm1, %v22543_v6 }
 0x648   : > { %18047 = vmatmul.mubr.msk.f32.gmra.mrb[44].mxu0 %vm171_vm1, %v22547_v22 }
 0x649   : > { %18049 = vmatprep.mubr.msk.f32.mxu0 %vm171_vm1, %v22551_v2 }
 0x64c   : > { %18050 = vmatmul.mubr.msk.f32.gmra.mrb[46].mxu0 %vm171_vm1, %v22555_v43 }
 0x64d   : > { %18052 = vmatprep.mubr.msk.f32.mxu0 %vm171_vm1, %v22559_v58 }
 0x650   : > { %18053 = vmatmul.mubr.msk.f32.gmra.mrb[48].mxu0 %vm171_vm1, %v22563_v15 }
 0x651   : > { %18055 = vmatprep.mubr.msk.f32.mxu0 %vm171_vm1, %v22567_v38 }
 0x654   : > { %18056 = vmatmul.mubr.msk.f32.gmra.mrb[50].mxu0 %vm171_vm1, %v22571_v61 }
 0x655   : > { %18058 = vmatprep.mubr.msk.f32.mxu0 %vm171_vm1, %v22575_v34 }
 0x658   : > { %18059 = vmatmul.mubr.msk.f32.gmra.mrb[52].mxu0 %vm171_vm1, %v22579_v26 }
 0x659   : > { %18061 = vmatprep.mubr.msk.f32.mxu0 %vm171_vm1, %v22583_v16 }
 0x65c   : > { %18062 = vmatmul.mubr.msk.f32.gmra.mrb[54].mxu0 %vm171_vm1, %v22587_v8 }
 0x65d   : > { %18064 = vmatprep.mubr.msk.f32.mxu0 %vm171_vm1, %v22591_v4 }
 0x660   : > { %18065 = vmatmul.mubr.msk.f32.gmra.mrb[56].mxu0 %vm171_vm1, %v22595_v12 }
 0x661   : > { %18067 = vmatprep.mubr.msk.f32.mxu0 %vm171_vm1, %v22599_v42 }
 0x664   : > { %18068 = vmatmul.mubr.msk.f32.gmra.mrb[58].mxu0 %vm171_vm1, %v22603_v62 }
 0x665   : > { %18070 = vmatprep.mubr.msk.f32.mxu0 %vm171_vm1, %v22607_v28 }
 0x668   : > { %18071 = vmatmul.mubr.msk.f32.gmra.mrb[60].mxu0 %vm171_vm1, %v22611_v29 }
 0x669   : > { %18073 = vmatprep.mubr.msk.f32.mxu0 %vm171_vm1, %v22615_v24 }
 0x66c   : > { %18074 = vmatmul.mubr.msk.f32.gmra.mrb[62].mxu0 %vm171_vm1, %v22619_v45 }
 0x66d   : > { %18078 = vmatprep.mubr.msk.f32.mxu0 %vm171_vm1, %v22482_v19  ;;  %v8218_v19 = vld [vmem:[#allocation2 + $0xd4] sm:$0xff] }
 0x670   : > { %18079 = vmatmul.mubr.msk.f32.vlgmr.msra.gmra.mrb[32].mxu0 %vm171_vm1, %v8214_v50  ;;  %v8220_v50 = vld [vmem:[#allocation2 + $0xf4] sm:$0xff] }
 0x671   : > { %18127 = vmatpush3.msk.msra.mxu0 %vm498_vm0, %v22495_v3  ;;  %18081 = vmatprep.mubr.msk.f32.mxu0 %vm171_vm1, %v22508_v51  ;;  %v22642_v3 = vld [vmem:[#allocation2 + $0x114] sm:$0xff] }
 0x672   : > { %18176 = vmatprep.subr.msk.mxu0 %vm498_vm0, %v15406_v46  ;;  %v22654_v51 = vld [vmem:[#allocation2 + $0x154] sm:$0xff] }
 0x674   : > { %18082 = vmatmul.mubr.msk.f32.gmra.mrb[34].mxu0 %vm171_vm1, %v8216_v25  ;;  %v22648_v25 = vld [vmem:[#allocation2 + $0x134] sm:$0xff] }
 0x675   : > { %18084 = vmatprep.mubr.msk.f32.mxu0 %vm171_vm1, %v22521_v57  ;;  %v22660_v57 = vld [vmem:[#allocation2 + $0x174] sm:$0xff] }
 0x678   : > { %18085 = vmatmul.mubr.msk.f32.gmra.mrb[36].mxu0 %vm171_vm1, %v8218_v19  ;;  %v22672_v19 = vld [vmem:[#allocation2 + $0x1b4] sm:$0xff] }
 0x679   : > { %18087 = vmatprep.mubr.msk.f32.mxu0 %vm171_vm1, %v7504_v7  ;;  %v22666_v7 = vld [vmem:[#allocation2 + $0x194] sm:$0xff] }
 0x67c   : > { %18088 = vmatmul.mubr.msk.f32.gmra.mrb[38].mxu0 %vm171_vm1, %v8220_v50  ;;  %v22678_v50 = vld [vmem:[#allocation2 + $0x1d4] sm:$0xff] }
 0x67d   : > { %18090 = vmatprep.mubr.msk.f32.mxu0 %vm171_vm1, %v22531_v36 }
 0x680   : > { %18091 = vmatmul.mubr.msk.f32.gmra.mrb[40].mxu0 %vm171_vm1, %v22642_v3 }
 0x681   : > { %18093 = vmatprep.mubr.msk.f32.mxu0 %vm171_vm1, %v22539_v39 }
 0x684   : > { %18094 = vmatmul.mubr.msk.f32.gmra.mrb[42].mxu0 %vm171_vm1, %v22648_v25 }
 0x685   : > { %18096 = vmatprep.mubr.msk.f32.mxu0 %vm171_vm1, %v22547_v22 }
 0x688   : > { %18097 = vmatmul.mubr.msk.f32.gmra.mrb[44].mxu0 %vm171_vm1, %v22654_v51 }
 0x689   : > { %18099 = vmatprep.mubr.msk.f32.mxu0 %vm171_vm1, %v22555_v43 }
 0x68c   : > { %18100 = vmatmul.mubr.msk.f32.gmra.mrb[46].mxu0 %vm171_vm1, %v22660_v57 }
 0x68d   : > { %18102 = vmatprep.mubr.msk.f32.mxu0 %vm171_vm1, %v22563_v15 }
 0x690   : > { %18103 = vmatmul.mubr.msk.f32.gmra.mrb[48].mxu0 %vm171_vm1, %v22666_v7 }
 0x691   : > { %18105 = vmatprep.mubr.msk.f32.mxu0 %vm171_vm1, %v22571_v61 }
 0x694   : > { %18106 = vmatmul.mubr.msk.f32.gmra.mrb[50].mxu0 %vm171_vm1, %v22672_v19 }
 0x695   : > { %18108 = vmatprep.mubr.msk.f32.mxu0 %vm171_vm1, %v22579_v26 }
 0x698   : > { %18109 = vmatmul.mubr.msk.f32.gmra.mrb[52].mxu0 %vm171_vm1, %v22678_v50 }
 0x699   : > { %18111 = vmatprep.mubr.msk.f32.mxu0 %vm171_vm1, %v22587_v8 }
 0x69c   : > { %18112 = vmatmul.mubr.msk.f32.gmra.mrb[54].mxu0 %vm171_vm1, %v22684_v49 }
 0x69d   : > { %18114 = vmatprep.mubr.msk.f32.mxu0 %vm171_vm1, %v22595_v12 }
 0x6a0   : > { %18115 = vmatmul.mubr.msk.f32.gmra.mrb[56].mxu0 %vm171_vm1, %v22690_v18 }
 0x6a1   : > { %18117 = vmatprep.mubr.msk.f32.mxu0 %vm171_vm1, %v22603_v62 }
 0x6a4   : > { %18118 = vmatmul.mubr.msk.f32.gmra.mrb[58].mxu0 %vm171_vm1, %v22696_v32 }
 0x6a5   : > { %18120 = vmatprep.mubr.msk.f32.mxu0 %vm171_vm1, %v22611_v29 }
 0x6a8   : > { %18121 = vmatmul.mubr.msk.f32.gmra.mrb[60].mxu0 %vm171_vm1, %v22702_v54 }
 0x6a9   : > { %18123 = vmatprep.mubr.msk.f32.mxu0 %vm171_vm1, %v22619_v45 }
 0x6ac   : > { %18124 = vmatmul.mubr.msk.f32.gmra.mrb[62].mxu0 %vm171_vm1, %v22708_v37 }
 0x6ad   : > { %18128 = vmatprep.mubr.msk.f32.mxu0 %vm171_vm1, %v22527_v23  ;;  %v22769_v23 = vld [vmem:[#allocation2 + $0x28c] sm:$0xff] }
 0x6b0   : > { %18129 = vmatmul.mubr.msk.f32.vlgmr.msra.gmra.mrb[32].mxu0 %vm171_vm1, %v22531_v36 }
 0x6b1   : > { %18177 = vmatpush3.msk.msra.mxu0 %vm498_vm0, %v15406_v46  ;;  %18131 = vmatprep.mubr.msk.f32.mxu0 %vm171_vm1, %v22535_v35  ;;  %v22765_v46 = vld [vmem:[#allocation2 + $0x284] sm:$0xff] }
 0x6b2   : > { %18226 = vmatprep.subr.msk.mxu0 %vm498_vm0, %v15440_v9  ;;  %v22773_v35 = vld [vmem:[#allocation2 + $0x2a4] sm:$0xff] }
 0x6b3   : > { %24719 = vst [vmem:[#allocation58_spill] sm:$0xff] %v22773_v35 }
 0x6b4   : > { %18132 = vmatmul.mubr.msk.f32.gmra.mrb[34].mxu0 %vm171_vm1, %v22539_v39 }
 0x6b5   : > { %18134 = vmatprep.mubr.msk.f32.mxu0 %vm171_vm1, %v22543_v6  ;;  %v22777_v6 = vld [vmem:[#allocation2 + $0x2ac] sm:$0xff] }
 0x6b8   : > { %18135 = vmatmul.mubr.msk.f32.gmra.mrb[36].mxu0 %vm171_vm1, %v22547_v22 }
 0x6b9   : > { %18137 = vmatprep.mubr.msk.f32.mxu0 %vm171_vm1, %v22551_v2  ;;  %v22781_v2 = vld [vmem:[#allocation2 + $0x2c4] sm:$0xff] }
 0x6ba   : > { %24720 = vst [vmem:[#allocation7_spill] sm:$0xff] %v22781_v2 }
 0x6bc   : > { %18138 = vmatmul.mubr.msk.f32.gmra.mrb[38].mxu0 %vm171_vm1, %v22555_v43 }
 0x6bd   : > { %18140 = vmatprep.mubr.msk.f32.mxu0 %vm171_vm1, %v22559_v58 }
 0x6c0   : > { %18141 = vmatmul.mubr.msk.f32.gmra.mrb[40].mxu0 %vm171_vm1, %v22563_v15 }
 0x6c1   : > { %18143 = vmatprep.mubr.msk.f32.mxu0 %vm171_vm1, %v22567_v38 }
 0x6c4   : > { %18144 = vmatmul.mubr.msk.f32.gmra.mrb[42].mxu0 %vm171_vm1, %v22571_v61 }
 0x6c5   : > { %18146 = vmatprep.mubr.msk.f32.mxu0 %vm171_vm1, %v22575_v34 }
 0x6c8   : > { %18147 = vmatmul.mubr.msk.f32.gmra.mrb[44].mxu0 %vm171_vm1, %v22579_v26 }
 0x6c9   : > { %18149 = vmatprep.mubr.msk.f32.mxu0 %vm171_vm1, %v22583_v16 }
 0x6cc   : > { %18150 = vmatmul.mubr.msk.f32.gmra.mrb[46].mxu0 %vm171_vm1, %v22587_v8 }
 0x6cd   : > { %18152 = vmatprep.mubr.msk.f32.mxu0 %vm171_vm1, %v22591_v4 }
 0x6d0   : > { %18153 = vmatmul.mubr.msk.f32.gmra.mrb[48].mxu0 %vm171_vm1, %v22595_v12 }
 0x6d1   : > { %18155 = vmatprep.mubr.msk.f32.mxu0 %vm171_vm1, %v22599_v42 }
 0x6d4   : > { %18156 = vmatmul.mubr.msk.f32.gmra.mrb[50].mxu0 %vm171_vm1, %v22603_v62 }
 0x6d5   : > { %18158 = vmatprep.mubr.msk.f32.mxu0 %vm171_vm1, %v22607_v28 }
 0x6d8   : > { %18159 = vmatmul.mubr.msk.f32.gmra.mrb[52].mxu0 %vm171_vm1, %v22611_v29 }
 0x6d9   : > { %18161 = vmatprep.mubr.msk.f32.mxu0 %vm171_vm1, %v22615_v24 }
 0x6dc   : > { %18162 = vmatmul.mubr.msk.f32.gmra.mrb[54].mxu0 %vm171_vm1, %v22619_v45 }
 0x6dd   : > { %18164 = vmatprep.mubr.msk.f32.mxu0 %vm171_vm1, %v22765_v46 }
 0x6e0   : > { %18165 = vmatmul.mubr.msk.f32.gmra.mrb[56].mxu0 %vm171_vm1, %v22769_v23 }
 0x6e1   : > { %18167 = vmatprep.mubr.msk.f32.mxu0 %vm171_vm1, %v22773_v35  ;;  %v22793_v35 = vld [vmem:[#allocation2 + $0x2ec] sm:$0xff] }
 0x6e4   : > { %18168 = vmatmul.mubr.msk.f32.gmra.mrb[58].mxu0 %vm171_vm1, %v22777_v6 }
 0x6e5   : > { %18170 = vmatprep.mubr.msk.f32.mxu0 %vm171_vm1, %v22781_v2  ;;  %v15474_v2 = vld [vmem:[%s24181_s1 + $0x60] sm:$0xf] }
 0x6e8   : > { %18171 = vmatmul.mubr.msk.f32.gmra.mrb[60].mxu0 %vm171_vm1, %v22785_v20 }
 0x6e9   : > { %18173 = vmatprep.mubr.msk.f32.mxu0 %vm171_vm1, %v22789_v56 }
 0x6ec   : > { %18174 = vmatmul.mubr.msk.f32.gmra.mrb[62].mxu0 %vm171_vm1, %v22793_v35 }
 0x6ed   : > { %18178 = vmatprep.mubr.msk.f32.mxu0 %vm171_vm1, %v22221_v63  ;;  %v22854_v63 = vld [vmem:[#allocation2 + $0x290] sm:$0xff] }
 0x6f0   : > { %18179 = vmatmul.mubr.msk.f32.vlgmr.msra.gmra.mrb[32].mxu0 %vm171_vm1, %v22229_v31  ;;  %v22858_v31 = vld [vmem:[#allocation2 + $0x2a8] sm:$0xff] }
 0x6f1   : > { %18227 = vmatpush3.msk.msra.mxu0 %vm498_vm0, %v15440_v9  ;;  %18181 = vmatprep.mubr.msk.f32.mxu0 %vm171_vm1, %v22243_v48  ;;  %v22850_v9 = vld [vmem:[#allocation2 + $0x288] sm:$0xff]  ;;  %v22862_v48 = vld [vmem:[#allocation2 + $0x2b0] sm:$0xff] }
 0x6f2   : > { %18276 = vmatprep.subr.msk.mxu0 %vm498_vm0, %v15474_v2 }
 0x6f4   : > { %18182 = vmatmul.mubr.msk.f32.gmra.mrb[34].mxu0 %vm171_vm1, %v22251_v55  ;;  %v22866_v55 = vld [vmem:[#allocation2 + $0x2c8] sm:$0xff] }
 0x6f5   : > { %18184 = vmatprep.mubr.msk.f32.mxu0 %vm171_vm1, %v22265_v44  ;;  %v22870_v44 = vld [vmem:[#allocation2 + $0x2d0] sm:$0xff] }
 0x6f8   : > { %18185 = vmatmul.mubr.msk.f32.gmra.mrb[36].mxu0 %vm171_vm1, %v22273_v53  ;;  %v22874_v53 = vld [vmem:[#allocation2 + $0x2e8] sm:$0xff] }
 0x6f9   : > { %18187 = vmatprep.mubr.msk.f32.mxu0 %vm171_vm1, %v22287_v47  ;;  %v22878_v47 = vld [vmem:[#allocation2 + $0x2f0] sm:$0xff] }
 0x6fc   : > { %18188 = vmatmul.mubr.msk.f32.gmra.mrb[38].mxu0 %vm171_vm1, %v22295_v5  ;;  %v15508_v5 = vld [vmem:[%s24181_s1 + $0x64] sm:$0xf] }
 0x6fd   : > { %18190 = vmatprep.mubr.msk.f32.mxu0 %vm171_vm1, %v22309_v60  ;;  %v22937_v60 = vld [vmem:[#allocation2 + $0x294] sm:$0xff] }
 0x700   : > { %18191 = vmatmul.mubr.msk.f32.gmra.mrb[40].mxu0 %vm171_vm1, %v22317_v14  ;;  %v22943_v14 = vld [vmem:[#allocation2 + $0x2b4] sm:$0xff] }
 0x701   : > { %18193 = vmatprep.mubr.msk.f32.mxu0 %vm171_vm1, %v22331_v33 }
 0x704   : > { %18194 = vmatmul.mubr.msk.f32.gmra.mrb[42].mxu0 %vm171_vm1, %v22339_v13 }
 0x705   : > { %18196 = vmatprep.mubr.msk.f32.mxu0 %vm171_vm1, %v22353_v11 }
 0x708   : > { %18197 = vmatmul.mubr.msk.f32.gmra.mrb[44].mxu0 %vm171_vm1, %v22361_v40 }
 0x709   : > { %18199 = vmatprep.mubr.msk.f32.mxu0 %vm171_vm1, %v22375_v52 }
 0x70c   : > { %18200 = vmatmul.mubr.msk.f32.gmra.mrb[46].mxu0 %vm171_vm1, %v22383_v27 }
 0x70d   : > { %18202 = vmatprep.mubr.msk.f32.mxu0 %vm171_vm1, %v22397_v10 }
 0x710   : > { %18203 = vmatmul.mubr.msk.f32.gmra.mrb[48].mxu0 %vm171_vm1, %v22405_v17 }
 0x711   : > { %18205 = vmatprep.mubr.msk.f32.mxu0 %vm171_vm1, %v22419_v41 }
 0x714   : > { %18206 = vmatmul.mubr.msk.f32.gmra.mrb[50].mxu0 %vm171_vm1, %v22427_v0 }
 0x715   : > { %18208 = vmatprep.mubr.msk.f32.mxu0 %vm171_vm1, %v22441_v21 }
 0x718   : > { %18209 = vmatmul.mubr.msk.f32.gmra.mrb[52].mxu0 %vm171_vm1, %v22449_v1 }
 0x719   : > { %18211 = vmatprep.mubr.msk.f32.mxu0 %vm171_vm1, %v22463_v30 }
 0x71c   : > { %18212 = vmatmul.mubr.msk.f32.gmra.mrb[54].mxu0 %vm171_vm1, %v22471_v59 }
 0x71d   : > { %18214 = vmatprep.mubr.msk.f32.mxu0 %vm171_vm1, %v22850_v9 }
 0x720   : > { %18215 = vmatmul.mubr.msk.f32.gmra.mrb[56].mxu0 %vm171_vm1, %v22854_v63 }
 0x721   : > { %18217 = vmatprep.mubr.msk.f32.mxu0 %vm171_vm1, %v22858_v31 }
 0x724   : > { %18218 = vmatmul.mubr.msk.f32.gmra.mrb[58].mxu0 %vm171_vm1, %v22862_v48 }
 0x725   : > { %18220 = vmatprep.mubr.msk.f32.mxu0 %vm171_vm1, %v22866_v55 }
 0x728   : > { %18221 = vmatmul.mubr.msk.f32.gmra.mrb[60].mxu0 %vm171_vm1, %v22870_v44 }
 0x729   : > { %18223 = vmatprep.mubr.msk.f32.mxu0 %vm171_vm1, %v22874_v53 }
 0x72c   : > { %18224 = vmatmul.mubr.msk.f32.gmra.mrb[62].mxu0 %vm171_vm1, %v22878_v47 }
 0x72d   : > { %18228 = vmatprep.mubr.msk.f32.mxu0 %vm171_vm1, %v22531_v36  ;;  %v22949_v36 = vld [vmem:[#allocation2 + $0x2d4] sm:$0xff] }
 0x730   : > { %18229 = vmatmul.mubr.msk.f32.vlgmr.msra.gmra.mrb[32].mxu0 %vm171_vm1, %v22642_v3  ;;  %v10164_v3 = vld [vmem:[#allocation2 + $0x188] sm:$0xff] }
 0x731   : > { %18277 = vmatpush3.msk.msra.mxu0 %vm498_vm0, %v15474_v2  ;;  %18231 = vmatprep.mubr.msk.f32.mxu0 %vm171_vm1, %v22539_v39  ;;  %v22955_v39 = vld [vmem:[#allocation2 + $0x2f4] sm:$0xff] }
 0x732   : > { %18326 = vmatprep.subr.msk.mxu0 %vm498_vm0, %v15508_v5  ;;  %v10165_v2 = vld [vmem:[#allocation2 + $0x190] sm:$0xff] }
 0x734   : > { %18232 = vmatmul.mubr.msk.f32.gmra.mrb[34].mxu0 %vm171_vm1, %v22648_v25  ;;  %v15578_v25 = vld [vmem:[%s24181_s1 + $0x70] sm:$0xf] }
 0x735   : > { %18234 = vmatprep.mubr.msk.f32.mxu0 %vm171_vm1, %v22547_v22  ;;  %v15542_v22 = vld [vmem:[%s24181_s1 + $0x68] sm:$0xf]  ;;  %18426 = vmatprep.subr.msk.mxu1 %vm498_vm0, %v15578_v25 }
 0x736   : > { %18427 = vmatpush3.msk.msra.mxu1 %vm498_vm0, %v15578_v25 }
 0x738   : > { %18235 = vmatmul.mubr.msk.f32.gmra.mrb[36].mxu0 %vm171_vm1, %v22654_v51  ;;  %v23035_v51 = vld [vmem:[#allocation2 + $0x8] sm:$0xff] }
 0x739   : > { %18237 = vmatprep.mubr.msk.f32.mxu0 %vm171_vm1, %v22555_v43  ;;  %v9802_v43 = vld [vmem:[#allocation2 + $0x344] sm:$0xff]  ;;  %18428 = vmatprep.mubr.msk.f32.mxu1 %vm171_vm1, %v23035_v51 }
 0x73c   : > { %18238 = vmatmul.mubr.msk.f32.gmra.mrb[38].mxu0 %vm171_vm1, %v22660_v57  ;;  %v15577_v57 = vld [vmem:[%s24181_s1 + $0x6c] sm:$0xf] }
 0x73d   : > { %18240 = vmatprep.mubr.msk.f32.mxu0 %vm171_vm1, %v22563_v15  ;;  %18476 = vmatprep.subr.msk.mxu1 %vm498_vm0, %v15577_v57 }
 0x740   : > { %18241 = vmatmul.mubr.msk.f32.gmra.mrb[40].mxu0 %vm171_vm1, %v22666_v7 }
 0x741   : > { %18243 = vmatprep.mubr.msk.f32.mxu0 %vm171_vm1, %v22571_v61 }
 0x744   : > { %18244 = vmatmul.mubr.msk.f32.gmra.mrb[42].mxu0 %vm171_vm1, %v22672_v19 }
 0x745   : > { %18246 = vmatprep.mubr.msk.f32.mxu0 %vm171_vm1, %v22579_v26 }
 0x748   : > { %18247 = vmatmul.mubr.msk.f32.gmra.mrb[44].mxu0 %vm171_vm1, %v22678_v50 }
 0x749   : > { %18249 = vmatprep.mubr.msk.f32.mxu0 %vm171_vm1, %v22587_v8 }
 0x74c   : > { %18250 = vmatmul.mubr.msk.f32.gmra.mrb[46].mxu0 %vm171_vm1, %v22684_v49 }
 0x74d   : > { %18252 = vmatprep.mubr.msk.f32.mxu0 %vm171_vm1, %v22595_v12 }
 0x750   : > { %18253 = vmatmul.mubr.msk.f32.gmra.mrb[48].mxu0 %vm171_vm1, %v22690_v18 }
 0x751   : > { %18255 = vmatprep.mubr.msk.f32.mxu0 %vm171_vm1, %v22603_v62 }
 0x754   : > { %18256 = vmatmul.mubr.msk.f32.gmra.mrb[50].mxu0 %vm171_vm1, %v22696_v32 }
 0x755   : > { %18258 = vmatprep.mubr.msk.f32.mxu0 %vm171_vm1, %v22611_v29 }
 0x758   : > { %18259 = vmatmul.mubr.msk.f32.gmra.mrb[52].mxu0 %vm171_vm1, %v22702_v54 }
 0x759   : > { %18261 = vmatprep.mubr.msk.f32.mxu0 %vm171_vm1, %v22619_v45 }
 0x75c   : > { %18262 = vmatmul.mubr.msk.f32.gmra.mrb[54].mxu0 %vm171_vm1, %v22708_v37 }
 0x75d   : > { %18264 = vmatprep.mubr.msk.f32.mxu0 %vm171_vm1, %v22769_v23 }
 0x760   : > { %18265 = vmatmul.mubr.msk.f32.gmra.mrb[56].mxu0 %vm171_vm1, %v22937_v60 }
 0x761   : > { %18267 = vmatprep.mubr.msk.f32.mxu0 %vm171_vm1, %v22777_v6 }
 0x764   : > { %18268 = vmatmul.mubr.msk.f32.gmra.mrb[58].mxu0 %vm171_vm1, %v22943_v14 }
 0x765   : > { %18270 = vmatprep.mubr.msk.f32.mxu0 %vm171_vm1, %v22785_v20 }
 0x768   : > { %18271 = vmatmul.mubr.msk.f32.gmra.mrb[60].mxu0 %vm171_vm1, %v22949_v36 }
 0x769   : > { %18273 = vmatprep.mubr.msk.f32.mxu0 %vm171_vm1, %v22793_v35 }
 0x76c   : > { %18274 = vmatmul.mubr.msk.f32.gmra.mrb[62].mxu0 %vm171_vm1, %v22955_v39 }
 0x76d   : > { %18278 = vmatprep.mubr.msk.f32.mxu0 %vm171_vm1, %v22559_v58  ;;  %v9804_v58 = vld [vmem:[#allocation2 + $0x364] sm:$0xff] }
 0x770   : > { %18279 = vmatmul.mubr.msk.f32.vlgmr.msra.gmra.mrb[32].mxu0 %vm171_vm1, %v22563_v15 }
 0x771   : > { %18327 = vmatpush3.msk.msra.mxu0 %vm498_vm0, %v15508_v5  ;;  %18281 = vmatprep.mubr.msk.f32.mxu0 %vm171_vm1, %v22567_v38  ;;  %v23028_v38 = vld [vmem:[#allocation2 + $0x36c] sm:$0xff] }
 0x772   : > { %18376 = vmatprep.subr.msk.mxu0 %vm498_vm0, %v15542_v22  ;;  %v23050_v5 = vld [vmem:[#allocation2 + $0x28] sm:$0xff] }
 0x774   : > { %18282 = vmatmul.mubr.msk.f32.gmra.mrb[34].mxu0 %vm171_vm1, %v22571_v61 }
 0x775   : > { %18284 = vmatprep.mubr.msk.f32.mxu0 %vm171_vm1, %v22575_v34  ;;  %v23018_v34 = vld [vmem:[#allocation2 + $0x32c] sm:$0xff] }
 0x778   : > { %18285 = vmatmul.mubr.msk.f32.gmra.mrb[36].mxu0 %vm171_vm1, %v22579_v26 }
 0x779   : > { %18287 = vmatprep.mubr.msk.f32.mxu0 %vm171_vm1, %v22583_v16  ;;  %v9800_v16 = vld [vmem:[#allocation2 + $0x324] sm:$0xff] }
 0x77c   : > { %18288 = vmatmul.mubr.msk.f32.gmra.mrb[38].mxu0 %vm171_vm1, %v22587_v8 }
 0x77d   : > { %18290 = vmatprep.mubr.msk.f32.mxu0 %vm171_vm1, %v22591_v4  ;;  %v23013_v4 = vld [vmem:[#allocation2 + $0x30c] sm:$0xff] }
 0x780   : > { %18291 = vmatmul.mubr.msk.f32.gmra.mrb[40].mxu0 %vm171_vm1, %v22595_v12 }
 0x781   : > { %18293 = vmatprep.mubr.msk.f32.mxu0 %vm171_vm1, %v22599_v42  ;;  %v24721_v42 = vld [vmem:[#allocation58_spill] sm:$0xff] }
 0x784   : > { %18294 = vmatmul.mubr.msk.f32.gmra.mrb[42].mxu0 %vm171_vm1, %v22603_v62 }
 0x785   : > { %18296 = vmatprep.mubr.msk.f32.mxu0 %vm171_vm1, %v22607_v28  ;;  %v24722_v28 = vld [vmem:[#allocation7_spill] sm:$0xff] }
 0x788   : > { %18297 = vmatmul.mubr.msk.f32.gmra.mrb[44].mxu0 %vm171_vm1, %v22611_v29 }
 0x789   : > { %18299 = vmatprep.mubr.msk.f32.mxu0 %vm171_vm1, %v22615_v24  ;;  %v9798_v24 = vld [vmem:[#allocation2 + $0x304] sm:$0xff] }
 0x78c   : > { %18300 = vmatmul.mubr.msk.f32.gmra.mrb[46].mxu0 %vm171_vm1, %v22619_v45 }
 0x78d   : > { %18302 = vmatprep.mubr.msk.f32.mxu0 %vm171_vm1, %v22765_v46  ;;  %v23042_v46 = vld [vmem:[#allocation2 + $0x10] sm:$0xff] }
 0x78e   : > { %18429 = vmatmul.mubr.msk.f32.vlgmr.msra.gmra.mrb[32].mxu1 %vm171_vm1, %v23042_v46 }
 0x78f   : > { %18477 = vmatpush3.msk.msra.mxu1 %vm498_vm0, %v15577_v57  ;;  %18431 = vmatprep.mubr.msk.f32.mxu1 %vm171_vm1, %v23050_v5  ;;  %v24728_v57 = vld [vmem:[#allocation73_spill] sm:$0xff] }
 0x790   : > { %18303 = vmatmul.mubr.msk.f32.gmra.mrb[48].mxu0 %vm171_vm1, %v22769_v23 }
 0x791   : > { %18305 = vmatprep.mubr.msk.f32.mxu0 %vm171_vm1, %v24721_v42  ;;  %v23054_v42 = vld [vmem:[#allocation2 + $0x30] sm:$0xff] }
 0x792   : > { %18432 = vmatmul.mubr.msk.f32.gmra.mrb[34].mxu1 %vm171_vm1, %v23054_v42 }
 0x794   : > { %18306 = vmatmul.mubr.msk.f32.gmra.mrb[50].mxu0 %vm171_vm1, %v22777_v6 }
 0x795   : > { %18308 = vmatprep.mubr.msk.f32.mxu0 %vm171_vm1, %v24722_v28  ;;  %v23059_v28 = vld [vmem:[#allocation2 + $0x48] sm:$0xff] }
 0x796   : > { %18434 = vmatprep.mubr.msk.f32.mxu1 %vm171_vm1, %v23059_v28 }
 0x798   : > { %18309 = vmatmul.mubr.msk.f32.gmra.mrb[52].mxu0 %vm171_vm1, %v22785_v20 }
 0x799   : > { %18311 = vmatprep.mubr.msk.f32.mxu0 %vm171_vm1, %v22789_v56  ;;  %v23023_v56 = vld [vmem:[#allocation2 + $0x34c] sm:$0xff] }
 0x79c   : > { %18312 = vmatmul.mubr.msk.f32.gmra.mrb[54].mxu0 %vm171_vm1, %v22793_v35 }
 0x79d   : > { %18314 = vmatprep.mubr.msk.f32.mxu0 %vm171_vm1, %v9798_v24  ;;  %v23069_v24 = vld [vmem:[#allocation2 + $0x50] sm:$0xff] }
 0x79e   : > { %18435 = vmatmul.mubr.msk.f32.gmra.mrb[36].mxu1 %vm171_vm1, %v23069_v24 }
 0x7a0   : > { %18315 = vmatmul.mubr.msk.f32.gmra.mrb[56].mxu0 %vm171_vm1, %v23013_v4 }
 0x7a1   : > { %18317 = vmatprep.mubr.msk.f32.mxu0 %vm171_vm1, %v9800_v16 }
 0x7a4   : > { %18318 = vmatmul.mubr.msk.f32.gmra.mrb[58].mxu0 %vm171_vm1, %v23018_v34 }
 0x7a5   : > { %18320 = vmatprep.mubr.msk.f32.mxu0 %vm171_vm1, %v9802_v43 }
 0x7a8   : > { %18321 = vmatmul.mubr.msk.f32.gmra.mrb[60].mxu0 %vm171_vm1, %v23023_v56 }
 0x7a9   : > { %18323 = vmatprep.mubr.msk.f32.mxu0 %vm171_vm1, %v9804_v58 }
 0x7ac   : > { %18324 = vmatmul.mubr.msk.f32.gmra.mrb[62].mxu0 %vm171_vm1, %v23028_v38 }
 0x7ad   : > { %18328 = vmatprep.mubr.msk.f32.mxu0 %vm171_vm1, %v10164_v3 }
 0x7b0   : > { %18329 = vmatmul.mubr.msk.f32.vlgmr.msra.gmra.mrb[32].mxu0 %vm171_vm1, %v10165_v2 }
 0x7b1   : > { %18377 = vmatpush3.msk.msra.mxu0 %vm498_vm0, %v15542_v22  ;;  %18331 = vmatprep.mubr.msk.f32.mxu0 %vm171_vm1, %v22331_v33  ;;  %v23073_v33 = vld [vmem:[#allocation2 + $0x68] sm:$0xff] }
 0x7b2   : > { %18437 = vmatprep.mubr.msk.f32.mxu1 %vm171_vm1, %v23073_v33  ;;  %v23085_v22 = vld [vmem:[#allocation2 + $0x88] sm:$0xff] }
 0x7b4   : > { %18332 = vmatmul.mubr.msk.f32.gmra.mrb[34].mxu0 %vm171_vm1, %v22339_v13  ;;  %v23081_v13 = vld [vmem:[#allocation2 + $0x70] sm:$0xff] }
 0x7b5   : > { %18334 = vmatprep.mubr.msk.f32.mxu0 %vm171_vm1, %v22353_v11  ;;  %18438 = vmatmul.mubr.msk.f32.gmra.mrb[38].mxu1 %vm171_vm1, %v23081_v13  ;;  %v23093_v11 = vld [vmem:[#allocation2 + $0x90] sm:$0xff] }
 0x7b6   : > { %18440 = vmatprep.mubr.msk.f32.mxu1 %vm171_vm1, %v23085_v22 }
 0x7b8   : > { %18335 = vmatmul.mubr.msk.f32.gmra.mrb[36].mxu0 %vm171_vm1, %v22361_v40  ;;  %v10188_v40 = vld [vmem:[#allocation2 + $0x308] sm:$0xff] }
 0x7b9   : > { %18337 = vmatprep.mubr.msk.f32.mxu0 %vm171_vm1, %v22375_v52  ;;  %18441 = vmatmul.mubr.msk.f32.gmra.mrb[40].mxu1 %vm171_vm1, %v23093_v11  ;;  %v10189_v52 = vld [vmem:[#allocation2 + $0x310] sm:$0xff] }
 0x7bc   : > { %18338 = vmatmul.mubr.msk.f32.gmra.mrb[38].mxu0 %vm171_vm1, %v22383_v27  ;;  %v10190_v27 = vld [vmem:[#allocation2 + $0x328] sm:$0xff] }
 0x7bd   : > { %18340 = vmatprep.mubr.msk.f32.mxu0 %vm171_vm1, %v22397_v10  ;;  %v10191_v10 = vld [vmem:[#allocation2 + $0x330] sm:$0xff] }
 0x7c0   : > { %18341 = vmatmul.mubr.msk.f32.gmra.mrb[40].mxu0 %vm171_vm1, %v22405_v17  ;;  %v10192_v17 = vld [vmem:[#allocation2 + $0x348] sm:$0xff] }
 0x7c1   : > { %18343 = vmatprep.mubr.msk.f32.mxu0 %vm171_vm1, %v22419_v41  ;;  %v10193_v41 = vld [vmem:[#allocation2 + $0x350] sm:$0xff] }
 0x7c4   : > { %18344 = vmatmul.mubr.msk.f32.gmra.mrb[42].mxu0 %vm171_vm1, %v22427_v0  ;;  %v10195_v0 = vld [vmem:[#allocation2 + $0x370] sm:$0xff] }
 0x7c5   : > { %18346 = vmatprep.mubr.msk.f32.mxu0 %vm171_vm1, %v22441_v21 }
 0x7c8   : > { %18347 = vmatmul.mubr.msk.f32.gmra.mrb[44].mxu0 %vm171_vm1, %v22449_v1 }
 0x7c9   : > { %18349 = vmatprep.mubr.msk.f32.mxu0 %vm171_vm1, %v22463_v30  ;;  %v10194_v30 = vld [vmem:[#allocation2 + $0x368] sm:$0xff] }
 0x7cc   : > { %18350 = vmatmul.mubr.msk.f32.gmra.mrb[46].mxu0 %vm171_vm1, %v22471_v59 }
 0x7cd   : > { %18352 = vmatprep.mubr.msk.f32.mxu0 %vm171_vm1, %v22850_v9  ;;  %v24724_v9 = vld [vmem:[#allocation69_spill] sm:$0xff] }
 0x7d0   : > { %18353 = vmatmul.mubr.msk.f32.gmra.mrb[48].mxu0 %vm171_vm1, %v22854_v63 }
 0x7d1   : > { %18355 = vmatprep.mubr.msk.f32.mxu0 %vm171_vm1, %v22858_v31 }
 0x7d4   : > { %18356 = vmatmul.mubr.msk.f32.gmra.mrb[50].mxu0 %vm171_vm1, %v22862_v48 }
 0x7d5   : > { %18358 = vmatprep.mubr.msk.f32.mxu0 %vm171_vm1, %v22866_v55 }
 0x7d8   : > { %18359 = vmatmul.mubr.msk.f32.gmra.mrb[52].mxu0 %vm171_vm1, %v22870_v44 }
 0x7d9   : > { %18361 = vmatprep.mubr.msk.f32.mxu0 %vm171_vm1, %v22874_v53  ;;  %v24725_v53 = vld [vmem:[#allocation70_spill] sm:$0xff] }
 0x7dc   : > { %18362 = vmatmul.mubr.msk.f32.gmra.mrb[54].mxu0 %vm171_vm1, %v22878_v47 }
 0x7dd   : > { %18364 = vmatprep.mubr.msk.f32.mxu0 %vm171_vm1, %v10188_v40 }
 0x7e0   : > { %18365 = vmatmul.mubr.msk.f32.gmra.mrb[56].mxu0 %vm171_vm1, %v10189_v52 }
 0x7e1   : > { %18367 = vmatprep.mubr.msk.f32.mxu0 %vm171_vm1, %v10190_v27 }
 0x7e4   : > { %18368 = vmatmul.mubr.msk.f32.gmra.mrb[58].mxu0 %vm171_vm1, %v10191_v10 }
 0x7e5   : > { %18370 = vmatprep.mubr.msk.f32.mxu0 %vm171_vm1, %v10192_v17 }
 0x7e8   : > { %18371 = vmatmul.mubr.msk.f32.gmra.mrb[60].mxu0 %vm171_vm1, %v10193_v41  ;;  %v24729_v41 = vld [vmem:[#allocation80_spill] sm:$0xff] }
 0x7e9   : > { %18373 = vmatprep.mubr.msk.f32.mxu0 %vm171_vm1, %v10194_v30 }
 0x7ec   : > { %18374 = vmatmul.mubr.msk.f32.gmra.mrb[62].mxu0 %vm171_vm1, %v10195_v0 }
 0x7ed   : > { %18378 = vmatprep.mubr.msk.f32.mxu0 %vm171_vm1, %v22563_v15 }
 0x7f0   : > { %18379 = vmatmul.mubr.msk.f32.vlgmr.msra.gmra.mrb[32].mxu0 %vm171_vm1, %v22666_v7 }
 0x7f1   : > { %18381 = vmatprep.mubr.msk.f32.mxu0 %vm171_vm1, %v22571_v61 }
 0x7f4   : > { %18382 = vmatmul.mubr.msk.f32.gmra.mrb[34].mxu0 %vm171_vm1, %v22672_v19 }
 0x7f5   : > { %18384 = vmatprep.mubr.msk.f32.mxu0 %vm171_vm1, %v22579_v26  ;;  %v23231_v26 = vld [vmem:[%s24182_s2 + $0x2] ss:$0 sm:$0xff] }
 0x7f8   : > { %18385 = vmatmul.mubr.msk.f32.gmra.mrb[36].mxu0 %vm171_vm1, %v22678_v50  ;;  %v24723_v50 = vld [vmem:[#allocation68_spill] sm:$0xff] }
 0x7f9   : > { %18387 = vmatprep.mubr.msk.f32.mxu0 %vm171_vm1, %v22587_v8  ;;  %v23224_v8 = vld [vmem:[%s24181_s1 + $0x74] sm:$0xf] }
 0x7fa   : > { %18526 = vmatprep.subr.msk.mxu1 %vm498_vm0, %v23224_v8 }
 0x7fc   : > { %18388 = vmatmul.mubr.msk.f32.gmra.mrb[38].mxu0 %vm171_vm1, %v22684_v49  ;;  %v23201_v49 = vld [vmem:[#allocation2 + $0xb0] sm:$0xff] }
 0x7fd   : > { %18390 = vmatprep.mubr.msk.f32.mxu0 %vm171_vm1, %v22595_v12  ;;  %v23217_v12 = vld [vmem:[#allocation2 + $0xf0] sm:$0xff] }
 0x800   : > { %18391 = vmatmul.mubr.msk.f32.gmra.mrb[40].mxu0 %vm171_vm1, %v22690_v18  ;;  %v23197_v18 = vld [vmem:[#allocation2 + $0xa8] sm:$0xff] }
 0x801   : > { %18393 = vmatprep.mubr.msk.f32.mxu0 %vm171_vm1, %v22603_v62  ;;  %18443 = vmatprep.mubr.msk.f32.mxu1 %vm171_vm1, %v23197_v18  ;;  %v23213_v62 = vld [vmem:[#allocation2 + $0xe8] sm:$0xff] }
 0x802   : > { %18444 = vmatmul.mubr.msk.f32.gmra.mrb[42].mxu1 %vm171_vm1, %v23201_v49 }
 0x804   : > { %18394 = vmatmul.mubr.msk.f32.gmra.mrb[42].mxu0 %vm171_vm1, %v22696_v32  ;;  %v10585_v32 = vld [vmem:[#allocation2 + $0x374] sm:$0xff] }
 0x805   : > { %18396 = vmatprep.mubr.msk.f32.mxu0 %vm171_vm1, %v22611_v29  ;;  %v23209_v29 = vld [vmem:[#allocation2 + $0xd0] sm:$0xff] }
 0x808   : > { %18397 = vmatmul.mubr.msk.f32.gmra.mrb[44].mxu0 %vm171_vm1, %v22702_v54  ;;  %v10581_v54 = vld [vmem:[#allocation2 + $0x334] sm:$0xff] }
 0x809   : > { %18399 = vmatprep.mubr.msk.f32.mxu0 %vm171_vm1, %v22619_v45  ;;  %v23205_v45 = vld [vmem:[#allocation2 + $0xc8] sm:$0xff] }
 0x80a   : > { %18446 = vmatprep.mubr.msk.f32.mxu1 %vm171_vm1, %v23205_v45 }
 0x80b   : > { %18447 = vmatmul.mubr.msk.f32.gmra.mrb[44].mxu1 %vm171_vm1, %v23209_v29 }
 0x80c   : > { %18400 = vmatmul.mubr.msk.f32.gmra.mrb[46].mxu0 %vm171_vm1, %v22708_v37  ;;  %v10579_v37 = vld [vmem:[#allocation2 + $0x314] sm:$0xff]  ;;  %18449 = vmatprep.mubr.msk.f32.mxu1 %vm171_vm1, %v23213_v62 }
 0x80d   : > { %18402 = vmatprep.mubr.msk.f32.mxu0 %vm171_vm1, %v22769_v23 }
 0x80f   : > { %18450 = vmatmul.mubr.msk.f32.gmra.mrb[46].mxu1 %vm171_vm1, %v23217_v12 }
 0x810   : > { %18403 = vmatmul.mubr.msk.f32.gmra.mrb[48].mxu0 %vm171_vm1, %v22937_v60 }
 0x811   : > { %18405 = vmatprep.mubr.msk.f32.mxu0 %vm171_vm1, %v22777_v6 }
 0x814   : > { %18406 = vmatmul.mubr.msk.f32.gmra.mrb[50].mxu0 %vm171_vm1, %v22943_v14 }
 0x815   : > { %18408 = vmatprep.mubr.msk.f32.mxu0 %vm171_vm1, %v22785_v20  ;;  %v10583_v20 = vld [vmem:[#allocation2 + $0x354] sm:$0xff] }
 0x818   : > { %18409 = vmatmul.mubr.msk.f32.gmra.mrb[52].mxu0 %vm171_vm1, %v22949_v36  ;;  %v24726_v36 = vld [vmem:[#allocation71_spill] sm:$0xff] }
 0x819   : > { %18411 = vmatprep.mubr.msk.f32.mxu0 %vm171_vm1, %v22793_v35 }
 0x81c   : > { %18412 = vmatmul.mubr.msk.f32.gmra.mrb[54].mxu0 %vm171_vm1, %v22955_v39 }
 0x81d   : > { %18414 = vmatprep.mubr.msk.f32.mxu0 %vm171_vm1, %v23013_v4 }
 0x820   : > { %18415 = vmatmul.mubr.msk.f32.gmra.mrb[56].mxu0 %vm171_vm1, %v10579_v37 }
 0x821   : > { %18417 = vmatprep.mubr.msk.f32.mxu0 %vm171_vm1, %v23018_v34 }
 0x824   : > { %18418 = vmatmul.mubr.msk.f32.gmra.mrb[58].mxu0 %vm171_vm1, %v10581_v54 }
 0x825   : > { %18420 = vmatprep.mubr.msk.f32.mxu0 %vm171_vm1, %v23023_v56  ;;  %v24727_v56 = vld [vmem:[#allocation72_spill] sm:$0xff] }
 0x828   : > { %18421 = vmatmul.mubr.msk.f32.gmra.mrb[60].mxu0 %vm171_vm1, %v10583_v20  ;;  %v24730_v20 = vld [vmem:[#allocation82_spill] sm:$0xff] }
 0x829   : > { %18423 = vmatprep.mubr.msk.f32.mxu0 %vm171_vm1, %v23028_v38 }
 0x82c   : > { %18424 = vmatmul.mubr.msk.f32.gmra.mrb[62].mxu0 %vm171_vm1, %v10585_v32 }
 0x8c3   : > { %v18380_v21 = vpop.f32.mrb[32].mxu0 }
 0x8c4   : > { %v10950_v1 = vadd.f32 %v18380_v21, %v23231_v26  ;;  %v10753_v59 = vpop.f32.mrb[33].mxu0 }
 0x8c5   : > { %v10949_v61 = vadd.f32 %v23231_v26, %v10753_v59 }
 0x8c6   : > { %v10982_v15 = vmax.f32 %v10950_v1, 0.0 }
 0x8c7   : > { %v10981_v7 = vmax.f32 %v10949_v61, 0.0  ;;  %v18383_v19 = vpop.f32.mrb[34].mxu0 }
 0x8c8   : > { %v23236_v23 = vadd.f32 %v10982_v15, %v24723_v50  ;;  %11046 = vst.msk [vmem:[#allocation2 + $0x110] sm:$0xff] %vm171_vm1, %v10982_v15  ;;  %v10952_v35 = vadd.f32 %v18383_v19, %v23231_v26  ;;  %v10763_v6 = vpop.f32.mrb[35].mxu0 }
 0x8c9   : > { %v23241_v63 = vadd.f32 %v10981_v7, %v24724_v9  ;;  %11045 = vst.msk [vmem:[#allocation2 + $0x108] sm:$0xff] %vm171_vm1, %v10981_v7  ;;  %v10951_v31 = vadd.f32 %v23231_v26, %v10763_v6  ;;  %v24731_v7 = vld [vmem:[#allocation83_spill] sm:$0xff]  ;;  %v24732_v9 = vld [vmem:[#allocation84_spill] sm:$0xff] }
 0x8ca   : > { %v10984_v48 = vmax.f32 %v10952_v35, 0.0 }
 0x8cb   : > { %v10983_v55 = vmax.f32 %v10951_v31, 0.0  ;;  %v18386_v44 = vpop.f32.mrb[36].mxu0 }
 0x8cc   : > { %v23246_v47 = vadd.f32 %v10984_v48, %v24725_v53  ;;  %11048 = vst.msk [vmem:[#allocation2 + $0x130] sm:$0xff] %vm171_vm1, %v10984_v48  ;;  %v10954_v60 = vadd.f32 %v18386_v44, %v23231_v26  ;;  %v10773_v14 = vpop.f32.mrb[37].mxu0 }
 0x8cd   : > { %v23251_v39 = vadd.f32 %v10983_v55, %v24726_v36  ;;  %11047 = vst.msk [vmem:[#allocation2 + $0x128] sm:$0xff] %vm171_vm1, %v10983_v55  ;;  %v10953_v4 = vadd.f32 %v23231_v26, %v10773_v14  ;;  %v24733_v14 = vld [vmem:[#allocation86_spill] sm:$0xff] }
 0x8ce   : > { %v10986_v16 = vmax.f32 %v10954_v60, 0.0 }
 0x8cf   : > { %v10985_v34 = vmax.f32 %v10953_v4, 0.0  ;;  %v18389_v43 = vpop.f32.mrb[38].mxu0  ;;  %v23269_v52 = vld [vmem:[#allocation2 + $0x110] sm:$0xff] }
 0x8d0   : > { %v23256_v58 = vadd.f32 %v10986_v16, %v24727_v56  ;;  %11050 = vst.msk [vmem:[#allocation2 + $0x150] sm:$0xff] %vm171_vm1, %v10986_v16  ;;  %v10956_v38 = vadd.f32 %v18389_v43, %v23231_v26  ;;  %v10783_v3 = vpop.f32.mrb[39].mxu0  ;;  %v23260_v25 = vld [vmem:[#allocation2 + $0x108] sm:$0xff]  ;;  %v24734_v43 = vld [vmem:[#allocation74_spill] sm:$0xff] }
 0x8d1   : > { %v23263_v2 = vadd.f32 %v10985_v34, %v24728_v57  ;;  %11049 = vst.msk [vmem:[#allocation2 + $0x148] sm:$0xff] %vm171_vm1, %v10985_v34  ;;  %v10955_v40 = vadd.f32 %v23231_v26, %v10783_v3  ;;  %18452 = vmatprep.mubr.msk.f32.mxu1 %vm171_vm1, %v23260_v25 }
 0x8d2   : > { %v10988_v27 = vmax.f32 %v10956_v38, 0.0  ;;  %18453 = vmatmul.mubr.msk.f32.gmra.mrb[48].mxu1 %vm171_vm1, %v23269_v52 }
 0x8d3   : > { %v10987_v10 = vmax.f32 %v10955_v40, 0.0  ;;  %v18392_v17 = vpop.f32.mrb[40].mxu0  ;;  %v23287_v1 = vld [vmem:[#allocation2 + $0x130] sm:$0xff] }
 0x8d4   : > { %v23274_v30 = vadd.f32 %v10988_v27, %v24729_v41  ;;  %11052 = vst.msk [vmem:[#allocation2 + $0x170] sm:$0xff] %vm171_vm1, %v10988_v27  ;;  %v10958_v0 = vadd.f32 %v18392_v17, %v23231_v26  ;;  %v10793_v37 = vpop.f32.mrb[41].mxu0  ;;  %v23278_v54 = vld [vmem:[#allocation2 + $0x128] sm:$0xff] }
 0x8d5   : > { %v23281_v32 = vadd.f32 %v10987_v10, %v24730_v20  ;;  %11051 = vst.msk [vmem:[#allocation2 + $0x168] sm:$0xff] %vm171_vm1, %v10987_v10  ;;  %v10957_v21 = vadd.f32 %v23231_v26, %v10793_v37  ;;  %18455 = vmatprep.mubr.msk.f32.mxu1 %vm171_vm1, %v23278_v54  ;;  %v24735_v10 = vld [vmem:[#allocation75_spill] sm:$0xff]  ;;  %v24736_v20 = vld [vmem:[#allocation76_spill] sm:$0xff] }
 0x8d6   : > { %v10990_v59 = vmax.f32 %v10958_v0, 0.0  ;;  %18456 = vmatmul.mubr.msk.f32.gmra.mrb[50].mxu1 %vm171_vm1, %v23287_v1 }
 0x8d7   : > { %v10989_v61 = vmax.f32 %v10957_v21, 0.0  ;;  %v18395_v15 = vpop.f32.mrb[42].mxu0  ;;  %v23305_v55 = vld [vmem:[#allocation2 + $0x150] sm:$0xff] }
 0x8d8   : > { %v23292_v19 = vadd.f32 %v10990_v59, %v24731_v7  ;;  %11054 = vst.msk [vmem:[#allocation2 + $0x190] sm:$0xff] %vm171_vm1, %v10990_v59  ;;  %v10960_v50 = vadd.f32 %v18395_v15, %v23231_v26  ;;  %v10803_v35 = vpop.f32.mrb[43].mxu0  ;;  %v23296_v6 = vld [vmem:[#allocation2 + $0x148] sm:$0xff] }
 0x8d9   : > { %v23299_v31 = vadd.f32 %v10989_v61, %v24732_v9  ;;  %11053 = vst.msk [vmem:[#allocation2 + $0x188] sm:$0xff] %vm171_vm1, %v10989_v61  ;;  %v10959_v48 = vadd.f32 %v23231_v26, %v10803_v35  ;;  %18458 = vmatprep.mubr.msk.f32.mxu1 %vm171_vm1, %v23296_v6  ;;  %v24737_v35 = vld [vmem:[#allocation77_spill] sm:$0xff] }
 0x8da   : > { %v10992_v44 = vmax.f32 %v10960_v50, 0.0  ;;  %18459 = vmatmul.mubr.msk.f32.gmra.mrb[52].mxu1 %vm171_vm1, %v23305_v55 }
 0x8db   : > { %v10991_v53 = vmax.f32 %v10959_v48, 0.0  ;;  %v18398_v60 = vpop.f32.mrb[44].mxu0  ;;  %v23323_v3 = vld [vmem:[#allocation2 + $0x170] sm:$0xff] }
 0x8dc   : > { %v23310_v36 = vadd.f32 %v10992_v44, %v24733_v14  ;;  %11056 = vst.msk [vmem:[#allocation2 + $0x1b0] sm:$0xff] %vm171_vm1, %v10992_v44  ;;  %v10962_v4 = vadd.f32 %v18398_v60, %v23231_v26  ;;  %v10813_v16 = vpop.f32.mrb[45].mxu0  ;;  %v23314_v34 = vld [vmem:[#allocation2 + $0x168] sm:$0xff]  ;;  %v24738_v60 = vld [vmem:[#allocation78_spill] sm:$0xff] }
 0x8dd   : > { %v23317_v56 = vadd.f32 %v10991_v53, %v24734_v43  ;;  %11055 = vst.msk [vmem:[#allocation2 + $0x1a8] sm:$0xff] %vm171_vm1, %v10991_v53  ;;  %v10961_v38 = vadd.f32 %v23231_v26, %v10813_v16  ;;  %18461 = vmatprep.mubr.msk.f32.mxu1 %vm171_vm1, %v23314_v34 }
 0x8de   : > { %v10994_v57 = vmax.f32 %v10962_v4, 0.0  ;;  %18462 = vmatmul.mubr.msk.f32.gmra.mrb[54].mxu1 %vm171_vm1, %v23323_v3 }
 0x8df   : > { %v10993_v40 = vmax.f32 %v10961_v38, 0.0  ;;  %v18401_v27 = vpop.f32.mrb[46].mxu0  ;;  %v23341_v61 = vld [vmem:[#allocation2 + $0x190] sm:$0xff] }
 0x8e0   : > { %v23328_v17 = vadd.f32 %v10994_v57, %v24735_v10  ;;  %11058 = vst.msk [vmem:[#allocation2 + $0x1d0] sm:$0xff] %vm171_vm1, %v10994_v57  ;;  %v10964_v41 = vadd.f32 %v18401_v27, %v23231_v26  ;;  %v10823_v0 = vpop.f32.mrb[47].mxu0  ;;  %v23332_v37 = vld [vmem:[#allocation2 + $0x188] sm:$0xff] }
 0x8e1   : > { %v23335_v21 = vadd.f32 %v10993_v40, %v24736_v20  ;;  %11057 = vst.msk [vmem:[#allocation2 + $0x1c8] sm:$0xff] %vm171_vm1, %v10993_v40  ;;  %v10963_v59 = vadd.f32 %v23231_v26, %v10823_v0  ;;  %18464 = vmatprep.mubr.msk.f32.mxu1 %vm171_vm1, %v23332_v37  ;;  %v24739_v40 = vld [vmem:[#allocation79_spill] sm:$0xff]  ;;  %v24740_v20 = vld [vmem:[#allocation81_spill] sm:$0xff] }
 0x8e2   : > { %v10996_v15 = vmax.f32 %v10964_v41, 0.0  ;;  %18465 = vmatmul.mubr.msk.f32.gmra.mrb[56].mxu1 %vm171_vm1, %v23341_v61 }
 0x8e3   : > { %v10995_v7 = vmax.f32 %v10963_v59, 0.0  ;;  %v18404_v50 = vpop.f32.mrb[48].mxu0  ;;  %v23359_v16 = vld [vmem:[#allocation2 + $0x1b0] sm:$0xff] }
 0x8e4   : > { %v23346_v9 = vadd.f32 %v10996_v15, %v24737_v35  ;;  %11060 = vst.msk [vmem:[#allocation2 + $0x1f0] sm:$0xff] %vm171_vm1, %v10996_v15  ;;  %v10966_v48 = vadd.f32 %v18404_v50, %v23231_v26  ;;  %v10833_v44 = vpop.f32.mrb[49].mxu0  ;;  %v23350_v53 = vld [vmem:[#allocation2 + $0x1a8] sm:$0xff] }
 0x8e5   : > { %v23353_v14 = vadd.f32 %v10995_v7, %v24738_v60  ;;  %11059 = vst.msk [vmem:[#allocation2 + $0x1e8] sm:$0xff] %vm171_vm1, %v10995_v7  ;;  %v10965_v4 = vadd.f32 %v23231_v26, %v10833_v44  ;;  %18467 = vmatprep.mubr.msk.f32.mxu1 %vm171_vm1, %v23350_v53  ;;  %v24742_v44 = vld [vmem:[#allocation85_spill] sm:$0xff] }
 0x8e6   : > { %v10998_v43 = vmax.f32 %v10966_v48, 0.0  ;;  %18468 = vmatmul.mubr.msk.f32.gmra.mrb[58].mxu1 %vm171_vm1, %v23359_v16 }
 0x8e7   : > { %v10997_v38 = vmax.f32 %v10965_v4, 0.0  ;;  %v18407_v57 = vpop.f32.mrb[50].mxu0  ;;  %v23377_v7 = vld [vmem:[#allocation2 + $0x1d0] sm:$0xff] }
 0x8e8   : > { %v23364_v27 = vadd.f32 %v10998_v43, %v24739_v40  ;;  %11062 = vst.msk [vmem:[#allocation2 + $0x210] sm:$0xff] %vm171_vm1, %v10998_v43  ;;  %v10968_v10 = vadd.f32 %v18407_v57, %v23231_v26  ;;  %v10843_v41 = vpop.f32.mrb[51].mxu0  ;;  %v23368_v0 = vld [vmem:[#allocation2 + $0x1c8] sm:$0xff]  ;;  %v11077_v57 = vld [vmem:[#allocation2] sm:$0xff] }
 0x8e9   : > { %v23371_v59 = vadd.f32 %v10997_v38, %v24740_v20  ;;  %11061 = vst.msk [vmem:[#allocation2 + $0x208] sm:$0xff] %vm171_vm1, %v10997_v38  ;;  %v10967_v15 = vadd.f32 %v23231_v26, %v10843_v41  ;;  %18470 = vmatprep.mubr.msk.f32.mxu1 %vm171_vm1, %v23368_v0  ;;  %v24744_v40 = vld [vmem:[#allocation87_spill] sm:$0xff] }
 0x8ea   : > { %v11000_v50 = vmax.f32 %v10968_v10, 0.0  ;;  %18471 = vmatmul.mubr.msk.f32.gmra.mrb[60].mxu1 %vm171_vm1, %v23377_v7 }
 0x8eb   : > { %24741 = vst [vmem:[#allocation59_spill] sm:$0xff] %v23371_v59  ;;  %v10999_v35 = vmax.f32 %v10967_v15, 0.0  ;;  %v18410_v48 = vpop.f32.mrb[52].mxu0  ;;  %v23395_v20 = vld [vmem:[#allocation2 + $0x1f0] sm:$0xff] }
 0x8ec   : > { %v23382_v60 = vadd.f32 %v11000_v50, %v24742_v44  ;;  %11064 = vst.msk [vmem:[#allocation2 + $0x230] sm:$0xff] %vm171_vm1, %v11000_v50  ;;  %v10970_v4 = vadd.f32 %v18410_v48, %v23231_v26  ;;  %v10853_v43 = vpop.f32.mrb[53].mxu0  ;;  %v23386_v38 = vld [vmem:[#allocation2 + $0x1e8] sm:$0xff] }
 0x8ed   : > { %v23389_v41 = vadd.f32 %v10999_v35, %v24744_v40  ;;  %11063 = vst.msk [vmem:[#allocation2 + $0x228] sm:$0xff] %vm171_vm1, %v10999_v35  ;;  %v10969_v10 = vadd.f32 %v23231_v26, %v10853_v43  ;;  %18473 = vmatprep.mubr.msk.f32.mxu1 %vm171_vm1, %v23386_v38  ;;  %v24746_v44 = vld [vmem:[#allocation88_spill] sm:$0xff] }
 0x8ee   : > { %24743 = vst [vmem:[#allocation10_spill] sm:$0xff] %v23382_v60  ;;  %v11002_v15 = vmax.f32 %v10970_v4, 0.0  ;;  %18474 = vmatmul.mubr.msk.f32.gmra.mrb[62].mxu1 %vm171_vm1, %v23395_v20  ;;  %v24748_v60 = vld [vmem:[#allocation89_spill] sm:$0xff] }
 0x8ef   : > { %24745 = vst [vmem:[#allocation61_spill] sm:$0xff] %v23389_v41  ;;  %v11001_v50 = vmax.f32 %v10969_v10, 0.0  ;;  %v18413_v48 = vpop.f32.mrb[54].mxu0  ;;  %18478 = vmatprep.mubr.msk.f32.mxu1 %vm171_vm1, %v11077_v57  ;;  %v11079_v41 = vld [vmem:[#allocation2 + $0x20] sm:$0xff]  ;;  %v23413_v57 = vld [vmem:[%s24181_s1 + $0x78] sm:$0xf] }
 0x8f0   : > { %v23401_v40 = vadd.f32 %v11002_v15, %v24746_v44  ;;  %11066 = vst.msk [vmem:[#allocation2 + $0x250] sm:$0xff] %vm171_vm1, %v11002_v15  ;;  %v10972_v35 = vadd.f32 %v18413_v48, %v23231_v26  ;;  %v10863_v43 = vpop.f32.mrb[55].mxu0 }
 0x8f1   : > { %v23406_v59 = vadd.f32 %v11001_v50, %v24748_v60  ;;  %11065 = vst.msk [vmem:[#allocation2 + $0x248] sm:$0xff] %vm171_vm1, %v11001_v50  ;;  %v10971_v4 = vadd.f32 %v23231_v26, %v10863_v43  ;;  %v24750_v60 = vld [vmem:[#allocation67_spill] sm:$0xff] }
 0x8f2   : > { %24747 = vst [vmem:[#allocation9_spill] sm:$0xff] %v23401_v40  ;;  %v11004_v10 = vmax.f32 %v10972_v35, 0.0  ;;  %18479 = vmatmul.mubr.msk.f32.vlgmr.msra.gmra.mrb[32].mxu1 %vm171_vm1, %v23035_v51  ;;  %v24752_v51 = vld [vmem:[#allocation4_spill] sm:$0xff] }
 0x8f3   : > { %24749 = vst [vmem:[#allocation63_spill] sm:$0xff] %v23406_v59  ;;  %v11003_v15 = vmax.f32 %v10971_v4, 0.0  ;;  %18527 = vmatpush3.msk.msra.mxu1 %vm498_vm0, %v23224_v8  ;;  %v18416_v48 = vpop.f32.mrb[56].mxu0  ;;  %18481 = vmatprep.mubr.msk.f32.mxu1 %vm171_vm1, %v11079_v41  ;;  %v11081_v59 = vld [vmem:[#allocation2 + $0x40] sm:$0xff] }
 0x8f4   : > { %v23421_v50 = vadd.f32 %v11004_v10, %v24750_v60  ;;  %11068 = vst.msk [vmem:[#allocation2 + $0x270] sm:$0xff] %vm171_vm1, %v11004_v10  ;;  %v10974_v44 = vadd.f32 %v18416_v48, %v23231_v26  ;;  %v10873_v43 = vpop.f32.mrb[57].mxu0  ;;  %18576 = vmatprep.subr.msk.mxu1 %vm498_vm0, %v23413_v57  ;;  %v24754_v48 = vld [vmem:[#allocation39_spill] sm:$0xff] }
 0x8f5   : > { %v23428_v35 = vadd.f32 %v11003_v15, %v24752_v51  ;;  %11067 = vst.msk [vmem:[#allocation2 + $0x268] sm:$0xff] %vm171_vm1, %v11003_v15  ;;  %v10973_v8 = vadd.f32 %v23231_v26, %v10873_v43  ;;  %v24755_v15 = vld [vmem:[#allocation3_spill] sm:$0xff] }
 0x8f6   : > { %24751 = vst [vmem:[#allocation12_spill] sm:$0xff] %v23421_v50  ;;  %v11006_v41 = vmax.f32 %v10974_v44, 0.0  ;;  %18482 = vmatmul.mubr.msk.f32.gmra.mrb[34].mxu1 %vm171_vm1, %v23050_v5  ;;  %v11083_v50 = vld [vmem:[#allocation2 + $0x60] sm:$0xff] }
 0x8f7   : > { %24753 = vst [vmem:[#allocation33_spill] sm:$0xff] %v23428_v35  ;;  %v11005_v4 = vmax.f32 %v10973_v8, 0.0  ;;  %v18419_v10 = vpop.f32.mrb[58].mxu0  ;;  %18484 = vmatprep.mubr.msk.f32.mxu1 %vm171_vm1, %v11081_v59  ;;  %v24757_v8 = vld [vmem:[#allocation40_spill] sm:$0xff] }
 0x8f8   : > { %v23436_v60 = vadd.f32 %v11006_v41, %v24754_v48  ;;  %11070 = vst.msk [vmem:[#allocation2 + $0x290] sm:$0xff] %vm171_vm1, %v11006_v41  ;;  %v10976_v51 = vadd.f32 %v18419_v10, %v23231_v26  ;;  %v10883_v35 = vpop.f32.mrb[59].mxu0 }
 0x8f9   : > { %v23441_v40 = vadd.f32 %v11005_v4, %v24755_v15  ;;  %11069 = vst.msk [vmem:[#allocation2 + $0x288] sm:$0xff] %vm171_vm1, %v11005_v4  ;;  %v10975_v5 = vadd.f32 %v23231_v26, %v10883_v35  ;;  %v11085_v15 = vld [vmem:[#allocation2 + $0x80] sm:$0xff]  ;;  %v24758_v4 = vld [vmem:[#allocation6_spill] sm:$0xff] }
 0x8fa   : > { %v11008_v44 = vmax.f32 %v10976_v51, 0.0  ;;  %18485 = vmatmul.mubr.msk.f32.gmra.mrb[36].mxu1 %vm171_vm1, %v23059_v28 }
 0x8fb   : > { %24756 = vst [vmem:[#allocation11_spill] sm:$0xff] %v23441_v40  ;;  %v11007_v59 = vmax.f32 %v10975_v5, 0.0  ;;  %v18422_v43 = vpop.f32.mrb[60].mxu0  ;;  %18487 = vmatprep.mubr.msk.f32.mxu1 %vm171_vm1, %v11083_v50  ;;  %v24760_v5 = vld [vmem:[#allocation54_spill] sm:$0xff] }
 0x8fc   : > { %v23449_v41 = vadd.f32 %v11008_v44, %v24757_v8  ;;  %11072 = vst.msk [vmem:[#allocation2 + $0x2b0] sm:$0xff] %vm171_vm1, %v11008_v44  ;;  %v10978_v10 = vadd.f32 %v18422_v43, %v23231_v26  ;;  %v10893_v48 = vpop.f32.mrb[61].mxu0 }
 0x8fd   : > { %v23454_v40 = vadd.f32 %v11007_v59, %v24758_v4  ;;  %11071 = vst.msk [vmem:[#allocation2 + $0x2a8] sm:$0xff] %vm171_vm1, %v11007_v59  ;;  %v10977_v28 = vadd.f32 %v23231_v26, %v10893_v48  ;;  %v11087_v4 = vld [vmem:[#allocation2 + $0xa0] sm:$0xff]  ;;  %v24761_v59 = vld [vmem:[#allocation5_spill] sm:$0xff] }
 0x8fe   : > { %v11010_v35 = vmax.f32 %v10978_v10, 0.0  ;;  %18488 = vmatmul.mubr.msk.f32.gmra.mrb[38].mxu1 %vm171_vm1, %v23073_v33 }
 0x8ff   : > { %24759 = vst [vmem:[#allocation34_spill] sm:$0xff] %v23454_v40  ;;  %v11009_v50 = vmax.f32 %v10977_v28, 0.0  ;;  %v18425_v51 = vpop.f32.mrb[62].mxu0  ;;  %18490 = vmatprep.mubr.msk.f32.mxu1 %vm171_vm1, %v11085_v15  ;;  %v24762_v15 = vld [vmem:[#allocation56_spill] sm:$0xff] }
 0x900   : > { %v23462_v44 = vadd.f32 %v11010_v35, %v24760_v5  ;;  %11074 = vst.msk [vmem:[#allocation2 + $0x2d0] sm:$0xff] %vm171_vm1, %v11010_v35  ;;  %v10980_v43 = vadd.f32 %v18425_v51, %v23231_v26  ;;  %v10903_v8 = vpop.f32.mrb[63].mxu0  ;;  %v11089_v35 = vld [vmem:[#allocation2 + $0xc0] sm:$0xff]  ;;  %v24763_v51 = vld [vmem:[#allocation8_spill] sm:$0xff] }
 0x901   : > { %v23467_v40 = vadd.f32 %v11009_v50, %v24761_v59  ;;  %11073 = vst.msk [vmem:[#allocation2 + $0x2c8] sm:$0xff] %vm171_vm1, %v11009_v50  ;;  %v10979_v33 = vadd.f32 %v23231_v26, %v10903_v8  ;;  %v23488_v26 = vld [vmem:[#allocation2 + $0x100] sm:$0xff]  ;;  %v11730_v59 = vld [vmem:[#allocation2 + $0x18] sm:$0xff] }
 0x902   : > { %v11012_v10 = vmax.f32 %v10980_v43, 0.0  ;;  %18491 = vmatmul.mubr.msk.f32.gmra.mrb[40].mxu1 %vm171_vm1, %v23085_v22  ;;  %v11091_v22 = vld [vmem:[#allocation2 + $0xe0] sm:$0xff] }
 0x903   : > { %v11011_v48 = vmax.f32 %v10979_v33, 0.0  ;;  %18493 = vmatprep.mubr.msk.f32.mxu1 %vm171_vm1, %v11087_v4  ;;  %v23494_v50 = vld [vmem:[#allocation2 + $0x120] sm:$0xff]  ;;  %v15713_v33 = vld [vmem:[%s24181_s1 + $0x7c] sm:$0xf] }
 0x904   : > { %v23475_v28 = vadd.f32 %v11012_v10, %v24762_v15  ;;  %11076 = vst.msk [vmem:[#allocation2 + $0x2f0] sm:$0xff] %vm171_vm1, %v11012_v10  ;;  %v23518_v43 = vld [vmem:[#allocation2 + $0x1a0] sm:$0xff]  ;;  %v11732_v10 = vld [vmem:[#allocation2 + $0x38] sm:$0xff] }
 0x905   : > { %v23479_v5 = vadd.f32 %v11011_v48, %v24763_v51  ;;  %11075 = vst.msk [vmem:[#allocation2 + $0x2e8] sm:$0xff] %vm171_vm1, %v11011_v48  ;;  %v23524_v8 = vld [vmem:[#allocation2 + $0x1c0] sm:$0xff]  ;;  %v11736_v48 = vld [vmem:[#allocation2 + $0x78] sm:$0xff] }
 0x906   : > { %18494 = vmatmul.mubr.msk.f32.gmra.mrb[42].mxu1 %vm171_vm1, %v23197_v18  ;;  %v23500_v18 = vld [vmem:[#allocation2 + $0x140] sm:$0xff]  ;;  %v23594_v15 = vld [vmem:[#allocation2 + $0x198] sm:$0xff] }
 0x907   : > { %24764 = vst [vmem:[#allocation14_spill] sm:$0xff] %v23479_v5  ;;  %18496 = vmatprep.mubr.msk.f32.mxu1 %vm171_vm1, %v11089_v35  ;;  %v23530_v4 = vld [vmem:[#allocation2 + $0x1e0] sm:$0xff]  ;;  %v23600_v35 = vld [vmem:[#allocation2 + $0x1b8] sm:$0xff] }
 0x908   : > { %v23606_v51 = vld [vmem:[#allocation2 + $0x1d8] sm:$0xff]  ;;  %v15781_v5 = vld [vmem:[%s24181_s1 + $0x84] sm:$0xf] }
 0x90a   : > { %18497 = vmatmul.mubr.msk.f32.gmra.mrb[44].mxu1 %vm171_vm1, %v23205_v45  ;;  %v23506_v45 = vld [vmem:[#allocation2 + $0x160] sm:$0xff] }
 0x90b   : > { %18499 = vmatprep.mubr.msk.f32.mxu1 %vm171_vm1, %v11091_v22  ;;  %v23612_v22 = vld [vmem:[#allocation2 + $0x1f8] sm:$0xff] }
 0x90e   : > { %18500 = vmatmul.mubr.msk.f32.gmra.mrb[46].mxu1 %vm171_vm1, %v23213_v62  ;;  %v23512_v62 = vld [vmem:[#allocation2 + $0x180] sm:$0xff] }
 0x90f   : > { %18502 = vmatprep.mubr.msk.f32.mxu1 %vm171_vm1, %v23488_v26 }
 0x912   : > { %18503 = vmatmul.mubr.msk.f32.gmra.mrb[48].mxu1 %vm171_vm1, %v23260_v25 }
 0x913   : > { %18505 = vmatprep.mubr.msk.f32.mxu1 %vm171_vm1, %v23494_v50 }
 0x916   : > { %18506 = vmatmul.mubr.msk.f32.gmra.mrb[50].mxu1 %vm171_vm1, %v23278_v54 }
 0x917   : > { %18508 = vmatprep.mubr.msk.f32.mxu1 %vm171_vm1, %v23500_v18 }
 0x91a   : > { %18509 = vmatmul.mubr.msk.f32.gmra.mrb[52].mxu1 %vm171_vm1, %v23296_v6 }
 0x91b   : > { %18511 = vmatprep.mubr.msk.f32.mxu1 %vm171_vm1, %v23506_v45 }
 0x91e   : > { %18512 = vmatmul.mubr.msk.f32.gmra.mrb[54].mxu1 %vm171_vm1, %v23314_v34 }
 0x91f   : > { %18514 = vmatprep.mubr.msk.f32.mxu1 %vm171_vm1, %v23512_v62 }
 0x922   : > { %18515 = vmatmul.mubr.msk.f32.gmra.mrb[56].mxu1 %vm171_vm1, %v23332_v37 }
 0x923   : > { %18517 = vmatprep.mubr.msk.f32.mxu1 %vm171_vm1, %v23518_v43 }
 0x926   : > { %18518 = vmatmul.mubr.msk.f32.gmra.mrb[58].mxu1 %vm171_vm1, %v23350_v53 }
 0x927   : > { %18520 = vmatprep.mubr.msk.f32.mxu1 %vm171_vm1, %v23524_v8 }
 0x92a   : > { %18521 = vmatmul.mubr.msk.f32.gmra.mrb[60].mxu1 %vm171_vm1, %v23368_v0 }
 0x92b   : > { %18523 = vmatprep.mubr.msk.f32.mxu1 %vm171_vm1, %v23530_v4 }
 0x92e   : > { %18524 = vmatmul.mubr.msk.f32.gmra.mrb[62].mxu1 %vm171_vm1, %v23386_v38 }
 0x92f   : > { %18528 = vmatprep.mubr.msk.f32.mxu1 %vm171_vm1, %v23042_v46  ;;  %v11734_v46 = vld [vmem:[#allocation2 + $0x58] sm:$0xff] }
 0x932   : > { %18529 = vmatmul.mubr.msk.f32.vlgmr.msra.gmra.mrb[32].mxu1 %vm171_vm1, %v11730_v59  ;;  %v15747_v59 = vld [vmem:[%s24181_s1 + $0x80] sm:$0xf] }
 0x933   : > { %18577 = vmatpush3.msk.msra.mxu1 %vm498_vm0, %v23413_v57  ;;  %18531 = vmatprep.mubr.msk.f32.mxu1 %vm171_vm1, %v23054_v42  ;;  %v11738_v42 = vld [vmem:[#allocation2 + $0x98] sm:$0xff] }
 0x934   : > { %18626 = vmatprep.subr.msk.mxu1 %vm498_vm0, %v15713_v33  ;;  %v11740_v57 = vld [vmem:[#allocation2 + $0xb8] sm:$0xff] }
 0x936   : > { %18532 = vmatmul.mubr.msk.f32.gmra.mrb[34].mxu1 %vm171_vm1, %v11732_v10  ;;  %v23689_v10 = vld [vmem:[#allocation2 + $0x2a0] sm:$0xff] }
 0x937   : > { %18534 = vmatprep.mubr.msk.f32.mxu1 %vm171_vm1, %v23069_v24  ;;  %v11742_v24 = vld [vmem:[#allocation2 + $0xd8] sm:$0xff] }
 0x93a   : > { %18535 = vmatmul.mubr.msk.f32.gmra.mrb[36].mxu1 %vm171_vm1, %v11734_v46  ;;  %v23691_v46 = vld [vmem:[#allocation2 + $0x288] sm:$0xff] }
 0x93b   : > { %18537 = vmatprep.mubr.msk.f32.mxu1 %vm171_vm1, %v23081_v13  ;;  %v11744_v13 = vld [vmem:[#allocation2 + $0xf8] sm:$0xff] }
 0x93e   : > { %18538 = vmatmul.mubr.msk.f32.gmra.mrb[38].mxu1 %vm171_vm1, %v11736_v48  ;;  %v23697_v48 = vld [vmem:[#allocation2 + $0x2c0] sm:$0xff] }
 0x93f   : > { %18540 = vmatprep.mubr.msk.f32.mxu1 %vm171_vm1, %v23093_v11  ;;  %v23570_v11 = vld [vmem:[#allocation2 + $0x118] sm:$0xff] }
 0x942   : > { %18541 = vmatmul.mubr.msk.f32.gmra.mrb[40].mxu1 %vm171_vm1, %v11738_v42  ;;  %v23699_v42 = vld [vmem:[#allocation2 + $0x2a8] sm:$0xff] }
 0x943   : > { %18543 = vmatprep.mubr.msk.f32.mxu1 %vm171_vm1, %v23201_v49  ;;  %v23576_v49 = vld [vmem:[#allocation2 + $0x138] sm:$0xff] }
 0x946   : > { %18544 = vmatmul.mubr.msk.f32.gmra.mrb[42].mxu1 %vm171_vm1, %v11740_v57  ;;  %v23705_v57 = vld [vmem:[#allocation2 + $0x2e0] sm:$0xff] }
 0x947   : > { %18546 = vmatprep.mubr.msk.f32.mxu1 %vm171_vm1, %v23209_v29  ;;  %v23582_v29 = vld [vmem:[#allocation2 + $0x158] sm:$0xff] }
 0x94a   : > { %18547 = vmatmul.mubr.msk.f32.gmra.mrb[44].mxu1 %vm171_vm1, %v11742_v24  ;;  %v23707_v24 = vld [vmem:[#allocation2 + $0x2c8] sm:$0xff] }
 0x94b   : > { %18549 = vmatprep.mubr.msk.f32.mxu1 %vm171_vm1, %v23217_v12  ;;  %v23588_v12 = vld [vmem:[#allocation2 + $0x178] sm:$0xff] }
 0x94e   : > { %18550 = vmatmul.mubr.msk.f32.gmra.mrb[46].mxu1 %vm171_vm1, %v11744_v13  ;;  %v23713_v13 = vld [vmem:[#allocation2 + $0x2e8] sm:$0xff] }
 0x94f   : > { %18552 = vmatprep.mubr.msk.f32.mxu1 %vm171_vm1, %v23269_v52 }
 0x952   : > { %18553 = vmatmul.mubr.msk.f32.gmra.mrb[48].mxu1 %vm171_vm1, %v23570_v11 }
 0x953   : > { %18555 = vmatprep.mubr.msk.f32.mxu1 %vm171_vm1, %v23287_v1 }
 0x956   : > { %18556 = vmatmul.mubr.msk.f32.gmra.mrb[50].mxu1 %vm171_vm1, %v23576_v49 }
 0x957   : > { %18558 = vmatprep.mubr.msk.f32.mxu1 %vm171_vm1, %v23305_v55 }
 0x95a   : > { %18559 = vmatmul.mubr.msk.f32.gmra.mrb[52].mxu1 %vm171_vm1, %v23582_v29 }
 0x95b   : > { %18561 = vmatprep.mubr.msk.f32.mxu1 %vm171_vm1, %v23323_v3 }
 0x95e   : > { %18562 = vmatmul.mubr.msk.f32.gmra.mrb[54].mxu1 %vm171_vm1, %v23588_v12 }
 0x95f   : > { %18564 = vmatprep.mubr.msk.f32.mxu1 %vm171_vm1, %v23341_v61 }
 0x962   : > { %18565 = vmatmul.mubr.msk.f32.gmra.mrb[56].mxu1 %vm171_vm1, %v23594_v15 }
 0x963   : > { %18567 = vmatprep.mubr.msk.f32.mxu1 %vm171_vm1, %v23359_v16 }
 0x966   : > { %18568 = vmatmul.mubr.msk.f32.gmra.mrb[58].mxu1 %vm171_vm1, %v23600_v35 }
 0x967   : > { %18570 = vmatprep.mubr.msk.f32.mxu1 %vm171_vm1, %v23377_v7 }
 0x96a   : > { %18571 = vmatmul.mubr.msk.f32.gmra.mrb[60].mxu1 %vm171_vm1, %v23606_v51 }
 0x96b   : > { %18573 = vmatprep.mubr.msk.f32.mxu1 %vm171_vm1, %v23395_v20 }
 0x96e   : > { %18574 = vmatmul.mubr.msk.f32.gmra.mrb[62].mxu1 %vm171_vm1, %v23612_v22 }
 0x96f   : > { %18578 = vmatprep.mubr.msk.f32.mxu1 %vm171_vm1, %v23488_v26  ;;  %v23651_v26 = vld [vmem:[#allocation2 + $0x200] sm:$0xff] }
 0x972   : > { %18579 = vmatmul.mubr.msk.f32.vlgmr.msra.gmra.mrb[32].mxu1 %vm171_vm1, %v23260_v25 }
 0x973   : > { %18627 = vmatpush3.msk.msra.mxu1 %vm498_vm0, %v15713_v33  ;;  %18581 = vmatprep.mubr.msk.f32.mxu1 %vm171_vm1, %v23494_v50  ;;  %v23657_v50 = vld [vmem:[#allocation2 + $0x220] sm:$0xff]  ;;  %v23683_v33 = vld [vmem:[#allocation2 + $0x268] sm:$0xff] }
 0x974   : > { %18676 = vmatprep.subr.msk.mxu1 %vm498_vm0, %v15747_v59 }
 0x976   : > { %18582 = vmatmul.mubr.msk.f32.gmra.mrb[34].mxu1 %vm171_vm1, %v23278_v54 }
 0x977   : > { %18584 = vmatprep.mubr.msk.f32.mxu1 %vm171_vm1, %v23500_v18  ;;  %v23659_v18 = vld [vmem:[#allocation2 + $0x208] sm:$0xff] }
 0x97a   : > { %18585 = vmatmul.mubr.msk.f32.gmra.mrb[36].mxu1 %vm171_vm1, %v23296_v6 }
 0x97b   : > { %18587 = vmatprep.mubr.msk.f32.mxu1 %vm171_vm1, %v23506_v45  ;;  %v23665_v45 = vld [vmem:[#allocation2 + $0x240] sm:$0xff] }
 0x97e   : > { %18588 = vmatmul.mubr.msk.f32.gmra.mrb[38].mxu1 %vm171_vm1, %v23314_v34 }
 0x97f   : > { %18590 = vmatprep.mubr.msk.f32.mxu1 %vm171_vm1, %v23512_v62  ;;  %v23667_v62 = vld [vmem:[#allocation2 + $0x228] sm:$0xff] }
 0x982   : > { %18591 = vmatmul.mubr.msk.f32.gmra.mrb[40].mxu1 %vm171_vm1, %v23332_v37 }
 0x983   : > { %18593 = vmatprep.mubr.msk.f32.mxu1 %vm171_vm1, %v23518_v43  ;;  %v23673_v43 = vld [vmem:[#allocation2 + $0x260] sm:$0xff] }
 0x986   : > { %18594 = vmatmul.mubr.msk.f32.gmra.mrb[42].mxu1 %vm171_vm1, %v23350_v53 }
 0x987   : > { %18596 = vmatprep.mubr.msk.f32.mxu1 %vm171_vm1, %v23524_v8  ;;  %v23675_v8 = vld [vmem:[#allocation2 + $0x248] sm:$0xff] }
 0x98a   : > { %18597 = vmatmul.mubr.msk.f32.gmra.mrb[44].mxu1 %vm171_vm1, %v23368_v0 }
 0x98b   : > { %18599 = vmatprep.mubr.msk.f32.mxu1 %vm171_vm1, %v23530_v4  ;;  %v23681_v4 = vld [vmem:[#allocation2 + $0x280] sm:$0xff] }
 0x98e   : > { %18600 = vmatmul.mubr.msk.f32.gmra.mrb[46].mxu1 %vm171_vm1, %v23386_v38 }
 0x98f   : > { %18602 = vmatprep.mubr.msk.f32.mxu1 %vm171_vm1, %v23651_v26 }
 0x992   : > { %18603 = vmatmul.mubr.msk.f32.gmra.mrb[48].mxu1 %vm171_vm1, %v23659_v18 }
 0x993   : > { %18605 = vmatprep.mubr.msk.f32.mxu1 %vm171_vm1, %v23657_v50 }
 0x996   : > { %18606 = vmatmul.mubr.msk.f32.gmra.mrb[50].mxu1 %vm171_vm1, %v23667_v62 }
 0x997   : > { %18608 = vmatprep.mubr.msk.f32.mxu1 %vm171_vm1, %v23665_v45 }
 0x99a   : > { %18609 = vmatmul.mubr.msk.f32.gmra.mrb[52].mxu1 %vm171_vm1, %v23675_v8 }
 0x99b   : > { %18611 = vmatprep.mubr.msk.f32.mxu1 %vm171_vm1, %v23673_v43 }
 0x99e   : > { %18612 = vmatmul.mubr.msk.f32.gmra.mrb[54].mxu1 %vm171_vm1, %v23683_v33 }
 0x99f   : > { %18614 = vmatprep.mubr.msk.f32.mxu1 %vm171_vm1, %v23681_v4 }
 0x9a2   : > { %18615 = vmatmul.mubr.msk.f32.gmra.mrb[56].mxu1 %vm171_vm1, %v23691_v46 }
 0x9a3   : > { %18617 = vmatprep.mubr.msk.f32.mxu1 %vm171_vm1, %v23689_v10 }
 0x9a6   : > { %18618 = vmatmul.mubr.msk.f32.gmra.mrb[58].mxu1 %vm171_vm1, %v23699_v42 }
 0x9a7   : > { %18620 = vmatprep.mubr.msk.f32.mxu1 %vm171_vm1, %v23697_v48 }
 0x9aa   : > { %18621 = vmatmul.mubr.msk.f32.gmra.mrb[60].mxu1 %vm171_vm1, %v23707_v24 }
 0x9ab   : > { %18623 = vmatprep.mubr.msk.f32.mxu1 %vm171_vm1, %v23705_v57 }
 0x9ae   : > { %18624 = vmatmul.mubr.msk.f32.gmra.mrb[62].mxu1 %vm171_vm1, %v23713_v13 }
 0x9af   : > { %18628 = vmatprep.mubr.msk.f32.mxu1 %vm171_vm1, %v23260_v25  ;;  %v23756_v25 = vld [vmem:[#allocation2 + $0x210] sm:$0xff] }
 0x9b2   : > { %18629 = vmatmul.mubr.msk.f32.vlgmr.msra.gmra.mrb[32].mxu1 %vm171_vm1, %v23269_v52 }
 0x9b3   : > { %18677 = vmatpush3.msk.msra.mxu1 %vm498_vm0, %v15747_v59  ;;  %18631 = vmatprep.mubr.msk.f32.mxu1 %vm171_vm1, %v23278_v54  ;;  %v23762_v54 = vld [vmem:[#allocation2 + $0x230] sm:$0xff]  ;;  %v15815_v59 = vld [vmem:[%s24181_s1 + $0x88] sm:$0xf] }
 0x9b4   : > { %18726 = vmatprep.subr.msk.mxu1 %vm498_vm0, %v15781_v5 }
 0x9b6   : > { %18632 = vmatmul.mubr.msk.f32.gmra.mrb[34].mxu1 %vm171_vm1, %v23287_v1 }
 0x9b7   : > { %18634 = vmatprep.mubr.msk.f32.mxu1 %vm171_vm1, %v23296_v6  ;;  %v23768_v6 = vld [vmem:[#allocation2 + $0x250] sm:$0xff] }
 0x9ba   : > { %18635 = vmatmul.mubr.msk.f32.gmra.mrb[36].mxu1 %vm171_vm1, %v23305_v55 }
 0x9bb   : > { %18637 = vmatprep.mubr.msk.f32.mxu1 %vm171_vm1, %v23314_v34  ;;  %v23774_v34 = vld [vmem:[#allocation2 + $0x270] sm:$0xff] }
 0x9be   : > { %18638 = vmatmul.mubr.msk.f32.gmra.mrb[38].mxu1 %vm171_vm1, %v23323_v3 }
 0x9bf   : > { %18640 = vmatprep.mubr.msk.f32.mxu1 %vm171_vm1, %v23332_v37  ;;  %v23780_v37 = vld [vmem:[#allocation2 + $0x290] sm:$0xff] }
 0x9c2   : > { %18641 = vmatmul.mubr.msk.f32.gmra.mrb[40].mxu1 %vm171_vm1, %v23341_v61 }
 0x9c3   : > { %18643 = vmatprep.mubr.msk.f32.mxu1 %vm171_vm1, %v23350_v53  ;;  %v23786_v53 = vld [vmem:[#allocation2 + $0x2b0] sm:$0xff] }
 0x9c6   : > { %18644 = vmatmul.mubr.msk.f32.gmra.mrb[42].mxu1 %vm171_vm1, %v23359_v16 }
 0x9c7   : > { %18646 = vmatprep.mubr.msk.f32.mxu1 %vm171_vm1, %v23368_v0  ;;  %v23792_v0 = vld [vmem:[#allocation2 + $0x2d0] sm:$0xff] }
 0x9ca   : > { %18647 = vmatmul.mubr.msk.f32.gmra.mrb[44].mxu1 %vm171_vm1, %v23377_v7 }
 0x9cb   : > { %18649 = vmatprep.mubr.msk.f32.mxu1 %vm171_vm1, %v23386_v38  ;;  %v23798_v38 = vld [vmem:[#allocation2 + $0x2f0] sm:$0xff] }
 0x9ce   : > { %18650 = vmatmul.mubr.msk.f32.gmra.mrb[46].mxu1 %vm171_vm1, %v23395_v20 }
 0x9cf   : > { %18652 = vmatprep.mubr.msk.f32.mxu1 %vm171_vm1, %v23659_v18 }
 0x9d2   : > { %18653 = vmatmul.mubr.msk.f32.gmra.mrb[48].mxu1 %vm171_vm1, %v23756_v25 }
 0x9d3   : > { %18655 = vmatprep.mubr.msk.f32.mxu1 %vm171_vm1, %v23667_v62 }
 0x9d6   : > { %18656 = vmatmul.mubr.msk.f32.gmra.mrb[50].mxu1 %vm171_vm1, %v23762_v54 }
 0x9d7   : > { %18658 = vmatprep.mubr.msk.f32.mxu1 %vm171_vm1, %v23675_v8 }
 0x9da   : > { %18659 = vmatmul.mubr.msk.f32.gmra.mrb[52].mxu1 %vm171_vm1, %v23768_v6 }
 0x9db   : > { %18661 = vmatprep.mubr.msk.f32.mxu1 %vm171_vm1, %v23683_v33 }
 0x9de   : > { %18662 = vmatmul.mubr.msk.f32.gmra.mrb[54].mxu1 %vm171_vm1, %v23774_v34 }
 0x9df   : > { %18664 = vmatprep.mubr.msk.f32.mxu1 %vm171_vm1, %v23691_v46 }
 0x9e2   : > { %18665 = vmatmul.mubr.msk.f32.gmra.mrb[56].mxu1 %vm171_vm1, %v23780_v37 }
 0x9e3   : > { %18667 = vmatprep.mubr.msk.f32.mxu1 %vm171_vm1, %v23699_v42 }
 0x9e6   : > { %18668 = vmatmul.mubr.msk.f32.gmra.mrb[58].mxu1 %vm171_vm1, %v23786_v53 }
 0x9e7   : > { %18670 = vmatprep.mubr.msk.f32.mxu1 %vm171_vm1, %v23707_v24 }
 0x9ea   : > { %18671 = vmatmul.mubr.msk.f32.gmra.mrb[60].mxu1 %vm171_vm1, %v23792_v0 }
 0x9eb   : > { %18673 = vmatprep.mubr.msk.f32.mxu1 %vm171_vm1, %v23713_v13 }
 0x9ee   : > { %18674 = vmatmul.mubr.msk.f32.gmra.mrb[62].mxu1 %vm171_vm1, %v23798_v38 }
 0x9ef   : > { %18678 = vmatprep.mubr.msk.f32.mxu1 %vm171_vm1, %v23269_v52  ;;  %v23841_v52 = vld [vmem:[#allocation2 + $0x218] sm:$0xff] }
 0x9f2   : > { %18679 = vmatmul.mubr.msk.f32.vlgmr.msra.gmra.mrb[32].mxu1 %vm171_vm1, %v23570_v11  ;;  %v13306_v11 = vld [vmem:[#allocation2 + $0x300] sm:$0xff] }
 0x9f3   : > { %18727 = vmatpush3.msk.msra.mxu1 %vm498_vm0, %v15781_v5  ;;  %18681 = vmatprep.mubr.msk.f32.mxu1 %vm171_vm1, %v23287_v1  ;;  %v23847_v1 = vld [vmem:[#allocation2 + $0x238] sm:$0xff]  ;;  %v15849_v5 = vld [vmem:[%s24181_s1 + $0x8c] sm:$0xf] }
 0x9f4   : > { %18776 = vmatprep.subr.msk.mxu1 %vm498_vm0, %v15815_v59 }
 0x9f6   : > { %18682 = vmatmul.mubr.msk.f32.gmra.mrb[34].mxu1 %vm171_vm1, %v23576_v49  ;;  %v13307_v49 = vld [vmem:[#allocation2 + $0x308] sm:$0xff] }
 0x9f7   : > { %18684 = vmatprep.mubr.msk.f32.mxu1 %vm171_vm1, %v23305_v55  ;;  %v23853_v55 = vld [vmem:[#allocation2 + $0x258] sm:$0xff] }
 0x9fa   : > { %18685 = vmatmul.mubr.msk.f32.gmra.mrb[36].mxu1 %vm171_vm1, %v23582_v29  ;;  %v13308_v29 = vld [vmem:[#allocation2 + $0x320] sm:$0xff] }
 0x9fb   : > { %18687 = vmatprep.mubr.msk.f32.mxu1 %vm171_vm1, %v23323_v3  ;;  %v23859_v3 = vld [vmem:[#allocation2 + $0x278] sm:$0xff] }
 0x9fe   : > { %18688 = vmatmul.mubr.msk.f32.gmra.mrb[38].mxu1 %vm171_vm1, %v23588_v12  ;;  %v13309_v12 = vld [vmem:[#allocation2 + $0x328] sm:$0xff] }
 0x9ff   : > { %18690 = vmatprep.mubr.msk.f32.mxu1 %vm171_vm1, %v23341_v61  ;;  %v23865_v61 = vld [vmem:[#allocation2 + $0x298] sm:$0xff] }
 0xa02   : > { %18691 = vmatmul.mubr.msk.f32.gmra.mrb[40].mxu1 %vm171_vm1, %v23594_v15  ;;  %v13310_v15 = vld [vmem:[#allocation2 + $0x340] sm:$0xff] }
 0xa03   : > { %18693 = vmatprep.mubr.msk.f32.mxu1 %vm171_vm1, %v23359_v16  ;;  %v23871_v16 = vld [vmem:[#allocation2 + $0x2b8] sm:$0xff] }
 0xa06   : > { %18694 = vmatmul.mubr.msk.f32.gmra.mrb[42].mxu1 %vm171_vm1, %v23600_v35  ;;  %v13311_v35 = vld [vmem:[#allocation2 + $0x348] sm:$0xff] }
 0xa07   : > { %18696 = vmatprep.mubr.msk.f32.mxu1 %vm171_vm1, %v23377_v7  ;;  %v23877_v7 = vld [vmem:[#allocation2 + $0x2d8] sm:$0xff] }
 0xa0a   : > { %18697 = vmatmul.mubr.msk.f32.gmra.mrb[44].mxu1 %vm171_vm1, %v23606_v51  ;;  %v13312_v51 = vld [vmem:[#allocation2 + $0x360] sm:$0xff] }
 0xa0b   : > { %18699 = vmatprep.mubr.msk.f32.mxu1 %vm171_vm1, %v23395_v20  ;;  %v23883_v20 = vld [vmem:[#allocation2 + $0x2f8] sm:$0xff] }
 0xa0e   : > { %18700 = vmatmul.mubr.msk.f32.gmra.mrb[46].mxu1 %vm171_vm1, %v23612_v22  ;;  %v13313_v22 = vld [vmem:[#allocation2 + $0x368] sm:$0xff] }
 0xa0f   : > { %18702 = vmatprep.mubr.msk.f32.mxu1 %vm171_vm1, %v23756_v25 }
 0xa12   : > { %18703 = vmatmul.mubr.msk.f32.gmra.mrb[48].mxu1 %vm171_vm1, %v23841_v52 }
 0xa13   : > { %18705 = vmatprep.mubr.msk.f32.mxu1 %vm171_vm1, %v23762_v54 }
 0xa16   : > { %18706 = vmatmul.mubr.msk.f32.gmra.mrb[50].mxu1 %vm171_vm1, %v23847_v1 }
 0xa17   : > { %18708 = vmatprep.mubr.msk.f32.mxu1 %vm171_vm1, %v23768_v6 }
 0xa1a   : > { %18709 = vmatmul.mubr.msk.f32.gmra.mrb[52].mxu1 %vm171_vm1, %v23853_v55 }
 0xa1b   : > { %18711 = vmatprep.mubr.msk.f32.mxu1 %vm171_vm1, %v23774_v34 }
 0xa1e   : > { %18712 = vmatmul.mubr.msk.f32.gmra.mrb[54].mxu1 %vm171_vm1, %v23859_v3 }
 0xa1f   : > { %18714 = vmatprep.mubr.msk.f32.mxu1 %vm171_vm1, %v23780_v37 }
 0xa22   : > { %18715 = vmatmul.mubr.msk.f32.gmra.mrb[56].mxu1 %vm171_vm1, %v23865_v61 }
 0xa23   : > { %18717 = vmatprep.mubr.msk.f32.mxu1 %vm171_vm1, %v23786_v53 }
 0xa26   : > { %18718 = vmatmul.mubr.msk.f32.gmra.mrb[58].mxu1 %vm171_vm1, %v23871_v16 }
 0xa27   : > { %18720 = vmatprep.mubr.msk.f32.mxu1 %vm171_vm1, %v23792_v0 }
 0xa2a   : > { %18721 = vmatmul.mubr.msk.f32.gmra.mrb[60].mxu1 %vm171_vm1, %v23877_v7 }
 0xa2b   : > { %18723 = vmatprep.mubr.msk.f32.mxu1 %vm171_vm1, %v23798_v38 }
 0xa2e   : > { %18724 = vmatmul.mubr.msk.f32.gmra.mrb[62].mxu1 %vm171_vm1, %v23883_v20 }
 0xa2f   : > { %18728 = vmatprep.mubr.msk.f32.mxu1 %vm171_vm1, %v23651_v26  ;;  %v13314_v26 = vld [vmem:[#allocation2 + $0x380] sm:$0xff] }
 0xa32   : > { %18729 = vmatmul.mubr.msk.f32.vlgmr.msra.gmra.mrb[32].mxu1 %vm171_vm1, %v23659_v18 }
 0xa33   : > { %18777 = vmatpush3.msk.msra.mxu1 %vm498_vm0, %v15815_v59  ;;  %18731 = vmatprep.mubr.msk.f32.mxu1 %vm171_vm1, %v23657_v50  ;;  %v13315_v50 = vld [vmem:[#allocation2 + $0x388] sm:$0xff]  ;;  %v24040_v59 = vld [vmem:[%s24182_s2 + $0x3] ss:$0 sm:$0xff] }
 0xa34   : > { %18826 = vmatprep.subr.msk.mxu1 %vm498_vm0, %v15849_v5 }
 0xa36   : > { %18732 = vmatmul.mubr.msk.f32.gmra.mrb[34].mxu1 %vm171_vm1, %v23667_v62 }
 0xa37   : > { %18734 = vmatprep.mubr.msk.f32.mxu1 %vm171_vm1, %v23665_v45  ;;  %v13316_v45 = vld [vmem:[#allocation2 + $0x3a0] sm:$0xff] }
 0xa3a   : > { %18735 = vmatmul.mubr.msk.f32.gmra.mrb[36].mxu1 %vm171_vm1, %v23675_v8 }
 0xa3b   : > { %18737 = vmatprep.mubr.msk.f32.mxu1 %vm171_vm1, %v23673_v43  ;;  %v13317_v43 = vld [vmem:[#allocation2 + $0x3a8] sm:$0xff] }
 0xa3e   : > { %18738 = vmatmul.mubr.msk.f32.gmra.mrb[38].mxu1 %vm171_vm1, %v23683_v33 }
 0xa3f   : > { %18740 = vmatprep.mubr.msk.f32.mxu1 %vm171_vm1, %v23681_v4  ;;  %v13318_v4 = vld [vmem:[#allocation2 + $0x3c0] sm:$0xff] }
 0xa42   : > { %18741 = vmatmul.mubr.msk.f32.gmra.mrb[40].mxu1 %vm171_vm1, %v23691_v46 }
 0xa43   : > { %18743 = vmatprep.mubr.msk.f32.mxu1 %vm171_vm1, %v23689_v10  ;;  %v13319_v10 = vld [vmem:[#allocation2 + $0x3c8] sm:$0xff] }
 0xa46   : > { %18744 = vmatmul.mubr.msk.f32.gmra.mrb[42].mxu1 %vm171_vm1, %v23699_v42 }
 0xa47   : > { %18746 = vmatprep.mubr.msk.f32.mxu1 %vm171_vm1, %v23697_v48  ;;  %v13320_v48 = vld [vmem:[#allocation2 + $0x3e0] sm:$0xff] }
 0xa4a   : > { %18747 = vmatmul.mubr.msk.f32.gmra.mrb[44].mxu1 %vm171_vm1, %v23707_v24 }
 0xa4b   : > { %18749 = vmatprep.mubr.msk.f32.mxu1 %vm171_vm1, %v23705_v57  ;;  %v13321_v57 = vld [vmem:[#allocation2 + $0x3e8] sm:$0xff] }
 0xa4e   : > { %18750 = vmatmul.mubr.msk.f32.gmra.mrb[46].mxu1 %vm171_vm1, %v23713_v13 }
 0xa4f   : > { %18752 = vmatprep.mubr.msk.f32.mxu1 %vm171_vm1, %v13306_v11 }
 0xa52   : > { %18753 = vmatmul.mubr.msk.f32.gmra.mrb[48].mxu1 %vm171_vm1, %v13307_v49 }
 0xa53   : > { %18755 = vmatprep.mubr.msk.f32.mxu1 %vm171_vm1, %v13308_v29 }
 0xa56   : > { %18756 = vmatmul.mubr.msk.f32.gmra.mrb[50].mxu1 %vm171_vm1, %v13309_v12 }
 0xa57   : > { %18758 = vmatprep.mubr.msk.f32.mxu1 %vm171_vm1, %v13310_v15 }
 0xa5a   : > { %18759 = vmatmul.mubr.msk.f32.gmra.mrb[52].mxu1 %vm171_vm1, %v13311_v35 }
 0xa5b   : > { %18761 = vmatprep.mubr.msk.f32.mxu1 %vm171_vm1, %v13312_v51 }
 0xa5e   : > { %18762 = vmatmul.mubr.msk.f32.gmra.mrb[54].mxu1 %vm171_vm1, %v13313_v22 }
 0xa5f   : > { %18764 = vmatprep.mubr.msk.f32.mxu1 %vm171_vm1, %v13314_v26 }
 0xa62   : > { %18765 = vmatmul.mubr.msk.f32.gmra.mrb[56].mxu1 %vm171_vm1, %v13315_v50 }
 0xa63   : > { %18767 = vmatprep.mubr.msk.f32.mxu1 %vm171_vm1, %v13316_v45 }
 0xa66   : > { %18768 = vmatmul.mubr.msk.f32.gmra.mrb[58].mxu1 %vm171_vm1, %v13317_v43 }
 0xa67   : > { %18770 = vmatprep.mubr.msk.f32.mxu1 %vm171_vm1, %v13318_v4 }
 0xa6a   : > { %18771 = vmatmul.mubr.msk.f32.gmra.mrb[60].mxu1 %vm171_vm1, %v13319_v10 }
 0xa6b   : > { %18773 = vmatprep.mubr.msk.f32.mxu1 %vm171_vm1, %v13320_v48 }
 0xa6e   : > { %18774 = vmatmul.mubr.msk.f32.gmra.mrb[62].mxu1 %vm171_vm1, %v13321_v57 }
 0xa6f   : > { %18778 = vmatprep.mubr.msk.f32.mxu1 %vm171_vm1, %v23659_v18  ;;  %v13697_v18 = vld [vmem:[#allocation2 + $0x310] sm:$0xff] }
 0xa72   : > { %18779 = vmatmul.mubr.msk.f32.vlgmr.msra.gmra.mrb[32].mxu1 %vm171_vm1, %v23756_v25 }
 0xa73   : > { %18827 = vmatpush3.msk.msra.mxu1 %vm498_vm0, %v15849_v5  ;;  %18781 = vmatprep.mubr.msk.f32.mxu1 %vm171_vm1, %v23667_v62  ;;  %v13699_v62 = vld [vmem:[#allocation2 + $0x330] sm:$0xff] }
 0xa76   : > { %18782 = vmatmul.mubr.msk.f32.gmra.mrb[34].mxu1 %vm171_vm1, %v23762_v54 }
 0xa77   : > { %18784 = vmatprep.mubr.msk.f32.mxu1 %vm171_vm1, %v23675_v8  ;;  %v13701_v8 = vld [vmem:[#allocation2 + $0x350] sm:$0xff] }
 0xa7a   : > { %18785 = vmatmul.mubr.msk.f32.gmra.mrb[36].mxu1 %vm171_vm1, %v23768_v6 }
 0xa7b   : > { %18787 = vmatprep.mubr.msk.f32.mxu1 %vm171_vm1, %v23683_v33  ;;  %v13703_v33 = vld [vmem:[#allocation2 + $0x370] sm:$0xff] }
 0xa7e   : > { %18788 = vmatmul.mubr.msk.f32.gmra.mrb[38].mxu1 %vm171_vm1, %v23774_v34 }
 0xa7f   : > { %18790 = vmatprep.mubr.msk.f32.mxu1 %vm171_vm1, %v23691_v46  ;;  %v13705_v46 = vld [vmem:[#allocation2 + $0x390] sm:$0xff] }
 0xa82   : > { %18791 = vmatmul.mubr.msk.f32.gmra.mrb[40].mxu1 %vm171_vm1, %v23780_v37 }
 0xa83   : > { %18793 = vmatprep.mubr.msk.f32.mxu1 %vm171_vm1, %v23699_v42  ;;  %v13707_v42 = vld [vmem:[#allocation2 + $0x3b0] sm:$0xff] }
 0xa86   : > { %18794 = vmatmul.mubr.msk.f32.gmra.mrb[42].mxu1 %vm171_vm1, %v23786_v53 }
 0xa87   : > { %18796 = vmatprep.mubr.msk.f32.mxu1 %vm171_vm1, %v23707_v24  ;;  %v13709_v24 = vld [vmem:[#allocation2 + $0x3d0] sm:$0xff] }
 0xa8a   : > { %18797 = vmatmul.mubr.msk.f32.gmra.mrb[44].mxu1 %vm171_vm1, %v23792_v0 }
 0xa8b   : > { %18799 = vmatprep.mubr.msk.f32.mxu1 %vm171_vm1, %v23713_v13  ;;  %v13711_v13 = vld [vmem:[#allocation2 + $0x3f0] sm:$0xff] }
 0xa8e   : > { %18800 = vmatmul.mubr.msk.f32.gmra.mrb[46].mxu1 %vm171_vm1, %v23798_v38 }
 0xa8f   : > { %18802 = vmatprep.mubr.msk.f32.mxu1 %vm171_vm1, %v13307_v49 }
 0xa92   : > { %18803 = vmatmul.mubr.msk.f32.gmra.mrb[48].mxu1 %vm171_vm1, %v13697_v18 }
 0xa93   : > { %18805 = vmatprep.mubr.msk.f32.mxu1 %vm171_vm1, %v13309_v12 }
 0xa96   : > { %18806 = vmatmul.mubr.msk.f32.gmra.mrb[50].mxu1 %vm171_vm1, %v13699_v62 }
 0xa97   : > { %18808 = vmatprep.mubr.msk.f32.mxu1 %vm171_vm1, %v13311_v35 }
 0xa9a   : > { %18809 = vmatmul.mubr.msk.f32.gmra.mrb[52].mxu1 %vm171_vm1, %v13701_v8 }
 0xa9b   : > { %18811 = vmatprep.mubr.msk.f32.mxu1 %vm171_vm1, %v13313_v22 }
 0xa9e   : > { %18812 = vmatmul.mubr.msk.f32.gmra.mrb[54].mxu1 %vm171_vm1, %v13703_v33 }
 0xa9f   : > { %18814 = vmatprep.mubr.msk.f32.mxu1 %vm171_vm1, %v13315_v50 }
 0xaa2   : > { %18815 = vmatmul.mubr.msk.f32.gmra.mrb[56].mxu1 %vm171_vm1, %v13705_v46 }
 0xaa3   : > { %18817 = vmatprep.mubr.msk.f32.mxu1 %vm171_vm1, %v13317_v43 }
 0xaa6   : > { %18818 = vmatmul.mubr.msk.f32.gmra.mrb[58].mxu1 %vm171_vm1, %v13707_v42 }
 0xaa7   : > { %18820 = vmatprep.mubr.msk.f32.mxu1 %vm171_vm1, %v13319_v10 }
 0xaaa   : > { %18821 = vmatmul.mubr.msk.f32.gmra.mrb[60].mxu1 %vm171_vm1, %v13709_v24 }
 0xaab   : > { %18823 = vmatprep.mubr.msk.f32.mxu1 %vm171_vm1, %v13321_v57 }
 0xaae   : > { %18824 = vmatmul.mubr.msk.f32.gmra.mrb[62].mxu1 %vm171_vm1, %v13711_v13 }
 0xaaf   : > { %18828 = vmatprep.mubr.msk.f32.mxu1 %vm171_vm1, %v23756_v25  ;;  %v14087_v25 = vld [vmem:[#allocation2 + $0x318] sm:$0xff] }
 0xab2   : > { %18829 = vmatmul.mubr.msk.f32.vlgmr.msra.gmra.mrb[32].mxu1 %vm171_vm1, %v23841_v52 }
 0xab3   : > { %18831 = vmatprep.mubr.msk.f32.mxu1 %vm171_vm1, %v23762_v54  ;;  %v14089_v54 = vld [vmem:[#allocation2 + $0x338] sm:$0xff] }
 0xab6   : > { %18832 = vmatmul.mubr.msk.f32.gmra.mrb[34].mxu1 %vm171_vm1, %v23847_v1 }
 0xab7   : > { %18834 = vmatprep.mubr.msk.f32.mxu1 %vm171_vm1, %v23768_v6  ;;  %v14091_v6 = vld [vmem:[#allocation2 + $0x358] sm:$0xff] }
 0xaba   : > { %18835 = vmatmul.mubr.msk.f32.gmra.mrb[36].mxu1 %vm171_vm1, %v23853_v55 }
 0xabb   : > { %18837 = vmatprep.mubr.msk.f32.mxu1 %vm171_vm1, %v23774_v34  ;;  %v14093_v34 = vld [vmem:[#allocation2 + $0x378] sm:$0xff] }
 0xabe   : > { %18838 = vmatmul.mubr.msk.f32.gmra.mrb[38].mxu1 %vm171_vm1, %v23859_v3 }
 0xabf   : > { %18840 = vmatprep.mubr.msk.f32.mxu1 %vm171_vm1, %v23780_v37  ;;  %v14095_v37 = vld [vmem:[#allocation2 + $0x398] sm:$0xff] }
 0xac2   : > { %18841 = vmatmul.mubr.msk.f32.gmra.mrb[40].mxu1 %vm171_vm1, %v23865_v61 }
 0xac3   : > { %18843 = vmatprep.mubr.msk.f32.mxu1 %vm171_vm1, %v23786_v53  ;;  %v14097_v53 = vld [vmem:[#allocation2 + $0x3b8] sm:$0xff] }
 0xac6   : > { %18844 = vmatmul.mubr.msk.f32.gmra.mrb[42].mxu1 %vm171_vm1, %v23871_v16 }
 0xac7   : > { %18846 = vmatprep.mubr.msk.f32.mxu1 %vm171_vm1, %v23792_v0  ;;  %v14099_v0 = vld [vmem:[#allocation2 + $0x3d8] sm:$0xff] }
 0xaca   : > { %18847 = vmatmul.mubr.msk.f32.gmra.mrb[44].mxu1 %vm171_vm1, %v23877_v7 }
 0xacb   : > { %18849 = vmatprep.mubr.msk.f32.mxu1 %vm171_vm1, %v23798_v38  ;;  %v14101_v38 = vld [vmem:[#allocation2 + $0x3f8] sm:$0xff] }
 0xace   : > { %18850 = vmatmul.mubr.msk.f32.gmra.mrb[46].mxu1 %vm171_vm1, %v23883_v20 }
 0xacf   : > { %18852 = vmatprep.mubr.msk.f32.mxu1 %vm171_vm1, %v13697_v18 }
 0xad2   : > { %18853 = vmatmul.mubr.msk.f32.gmra.mrb[48].mxu1 %vm171_vm1, %v14087_v25 }
 0xad3   : > { %18855 = vmatprep.mubr.msk.f32.mxu1 %vm171_vm1, %v13699_v62 }
 0xad6   : > { %18856 = vmatmul.mubr.msk.f32.gmra.mrb[50].mxu1 %vm171_vm1, %v14089_v54 }
 0xad7   : > { %18858 = vmatprep.mubr.msk.f32.mxu1 %vm171_vm1, %v13701_v8 }
 0xada   : > { %18859 = vmatmul.mubr.msk.f32.gmra.mrb[52].mxu1 %vm171_vm1, %v14091_v6 }
 0xadb   : > { %18861 = vmatprep.mubr.msk.f32.mxu1 %vm171_vm1, %v13703_v33 }
 0xade   : > { %18862 = vmatmul.mubr.msk.f32.gmra.mrb[54].mxu1 %vm171_vm1, %v14093_v34 }
 0xadf   : > { %18864 = vmatprep.mubr.msk.f32.mxu1 %vm171_vm1, %v13705_v46 }
 0xae2   : > { %18865 = vmatmul.mubr.msk.f32.gmra.mrb[56].mxu1 %vm171_vm1, %v14095_v37 }
 0xae3   : > { %18867 = vmatprep.mubr.msk.f32.mxu1 %vm171_vm1, %v13707_v42 }
 0xae6   : > { %18868 = vmatmul.mubr.msk.f32.gmra.mrb[58].mxu1 %vm171_vm1, %v14097_v53 }
 0xae7   : > { %18870 = vmatprep.mubr.msk.f32.mxu1 %vm171_vm1, %v13709_v24 }
 0xaea   : > { %18871 = vmatmul.mubr.msk.f32.gmra.mrb[60].mxu1 %vm171_vm1, %v14099_v0 }
 0xaeb   : > { %18873 = vmatprep.mubr.msk.f32.mxu1 %vm171_vm1, %v13711_v13 }
 0xaee   : > { %18874 = vmatmul.mubr.msk.f32.gmra.mrb[62].mxu1 %vm171_vm1, %v14101_v38 }
 0xb85   : > { %v18830_v52 = vpop.f32.mrb[32].mxu1 }
 0xb86   : > { %v14466_v1 = vadd.f32 %v18830_v52, %v24040_v59  ;;  %v14269_v55 = vpop.f32.mrb[33].mxu1 }
 0xb87   : > { %v14465_v3 = vadd.f32 %v24040_v59, %v14269_v55 }
 0xb88   : > { %v14498_v61 = vmax.f32 %v14466_v1, 0.0 }
 0xb89   : > { %v14497_v16 = vmax.f32 %v14465_v3, 0.0  ;;  %v18833_v7 = vpop.f32.mrb[34].mxu1 }
 0xb8a   : > { %v14530_v20 = vadd.f32 %v14498_v61, %v23236_v23  ;;  %v14468_v5 = vadd.f32 %v18833_v7, %v24040_v59  ;;  %v14279_v11 = vpop.f32.mrb[35].mxu1 }
 0xb8b   : > { %v14529_v49 = vadd.f32 %v14497_v16, %v23241_v63  ;;  %v14467_v29 = vadd.f32 %v24040_v59, %v14279_v11 }
 0xb8c   : > { %14562 = vst.msk [vmem:[%s24049_s29 + $0x8] sm:$0xff] %vm171_vm1, %v14530_v20  ;;  %v14500_v12 = vmax.f32 %v14468_v5, 0.0 }
 0xb8d   : > { %14561 = vst.msk [vmem:[%s24049_s29] sm:$0xff] %vm171_vm1, %v14529_v49  ;;  %v14499_v15 = vmax.f32 %v14467_v29, 0.0  ;;  %v18836_v35 = vpop.f32.mrb[36].mxu1 }
 0xb8e   : > { %v14532_v51 = vadd.f32 %v14500_v12, %v23246_v47  ;;  %v14470_v23 = vadd.f32 %v18836_v35, %v24040_v59  ;;  %v14289_v22 = vpop.f32.mrb[37].mxu1 }
 0xb8f   : > { %v14531_v26 = vadd.f32 %v14499_v15, %v23251_v39  ;;  %v14469_v63 = vadd.f32 %v24040_v59, %v14289_v22 }
 0xb90   : > { %14564 = vst.msk [vmem:[%s24049_s29 + $0x18] sm:$0xff] %vm171_vm1, %v14532_v51  ;;  %v14502_v50 = vmax.f32 %v14470_v23, 0.0 }
 0xb91   : > { %14563 = vst.msk [vmem:[%s24049_s29 + $0x10] sm:$0xff] %vm171_vm1, %v14531_v26  ;;  %v14501_v45 = vmax.f32 %v14469_v63, 0.0  ;;  %v18839_v43 = vpop.f32.mrb[38].mxu1  ;;  %v24765_v26 = vld [vmem:[#allocation59_spill] sm:$0xff] }
 0xb92   : > { %v14534_v4 = vadd.f32 %v14502_v50, %v23256_v58  ;;  %v14472_v47 = vadd.f32 %v18839_v43, %v24040_v59  ;;  %v14299_v10 = vpop.f32.mrb[39].mxu1 }
 0xb93   : > { %v14533_v48 = vadd.f32 %v14501_v45, %v23263_v2  ;;  %v14471_v39 = vadd.f32 %v24040_v59, %v14299_v10 }
 0xb94   : > { %14566 = vst.msk [vmem:[%s24049_s29 + $0x28] sm:$0xff] %vm171_vm1, %v14534_v4  ;;  %v14504_v57 = vmax.f32 %v14472_v47, 0.0  ;;  %v24766_v4 = vld [vmem:[#allocation10_spill] sm:$0xff] }
 0xb95   : > { %14565 = vst.msk [vmem:[%s24049_s29 + $0x20] sm:$0xff] %vm171_vm1, %v14533_v48  ;;  %v14503_v18 = vmax.f32 %v14471_v39, 0.0  ;;  %v18842_v62 = vpop.f32.mrb[40].mxu1  ;;  %v24767_v48 = vld [vmem:[#allocation61_spill] sm:$0xff] }
 0xb96   : > { %v14536_v8 = vadd.f32 %v14504_v57, %v23274_v30  ;;  %v14474_v58 = vadd.f32 %v18842_v62, %v24040_v59  ;;  %v14309_v33 = vpop.f32.mrb[41].mxu1 }
 0xb97   : > { %v14535_v46 = vadd.f32 %v14503_v18, %v23281_v32  ;;  %v14473_v2 = vadd.f32 %v24040_v59, %v14309_v33 }
 0xb98   : > { %14568 = vst.msk [vmem:[%s24049_s29 + $0x38] sm:$0xff] %vm171_vm1, %v14536_v8  ;;  %v14506_v42 = vmax.f32 %v14474_v58, 0.0  ;;  %v24768_v58 = vld [vmem:[#allocation9_spill] sm:$0xff] }
 0xb99   : > { %14567 = vst.msk [vmem:[%s24049_s29 + $0x30] sm:$0xff] %vm171_vm1, %v14535_v46  ;;  %v14505_v24 = vmax.f32 %v14473_v2, 0.0  ;;  %v18845_v13 = vpop.f32.mrb[42].mxu1 }
 0xb9a   : > { %v14538_v25 = vadd.f32 %v14506_v42, %v23292_v19  ;;  %v14476_v30 = vadd.f32 %v18845_v13, %v24040_v59  ;;  %v14319_v54 = vpop.f32.mrb[43].mxu1  ;;  %v24769_v42 = vld [vmem:[#allocation63_spill] sm:$0xff] }
 0xb9b   : > { %v14537_v6 = vadd.f32 %v14505_v24, %v23299_v31  ;;  %v14475_v32 = vadd.f32 %v24040_v59, %v14319_v54 }
 0xb9c   : > { %14570 = vst.msk [vmem:[%s24049_s29 + $0x48] sm:$0xff] %vm171_vm1, %v14538_v25  ;;  %v14508_v34 = vmax.f32 %v14476_v30, 0.0 }
 0xb9d   : > { %14569 = vst.msk [vmem:[%s24049_s29 + $0x40] sm:$0xff] %vm171_vm1, %v14537_v6  ;;  %v14507_v37 = vmax.f32 %v14475_v32, 0.0  ;;  %v18848_v53 = vpop.f32.mrb[44].mxu1  ;;  %v24770_v6 = vld [vmem:[#allocation12_spill] sm:$0xff] }
 0xb9e   : > { %v14540_v0 = vadd.f32 %v14508_v34, %v23310_v36  ;;  %v14478_v19 = vadd.f32 %v18848_v53, %v24040_v59  ;;  %v14329_v38 = vpop.f32.mrb[45].mxu1  ;;  %v24771_v53 = vld [vmem:[#allocation33_spill] sm:$0xff] }
 0xb9f   : > { %v14539_v52 = vadd.f32 %v14507_v37, %v23317_v56  ;;  %v14477_v31 = vadd.f32 %v24040_v59, %v14329_v38 }
 0xba0   : > { %14572 = vst.msk [vmem:[%s24049_s29 + $0x58] sm:$0xff] %vm171_vm1, %v14540_v0  ;;  %v14510_v1 = vmax.f32 %v14478_v19, 0.0 }
 0xba1   : > { %14571 = vst.msk [vmem:[%s24049_s29 + $0x50] sm:$0xff] %vm171_vm1, %v14539_v52  ;;  %v14509_v55 = vmax.f32 %v14477_v31, 0.0  ;;  %v18851_v3 = vpop.f32.mrb[46].mxu1 }
 0xba2   : > { %v14542_v61 = vadd.f32 %v14510_v1, %v23328_v17  ;;  %v14480_v36 = vadd.f32 %v18851_v3, %v24040_v59  ;;  %v14339_v16 = vpop.f32.mrb[47].mxu1 }
 0xba3   : > { %v14541_v7 = vadd.f32 %v14509_v55, %v23335_v21  ;;  %v14479_v56 = vadd.f32 %v24040_v59, %v14339_v16 }
 0xba4   : > { %14574 = vst.msk [vmem:[%s24049_s29 + $0x68] sm:$0xff] %vm171_vm1, %v14542_v61  ;;  %v14512_v20 = vmax.f32 %v14480_v36, 0.0  ;;  %v24772_v61 = vld [vmem:[#allocation11_spill] sm:$0xff] }
 0xba5   : > { %14573 = vst.msk [vmem:[%s24049_s29 + $0x60] sm:$0xff] %vm171_vm1, %v14541_v7  ;;  %v14511_v5 = vmax.f32 %v14479_v56, 0.0  ;;  %v18854_v11 = vpop.f32.mrb[48].mxu1 }
 0xba6   : > { %v14544_v49 = vadd.f32 %v14512_v20, %v23346_v9  ;;  %v14482_v17 = vadd.f32 %v18854_v11, %v24040_v59  ;;  %v14349_v29 = vpop.f32.mrb[49].mxu1 }
 0xba7   : > { %v14543_v12 = vadd.f32 %v14511_v5, %v23353_v14  ;;  %v14481_v21 = vadd.f32 %v24040_v59, %v14349_v29 }
 0xba8   : > { %14576 = vst.msk [vmem:[%s24049_s29 + $0x78] sm:$0xff] %vm171_vm1, %v14544_v49  ;;  %v14514_v15 = vmax.f32 %v14482_v17, 0.0  ;;  %v24773_v49 = vld [vmem:[#allocation34_spill] sm:$0xff] }
 0xba9   : > { %14575 = vst.msk [vmem:[%s24049_s29 + $0x70] sm:$0xff] %vm171_vm1, %v14543_v12  ;;  %v14513_v35 = vmax.f32 %v14481_v21, 0.0  ;;  %v18857_v51 = vpop.f32.mrb[50].mxu1 }
 0xbaa   : > { %v14546_v23 = vadd.f32 %v14514_v15, %v23364_v27  ;;  %v14484_v9 = vadd.f32 %v18857_v51, %v24040_v59  ;;  %v14359_v22 = vpop.f32.mrb[51].mxu1 }
 0xbab   : > { %v14545_v63 = vadd.f32 %v14513_v35, %v24765_v26  ;;  %v14483_v14 = vadd.f32 %v24040_v59, %v14359_v22 }
 0xbac   : > { %14578 = vst.msk [vmem:[%s24049_s29 + $0x88] sm:$0xff] %vm171_vm1, %v14546_v23  ;;  %v14516_v50 = vmax.f32 %v14484_v9, 0.0 }
 0xbad   : > { %14577 = vst.msk [vmem:[%s24049_s29 + $0x80] sm:$0xff] %vm171_vm1, %v14545_v63  ;;  %v14515_v45 = vmax.f32 %v14483_v14, 0.0  ;;  %v18860_v43 = vpop.f32.mrb[52].mxu1  ;;  %v24774_v14 = vld [vmem:[#allocation14_spill] sm:$0xff] }
 0xbae   : > { %v14548_v47 = vadd.f32 %v14516_v50, %v24766_v4  ;;  %v14486_v27 = vadd.f32 %v18860_v43, %v24040_v59  ;;  %v14369_v10 = vpop.f32.mrb[53].mxu1 }
 0xbaf   : > { %v14547_v39 = vadd.f32 %v14515_v45, %v24767_v48  ;;  %v14485_v57 = vadd.f32 %v24040_v59, %v14369_v10 }
 0xbb0   : > { %14580 = vst.msk [vmem:[%s24049_s29 + $0x98] sm:$0xff] %vm171_vm1, %v14548_v47  ;;  %v14518_v18 = vmax.f32 %v14486_v27, 0.0 }
 0xbb1   : > { %14579 = vst.msk [vmem:[%s24049_s29 + $0x90] sm:$0xff] %vm171_vm1, %v14547_v39  ;;  %v14517_v62 = vmax.f32 %v14485_v57, 0.0  ;;  %v18863_v8 = vpop.f32.mrb[54].mxu1 }
 0xbb2   : > { %v14550_v33 = vadd.f32 %v14518_v18, %v24768_v58  ;;  %v14488_v46 = vadd.f32 %v18863_v8, %v24040_v59  ;;  %v14379_v2 = vpop.f32.mrb[55].mxu1 }
 0xbb3   : > { %v14549_v24 = vadd.f32 %v14517_v62, %v24769_v42  ;;  %v14487_v13 = vadd.f32 %v24040_v59, %v14379_v2 }
 0xbb4   : > { %14582 = vst.msk [vmem:[%s24049_s29 + $0xa8] sm:$0xff] %vm171_vm1, %v14550_v33  ;;  %v14520_v25 = vmax.f32 %v14488_v46, 0.0 }
 0xbb5   : > { %14581 = vst.msk [vmem:[%s24049_s29 + $0xa0] sm:$0xff] %vm171_vm1, %v14549_v24  ;;  %v14519_v30 = vmax.f32 %v14487_v13, 0.0  ;;  %v18866_v54 = vpop.f32.mrb[56].mxu1 }
 0xbb6   : > { %v14552_v32 = vadd.f32 %v14520_v25, %v24770_v6  ;;  %v14490_v34 = vadd.f32 %v18866_v54, %v24040_v59  ;;  %v14389_v37 = vpop.f32.mrb[57].mxu1 }
 0xbb7   : > { %v14551_v0 = vadd.f32 %v14519_v30, %v24771_v53  ;;  %v14489_v19 = vadd.f32 %v24040_v59, %v14389_v37 }
 0xbb8   : > { %14584 = vst.msk [vmem:[%s24049_s29 + $0xb8] sm:$0xff] %vm171_vm1, %v14552_v32  ;;  %v14522_v38 = vmax.f32 %v14490_v34, 0.0 }
 0xbb9   : > { %14583 = vst.msk [vmem:[%s24049_s29 + $0xb0] sm:$0xff] %vm171_vm1, %v14551_v0  ;;  %v14521_v52 = vmax.f32 %v14489_v19, 0.0  ;;  %v18869_v31 = vpop.f32.mrb[58].mxu1 }
 0xbba   : > { %v14554_v1 = vadd.f32 %v14522_v38, %v23436_v60  ;;  %v14492_v55 = vadd.f32 %v18869_v31, %v24040_v59  ;;  %v14399_v3 = vpop.f32.mrb[59].mxu1 }
 0xbbb   : > { %v14553_v36 = vadd.f32 %v14521_v52, %v24772_v61  ;;  %v14491_v16 = vadd.f32 %v24040_v59, %v14399_v3 }
 0xbbc   : > { %14586 = vst.msk [vmem:[%s24049_s29 + $0xc8] sm:$0xff] %vm171_vm1, %v14554_v1  ;;  %v14524_v7 = vmax.f32 %v14492_v55, 0.0 }
 0xbbd   : > { %14585 = vst.msk [vmem:[%s24049_s29 + $0xc0] sm:$0xff] %vm171_vm1, %v14553_v36  ;;  %v14523_v56 = vmax.f32 %v14491_v16, 0.0  ;;  %v18872_v20 = vpop.f32.mrb[60].mxu1 }
 0xbbe   : > { %v14556_v5 = vadd.f32 %v14524_v7, %v23449_v41  ;;  %v14494_v60 = vadd.f32 %v18872_v20, %v24040_v59  ;;  %v14409_v11 = vpop.f32.mrb[61].mxu1 }
 0xbbf   : > { %v14555_v17 = vadd.f32 %v14523_v56, %v24773_v49  ;;  %v14493_v29 = vadd.f32 %v24040_v59, %v14409_v11 }
 0xbc0   : > { %14588 = vst.msk [vmem:[%s24049_s29 + $0xd8] sm:$0xff] %vm171_vm1, %v14556_v5  ;;  %v14526_v12 = vmax.f32 %v14494_v60, 0.0 }
 0xbc1   : > { %14587 = vst.msk [vmem:[%s24049_s29 + $0xd0] sm:$0xff] %vm171_vm1, %v14555_v17  ;;  %v14525_v21 = vmax.f32 %v14493_v29, 0.0  ;;  %v18875_v15 = vpop.f32.mrb[62].mxu1 }
 0xbc2   : > { %v14558_v35 = vadd.f32 %v14526_v12, %v23462_v44  ;;  %v14496_v41 = vadd.f32 %v18875_v15, %v24040_v59  ;;  %v14419_v51 = vpop.f32.mrb[63].mxu1 }
 0xbc3   : > { %v14557_v23 = vadd.f32 %v14525_v21, %v23467_v40  ;;  %v14495_v9 = vadd.f32 %v24040_v59, %v14419_v51 }
 0xbc4   : > { %14590 = vst.msk [vmem:[%s24049_s29 + $0xe8] sm:$0xff] %vm171_vm1, %v14558_v35  ;;  %v14528_v22 = vmax.f32 %v14496_v41, 0.0 }
 0xbc5   : > { %14589 = vst.msk [vmem:[%s24049_s29 + $0xe0] sm:$0xff] %vm171_vm1, %v14557_v23  ;;  %v14527_v26 = vmax.f32 %v14495_v9, 0.0 }
 0xbc6   : > { %v14560_v63 = vadd.f32 %v14528_v22, %v23475_v28 }
 0xbc7   : > { %v14559_v50 = vadd.f32 %v14527_v26, %v24774_v14 }
 0xbc8   : > { %14592 = vst.msk [vmem:[%s24049_s29 + $0xf8] sm:$0xff] %vm171_vm1, %v14560_v63 }
 0xbc9   : > { %14591 = vst.msk [vmem:[%s24049_s29 + $0xf0] sm:$0xff] %vm171_vm1, %v14559_v50 }
 0xbca PF: > { %s13_s12 = sadd.s32 1, %s19915_s12  }
 0xbcb   : > { %p10_p4 = scmp.ge.s32.totalorder %s13_s12, 4  }
 0xbcd   :  { %12 = sbr.rel (!%p10_p4) target bundleno = 1 (0x1), region = 106 }

</bundles_post_ra>
